<compile_context>
chip_gen: v6e
topology: v6e:2x2x1
jax: 0.10.0
libtpu: 0.0.40
codegen_flags: <defaults>
</compile_context>

<pallas_src>
import functools

import numpy as np
import jax
import jax.numpy as jnp
from jax import lax
from jax.experimental import pallas as pl
from jax.experimental.pallas import tpu as pltpu


# ----------------------------------------------------------------------------
# Constant pooling / padding matrices (built once with numpy, tiny).
# Activations are laid out flat on the *padded* grid: row = h * Wp + w.
# ----------------------------------------------------------------------------
def _pool_matrix(H, W, Wp):
    """[ (H//2)*(W//2), R ] AvgPool2d(2,2) over a conv output laid out on the
    padded-grid flat coordinates (row = h*Wp + w), R = (H-1)*Wp + W."""
    Ho, Wo = H // 2, W // 2
    R = (H - 1) * Wp + W
    m = np.zeros((Ho * Wo, R), np.float32)
    for ho in range(Ho):
        for wo in range(Wo):
            for dh in range(2):
                for dw in range(2):
                    m[ho * Wo + wo, (2 * ho + dh) * Wp + (2 * wo + dw)] = 0.25
    return m


def _pad_matrix(Ho, Wo, p):
    """[ (Ho+2p)*(Wo+2p), Ho*Wo ] replicate ('edge') padding as a 0/1 selection
    matrix; output rows are flat on the padded grid (row = hp*Wp + wp)."""
    Hp, Wp = Ho + 2 * p, Wo + 2 * p
    m = np.zeros((Hp * Wp, Ho * Wo), np.float32)
    for hp in range(Hp):
        for wp in range(Wp):
            h = min(max(hp - p, 0), Ho - 1)
            w = min(max(wp - p, 0), Wo - 1)
            m[hp * Wp + wp, h * Wo + w] = 1.0
    return m


# ----------------------------------------------------------------------------
# Fused kernel: conv1+relu+pool -> conv2+relu+pool -> conv3+relu+pool -> linear
# One grid step = one image; everything stays in VMEM/vregs.
# ----------------------------------------------------------------------------
def _mnist_fused_kernel(
    x_ref, w1_ref, b1_ref, w2_ref, b2_ref, w3_ref, b3_ref,
    m1_ref, m2_ref, p3_ref, wl_ref, bl_ref, o_ref,
    *, K1, K2, Wp1, R1, Wp2, R2, Wp3, R3, C1, C2, C3, mxu_dtype,
):
    f32 = jnp.float32

    # ---- conv1 (3x3, Cin=1 -> C1): tiny contraction, keep it on the VPU as
    #      K*K broadcast multiply-adds; bias + ReLU in f32. ---------------------
    x = x_ref[...]                                  # [Np1, 1] f32 (padded, flat)
    w1 = w1_ref[...]                                # [K1*K1, C1] f32
    acc1 = jnp.zeros((R1, C1), f32)
    for kh in range(K1):
        for kw in range(K1):
            t = kh * K1 + kw
            d = kh * Wp1 + kw
            acc1 = acc1 + x[d:d + R1, :] * w1[t:t + 1, :]
    h1 = jnp.maximum(acc1 + b1_ref[...], 0.0)       # [R1, C1] f32

    # ---- avgpool(2,2) + replicate-pad for conv2, folded into one MXU matmul
    #      with a constant VMEM-resident selection matrix. ----------------------
    x2 = jnp.dot(m1_ref[...], h1.astype(mxu_dtype),
                 preferred_element_type=f32)        # [Np2, C1] f32

    # ---- conv2 (5x5, C1 -> C2): 25 shifted MXU matmuls (in-VMEM im2col). ------
    w2 = w2_ref[...]                                # [K2*K2*C1, C2] mxu_dtype
    acc2 = jnp.zeros((R2, C2), f32)
    for kh in range(K2):
        for kw in range(K2):
            t = kh * K2 + kw
            d = kh * Wp2 + kw
            acc2 = acc2 + jnp.dot(
                x2[d:d + R2, :].astype(mxu_dtype),
                w2[t * C1:(t + 1) * C1, :],
                preferred_element_type=f32)
    h2 = jnp.maximum(acc2 + b2_ref[...], 0.0)       # [R2, C2] f32

    # ---- avgpool + pad for conv3 (one matmul). --------------------------------
    x3 = jnp.dot(m2_ref[...], h2.astype(mxu_dtype),
                 preferred_element_type=f32)        # [Np3, C2] f32

    # ---- conv3 (5x5, C2 -> C3). -----------------------------------------------
    w3 = w3_ref[...]                                # [K2*K2*C2, C3] mxu_dtype
    acc3 = jnp.zeros((R3, C3), f32)
    for kh in range(K2):
        for kw in range(K2):
            t = kh * K2 + kw
            d = kh * Wp3 + kw
            acc3 = acc3 + jnp.dot(
                x3[d:d + R3, :].astype(mxu_dtype),
                w3[t * C2:(t + 1) * C2, :],
                preferred_element_type=f32)
    h3 = jnp.maximum(acc3 + b3_ref[...], 0.0)       # [R3, C3] f32

    # ---- final avgpool, only position (0,0) is consumed (x[:, :, 0, 0]),
    #      then the Linear layer fused as the epilogue; 128-lane-dense store. ---
    feat = jnp.dot(p3_ref[...], h3, preferred_element_type=f32)           # [1, C3]
    logits = jnp.dot(feat, wl_ref[...], preferred_element_type=f32) + bl_ref[...]
    o_ref[...] = logits.astype(o_ref.dtype)          # [1, 128]


# ----------------------------------------------------------------------------
# Wrapper
# ----------------------------------------------------------------------------
def mnist_net_forward(params, x, *, mxu_dtype=jnp.bfloat16):
    """MnistNet forward as a single fused Pallas TPU kernel.  x: [B,1,H,W]."""
    B, Cin, H, W = x.shape
    if Cin != 1:
        raise ValueError("MnistNet expects a single input channel")
    K1, K2, P1, P2 = 3, 5, 1, 2
    C1, C2, C3, NOUT, NCLS = 16, 32, 64, 128, 10

    # Spatial geometry of the three conv/pool stages.
    H1, W1 = H, W
    Hp1, Wp1 = H1 + 2 * P1, W1 + 2 * P1
    R1 = (H1 - 1) * Wp1 + W1
    H2, W2 = H1 // 2, W1 // 2
    Hp2, Wp2 = H2 + 2 * P2, W2 + 2 * P2
    R2 = (H2 - 1) * Wp2 + W2
    H3, W3 = H2 // 2, W2 // 2
    Hp3, Wp3 = H3 + 2 * P2, W3 + 2 * P2
    R3 = (H3 - 1) * Wp3 + W3
    if H3 < 2 or W3 < 2:
        raise ValueError("input spatial size too small for three pool stages")
    Np1, Np2, Np3 = Hp1 * Wp1, Hp2 * Wp2, Hp3 * Wp3

    # Model-boundary layout glue only (cheap, input image): NCHW -> replicate-
    # padded flat [B, Np1, 1].  Everything else happens inside the kernel.
    xp = jnp.pad(x.astype(jnp.float32), ((0, 0), (0, 0), (P1, P1), (P1, P1)),
                 mode="edge")
    x_flat = xp.reshape(B, Np1, 1)

    # Weights: [Cout,Cin,K,K] -> [(kh*K+kw)*Cin + cin, Cout].  MXU inputs bf16,
    # f32 accumulation; biases / VPU epilogue stay f32.
    w1 = params["conv1_w"].transpose(2, 3, 1, 0).reshape(K1 * K1, C1).astype(jnp.float32)
    w2 = params["conv2_w"].transpose(2, 3, 1, 0).reshape(K2 * K2 * C1, C2).astype(mxu_dtype)
    w3 = params["conv3_w"].transpose(2, 3, 1, 0).reshape(K2 * K2 * C2, C3).astype(mxu_dtype)
    b1 = params["conv1_b"].reshape(1, C1).astype(jnp.float32)
    b2 = params["conv2_b"].reshape(1, C2).astype(jnp.float32)
    b3 = params["conv3_b"].reshape(1, C3).astype(jnp.float32)
    # Linear fused into the kernel; pad N=10 -> 128 lanes for a dense store.
    wl = jnp.zeros((C3, NOUT), jnp.float32).at[:, :NCLS].set(
        params["lin_w"].T.astype(jnp.float32))
    bl = jnp.zeros((1, NOUT), jnp.float32).at[:, :NCLS].set(
        params["lin_b"].astype(jnp.float32)[None, :])

    # Constant avgpool(2,2) [+ next stage's replicate pad] as matrices (exact
    # 0 / 0.25 entries), applied on the MXU -> no reshapes/strided access.
    m1 = jnp.asarray(_pad_matrix(H2, W2, P2) @ _pool_matrix(H1, W1, Wp1), dtype=mxu_dtype)
    m2 = jnp.asarray(_pad_matrix(H3, W3, P2) @ _pool_matrix(H2, W2, Wp2), dtype=mxu_dtype)
    p3 = jnp.asarray(_pool_matrix(H3, W3, Wp3)[0:1, :], dtype=jnp.float32)

    operands = (x_flat, w1, b1, w2, b2, w3, b3, m1, m2, p3, wl, bl)

    kernel = functools.partial(
        _mnist_fused_kernel, K1=K1, K2=K2, Wp1=Wp1, R1=R1, Wp2=Wp2, R2=R2,
        Wp3=Wp3, R3=R3, C1=C1, C2=C2, C3=C3, mxu_dtype=mxu_dtype)

    flops = 2 * B * (R1 * K1 * K1 * C1 + Np2 * R1 * C1
                     + R2 * K2 * K2 * C1 * C2 + Np3 * R2 * C2
                     + R3 * K2 * K2 * C2 * C3 + R3 * C3 + C3 * NOUT)
    bytes_accessed = int(sum(int(a.size) * a.dtype.itemsize for a in operands)
                         + B * NOUT * 4)

    out = pl.pallas_call(
        kernel,
        out_shape=jax.ShapeDtypeStruct((B, 1, NOUT), jnp.float32),
        grid=(B,),
        in_specs=[
            pl.BlockSpec((None, Np1, 1), lambda b: (b, 0, 0)),  # per-image input
            pl.BlockSpec(w1.shape, lambda b: (0, 0)),   # constant index maps ->
            pl.BlockSpec(b1.shape, lambda b: (0, 0)),   # weights & pool/pad
            pl.BlockSpec(w2.shape, lambda b: (0, 0)),   # matrices stay resident
            pl.BlockSpec(b2.shape, lambda b: (0, 0)),   # in VMEM across the grid
            pl.BlockSpec(w3.shape, lambda b: (0, 0)),
            pl.BlockSpec(b3.shape, lambda b: (0, 0)),
            pl.BlockSpec(m1.shape, lambda b: (0, 0)),
            pl.BlockSpec(m2.shape, lambda b: (0, 0)),
            pl.BlockSpec(p3.shape, lambda b: (0, 0)),
            pl.BlockSpec(wl.shape, lambda b: (0, 0)),
            pl.BlockSpec(bl.shape, lambda b: (0, 0)),
        ],
        out_specs=pl.BlockSpec((None, 1, NOUT), lambda b: (b, 0, 0)),
        compiler_params=pltpu.CompilerParams(
            dimension_semantics=("parallel",),     # shards batch over v7x's 2 TCs
            vmem_limit_bytes=32 * 1024 * 1024,     # explicit; fits v5e/v6e/v7x
        ),
        cost_estimate=pl.CostEstimate(flops=int(flops), transcendentals=0,
                                      bytes_accessed=bytes_accessed),
    )(*operands)
    return out[:, 0, :NCLS]


# ----------------------------------------------------------------------------
# Pure-JAX reference (XLA) and parameter init, for the self-check.
# ----------------------------------------------------------------------------
def _reference_forward(params, x):
    def conv(h, w, b, p):
        hp = jnp.pad(h, ((0, 0), (0, 0), (p, p), (p, p)), mode="edge")
        y = lax.conv_general_dilated(hp, w, window_strides=(1, 1), padding="VALID",
                                     dimension_numbers=("NCHW", "OIHW", "NCHW"))
        return jax.nn.relu(y + b[None, :, None, None])

    def pool(h):
        B, C, H, W = h.shape
        h = h[:, :, :(H // 2) * 2, :(W // 2) * 2]
        h = h.reshape(B, C, H // 2, 2, W // 2, 2)
        return h.mean(axis=(3, 5))

    h = pool(conv(x, params["conv1_w"], params["conv1_b"], 1))
    h = pool(conv(h, params["conv2_w"], params["conv2_b"], 2))
    h = pool(conv(h, params["conv3_w"], params["conv3_b"], 2))
    return h[:, :, 0, 0] @ params["lin_w"].T + params["lin_b"]


def init_params(key):
    ks = jax.random.split(key, 8)

    def u(k, shape, fan_in):
        bound = 1.0 / jnp.sqrt(jnp.float32(fan_in))
        return jax.random.uniform(k, shape, jnp.float32, -bound, bound)

    return {
        "conv1_w": u(ks[0], (16, 1, 3, 3), 1 * 3 * 3),
        "conv1_b": u(ks[1], (16,), 1 * 3 * 3),
        "conv2_w": u(ks[2], (32, 16, 5, 5), 16 * 5 * 5),
        "conv2_b": u(ks[3], (32,), 16 * 5 * 5),
        "conv3_w": u(ks[4], (64, 32, 5, 5), 32 * 5 * 5),
        "conv3_b": u(ks[5], (64,), 32 * 5 * 5),
        "lin_w": u(ks[6], (10, 64), 64),
        "lin_b": u(ks[7], (10,), 64),
    }


if __name__ == "__main__":
    key = jax.random.PRNGKey(0)
    pkey, xkey = jax.random.split(key)
    params = init_params(pkey)
    # MNIST-like toy input: batch=2, channels=1 (fixed by conv_1), spatial=16.
    x = jax.random.normal(xkey, (2, 1, 16, 16), jnp.float32)

    out = jax.jit(mnist_net_forward)(params, x)
    jax.block_until_ready(out)
    assert out.shape == (2, 10) and out.dtype == jnp.float32

    # Numerical self-check vs plain XLA (loose tolerance: bf16 MXU inputs).
    ref = jax.jit(_reference_forward)(params, x)
    err = float(jnp.max(jnp.abs(out - ref)))
    assert err < 5e-2, f"mismatch vs XLA reference: max abs err = {err}"

    print("KERNEL_OK")
</pallas_src>

<mosaic_0001>
module attributes {stable_mosaic.version = 11 : i64} {
  func.func @_mnist_fused_kernel(%arg0: i32, %arg1: memref<1x324x1xf32, #tpu.memory_space<vmem>>, %arg2: memref<9x16xf32, #tpu.memory_space<vmem>>, %arg3: memref<1x16xf32, #tpu.memory_space<vmem>>, %arg4: memref<400x32xbf16, #tpu.memory_space<vmem>>, %arg5: memref<1x32xf32, #tpu.memory_space<vmem>>, %arg6: memref<800x64xbf16, #tpu.memory_space<vmem>>, %arg7: memref<1x64xf32, #tpu.memory_space<vmem>>, %arg8: memref<144x286xbf16, #tpu.memory_space<vmem>>, %arg9: memref<64x92xbf16, #tpu.memory_space<vmem>>, %arg10: memref<1x28xf32, #tpu.memory_space<vmem>>, %arg11: memref<64x128xf32, #tpu.memory_space<vmem>>, %arg12: memref<1x128xf32, #tpu.memory_space<vmem>>, %arg13: memref<1x1x128xf32, #tpu.memory_space<vmem>>) attributes {dimension_semantics = [#tpu.dimension_semantics<parallel>], iteration_bounds = array<i64: 2>, scalar_prefetch = 0 : i64, scratch_operands = 0 : i64, tpu.core_type = #tpu.core_type<tc>, window_params = [{transform_indices = @transform_0, window_bounds = array<i64: 1, 324, 1>}, {pipeline_mode = #tpu.pipeline_mode<synchronous>, transform_indices = @transform_1, window_bounds = array<i64: 9, 16>}, {pipeline_mode = #tpu.pipeline_mode<synchronous>, transform_indices = @transform_2, window_bounds = array<i64: 1, 16>}, {pipeline_mode = #tpu.pipeline_mode<synchronous>, transform_indices = @transform_3, window_bounds = array<i64: 400, 32>}, {pipeline_mode = #tpu.pipeline_mode<synchronous>, transform_indices = @transform_4, window_bounds = array<i64: 1, 32>}, {pipeline_mode = #tpu.pipeline_mode<synchronous>, transform_indices = @transform_5, window_bounds = array<i64: 800, 64>}, {pipeline_mode = #tpu.pipeline_mode<synchronous>, transform_indices = @transform_6, window_bounds = array<i64: 1, 64>}, {pipeline_mode = #tpu.pipeline_mode<synchronous>, transform_indices = @transform_7, window_bounds = array<i64: 144, 286>}, {pipeline_mode = #tpu.pipeline_mode<synchronous>, transform_indices = @transform_8, window_bounds = array<i64: 64, 92>}, {pipeline_mode = #tpu.pipeline_mode<synchronous>, transform_indices = @transform_9, window_bounds = array<i64: 1, 28>}, {pipeline_mode = #tpu.pipeline_mode<synchronous>, transform_indices = @transform_10, window_bounds = array<i64: 64, 128>}, {pipeline_mode = #tpu.pipeline_mode<synchronous>, transform_indices = @transform_11, window_bounds = array<i64: 1, 128>}, {transform_indices = @transform_12, window_bounds = array<i64: 1, 1, 128>}]} {
    %c0 = arith.constant 0 : index
    %c0_0 = arith.constant 0 : index
    %c0_1 = arith.constant 0 : index
    %0 = vector.load %arg1[%c0, %c0_0, %c0_1] : memref<1x324x1xf32, #tpu.memory_space<vmem>>, vector<1x324x1xf32>
    %1 = vector.shape_cast %0 : vector<1x324x1xf32> to vector<324x1xf32>
    %c0_2 = arith.constant 0 : index
    %c0_3 = arith.constant 0 : index
    %2 = vector.load %arg2[%c0_2, %c0_3] : memref<9x16xf32, #tpu.memory_space<vmem>>, vector<9x16xf32>
    %cst = arith.constant 0.000000e+00 : f32
    %3 = vector.broadcast %cst : f32 to vector<286x16xf32>
    %4 = vector.extract_strided_slice %1 {offsets = [0, 0], sizes = [286, 1], strides = [1, 1]} : vector<324x1xf32> to vector<286x1xf32>
    %5 = vector.extract_strided_slice %2 {offsets = [0, 0], sizes = [1, 16], strides = [1, 1]} : vector<9x16xf32> to vector<1x16xf32>
    %6 = vector.broadcast %4 : vector<286x1xf32> to vector<286x16xf32>
    %7 = vector.broadcast %5 : vector<1x16xf32> to vector<286x16xf32>
    %8 = arith.mulf %6, %7 : vector<286x16xf32>
    %9 = arith.addf %3, %8 : vector<286x16xf32>
    %10 = vector.extract_strided_slice %1 {offsets = [1, 0], sizes = [286, 1], strides = [1, 1]} : vector<324x1xf32> to vector<286x1xf32>
    %11 = vector.extract_strided_slice %2 {offsets = [1, 0], sizes = [1, 16], strides = [1, 1]} : vector<9x16xf32> to vector<1x16xf32>
    %12 = vector.broadcast %10 : vector<286x1xf32> to vector<286x16xf32>
    %13 = vector.broadcast %11 : vector<1x16xf32> to vector<286x16xf32>
    %14 = arith.mulf %12, %13 : vector<286x16xf32>
    %15 = arith.addf %9, %14 : vector<286x16xf32>
    %16 = vector.extract_strided_slice %1 {offsets = [2, 0], sizes = [286, 1], strides = [1, 1]} : vector<324x1xf32> to vector<286x1xf32>
    %17 = vector.extract_strided_slice %2 {offsets = [2, 0], sizes = [1, 16], strides = [1, 1]} : vector<9x16xf32> to vector<1x16xf32>
    %18 = vector.broadcast %16 : vector<286x1xf32> to vector<286x16xf32>
    %19 = vector.broadcast %17 : vector<1x16xf32> to vector<286x16xf32>
    %20 = arith.mulf %18, %19 : vector<286x16xf32>
    %21 = arith.addf %15, %20 : vector<286x16xf32>
    %22 = vector.extract_strided_slice %1 {offsets = [18, 0], sizes = [286, 1], strides = [1, 1]} : vector<324x1xf32> to vector<286x1xf32>
    %23 = vector.extract_strided_slice %2 {offsets = [3, 0], sizes = [1, 16], strides = [1, 1]} : vector<9x16xf32> to vector<1x16xf32>
    %24 = vector.broadcast %22 : vector<286x1xf32> to vector<286x16xf32>
    %25 = vector.broadcast %23 : vector<1x16xf32> to vector<286x16xf32>
    %26 = arith.mulf %24, %25 : vector<286x16xf32>
    %27 = arith.addf %21, %26 : vector<286x16xf32>
    %28 = vector.extract_strided_slice %1 {offsets = [19, 0], sizes = [286, 1], strides = [1, 1]} : vector<324x1xf32> to vector<286x1xf32>
    %29 = vector.extract_strided_slice %2 {offsets = [4, 0], sizes = [1, 16], strides = [1, 1]} : vector<9x16xf32> to vector<1x16xf32>
    %30 = vector.broadcast %28 : vector<286x1xf32> to vector<286x16xf32>
    %31 = vector.broadcast %29 : vector<1x16xf32> to vector<286x16xf32>
    %32 = arith.mulf %30, %31 : vector<286x16xf32>
    %33 = arith.addf %27, %32 : vector<286x16xf32>
    %34 = vector.extract_strided_slice %1 {offsets = [20, 0], sizes = [286, 1], strides = [1, 1]} : vector<324x1xf32> to vector<286x1xf32>
    %35 = vector.extract_strided_slice %2 {offsets = [5, 0], sizes = [1, 16], strides = [1, 1]} : vector<9x16xf32> to vector<1x16xf32>
    %36 = vector.broadcast %34 : vector<286x1xf32> to vector<286x16xf32>
    %37 = vector.broadcast %35 : vector<1x16xf32> to vector<286x16xf32>
    %38 = arith.mulf %36, %37 : vector<286x16xf32>
    %39 = arith.addf %33, %38 : vector<286x16xf32>
    %40 = vector.extract_strided_slice %1 {offsets = [36, 0], sizes = [286, 1], strides = [1, 1]} : vector<324x1xf32> to vector<286x1xf32>
    %41 = vector.extract_strided_slice %2 {offsets = [6, 0], sizes = [1, 16], strides = [1, 1]} : vector<9x16xf32> to vector<1x16xf32>
    %42 = vector.broadcast %40 : vector<286x1xf32> to vector<286x16xf32>
    %43 = vector.broadcast %41 : vector<1x16xf32> to vector<286x16xf32>
    %44 = arith.mulf %42, %43 : vector<286x16xf32>
    %45 = arith.addf %39, %44 : vector<286x16xf32>
    %46 = vector.extract_strided_slice %1 {offsets = [37, 0], sizes = [286, 1], strides = [1, 1]} : vector<324x1xf32> to vector<286x1xf32>
    %47 = vector.extract_strided_slice %2 {offsets = [7, 0], sizes = [1, 16], strides = [1, 1]} : vector<9x16xf32> to vector<1x16xf32>
    %48 = vector.broadcast %46 : vector<286x1xf32> to vector<286x16xf32>
    %49 = vector.broadcast %47 : vector<1x16xf32> to vector<286x16xf32>
    %50 = arith.mulf %48, %49 : vector<286x16xf32>
    %51 = arith.addf %45, %50 : vector<286x16xf32>
    %52 = vector.extract_strided_slice %1 {offsets = [38, 0], sizes = [286, 1], strides = [1, 1]} : vector<324x1xf32> to vector<286x1xf32>
    %53 = vector.extract_strided_slice %2 {offsets = [8, 0], sizes = [1, 16], strides = [1, 1]} : vector<9x16xf32> to vector<1x16xf32>
    %54 = vector.broadcast %52 : vector<286x1xf32> to vector<286x16xf32>
    %55 = vector.broadcast %53 : vector<1x16xf32> to vector<286x16xf32>
    %56 = arith.mulf %54, %55 : vector<286x16xf32>
    %57 = arith.addf %51, %56 : vector<286x16xf32>
    %c0_4 = arith.constant 0 : index
    %c0_5 = arith.constant 0 : index
    %58 = vector.load %arg3[%c0_4, %c0_5] : memref<1x16xf32, #tpu.memory_space<vmem>>, vector<1x16xf32>
    %59 = vector.broadcast %58 : vector<1x16xf32> to vector<286x16xf32>
    %60 = arith.addf %57, %59 : vector<286x16xf32>
    %cst_6 = arith.constant 0.000000e+00 : f32
    %61 = vector.broadcast %cst_6 : f32 to vector<286x16xf32>
    %62 = arith.maximumf %60, %61 : vector<286x16xf32>
    %c0_7 = arith.constant 0 : index
    %c0_8 = arith.constant 0 : index
    %63 = vector.load %arg8[%c0_7, %c0_8] : memref<144x286xbf16, #tpu.memory_space<vmem>>, vector<144x286xbf16>
    %64 = arith.truncf %62 : vector<286x16xf32> to vector<286x16xbf16>
    %cst_9 = arith.constant dense<0.000000e+00> : vector<144x16xf32>
    %65 = tpu.matmul %63, %64, %cst_9 {dimension_numbers = #tpu.dot_dimension_numbers<[1], [0], [0], [1], [0, 0, 1, 1], [], []>} : vector<144x286xbf16>, vector<286x16xbf16>, vector<144x16xf32> -> vector<144x16xf32>
    %c0_10 = arith.constant 0 : index
    %c0_11 = arith.constant 0 : index
    %66 = vector.load %arg4[%c0_10, %c0_11] : memref<400x32xbf16, #tpu.memory_space<vmem>>, vector<400x32xbf16>
    %cst_12 = arith.constant 0.000000e+00 : f32
    %67 = vector.broadcast %cst_12 : f32 to vector<92x32xf32>
    %68 = vector.extract_strided_slice %65 {offsets = [0, 0], sizes = [92, 16], strides = [1, 1]} : vector<144x16xf32> to vector<92x16xf32>
    %69 = arith.truncf %68 : vector<92x16xf32> to vector<92x16xbf16>
    %70 = vector.extract_strided_slice %66 {offsets = [0, 0], sizes = [16, 32], strides = [1, 1]} : vector<400x32xbf16> to vector<16x32xbf16>
    %cst_13 = arith.constant dense<0.000000e+00> : vector<92x32xf32>
    %71 = tpu.matmul %69, %70, %cst_13 {dimension_numbers = #tpu.dot_dimension_numbers<[1], [0], [0], [1], [0, 0, 1, 1], [], []>} : vector<92x16xbf16>, vector<16x32xbf16>, vector<92x32xf32> -> vector<92x32xf32>
    %72 = arith.addf %67, %71 : vector<92x32xf32>
    %73 = vector.extract_strided_slice %65 {offsets = [1, 0], sizes = [92, 16], strides = [1, 1]} : vector<144x16xf32> to vector<92x16xf32>
    %74 = arith.truncf %73 : vector<92x16xf32> to vector<92x16xbf16>
    %75 = vector.extract_strided_slice %66 {offsets = [16, 0], sizes = [16, 32], strides = [1, 1]} : vector<400x32xbf16> to vector<16x32xbf16>
    %cst_14 = arith.constant dense<0.000000e+00> : vector<92x32xf32>
    %76 = tpu.matmul %74, %75, %cst_14 {dimension_numbers = #tpu.dot_dimension_numbers<[1], [0], [0], [1], [0, 0, 1, 1], [], []>} : vector<92x16xbf16>, vector<16x32xbf16>, vector<92x32xf32> -> vector<92x32xf32>
    %77 = arith.addf %72, %76 : vector<92x32xf32>
    %78 = vector.extract_strided_slice %65 {offsets = [2, 0], sizes = [92, 16], strides = [1, 1]} : vector<144x16xf32> to vector<92x16xf32>
    %79 = arith.truncf %78 : vector<92x16xf32> to vector<92x16xbf16>
    %80 = vector.extract_strided_slice %66 {offsets = [32, 0], sizes = [16, 32], strides = [1, 1]} : vector<400x32xbf16> to vector<16x32xbf16>
    %cst_15 = arith.constant dense<0.000000e+00> : vector<92x32xf32>
    %81 = tpu.matmul %79, %80, %cst_15 {dimension_numbers = #tpu.dot_dimension_numbers<[1], [0], [0], [1], [0, 0, 1, 1], [], []>} : vector<92x16xbf16>, vector<16x32xbf16>, vector<92x32xf32> -> vector<92x32xf32>
    %82 = arith.addf %77, %81 : vector<92x32xf32>
    %83 = vector.extract_strided_slice %65 {offsets = [3, 0], sizes = [92, 16], strides = [1, 1]} : vector<144x16xf32> to vector<92x16xf32>
    %84 = arith.truncf %83 : vector<92x16xf32> to vector<92x16xbf16>
    %85 = vector.extract_strided_slice %66 {offsets = [48, 0], sizes = [16, 32], strides = [1, 1]} : vector<400x32xbf16> to vector<16x32xbf16>
    %cst_16 = arith.constant dense<0.000000e+00> : vector<92x32xf32>
    %86 = tpu.matmul %84, %85, %cst_16 {dimension_numbers = #tpu.dot_dimension_numbers<[1], [0], [0], [1], [0, 0, 1, 1], [], []>} : vector<92x16xbf16>, vector<16x32xbf16>, vector<92x32xf32> -> vector<92x32xf32>
    %87 = arith.addf %82, %86 : vector<92x32xf32>
    %88 = vector.extract_strided_slice %65 {offsets = [4, 0], sizes = [92, 16], strides = [1, 1]} : vector<144x16xf32> to vector<92x16xf32>
    %89 = arith.truncf %88 : vector<92x16xf32> to vector<92x16xbf16>
    %90 = vector.extract_strided_slice %66 {offsets = [64, 0], sizes = [16, 32], strides = [1, 1]} : vector<400x32xbf16> to vector<16x32xbf16>
    %cst_17 = arith.constant dense<0.000000e+00> : vector<92x32xf32>
    %91 = tpu.matmul %89, %90, %cst_17 {dimension_numbers = #tpu.dot_dimension_numbers<[1], [0], [0], [1], [0, 0, 1, 1], [], []>} : vector<92x16xbf16>, vector<16x32xbf16>, vector<92x32xf32> -> vector<92x32xf32>
    %92 = arith.addf %87, %91 : vector<92x32xf32>
    %93 = vector.extract_strided_slice %65 {offsets = [12, 0], sizes = [92, 16], strides = [1, 1]} : vector<144x16xf32> to vector<92x16xf32>
    %94 = arith.truncf %93 : vector<92x16xf32> to vector<92x16xbf16>
    %95 = vector.extract_strided_slice %66 {offsets = [80, 0], sizes = [16, 32], strides = [1, 1]} : vector<400x32xbf16> to vector<16x32xbf16>
    %cst_18 = arith.constant dense<0.000000e+00> : vector<92x32xf32>
    %96 = tpu.matmul %94, %95, %cst_18 {dimension_numbers = #tpu.dot_dimension_numbers<[1], [0], [0], [1], [0, 0, 1, 1], [], []>} : vector<92x16xbf16>, vector<16x32xbf16>, vector<92x32xf32> -> vector<92x32xf32>
    %97 = arith.addf %92, %96 : vector<92x32xf32>
    %98 = vector.extract_strided_slice %65 {offsets = [13, 0], sizes = [92, 16], strides = [1, 1]} : vector<144x16xf32> to vector<92x16xf32>
    %99 = arith.truncf %98 : vector<92x16xf32> to vector<92x16xbf16>
    %100 = vector.extract_strided_slice %66 {offsets = [96, 0], sizes = [16, 32], strides = [1, 1]} : vector<400x32xbf16> to vector<16x32xbf16>
    %cst_19 = arith.constant dense<0.000000e+00> : vector<92x32xf32>
    %101 = tpu.matmul %99, %100, %cst_19 {dimension_numbers = #tpu.dot_dimension_numbers<[1], [0], [0], [1], [0, 0, 1, 1], [], []>} : vector<92x16xbf16>, vector<16x32xbf16>, vector<92x32xf32> -> vector<92x32xf32>
    %102 = arith.addf %97, %101 : vector<92x32xf32>
    %103 = vector.extract_strided_slice %65 {offsets = [14, 0], sizes = [92, 16], strides = [1, 1]} : vector<144x16xf32> to vector<92x16xf32>
    %104 = arith.truncf %103 : vector<92x16xf32> to vector<92x16xbf16>
    %105 = vector.extract_strided_slice %66 {offsets = [112, 0], sizes = [16, 32], strides = [1, 1]} : vector<400x32xbf16> to vector<16x32xbf16>
    %cst_20 = arith.constant dense<0.000000e+00> : vector<92x32xf32>
    %106 = tpu.matmul %104, %105, %cst_20 {dimension_numbers = #tpu.dot_dimension_numbers<[1], [0], [0], [1], [0, 0, 1, 1], [], []>} : vector<92x16xbf16>, vector<16x32xbf16>, vector<92x32xf32> -> vector<92x32xf32>
    %107 = arith.addf %102, %106 : vector<92x32xf32>
    %108 = vector.extract_strided_slice %65 {offsets = [15, 0], sizes = [92, 16], strides = [1, 1]} : vector<144x16xf32> to vector<92x16xf32>
    %109 = arith.truncf %108 : vector<92x16xf32> to vector<92x16xbf16>
    %110 = vector.extract_strided_slice %66 {offsets = [128, 0], sizes = [16, 32], strides = [1, 1]} : vector<400x32xbf16> to vector<16x32xbf16>
    %cst_21 = arith.constant dense<0.000000e+00> : vector<92x32xf32>
    %111 = tpu.matmul %109, %110, %cst_21 {dimension_numbers = #tpu.dot_dimension_numbers<[1], [0], [0], [1], [0, 0, 1, 1], [], []>} : vector<92x16xbf16>, vector<16x32xbf16>, vector<92x32xf32> -> vector<92x32xf32>
    %112 = arith.addf %107, %111 : vector<92x32xf32>
    %113 = vector.extract_strided_slice %65 {offsets = [16, 0], sizes = [92, 16], strides = [1, 1]} : vector<144x16xf32> to vector<92x16xf32>
    %114 = arith.truncf %113 : vector<92x16xf32> to vector<92x16xbf16>
    %115 = vector.extract_strided_slice %66 {offsets = [144, 0], sizes = [16, 32], strides = [1, 1]} : vector<400x32xbf16> to vector<16x32xbf16>
    %cst_22 = arith.constant dense<0.000000e+00> : vector<92x32xf32>
    %116 = tpu.matmul %114, %115, %cst_22 {dimension_numbers = #tpu.dot_dimension_numbers<[1], [0], [0], [1], [0, 0, 1, 1], [], []>} : vector<92x16xbf16>, vector<16x32xbf16>, vector<92x32xf32> -> vector<92x32xf32>
    %117 = arith.addf %112, %116 : vector<92x32xf32>
    %118 = vector.extract_strided_slice %65 {offsets = [24, 0], sizes = [92, 16], strides = [1, 1]} : vector<144x16xf32> to vector<92x16xf32>
    %119 = arith.truncf %118 : vector<92x16xf32> to vector<92x16xbf16>
    %120 = vector.extract_strided_slice %66 {offsets = [160, 0], sizes = [16, 32], strides = [1, 1]} : vector<400x32xbf16> to vector<16x32xbf16>
    %cst_23 = arith.constant dense<0.000000e+00> : vector<92x32xf32>
    %121 = tpu.matmul %119, %120, %cst_23 {dimension_numbers = #tpu.dot_dimension_numbers<[1], [0], [0], [1], [0, 0, 1, 1], [], []>} : vector<92x16xbf16>, vector<16x32xbf16>, vector<92x32xf32> -> vector<92x32xf32>
    %122 = arith.addf %117, %121 : vector<92x32xf32>
    %123 = vector.extract_strided_slice %65 {offsets = [25, 0], sizes = [92, 16], strides = [1, 1]} : vector<144x16xf32> to vector<92x16xf32>
    %124 = arith.truncf %123 : vector<92x16xf32> to vector<92x16xbf16>
    %125 = vector.extract_strided_slice %66 {offsets = [176, 0], sizes = [16, 32], strides = [1, 1]} : vector<400x32xbf16> to vector<16x32xbf16>
    %cst_24 = arith.constant dense<0.000000e+00> : vector<92x32xf32>
    %126 = tpu.matmul %124, %125, %cst_24 {dimension_numbers = #tpu.dot_dimension_numbers<[1], [0], [0], [1], [0, 0, 1, 1], [], []>} : vector<92x16xbf16>, vector<16x32xbf16>, vector<92x32xf32> -> vector<92x32xf32>
    %127 = arith.addf %122, %126 : vector<92x32xf32>
    %128 = vector.extract_strided_slice %65 {offsets = [26, 0], sizes = [92, 16], strides = [1, 1]} : vector<144x16xf32> to vector<92x16xf32>
    %129 = arith.truncf %128 : vector<92x16xf32> to vector<92x16xbf16>
    %130 = vector.extract_strided_slice %66 {offsets = [192, 0], sizes = [16, 32], strides = [1, 1]} : vector<400x32xbf16> to vector<16x32xbf16>
    %cst_25 = arith.constant dense<0.000000e+00> : vector<92x32xf32>
    %131 = tpu.matmul %129, %130, %cst_25 {dimension_numbers = #tpu.dot_dimension_numbers<[1], [0], [0], [1], [0, 0, 1, 1], [], []>} : vector<92x16xbf16>, vector<16x32xbf16>, vector<92x32xf32> -> vector<92x32xf32>
    %132 = arith.addf %127, %131 : vector<92x32xf32>
    %133 = vector.extract_strided_slice %65 {offsets = [27, 0], sizes = [92, 16], strides = [1, 1]} : vector<144x16xf32> to vector<92x16xf32>
    %134 = arith.truncf %133 : vector<92x16xf32> to vector<92x16xbf16>
    %135 = vector.extract_strided_slice %66 {offsets = [208, 0], sizes = [16, 32], strides = [1, 1]} : vector<400x32xbf16> to vector<16x32xbf16>
    %cst_26 = arith.constant dense<0.000000e+00> : vector<92x32xf32>
    %136 = tpu.matmul %134, %135, %cst_26 {dimension_numbers = #tpu.dot_dimension_numbers<[1], [0], [0], [1], [0, 0, 1, 1], [], []>} : vector<92x16xbf16>, vector<16x32xbf16>, vector<92x32xf32> -> vector<92x32xf32>
    %137 = arith.addf %132, %136 : vector<92x32xf32>
    %138 = vector.extract_strided_slice %65 {offsets = [28, 0], sizes = [92, 16], strides = [1, 1]} : vector<144x16xf32> to vector<92x16xf32>
    %139 = arith.truncf %138 : vector<92x16xf32> to vector<92x16xbf16>
    %140 = vector.extract_strided_slice %66 {offsets = [224, 0], sizes = [16, 32], strides = [1, 1]} : vector<400x32xbf16> to vector<16x32xbf16>
    %cst_27 = arith.constant dense<0.000000e+00> : vector<92x32xf32>
    %141 = tpu.matmul %139, %140, %cst_27 {dimension_numbers = #tpu.dot_dimension_numbers<[1], [0], [0], [1], [0, 0, 1, 1], [], []>} : vector<92x16xbf16>, vector<16x32xbf16>, vector<92x32xf32> -> vector<92x32xf32>
    %142 = arith.addf %137, %141 : vector<92x32xf32>
    %143 = vector.extract_strided_slice %65 {offsets = [36, 0], sizes = [92, 16], strides = [1, 1]} : vector<144x16xf32> to vector<92x16xf32>
    %144 = arith.truncf %143 : vector<92x16xf32> to vector<92x16xbf16>
    %145 = vector.extract_strided_slice %66 {offsets = [240, 0], sizes = [16, 32], strides = [1, 1]} : vector<400x32xbf16> to vector<16x32xbf16>
    %cst_28 = arith.constant dense<0.000000e+00> : vector<92x32xf32>
    %146 = tpu.matmul %144, %145, %cst_28 {dimension_numbers = #tpu.dot_dimension_numbers<[1], [0], [0], [1], [0, 0, 1, 1], [], []>} : vector<92x16xbf16>, vector<16x32xbf16>, vector<92x32xf32> -> vector<92x32xf32>
    %147 = arith.addf %142, %146 : vector<92x32xf32>
    %148 = vector.extract_strided_slice %65 {offsets = [37, 0], sizes = [92, 16], strides = [1, 1]} : vector<144x16xf32> to vector<92x16xf32>
    %149 = arith.truncf %148 : vector<92x16xf32> to vector<92x16xbf16>
    %150 = vector.extract_strided_slice %66 {offsets = [256, 0], sizes = [16, 32], strides = [1, 1]} : vector<400x32xbf16> to vector<16x32xbf16>
    %cst_29 = arith.constant dense<0.000000e+00> : vector<92x32xf32>
    %151 = tpu.matmul %149, %150, %cst_29 {dimension_numbers = #tpu.dot_dimension_numbers<[1], [0], [0], [1], [0, 0, 1, 1], [], []>} : vector<92x16xbf16>, vector<16x32xbf16>, vector<92x32xf32> -> vector<92x32xf32>
    %152 = arith.addf %147, %151 : vector<92x32xf32>
    %153 = vector.extract_strided_slice %65 {offsets = [38, 0], sizes = [92, 16], strides = [1, 1]} : vector<144x16xf32> to vector<92x16xf32>
    %154 = arith.truncf %153 : vector<92x16xf32> to vector<92x16xbf16>
    %155 = vector.extract_strided_slice %66 {offsets = [272, 0], sizes = [16, 32], strides = [1, 1]} : vector<400x32xbf16> to vector<16x32xbf16>
    %cst_30 = arith.constant dense<0.000000e+00> : vector<92x32xf32>
    %156 = tpu.matmul %154, %155, %cst_30 {dimension_numbers = #tpu.dot_dimension_numbers<[1], [0], [0], [1], [0, 0, 1, 1], [], []>} : vector<92x16xbf16>, vector<16x32xbf16>, vector<92x32xf32> -> vector<92x32xf32>
    %157 = arith.addf %152, %156 : vector<92x32xf32>
    %158 = vector.extract_strided_slice %65 {offsets = [39, 0], sizes = [92, 16], strides = [1, 1]} : vector<144x16xf32> to vector<92x16xf32>
    %159 = arith.truncf %158 : vector<92x16xf32> to vector<92x16xbf16>
    %160 = vector.extract_strided_slice %66 {offsets = [288, 0], sizes = [16, 32], strides = [1, 1]} : vector<400x32xbf16> to vector<16x32xbf16>
    %cst_31 = arith.constant dense<0.000000e+00> : vector<92x32xf32>
    %161 = tpu.matmul %159, %160, %cst_31 {dimension_numbers = #tpu.dot_dimension_numbers<[1], [0], [0], [1], [0, 0, 1, 1], [], []>} : vector<92x16xbf16>, vector<16x32xbf16>, vector<92x32xf32> -> vector<92x32xf32>
    %162 = arith.addf %157, %161 : vector<92x32xf32>
    %163 = vector.extract_strided_slice %65 {offsets = [40, 0], sizes = [92, 16], strides = [1, 1]} : vector<144x16xf32> to vector<92x16xf32>
    %164 = arith.truncf %163 : vector<92x16xf32> to vector<92x16xbf16>
    %165 = vector.extract_strided_slice %66 {offsets = [304, 0], sizes = [16, 32], strides = [1, 1]} : vector<400x32xbf16> to vector<16x32xbf16>
    %cst_32 = arith.constant dense<0.000000e+00> : vector<92x32xf32>
    %166 = tpu.matmul %164, %165, %cst_32 {dimension_numbers = #tpu.dot_dimension_numbers<[1], [0], [0], [1], [0, 0, 1, 1], [], []>} : vector<92x16xbf16>, vector<16x32xbf16>, vector<92x32xf32> -> vector<92x32xf32>
    %167 = arith.addf %162, %166 : vector<92x32xf32>
    %168 = vector.extract_strided_slice %65 {offsets = [48, 0], sizes = [92, 16], strides = [1, 1]} : vector<144x16xf32> to vector<92x16xf32>
    %169 = arith.truncf %168 : vector<92x16xf32> to vector<92x16xbf16>
    %170 = vector.extract_strided_slice %66 {offsets = [320, 0], sizes = [16, 32], strides = [1, 1]} : vector<400x32xbf16> to vector<16x32xbf16>
    %cst_33 = arith.constant dense<0.000000e+00> : vector<92x32xf32>
    %171 = tpu.matmul %169, %170, %cst_33 {dimension_numbers = #tpu.dot_dimension_numbers<[1], [0], [0], [1], [0, 0, 1, 1], [], []>} : vector<92x16xbf16>, vector<16x32xbf16>, vector<92x32xf32> -> vector<92x32xf32>
    %172 = arith.addf %167, %171 : vector<92x32xf32>
    %173 = vector.extract_strided_slice %65 {offsets = [49, 0], sizes = [92, 16], strides = [1, 1]} : vector<144x16xf32> to vector<92x16xf32>
    %174 = arith.truncf %173 : vector<92x16xf32> to vector<92x16xbf16>
    %175 = vector.extract_strided_slice %66 {offsets = [336, 0], sizes = [16, 32], strides = [1, 1]} : vector<400x32xbf16> to vector<16x32xbf16>
    %cst_34 = arith.constant dense<0.000000e+00> : vector<92x32xf32>
    %176 = tpu.matmul %174, %175, %cst_34 {dimension_numbers = #tpu.dot_dimension_numbers<[1], [0], [0], [1], [0, 0, 1, 1], [], []>} : vector<92x16xbf16>, vector<16x32xbf16>, vector<92x32xf32> -> vector<92x32xf32>
    %177 = arith.addf %172, %176 : vector<92x32xf32>
    %178 = vector.extract_strided_slice %65 {offsets = [50, 0], sizes = [92, 16], strides = [1, 1]} : vector<144x16xf32> to vector<92x16xf32>
    %179 = arith.truncf %178 : vector<92x16xf32> to vector<92x16xbf16>
    %180 = vector.extract_strided_slice %66 {offsets = [352, 0], sizes = [16, 32], strides = [1, 1]} : vector<400x32xbf16> to vector<16x32xbf16>
    %cst_35 = arith.constant dense<0.000000e+00> : vector<92x32xf32>
    %181 = tpu.matmul %179, %180, %cst_35 {dimension_numbers = #tpu.dot_dimension_numbers<[1], [0], [0], [1], [0, 0, 1, 1], [], []>} : vector<92x16xbf16>, vector<16x32xbf16>, vector<92x32xf32> -> vector<92x32xf32>
    %182 = arith.addf %177, %181 : vector<92x32xf32>
    %183 = vector.extract_strided_slice %65 {offsets = [51, 0], sizes = [92, 16], strides = [1, 1]} : vector<144x16xf32> to vector<92x16xf32>
    %184 = arith.truncf %183 : vector<92x16xf32> to vector<92x16xbf16>
    %185 = vector.extract_strided_slice %66 {offsets = [368, 0], sizes = [16, 32], strides = [1, 1]} : vector<400x32xbf16> to vector<16x32xbf16>
    %cst_36 = arith.constant dense<0.000000e+00> : vector<92x32xf32>
    %186 = tpu.matmul %184, %185, %cst_36 {dimension_numbers = #tpu.dot_dimension_numbers<[1], [0], [0], [1], [0, 0, 1, 1], [], []>} : vector<92x16xbf16>, vector<16x32xbf16>, vector<92x32xf32> -> vector<92x32xf32>
    %187 = arith.addf %182, %186 : vector<92x32xf32>
    %188 = vector.extract_strided_slice %65 {offsets = [52, 0], sizes = [92, 16], strides = [1, 1]} : vector<144x16xf32> to vector<92x16xf32>
    %189 = arith.truncf %188 : vector<92x16xf32> to vector<92x16xbf16>
    %190 = vector.extract_strided_slice %66 {offsets = [384, 0], sizes = [16, 32], strides = [1, 1]} : vector<400x32xbf16> to vector<16x32xbf16>
    %cst_37 = arith.constant dense<0.000000e+00> : vector<92x32xf32>
    %191 = tpu.matmul %189, %190, %cst_37 {dimension_numbers = #tpu.dot_dimension_numbers<[1], [0], [0], [1], [0, 0, 1, 1], [], []>} : vector<92x16xbf16>, vector<16x32xbf16>, vector<92x32xf32> -> vector<92x32xf32>
    %192 = arith.addf %187, %191 : vector<92x32xf32>
    %c0_38 = arith.constant 0 : index
    %c0_39 = arith.constant 0 : index
    %193 = vector.load %arg5[%c0_38, %c0_39] : memref<1x32xf32, #tpu.memory_space<vmem>>, vector<1x32xf32>
    %194 = vector.broadcast %193 : vector<1x32xf32> to vector<92x32xf32>
    %195 = arith.addf %192, %194 : vector<92x32xf32>
    %cst_40 = arith.constant 0.000000e+00 : f32
    %196 = vector.broadcast %cst_40 : f32 to vector<92x32xf32>
    %197 = arith.maximumf %195, %196 : vector<92x32xf32>
    %c0_41 = arith.constant 0 : index
    %c0_42 = arith.constant 0 : index
    %198 = vector.load %arg9[%c0_41, %c0_42] : memref<64x92xbf16, #tpu.memory_space<vmem>>, vector<64x92xbf16>
    %199 = arith.truncf %197 : vector<92x32xf32> to vector<92x32xbf16>
    %cst_43 = arith.constant dense<0.000000e+00> : vector<64x32xf32>
    %200 = tpu.matmul %198, %199, %cst_43 {dimension_numbers = #tpu.dot_dimension_numbers<[1], [0], [0], [1], [0, 0, 1, 1], [], []>} : vector<64x92xbf16>, vector<92x32xbf16>, vector<64x32xf32> -> vector<64x32xf32>
    %c0_44 = arith.constant 0 : index
    %c0_45 = arith.constant 0 : index
    %201 = vector.load %arg6[%c0_44, %c0_45] : memref<800x64xbf16, #tpu.memory_space<vmem>>, vector<800x64xbf16>
    %cst_46 = arith.constant 0.000000e+00 : f32
    %202 = vector.broadcast %cst_46 : f32 to vector<28x64xf32>
    %203 = vector.extract_strided_slice %200 {offsets = [0, 0], sizes = [28, 32], strides = [1, 1]} : vector<64x32xf32> to vector<28x32xf32>
    %204 = arith.truncf %203 : vector<28x32xf32> to vector<28x32xbf16>
    %205 = vector.extract_strided_slice %201 {offsets = [0, 0], sizes = [32, 64], strides = [1, 1]} : vector<800x64xbf16> to vector<32x64xbf16>
    %cst_47 = arith.constant dense<0.000000e+00> : vector<28x64xf32>
    %206 = tpu.matmul %204, %205, %cst_47 {dimension_numbers = #tpu.dot_dimension_numbers<[1], [0], [0], [1], [0, 0, 1, 1], [], []>} : vector<28x32xbf16>, vector<32x64xbf16>, vector<28x64xf32> -> vector<28x64xf32>
    %207 = arith.addf %202, %206 : vector<28x64xf32>
    %208 = vector.extract_strided_slice %200 {offsets = [1, 0], sizes = [28, 32], strides = [1, 1]} : vector<64x32xf32> to vector<28x32xf32>
    %209 = arith.truncf %208 : vector<28x32xf32> to vector<28x32xbf16>
    %210 = vector.extract_strided_slice %201 {offsets = [32, 0], sizes = [32, 64], strides = [1, 1]} : vector<800x64xbf16> to vector<32x64xbf16>
    %cst_48 = arith.constant dense<0.000000e+00> : vector<28x64xf32>
    %211 = tpu.matmul %209, %210, %cst_48 {dimension_numbers = #tpu.dot_dimension_numbers<[1], [0], [0], [1], [0, 0, 1, 1], [], []>} : vector<28x32xbf16>, vector<32x64xbf16>, vector<28x64xf32> -> vector<28x64xf32>
    %212 = arith.addf %207, %211 : vector<28x64xf32>
    %213 = vector.extract_strided_slice %200 {offsets = [2, 0], sizes = [28, 32], strides = [1, 1]} : vector<64x32xf32> to vector<28x32xf32>
    %214 = arith.truncf %213 : vector<28x32xf32> to vector<28x32xbf16>
    %215 = vector.extract_strided_slice %201 {offsets = [64, 0], sizes = [32, 64], strides = [1, 1]} : vector<800x64xbf16> to vector<32x64xbf16>
    %cst_49 = arith.constant dense<0.000000e+00> : vector<28x64xf32>
    %216 = tpu.matmul %214, %215, %cst_49 {dimension_numbers = #tpu.dot_dimension_numbers<[1], [0], [0], [1], [0, 0, 1, 1], [], []>} : vector<28x32xbf16>, vector<32x64xbf16>, vector<28x64xf32> -> vector<28x64xf32>
    %217 = arith.addf %212, %216 : vector<28x64xf32>
    %218 = vector.extract_strided_slice %200 {offsets = [3, 0], sizes = [28, 32], strides = [1, 1]} : vector<64x32xf32> to vector<28x32xf32>
    %219 = arith.truncf %218 : vector<28x32xf32> to vector<28x32xbf16>
    %220 = vector.extract_strided_slice %201 {offsets = [96, 0], sizes = [32, 64], strides = [1, 1]} : vector<800x64xbf16> to vector<32x64xbf16>
    %cst_50 = arith.constant dense<0.000000e+00> : vector<28x64xf32>
    %221 = tpu.matmul %219, %220, %cst_50 {dimension_numbers = #tpu.dot_dimension_numbers<[1], [0], [0], [1], [0, 0, 1, 1], [], []>} : vector<28x32xbf16>, vector<32x64xbf16>, vector<28x64xf32> -> vector<28x64xf32>
    %222 = arith.addf %217, %221 : vector<28x64xf32>
    %223 = vector.extract_strided_slice %200 {offsets = [4, 0], sizes = [28, 32], strides = [1, 1]} : vector<64x32xf32> to vector<28x32xf32>
    %224 = arith.truncf %223 : vector<28x32xf32> to vector<28x32xbf16>
    %225 = vector.extract_strided_slice %201 {offsets = [128, 0], sizes = [32, 64], strides = [1, 1]} : vector<800x64xbf16> to vector<32x64xbf16>
    %cst_51 = arith.constant dense<0.000000e+00> : vector<28x64xf32>
    %226 = tpu.matmul %224, %225, %cst_51 {dimension_numbers = #tpu.dot_dimension_numbers<[1], [0], [0], [1], [0, 0, 1, 1], [], []>} : vector<28x32xbf16>, vector<32x64xbf16>, vector<28x64xf32> -> vector<28x64xf32>
    %227 = arith.addf %222, %226 : vector<28x64xf32>
    %228 = vector.extract_strided_slice %200 {offsets = [8, 0], sizes = [28, 32], strides = [1, 1]} : vector<64x32xf32> to vector<28x32xf32>
    %229 = arith.truncf %228 : vector<28x32xf32> to vector<28x32xbf16>
    %230 = vector.extract_strided_slice %201 {offsets = [160, 0], sizes = [32, 64], strides = [1, 1]} : vector<800x64xbf16> to vector<32x64xbf16>
    %cst_52 = arith.constant dense<0.000000e+00> : vector<28x64xf32>
    %231 = tpu.matmul %229, %230, %cst_52 {dimension_numbers = #tpu.dot_dimension_numbers<[1], [0], [0], [1], [0, 0, 1, 1], [], []>} : vector<28x32xbf16>, vector<32x64xbf16>, vector<28x64xf32> -> vector<28x64xf32>
    %232 = arith.addf %227, %231 : vector<28x64xf32>
    %233 = vector.extract_strided_slice %200 {offsets = [9, 0], sizes = [28, 32], strides = [1, 1]} : vector<64x32xf32> to vector<28x32xf32>
    %234 = arith.truncf %233 : vector<28x32xf32> to vector<28x32xbf16>
    %235 = vector.extract_strided_slice %201 {offsets = [192, 0], sizes = [32, 64], strides = [1, 1]} : vector<800x64xbf16> to vector<32x64xbf16>
    %cst_53 = arith.constant dense<0.000000e+00> : vector<28x64xf32>
    %236 = tpu.matmul %234, %235, %cst_53 {dimension_numbers = #tpu.dot_dimension_numbers<[1], [0], [0], [1], [0, 0, 1, 1], [], []>} : vector<28x32xbf16>, vector<32x64xbf16>, vector<28x64xf32> -> vector<28x64xf32>
    %237 = arith.addf %232, %236 : vector<28x64xf32>
    %238 = vector.extract_strided_slice %200 {offsets = [10, 0], sizes = [28, 32], strides = [1, 1]} : vector<64x32xf32> to vector<28x32xf32>
    %239 = arith.truncf %238 : vector<28x32xf32> to vector<28x32xbf16>
    %240 = vector.extract_strided_slice %201 {offsets = [224, 0], sizes = [32, 64], strides = [1, 1]} : vector<800x64xbf16> to vector<32x64xbf16>
    %cst_54 = arith.constant dense<0.000000e+00> : vector<28x64xf32>
    %241 = tpu.matmul %239, %240, %cst_54 {dimension_numbers = #tpu.dot_dimension_numbers<[1], [0], [0], [1], [0, 0, 1, 1], [], []>} : vector<28x32xbf16>, vector<32x64xbf16>, vector<28x64xf32> -> vector<28x64xf32>
    %242 = arith.addf %237, %241 : vector<28x64xf32>
    %243 = vector.extract_strided_slice %200 {offsets = [11, 0], sizes = [28, 32], strides = [1, 1]} : vector<64x32xf32> to vector<28x32xf32>
    %244 = arith.truncf %243 : vector<28x32xf32> to vector<28x32xbf16>
    %245 = vector.extract_strided_slice %201 {offsets = [256, 0], sizes = [32, 64], strides = [1, 1]} : vector<800x64xbf16> to vector<32x64xbf16>
    %cst_55 = arith.constant dense<0.000000e+00> : vector<28x64xf32>
    %246 = tpu.matmul %244, %245, %cst_55 {dimension_numbers = #tpu.dot_dimension_numbers<[1], [0], [0], [1], [0, 0, 1, 1], [], []>} : vector<28x32xbf16>, vector<32x64xbf16>, vector<28x64xf32> -> vector<28x64xf32>
    %247 = arith.addf %242, %246 : vector<28x64xf32>
    %248 = vector.extract_strided_slice %200 {offsets = [12, 0], sizes = [28, 32], strides = [1, 1]} : vector<64x32xf32> to vector<28x32xf32>
    %249 = arith.truncf %248 : vector<28x32xf32> to vector<28x32xbf16>
    %250 = vector.extract_strided_slice %201 {offsets = [288, 0], sizes = [32, 64], strides = [1, 1]} : vector<800x64xbf16> to vector<32x64xbf16>
    %cst_56 = arith.constant dense<0.000000e+00> : vector<28x64xf32>
    %251 = tpu.matmul %249, %250, %cst_56 {dimension_numbers = #tpu.dot_dimension_numbers<[1], [0], [0], [1], [0, 0, 1, 1], [], []>} : vector<28x32xbf16>, vector<32x64xbf16>, vector<28x64xf32> -> vector<28x64xf32>
    %252 = arith.addf %247, %251 : vector<28x64xf32>
    %253 = vector.extract_strided_slice %200 {offsets = [16, 0], sizes = [28, 32], strides = [1, 1]} : vector<64x32xf32> to vector<28x32xf32>
    %254 = arith.truncf %253 : vector<28x32xf32> to vector<28x32xbf16>
    %255 = vector.extract_strided_slice %201 {offsets = [320, 0], sizes = [32, 64], strides = [1, 1]} : vector<800x64xbf16> to vector<32x64xbf16>
    %cst_57 = arith.constant dense<0.000000e+00> : vector<28x64xf32>
    %256 = tpu.matmul %254, %255, %cst_57 {dimension_numbers = #tpu.dot_dimension_numbers<[1], [0], [0], [1], [0, 0, 1, 1], [], []>} : vector<28x32xbf16>, vector<32x64xbf16>, vector<28x64xf32> -> vector<28x64xf32>
    %257 = arith.addf %252, %256 : vector<28x64xf32>
    %258 = vector.extract_strided_slice %200 {offsets = [17, 0], sizes = [28, 32], strides = [1, 1]} : vector<64x32xf32> to vector<28x32xf32>
    %259 = arith.truncf %258 : vector<28x32xf32> to vector<28x32xbf16>
    %260 = vector.extract_strided_slice %201 {offsets = [352, 0], sizes = [32, 64], strides = [1, 1]} : vector<800x64xbf16> to vector<32x64xbf16>
    %cst_58 = arith.constant dense<0.000000e+00> : vector<28x64xf32>
    %261 = tpu.matmul %259, %260, %cst_58 {dimension_numbers = #tpu.dot_dimension_numbers<[1], [0], [0], [1], [0, 0, 1, 1], [], []>} : vector<28x32xbf16>, vector<32x64xbf16>, vector<28x64xf32> -> vector<28x64xf32>
    %262 = arith.addf %257, %261 : vector<28x64xf32>
    %263 = vector.extract_strided_slice %200 {offsets = [18, 0], sizes = [28, 32], strides = [1, 1]} : vector<64x32xf32> to vector<28x32xf32>
    %264 = arith.truncf %263 : vector<28x32xf32> to vector<28x32xbf16>
    %265 = vector.extract_strided_slice %201 {offsets = [384, 0], sizes = [32, 64], strides = [1, 1]} : vector<800x64xbf16> to vector<32x64xbf16>
    %cst_59 = arith.constant dense<0.000000e+00> : vector<28x64xf32>
    %266 = tpu.matmul %264, %265, %cst_59 {dimension_numbers = #tpu.dot_dimension_numbers<[1], [0], [0], [1], [0, 0, 1, 1], [], []>} : vector<28x32xbf16>, vector<32x64xbf16>, vector<28x64xf32> -> vector<28x64xf32>
    %267 = arith.addf %262, %266 : vector<28x64xf32>
    %268 = vector.extract_strided_slice %200 {offsets = [19, 0], sizes = [28, 32], strides = [1, 1]} : vector<64x32xf32> to vector<28x32xf32>
    %269 = arith.truncf %268 : vector<28x32xf32> to vector<28x32xbf16>
    %270 = vector.extract_strided_slice %201 {offsets = [416, 0], sizes = [32, 64], strides = [1, 1]} : vector<800x64xbf16> to vector<32x64xbf16>
    %cst_60 = arith.constant dense<0.000000e+00> : vector<28x64xf32>
    %271 = tpu.matmul %269, %270, %cst_60 {dimension_numbers = #tpu.dot_dimension_numbers<[1], [0], [0], [1], [0, 0, 1, 1], [], []>} : vector<28x32xbf16>, vector<32x64xbf16>, vector<28x64xf32> -> vector<28x64xf32>
    %272 = arith.addf %267, %271 : vector<28x64xf32>
    %273 = vector.extract_strided_slice %200 {offsets = [20, 0], sizes = [28, 32], strides = [1, 1]} : vector<64x32xf32> to vector<28x32xf32>
    %274 = arith.truncf %273 : vector<28x32xf32> to vector<28x32xbf16>
    %275 = vector.extract_strided_slice %201 {offsets = [448, 0], sizes = [32, 64], strides = [1, 1]} : vector<800x64xbf16> to vector<32x64xbf16>
    %cst_61 = arith.constant dense<0.000000e+00> : vector<28x64xf32>
    %276 = tpu.matmul %274, %275, %cst_61 {dimension_numbers = #tpu.dot_dimension_numbers<[1], [0], [0], [1], [0, 0, 1, 1], [], []>} : vector<28x32xbf16>, vector<32x64xbf16>, vector<28x64xf32> -> vector<28x64xf32>
    %277 = arith.addf %272, %276 : vector<28x64xf32>
    %278 = vector.extract_strided_slice %200 {offsets = [24, 0], sizes = [28, 32], strides = [1, 1]} : vector<64x32xf32> to vector<28x32xf32>
    %279 = arith.truncf %278 : vector<28x32xf32> to vector<28x32xbf16>
    %280 = vector.extract_strided_slice %201 {offsets = [480, 0], sizes = [32, 64], strides = [1, 1]} : vector<800x64xbf16> to vector<32x64xbf16>
    %cst_62 = arith.constant dense<0.000000e+00> : vector<28x64xf32>
    %281 = tpu.matmul %279, %280, %cst_62 {dimension_numbers = #tpu.dot_dimension_numbers<[1], [0], [0], [1], [0, 0, 1, 1], [], []>} : vector<28x32xbf16>, vector<32x64xbf16>, vector<28x64xf32> -> vector<28x64xf32>
    %282 = arith.addf %277, %281 : vector<28x64xf32>
    %283 = vector.extract_strided_slice %200 {offsets = [25, 0], sizes = [28, 32], strides = [1, 1]} : vector<64x32xf32> to vector<28x32xf32>
    %284 = arith.truncf %283 : vector<28x32xf32> to vector<28x32xbf16>
    %285 = vector.extract_strided_slice %201 {offsets = [512, 0], sizes = [32, 64], strides = [1, 1]} : vector<800x64xbf16> to vector<32x64xbf16>
    %cst_63 = arith.constant dense<0.000000e+00> : vector<28x64xf32>
    %286 = tpu.matmul %284, %285, %cst_63 {dimension_numbers = #tpu.dot_dimension_numbers<[1], [0], [0], [1], [0, 0, 1, 1], [], []>} : vector<28x32xbf16>, vector<32x64xbf16>, vector<28x64xf32> -> vector<28x64xf32>
    %287 = arith.addf %282, %286 : vector<28x64xf32>
    %288 = vector.extract_strided_slice %200 {offsets = [26, 0], sizes = [28, 32], strides = [1, 1]} : vector<64x32xf32> to vector<28x32xf32>
    %289 = arith.truncf %288 : vector<28x32xf32> to vector<28x32xbf16>
    %290 = vector.extract_strided_slice %201 {offsets = [544, 0], sizes = [32, 64], strides = [1, 1]} : vector<800x64xbf16> to vector<32x64xbf16>
    %cst_64 = arith.constant dense<0.000000e+00> : vector<28x64xf32>
    %291 = tpu.matmul %289, %290, %cst_64 {dimension_numbers = #tpu.dot_dimension_numbers<[1], [0], [0], [1], [0, 0, 1, 1], [], []>} : vector<28x32xbf16>, vector<32x64xbf16>, vector<28x64xf32> -> vector<28x64xf32>
    %292 = arith.addf %287, %291 : vector<28x64xf32>
    %293 = vector.extract_strided_slice %200 {offsets = [27, 0], sizes = [28, 32], strides = [1, 1]} : vector<64x32xf32> to vector<28x32xf32>
    %294 = arith.truncf %293 : vector<28x32xf32> to vector<28x32xbf16>
    %295 = vector.extract_strided_slice %201 {offsets = [576, 0], sizes = [32, 64], strides = [1, 1]} : vector<800x64xbf16> to vector<32x64xbf16>
    %cst_65 = arith.constant dense<0.000000e+00> : vector<28x64xf32>
    %296 = tpu.matmul %294, %295, %cst_65 {dimension_numbers = #tpu.dot_dimension_numbers<[1], [0], [0], [1], [0, 0, 1, 1], [], []>} : vector<28x32xbf16>, vector<32x64xbf16>, vector<28x64xf32> -> vector<28x64xf32>
    %297 = arith.addf %292, %296 : vector<28x64xf32>
    %298 = vector.extract_strided_slice %200 {offsets = [28, 0], sizes = [28, 32], strides = [1, 1]} : vector<64x32xf32> to vector<28x32xf32>
    %299 = arith.truncf %298 : vector<28x32xf32> to vector<28x32xbf16>
    %300 = vector.extract_strided_slice %201 {offsets = [608, 0], sizes = [32, 64], strides = [1, 1]} : vector<800x64xbf16> to vector<32x64xbf16>
    %cst_66 = arith.constant dense<0.000000e+00> : vector<28x64xf32>
    %301 = tpu.matmul %299, %300, %cst_66 {dimension_numbers = #tpu.dot_dimension_numbers<[1], [0], [0], [1], [0, 0, 1, 1], [], []>} : vector<28x32xbf16>, vector<32x64xbf16>, vector<28x64xf32> -> vector<28x64xf32>
    %302 = arith.addf %297, %301 : vector<28x64xf32>
    %303 = vector.extract_strided_slice %200 {offsets = [32, 0], sizes = [28, 32], strides = [1, 1]} : vector<64x32xf32> to vector<28x32xf32>
    %304 = arith.truncf %303 : vector<28x32xf32> to vector<28x32xbf16>
    %305 = vector.extract_strided_slice %201 {offsets = [640, 0], sizes = [32, 64], strides = [1, 1]} : vector<800x64xbf16> to vector<32x64xbf16>
    %cst_67 = arith.constant dense<0.000000e+00> : vector<28x64xf32>
    %306 = tpu.matmul %304, %305, %cst_67 {dimension_numbers = #tpu.dot_dimension_numbers<[1], [0], [0], [1], [0, 0, 1, 1], [], []>} : vector<28x32xbf16>, vector<32x64xbf16>, vector<28x64xf32> -> vector<28x64xf32>
    %307 = arith.addf %302, %306 : vector<28x64xf32>
    %308 = vector.extract_strided_slice %200 {offsets = [33, 0], sizes = [28, 32], strides = [1, 1]} : vector<64x32xf32> to vector<28x32xf32>
    %309 = arith.truncf %308 : vector<28x32xf32> to vector<28x32xbf16>
    %310 = vector.extract_strided_slice %201 {offsets = [672, 0], sizes = [32, 64], strides = [1, 1]} : vector<800x64xbf16> to vector<32x64xbf16>
    %cst_68 = arith.constant dense<0.000000e+00> : vector<28x64xf32>
    %311 = tpu.matmul %309, %310, %cst_68 {dimension_numbers = #tpu.dot_dimension_numbers<[1], [0], [0], [1], [0, 0, 1, 1], [], []>} : vector<28x32xbf16>, vector<32x64xbf16>, vector<28x64xf32> -> vector<28x64xf32>
    %312 = arith.addf %307, %311 : vector<28x64xf32>
    %313 = vector.extract_strided_slice %200 {offsets = [34, 0], sizes = [28, 32], strides = [1, 1]} : vector<64x32xf32> to vector<28x32xf32>
    %314 = arith.truncf %313 : vector<28x32xf32> to vector<28x32xbf16>
    %315 = vector.extract_strided_slice %201 {offsets = [704, 0], sizes = [32, 64], strides = [1, 1]} : vector<800x64xbf16> to vector<32x64xbf16>
    %cst_69 = arith.constant dense<0.000000e+00> : vector<28x64xf32>
    %316 = tpu.matmul %314, %315, %cst_69 {dimension_numbers = #tpu.dot_dimension_numbers<[1], [0], [0], [1], [0, 0, 1, 1], [], []>} : vector<28x32xbf16>, vector<32x64xbf16>, vector<28x64xf32> -> vector<28x64xf32>
    %317 = arith.addf %312, %316 : vector<28x64xf32>
    %318 = vector.extract_strided_slice %200 {offsets = [35, 0], sizes = [28, 32], strides = [1, 1]} : vector<64x32xf32> to vector<28x32xf32>
    %319 = arith.truncf %318 : vector<28x32xf32> to vector<28x32xbf16>
    %320 = vector.extract_strided_slice %201 {offsets = [736, 0], sizes = [32, 64], strides = [1, 1]} : vector<800x64xbf16> to vector<32x64xbf16>
    %cst_70 = arith.constant dense<0.000000e+00> : vector<28x64xf32>
    %321 = tpu.matmul %319, %320, %cst_70 {dimension_numbers = #tpu.dot_dimension_numbers<[1], [0], [0], [1], [0, 0, 1, 1], [], []>} : vector<28x32xbf16>, vector<32x64xbf16>, vector<28x64xf32> -> vector<28x64xf32>
    %322 = arith.addf %317, %321 : vector<28x64xf32>
    %323 = vector.extract_strided_slice %200 {offsets = [36, 0], sizes = [28, 32], strides = [1, 1]} : vector<64x32xf32> to vector<28x32xf32>
    %324 = arith.truncf %323 : vector<28x32xf32> to vector<28x32xbf16>
    %325 = vector.extract_strided_slice %201 {offsets = [768, 0], sizes = [32, 64], strides = [1, 1]} : vector<800x64xbf16> to vector<32x64xbf16>
    %cst_71 = arith.constant dense<0.000000e+00> : vector<28x64xf32>
    %326 = tpu.matmul %324, %325, %cst_71 {dimension_numbers = #tpu.dot_dimension_numbers<[1], [0], [0], [1], [0, 0, 1, 1], [], []>} : vector<28x32xbf16>, vector<32x64xbf16>, vector<28x64xf32> -> vector<28x64xf32>
    %327 = arith.addf %322, %326 : vector<28x64xf32>
    %c0_72 = arith.constant 0 : index
    %c0_73 = arith.constant 0 : index
    %328 = vector.load %arg7[%c0_72, %c0_73] : memref<1x64xf32, #tpu.memory_space<vmem>>, vector<1x64xf32>
    %329 = vector.broadcast %328 : vector<1x64xf32> to vector<28x64xf32>
    %330 = arith.addf %327, %329 : vector<28x64xf32>
    %cst_74 = arith.constant 0.000000e+00 : f32
    %331 = vector.broadcast %cst_74 : f32 to vector<28x64xf32>
    %332 = arith.maximumf %330, %331 : vector<28x64xf32>
    %c0_75 = arith.constant 0 : index
    %c0_76 = arith.constant 0 : index
    %333 = vector.load %arg10[%c0_75, %c0_76] : memref<1x28xf32, #tpu.memory_space<vmem>>, vector<1x28xf32>
    %cst_77 = arith.constant dense<0.000000e+00> : vector<1x64xf32>
    %334 = tpu.matmul %333, %332, %cst_77 {dimension_numbers = #tpu.dot_dimension_numbers<[1], [0], [0], [1], [0, 0, 1, 1], [], []>} : vector<1x28xf32>, vector<28x64xf32>, vector<1x64xf32> -> vector<1x64xf32>
    %c0_78 = arith.constant 0 : index
    %c0_79 = arith.constant 0 : index
    %335 = vector.load %arg11[%c0_78, %c0_79] : memref<64x128xf32, #tpu.memory_space<vmem>>, vector<64x128xf32>
    %cst_80 = arith.constant dense<0.000000e+00> : vector<1x128xf32>
    %336 = tpu.matmul %334, %335, %cst_80 {dimension_numbers = #tpu.dot_dimension_numbers<[1], [0], [0], [1], [0, 0, 1, 1], [], []>} : vector<1x64xf32>, vector<64x128xf32>, vector<1x128xf32> -> vector<1x128xf32>
    %c0_81 = arith.constant 0 : index
    %c0_82 = arith.constant 0 : index
    %337 = vector.load %arg12[%c0_81, %c0_82] : memref<1x128xf32, #tpu.memory_space<vmem>>, vector<1x128xf32>
    %338 = arith.addf %336, %337 : vector<1x128xf32>
    %c0_83 = arith.constant 0 : index
    %c0_84 = arith.constant 0 : index
    %c0_85 = arith.constant 0 : index
    %339 = vector.load %arg13[%c0_83, %c0_84, %c0_85] : memref<1x1x128xf32, #tpu.memory_space<vmem>>, vector<1x1x128xf32>
    %340 = vector.shape_cast %339 : vector<1x1x128xf32> to vector<1x128xf32>
    %341 = vector.shape_cast %338 : vector<1x128xf32> to vector<1x1x128xf32>
    tpu.vector_store %arg13[%c0_83, %c0_84, %c0_85], %341 {strides = array<i32>} : memref<1x1x128xf32, #tpu.memory_space<vmem>>, vector<1x1x128xf32>,
    return
  }
  func.func @transform_0(%arg0: i32) -> (i32, i32, i32) {
    %c0_i32 = arith.constant 0 : i32
    %c0_i32_0 = arith.constant 0 : i32
    %c0_i32_1 = arith.constant 0 : i32
    return %arg0, %c0_i32, %c0_i32_0 : i32, i32, i32
  }
  func.func @transform_1(%arg0: i32) -> (i32, i32) {
    %c0_i32 = arith.constant 0 : i32
    %c0_i32_0 = arith.constant 0 : i32
    %c0_i32_1 = arith.constant 0 : i32
    return %c0_i32, %c0_i32_0 : i32, i32
  }
  func.func @transform_2(%arg0: i32) -> (i32, i32) {
    %c0_i32 = arith.constant 0 : i32
    %c0_i32_0 = arith.constant 0 : i32
    %c0_i32_1 = arith.constant 0 : i32
    return %c0_i32, %c0_i32_0 : i32, i32
  }
  func.func @transform_3(%arg0: i32) -> (i32, i32) {
    %c0_i32 = arith.constant 0 : i32
    %c0_i32_0 = arith.constant 0 : i32
    %c0_i32_1 = arith.constant 0 : i32
    return %c0_i32, %c0_i32_0 : i32, i32
  }
  func.func @transform_4(%arg0: i32) -> (i32, i32) {
    %c0_i32 = arith.constant 0 : i32
    %c0_i32_0 = arith.constant 0 : i32
    %c0_i32_1 = arith.constant 0 : i32
    return %c0_i32, %c0_i32_0 : i32, i32
  }
  func.func @transform_5(%arg0: i32) -> (i32, i32) {
    %c0_i32 = arith.constant 0 : i32
    %c0_i32_0 = arith.constant 0 : i32
    %c0_i32_1 = arith.constant 0 : i32
    return %c0_i32, %c0_i32_0 : i32, i32
  }
  func.func @transform_6(%arg0: i32) -> (i32, i32) {
    %c0_i32 = arith.constant 0 : i32
    %c0_i32_0 = arith.constant 0 : i32
    %c0_i32_1 = arith.constant 0 : i32
    return %c0_i32, %c0_i32_0 : i32, i32
  }
  func.func @transform_7(%arg0: i32) -> (i32, i32) {
    %c0_i32 = arith.constant 0 : i32
    %c0_i32_0 = arith.constant 0 : i32
    %c0_i32_1 = arith.constant 0 : i32
    return %c0_i32, %c0_i32_0 : i32, i32
  }
  func.func @transform_8(%arg0: i32) -> (i32, i32) {
    %c0_i32 = arith.constant 0 : i32
    %c0_i32_0 = arith.constant 0 : i32
    %c0_i32_1 = arith.constant 0 : i32
    return %c0_i32, %c0_i32_0 : i32, i32
  }
  func.func @transform_9(%arg0: i32) -> (i32, i32) {
    %c0_i32 = arith.constant 0 : i32
    %c0_i32_0 = arith.constant 0 : i32
    %c0_i32_1 = arith.constant 0 : i32
    return %c0_i32, %c0_i32_0 : i32, i32
  }
  func.func @transform_10(%arg0: i32) -> (i32, i32) {
    %c0_i32 = arith.constant 0 : i32
    %c0_i32_0 = arith.constant 0 : i32
    %c0_i32_1 = arith.constant 0 : i32
    return %c0_i32, %c0_i32_0 : i32, i32
  }
  func.func @transform_11(%arg0: i32) -> (i32, i32) {
    %c0_i32 = arith.constant 0 : i32
    %c0_i32_0 = arith.constant 0 : i32
    %c0_i32_1 = arith.constant 0 : i32
    return %c0_i32, %c0_i32_0 : i32, i32
  }
  func.func @transform_12(%arg0: i32) -> (i32, i32, i32) {
    %c0_i32 = arith.constant 0 : i32
    %c0_i32_0 = arith.constant 0 : i32
    %c0_i32_1 = arith.constant 0 : i32
    return %arg0, %c0_i32, %c0_i32_0 : i32, i32, i32
  }
}

</mosaic_0001>

<bundles_post_ra>
// kernel: mnist_net_forward.1
= control target key start
LH: loop header
LB: loop body
LE: loop exit
PB: predicated region body
PF: predicated region fallthrough
CT: control target
= control target key end

     0   :  { %s14691_s0 = inlined_call_operand.vmem [shape: f32[2,324,1], index: 0, kind: input, shape index: {}]   ;;  %s14692_s1 = inlined_call_operand.vmem [shape: f32[9,16], index: 1, kind: input, shape index: {}]   ;;  %s14693_s2 = inlined_call_operand.vmem [shape: f32[1,16], index: 2, kind: input, shape index: {}]   ;;  %s14694_s3 = inlined_call_operand.vmem [shape: bf16[400,32], index: 3, kind: input, shape index: {}]   ;;  %s14695_s4 = inlined_call_operand.vmem [shape: f32[1,32], index: 4, kind: input, shape index: {}]   ;;  %s14696_s5 = inlined_call_operand.vmem [shape: bf16[800,64], index: 5, kind: input, shape index: {}]   ;;  %s14697_s6 = inlined_call_operand.vmem [shape: f32[1,64], index: 6, kind: input, shape index: {}]   ;;  %s14698_s7 = inlined_call_operand.vmem [shape: bf16[144,286], index: 7, kind: input, shape index: {}]   ;;  %s14699_s8 = inlined_call_operand.vmem [shape: bf16[64,92], index: 8, kind: input, shape index: {}]   ;;  %s14700_s9 = inlined_call_operand.vmem [shape: f32[1,28], index: 9, kind: input, shape index: {}]   ;;  %s14701_s10 = inlined_call_operand.vmem [shape: f32[64,128], index: 10, kind: input, shape index: {}]   ;;  %s14702_s11 = inlined_call_operand.vmem [shape: f32[1,128], index: 11, kind: input, shape index: {}]   ;;  %s14703_s12 = inlined_call_operand.hbm [shape: f32[2,1,128], index: 12, kind: output, shape index: {}]  }
   0x1   :  { %14989 = sst [smem:[#allocation93_spill]] %s14691_s0 }
   0x2   :  { %14990 = sst [smem:[#allocation94_spill]] %s14692_s1 }
   0x3   :  { %17 = vsyncpa [#allocation3], 0 }
   0x4   :  { %19 = vsyncpa [#allocation3 + $0x1], 0  ;;  %s10303_s21 = smov 0   ;;  %s10305_s22 = smov 0  }
   0x5   :  { %s10307_s23 = smov 0   ;;  %s10309_s24 = smov 0  }
   0x6 LB: > { %s10324_s25 = sadd.s32 4294967295, %s10232_s24   ;;  %s8651_s26 = sadd.s32 4294967294, %s10232_s24   ;;  %s10232_s24 = sphi %s10309_s24, %s15544_s24   ;;  %s10228_s23 = sphi %s10307_s23, %s15543_s23   ;;  %s10224_s22 = sphi %s10305_s22, %s15542_s22   ;;  %s10220_s21 = sphi %s10303_s21, %s15541_s21  }
   0x7   : > { %s10328_s27 = sadd.s32 1, %s10232_s24   ;;  %s289_s28 = sadd.s32 1, %s10228_s23 }
   0x8   : > { %s286_s29 = ssub.s32 %s10232_s24, %s10328_s27  ;;  %p299_p0 = scmp.ne.s32.totalorder %s10228_s23, %s10224_s22 }
   0x9   : > { %p287_p1 = scmp.eq.s32.totalorder %s286_s29, 0  ;;  %p300_p2 = scmp.eq.s32.totalorder %s10324_s25, 1 }
   0xa   : > { %p305_p3 = scmp.ne.s32.totalorder %s10224_s22, %s10220_s21  ;;  %p306_p4 = scmp.eq.s32.totalorder %s8651_s26, 1 }
   0xb   : > { %s10339_s30 = scalar_select %p287_p1, %s10228_s23, %s289_s28  }
   0xc   : > { %p10341_p5 = por %p300_p2, %p299_p0  ;;  %p10345_p6 = por %p306_p4, %p305_p3 }
   0xd   : > { %p8654_p7 = scmp.ge.s32.totalorder %s10232_s24, 1  ;;  %p365_p8 = scmp.lt.s32.totalorder %s10232_s24, 3 }
   0xf   : > { %p366_p9 = pnand %p8654_p7, %p365_p8 }
  0x11   : > { %369 = sbr.rel (%p366_p9) target bundleno = 2229 (0x8b5), region = 68 }
  0x16   : > { %p406_p10 = scmp.lt.s32.totalorder %s10324_s25, 1  ;;  %v10234_v0 = vmov 0   ;;  %s14993_s0 = sld [smem:[#allocation93_spill]]  ;;  %v635_v42 = vlaneseq  ;;  %vm787_vm0 = vcmask 1046528   ;;  %vm1007_vm1 = vcmask 1045504  }
  0x17   : > { %10052 = vset.pattern.permute.xlu1 %v10234_v0  ;;  %10051 = vset.pattern.permute.xlu0 %v10234_v0  ;;  %s14994_s1 = sld [smem:[#allocation94_spill]]  ;;  %vm1463_vm2 = vcmask 1044480   ;;  %vm1687_vm3 = vcmask 1043456   ;;  %vm2144_vm4 = vcmask 1042432   ;;  %vm2368_vm5 = vcmask 1041408   ;;  %s10237_s17 = smov [#allocation2]  }
  0x18   : > { %s407_s15 = scalar_select %p406_p10, %s10324_s25, 1  ;;  %v636_v43 = vshrl.u32 %v635_v42, 7  ;;  %vm10236_vm6 = vmmov 0   ;;  %vm2782_vm7 = vcmask 244736   ;;  %vm3133_vm8 = vcmask 130048  }
  0x19   : > { %vm3079_vm9 = vsmask.f32 7424  ;;  %vm3467_vm10 = vsmask.f32 6400  ;;  %vm3878_vm11 = vsmask.f32 5376 }
  0x1a   : > { %s10008_s16 = smul.u32 328, %s407_s15  ;;  %v713_v44 = vsub.s32 1, %v636_v43  ;;  %v933_v45 = vsub.s32 2, %v636_v43  ;;  %v1163_v47 = vsub.s32 3, %v636_v43  ;;  %v637_v48 = vsub.s32 0, %v636_v43 }
  0x1b   : > { %v1387_v51 = vsub.s32 4, %v636_v43  ;;  %v1611_v52 = vsub.s32 5, %v636_v43  ;;  %v1845_v53 = vsub.s32 6, %v636_v43  ;;  %v2068_v54 = vsub.s32 7, %v636_v43 }
  0x1c   : > { %s10356_s19 = scalar_lea.vmem %s14993_s0, %s10008_s16  ;;  %vm4186_vm12 = vsmask.f32 4352  ;;  %vm6355_vm13 = vcmask 752640   ;;  %vm6565_vm14 = vcmask 261120   ;;  %vm8422_vm15 = vcmask 228352   ;;  %s404_s16 = sand.u32 1, %s10224_s22  }
  0x1d   : > { %v444_v1 = vld [vmem:[%s10356_s19 + $0x100] sm:$0xff]  ;;  %v442_v2 = vld [vmem:[%s10356_s19 + $0xf0] sm:$0xff]  ;;  %v443_v3 = vld [vmem:[%s10356_s19 + $0xf8] sm:$0xff]  ;;  %s405_s20 = scalar_lea.vmem [#allocation2], %s404_s16  ;;  %s8584_s15 = scalar_lea.sflag [#allocation3], %s404_s16 }
  0x1e   : > { %617 = vperm.xlu1 %10052, %v444_v1   ;;  %607 = vperm.xlu0 %10051, %v442_v2   ;;  %v426_v4 = vld [vmem:[%s10356_s19 + $0x70] sm:$0xff]  ;;  %v427_v5 = vld [vmem:[%s10356_s19 + $0x78] sm:$0xff]  ;;  %v428_v6 = vld [vmem:[%s10356_s19 + $0x80] sm:$0xff]  ;;  %s8596_s26 = sshll.u32 %s405_s20, 4  ;;  %s8597_s26 = int_to_ptr.vmem [resolvable:$true] %s8596_s26 }
  0x1f   : > { %v440_v7 = vld [vmem:[%s10356_s19 + $0xe0] sm:$0xff]  ;;  %v441_v8 = vld [vmem:[%s10356_s19 + $0xe8] sm:$0xff]  ;;  %v446_v10 = vld [vmem:[%s10356_s19 + $0x110] sm:$0xff] }
  0x20   : > { %v445_v9 = vld [vmem:[%s10356_s19 + $0x108] sm:$0xff]  ;;  %v424_v12 = vld [vmem:[%s10356_s19 + $0x60] sm:$0xff]  ;;  %v430_v13 = vld [vmem:[%s10356_s19 + $0x90] sm:$0xff] }
  0x21   : > { %v425_v11 = vld [vmem:[%s10356_s19 + $0x68] sm:$0xff]  ;;  %v439_v15 = vld [vmem:[%s10356_s19 + $0xd8] sm:$0xff]  ;;  %v438_v16 = vld [vmem:[%s10356_s19 + $0xd0] sm:$0xff] }
  0x22   : > { %612 = vperm.xlu0 %10051, %v443_v3   ;;  %527 = vperm.xlu1 %10052, %v426_v4   ;;  %v429_v14 = vld [vmem:[%s10356_s19 + $0x88] sm:$0xff]  ;;  %v423_v17 = vld [vmem:[%s10356_s19 + $0x58] sm:$0xff]  ;;  %v422_v18 = vld [vmem:[%s10356_s19 + $0x50] sm:$0xff] }
  0x23   : > { %v448_v19 = vld [vmem:[%s10356_s19 + $0x120] sm:$0xff]  ;;  %v447_v20 = vld [vmem:[%s10356_s19 + $0x118] sm:$0xff]  ;;  %v437_v23 = vld [vmem:[%s10356_s19 + $0xc8] sm:$0xff] }
  0x24   : > { %v432_v21 = vld [vmem:[%s10356_s19 + $0xa0] sm:$0xff]  ;;  %v431_v22 = vld [vmem:[%s10356_s19 + $0x98] sm:$0xff]  ;;  %v421_v25 = vld [vmem:[%s10356_s19 + $0x48] sm:$0xff] }
  0x25   : > { %v436_v24 = vld [vmem:[%s10356_s19 + $0xc0] sm:$0xff]  ;;  %v435_v27 = vld [vmem:[%s10356_s19 + $0xb8] sm:$0xff]  ;;  %v434_v28 = vld [vmem:[%s10356_s19 + $0xb0] sm:$0xff] }
  0x26   : > { %532 = vperm.xlu0 %10051, %v427_v5   ;;  %537 = vperm.xlu1 %10052, %v428_v6   ;;  %v420_v26 = vld [vmem:[%s10356_s19 + $0x40] sm:$0xff]  ;;  %v419_v29 = vld [vmem:[%s10356_s19 + $0x38] sm:$0xff]  ;;  %v418_v30 = vld [vmem:[%s10356_s19 + $0x30] sm:$0xff] }
  0x27   : > { %v433_v31 = vld [vmem:[%s10356_s19 + $0xa8] sm:$0xff]  ;;  %v416_v32 = vld [vmem:[%s10356_s19 + $0x20] sm:$0xff]  ;;  %v414_v34 = vld [vmem:[%s10356_s19 + $0x10] sm:$0xff] }
  0x28   : > { %v417_v33 = vld [vmem:[%s10356_s19 + $0x28] sm:$0xff]  ;;  %v415_v35 = vld [vmem:[%s10356_s19 + $0x18] sm:$0xff]  ;;  %v412_v36 = vld [vmem:[%s10356_s19] sm:$0xff] }
  0x29   : > { %v413_v37 = vld [vmem:[%s10356_s19 + $0x8] sm:$0xff]  ;;  %v450_v39 = vld [vmem:[%s10356_s19 + $0x130] sm:$0xff]  ;;  %v451_v40 = vld [vmem:[%s10356_s19 + $0x138] sm:$0xff] }
  0x2a   : > { %597 = vperm.xlu0 %10051, %v440_v7   ;;  %602 = vperm.xlu1 %10052, %v441_v8   ;;  %v449_v38 = vld [vmem:[%s10356_s19 + $0x128] sm:$0xff]  ;;  %v452_v41 = vld [vmem:[%s10356_s19 + $0x140] sm:$0xf]  ;;  %s8982_s19 = sshll.u32 %s10324_s25, 4  ;;  %s10176_s25 = sshll.u32 %s10237_s17, 4  ;;  %s10177_s25 = int_to_ptr.vmem [resolvable:$false] %s10176_s25 }
  0x2b   : > { %v453_v46 = vld [vmem:[%s14994_s1] sm:$0xff]  ;;  %s14656_s29 = scalar_lea.hbm %s14703_s12, %s8982_s19  ;;  %s10178_s18 = scalar_lea.vmem %s10177_s25, 32 }
  0x2c   : > { %v10402_v49 = vrot.slane %v453_v46, %v713_v44  ;;  %v10404_v50 = vrot.slane %v453_v46, %v933_v45  ;;  %v10410_v57 = vrot.slane %v453_v46, %v1163_v47  ;;  %v10412_v58 = vrot.slane %v453_v46, %v637_v48  ;;  %p10179_p0 = scmp.lt.s32.totalorder %s8597_s26, %s10177_s25 }
  0x2d   : > { %v10414_v59 = vrot.slane %v453_v46, %v1387_v51  ;;  %v10428_v63 = vrot.slane %v453_v46, %v1611_v52  ;;  %v10430_v0 = vrot.slane %v453_v46, %v1845_v53  ;;  %v10436_v2 = vrot.slane %v453_v46, %v2068_v54 }
  0x2e   : > { %622 = vperm.xlu0 %10051, %v445_v9   ;;  %627 = vperm.xlu1 %10052, %v446_v10   ;;  %14997 = vst [vmem:[#allocation7_spill] sm:$0xff] %v10410_v57 }
  0x2f   : > { %14998 = vst [vmem:[#allocation8_spill] sm:$0xff] %v10414_v59 }
  0x32   : > { %522 = vperm.xlu1 %10052, %v425_v11   ;;  %517 = vperm.xlu0 %10051, %v424_v12  }
  0x36   : > { %547 = vperm.xlu1 %10052, %v430_v13   ;;  %542 = vperm.xlu0 %10051, %v429_v14  }
  0x3a   : > { %592 = vperm.xlu1 %10052, %v439_v15   ;;  %587 = vperm.xlu0 %10051, %v438_v16  }
  0x3e   : > { %512 = vperm.xlu1 %10052, %v423_v17   ;;  %507 = vperm.xlu0 %10051, %v422_v18  }
  0x42   : > { %1153 = vperm.xlu1 %10052, %v448_v19   ;;  %632 = vperm.xlu0 %10051, %v447_v20  }
  0x46   : > { %557 = vperm.xlu1 %10052, %v432_v21   ;;  %552 = vperm.xlu0 %10051, %v431_v22  }
  0x4a   : > { %582 = vperm.xlu1 %10052, %v437_v23   ;;  %577 = vperm.xlu0 %10051, %v436_v24  }
  0x4e   : > { %502 = vperm.xlu1 %10052, %v421_v25   ;;  %497 = vperm.xlu0 %10051, %v420_v26  }
  0x52   : > { %572 = vperm.xlu1 %10052, %v435_v27   ;;  %567 = vperm.xlu0 %10051, %v434_v28  }
  0x56   : > { %492 = vperm.xlu1 %10052, %v419_v29   ;;  %487 = vperm.xlu0 %10051, %v418_v30  }
  0x5a   : > { %562 = vperm.xlu0 %10051, %v433_v31   ;;  %477 = vperm.xlu1 %10052, %v416_v32  }
  0x5e   : > { %482 = vperm.xlu0 %10051, %v417_v33   ;;  %467 = vperm.xlu1 %10052, %v414_v34  }
  0x62   : > { %472 = vperm.xlu0 %10051, %v415_v35   ;;  %457 = vperm.xlu1 %10052, %v412_v36  }
  0x66   : > { %462 = vperm.xlu0 %10051, %v413_v37   ;;  %1158 = vperm.xlu1 %10052, %v449_v38  }
  0x6a   : > { %1382 = vperm.xlu0 %10051, %v450_v39   ;;  %1835 = vperm.xlu1 %10052, %v451_v40  }
  0x6e   : > { %1840 = vperm.xlu0 %10051, %v452_v41  }
  0x99   : > { %v10406_v55 = vpop.permute.xlu1 %617  ;;  %v10408_v56 = vpop.permute.xlu0 %607 }
  0x9a   : > { %14995 = vst [vmem:[#allocation5_spill] sm:$0xff] %v10406_v55  ;;  %14996 = vst [vmem:[#allocation6_spill] sm:$0xff] %v10408_v56  ;;  %v10418_v60 = vmul.f32 %v10402_v49, %v10408_v56  ;;  %v10422_v61 = vmul.f32 %v10402_v49, %v10406_v55  ;;  %v10426_v62 = vmul.f32 %v10404_v50, %v10408_v56 }
  0x9b   : > { %v10434_v1 = vmul.f32 %v10404_v50, %v10406_v55  ;;  %v10440_v3 = vmul.f32 %v10410_v57, %v10406_v55  ;;  %v10444_v4 = vmul.f32 %v10414_v59, %v10406_v55  ;;  %v669_v7 = vmul.f32 %v10412_v58, %v10408_v56 }
  0x9c   : > { %14999 = vst [vmem:[#allocation9_spill] sm:$0xff] %v10422_v61  ;;  %v14709_v8 = vrot.slane %v10418_v60, 1  ;;  %v10455_v9 = vmul.f32 %v10428_v63, %v10406_v55  ;;  %v14705_v11 = vrot.slane %v10422_v61, 1  ;;  %v14708_v13 = vrot.slane %v10426_v62, 2 }
  0x9d   : > { %15000 = vst [vmem:[#allocation10_spill] sm:$0xff] %v10434_v1  ;;  %v10446_v5 = vpop.permute.xlu0 %612  ;;  %v10448_v6 = vpop.permute.xlu1 %527  ;;  %v14704_v15 = vrot.slane %v10434_v1, 2  ;;  %v10474_v17 = vmul.f32 %v10410_v57, %v10408_v56  ;;  %v10508_v35 = vmul.f32 %v10414_v59, %v10408_v56  ;;  %v10539_v51 = vmul.f32 %v10428_v63, %v10408_v56 }
  0x9e   : > { %15001 = vst [vmem:[#allocation11_spill] sm:$0xff] %v10448_v6  ;;  %v746_v10 = vmul.f32 %v10402_v49, %v10446_v5  ;;  %v966_v12 = vmul.f32 %v10404_v50, %v10446_v5  ;;  %v10465_v14 = vmul.f32 %v10402_v49, %v10448_v6  ;;  %v10470_v16 = vmul.f32 %v10404_v50, %v10448_v6 }
  0x9f   : > { %v10480_v21 = vmul.f32 %v10410_v57, %v10446_v5  ;;  %v670_v24 = vmul.f32 %v10412_v58, %v10446_v5  ;;  %v653_v27 = vmul.f32 %v10412_v58, %v10448_v6  ;;  %v10524_v45 = vmul.f32 %v10414_v59, %v10446_v5 }
  0xa0   : > { %15002 = vst [vmem:[#allocation12_spill] sm:$0xff] %v10465_v14  ;;  %15003 = vst [vmem:[#allocation13_spill] sm:$0xff] %v10470_v16  ;;  %v849_v18 = vrot.slane %v746_v10, 1  ;;  %v1069_v25 = vrot.slane %v966_v12, 2  ;;  %v14706_v32 = vrot.slane %v10465_v14, 1  ;;  %v14711_v33 = vrot.slane %v10470_v16, 2 }
  0xa1   : > { %v10482_v22 = vpop.permute.xlu0 %532  ;;  %v10484_v23 = vpop.permute.xlu1 %537 }
  0xa2   : > { %15004 = vst [vmem:[#allocation14_spill] sm:$0xff] %v10482_v22  ;;  %15005 = vst [vmem:[#allocation15_spill] sm:$0xff] %v10484_v23  ;;  %v730_v28 = vmul.f32 %v10402_v49, %v10482_v22  ;;  %v10495_v29 = vmul.f32 %v10402_v49, %v10484_v23  ;;  %v850_v30 = vsel %vm787_vm0, %v14709_v8, %v849_v18 }
  0xa3   : > { %v852_v31 = vsel %vm787_vm0, %v849_v18, %v14705_v11  ;;  %v925_v37 = vadd.f32 %v850_v30, %v669_v7  ;;  %v950_v43 = vmul.f32 %v10404_v50, %v10482_v22  ;;  %v10520_v44 = vmul.f32 %v10404_v50, %v10484_v23 }
  0xa4   : > { %15006 = vst [vmem:[#allocation16_spill] sm:$0xff] %v10495_v29  ;;  %v817_v36 = vrot.slane %v730_v28, 1  ;;  %v926_v38 = vadd.f32 %v852_v31, %v670_v24  ;;  %v14707_v40 = vrot.slane %v10495_v29, 1  ;;  %v1070_v48 = vsel %vm1007_vm1, %v14708_v13, %v1069_v25 }
  0xa5   : > { %v10512_v41 = vpop.permute.xlu0 %597  ;;  %v10514_v42 = vpop.permute.xlu1 %602  ;;  %15007 = vst [vmem:[#allocation17_spill] sm:$0xff] %v10520_v44  ;;  %v1072_v54 = vsel %vm1007_vm1, %v1069_v25, %v14704_v15  ;;  %v654_v7 = vmul.f32 %v10412_v58, %v10482_v22  ;;  %v1145_v10 = vadd.f32 %v1070_v48, %v925_v37  ;;  %v10559_v24 = vmul.f32 %v10410_v57, %v10484_v23 }
  0xa6   : > { %v10528_v46 = vmul.f32 %v10402_v49, %v10512_v41  ;;  %v10532_v47 = vmul.f32 %v10404_v50, %v10512_v41  ;;  %v10543_v52 = vmul.f32 %v10402_v49, %v10514_v42  ;;  %v10547_v53 = vmul.f32 %v10404_v50, %v10514_v42 }
  0xa7   : > { %v1146_v12 = vadd.f32 %v1072_v54, %v926_v38  ;;  %v818_v18 = vsel %vm787_vm0, %v14706_v32, %v817_v36  ;;  %15008 = vst [vmem:[#allocation18_spill] sm:$0xff] %v10559_v24  ;;  %v820_v25 = vsel %vm787_vm0, %v817_v36, %v14707_v40  ;;  %v1037_v37 = vrot.slane %v950_v43, 2 }
  0xa8   : > { %v14712_v38 = vrot.slane %v10520_v44, 2  ;;  %v909_v26 = vadd.f32 %v818_v18, %v653_v27  ;;  %v10601_v20 = vadd.f32 %v820_v25, %v654_v7  ;;  %v15020_v7 = vrot.slane %v10440_v3, 2 }
  0xa9   : > { %v10562_v30 = vpop.permute.xlu0 %622  ;;  %v10564_v31 = vpop.permute.xlu1 %627  ;;  %v1038_v19 = vsel %vm1007_vm1, %v14711_v33, %v1037_v37 }
  0xaa   : > { %15009 = vst [vmem:[#allocation19_spill] sm:$0xff] %v10562_v30  ;;  %15010 = vst [vmem:[#allocation20_spill] sm:$0xff] %v10564_v31  ;;  %v10573_v54 = vmul.f32 %v10402_v49, %v10562_v30  ;;  %v1196_v15 = vmul.f32 %v10410_v57, %v10562_v30  ;;  %v10579_v11 = vmul.f32 %v10410_v57, %v10564_v31 }
  0xab   : > { %v1420_v43 = vmul.f32 %v10414_v59, %v10562_v30  ;;  %v10587_v40 = vmul.f32 %v10414_v59, %v10564_v31  ;;  %v1644_v13 = vmul.f32 %v10428_v63, %v10562_v30  ;;  %v10594_v48 = vmul.f32 %v10428_v63, %v10564_v31 }
  0xac   : > { %15011 = vst [vmem:[#allocation21_spill] sm:$0xff] %v10573_v54  ;;  %15012 = vst [vmem:[#allocation22_spill] sm:$0xff] %v10579_v11  ;;  %v1298_v34 = vrot.slane %v1196_v15, 2  ;;  %v10606_v39 = vmul.f32 %v10404_v50, %v10562_v30  ;;  %v1040_v1 = vsel %vm1007_vm1, %v1037_v37, %v14712_v38  ;;  %v15021_v25 = vrot.slane %v10579_v11, 2 }
  0xad   : > { %15013 = vst [vmem:[#allocation23_spill] sm:$0xff] %v10587_v40  ;;  %15014 = vst [vmem:[#allocation24_spill] sm:$0xff] %v10594_v48  ;;  %v10596_v8 = vpop.permute.xlu1 %522  ;;  %v10598_v36 = vpop.permute.xlu0 %517  ;;  %v1525_v28 = vrot.slane %v1420_v43, 3  ;;  %v1749_v38 = vrot.slane %v1644_v13, 4  ;;  %v15026_v11 = vrot.slane %v10444_v4, 3  ;;  %v10673_v56 = vmul.f32 %v10436_v2, %v10564_v31 }
  0xae   : > { %15015 = vst [vmem:[#allocation25_spill] sm:$0xff] %v10596_v8  ;;  %15016 = vst [vmem:[#allocation26_spill] sm:$0xff] %v10598_v36  ;;  %v10616_v43 = vmul.f32 %v10402_v49, %v10596_v8  ;;  %v10620_v27 = vmul.f32 %v10404_v50, %v10596_v8  ;;  %v1299_v18 = vsel %vm1007_vm1, %v15020_v7, %v1298_v34 }
  0xaf   : > { %15017 = vst [vmem:[#allocation27_spill] sm:$0xff] %v10606_v39  ;;  %v1301_v15 = vsel %vm1007_vm1, %v1298_v34, %v15021_v25  ;;  %v10630_v33 = vmul.f32 %v10402_v49, %v10598_v36  ;;  %v10634_v37 = vmul.f32 %v10404_v50, %v10598_v36  ;;  %v1374_v7 = vadd.f32 %v1299_v18, %v1145_v10 }
  0xb0   : > { %15018 = vst [vmem:[#allocation28_spill] sm:$0xff] %v10616_v43  ;;  %15019 = vst [vmem:[#allocation29_spill] sm:$0xff] %v10620_v27  ;;  %v1375_v54 = vadd.f32 %v1301_v15, %v1146_v12  ;;  %v1526_v34 = vsel %vm1463_vm2, %v15026_v11, %v1525_v28  ;;  %v15027_v25 = vrot.slane %v10587_v40, 3  ;;  %v10669_v40 = vmul.f32 %v10430_v0, %v10564_v31 }
  0xb1   : > { %15022 = vst [vmem:[#allocation30_spill] sm:$0xff] %v10630_v33  ;;  %15023 = vst [vmem:[#allocation31_spill] sm:$0xff] %v10634_v37  ;;  %v10637_v39 = vpop.permute.xlu1 %547  ;;  %v10639_v61 = vpop.permute.xlu0 %542  ;;  %v1603_v15 = vadd.f32 %v1526_v34, %v1374_v7  ;;  %v15035_v34 = vrot.slane %v10594_v48, 4  ;;  %v1129_v48 = vadd.f32 %v1038_v19, %v909_v26  ;;  %v15047_v37 = vrot.slane %v10559_v24, 2 }
  0xb2   : > { %15024 = vst [vmem:[#allocation32_spill] sm:$0xff] %v10637_v39  ;;  %15025 = vst [vmem:[#allocation33_spill] sm:$0xff] %v10639_v61  ;;  %v1528_v44 = vsel %vm1463_vm2, %v1525_v28, %v15027_v25  ;;  %v10649_v29 = vmul.f32 %v10402_v49, %v10637_v39  ;;  %v10653_v13 = vmul.f32 %v10404_v50, %v10637_v39 }
  0xb3   : > { %v10657_v10 = vmul.f32 %v10402_v49, %v10639_v61  ;;  %v10661_v12 = vmul.f32 %v10404_v50, %v10639_v61  ;;  %v1604_v18 = vadd.f32 %v1528_v44, %v1375_v54  ;;  %v15034_v44 = vrot.slane %v10455_v9, 4 }
  0xb4   : > { %15028 = vst [vmem:[#allocation34_spill] sm:$0xff] %v10649_v29  ;;  %15029 = vst [vmem:[#allocation35_spill] sm:$0xff] %v10653_v13  ;;  %v1752_v32 = vsel %vm1687_vm3, %v1749_v38, %v15035_v34 }
  0xb5   : > { %15030 = vst [vmem:[#allocation36_spill] sm:$0xff] %v10657_v10  ;;  %15031 = vst [vmem:[#allocation37_spill] sm:$0xff] %v10661_v12  ;;  %v10677_v6 = vpop.permute.xlu1 %592  ;;  %v10679_v7 = vpop.permute.xlu0 %587  ;;  %v1750_v54 = vsel %vm1687_vm3, %v15034_v44, %v1749_v38  ;;  %v10691_v22 = vadd.f32 %v1752_v32, %v1604_v18  ;;  %v10708_v38 = vld [vmem:[%s14994_s1 + $0x8] ss:$0 sm:$0xff]  ;;  %v1180_v32 = vmul.f32 %v10410_v57, %v10639_v61 }
  0xb6   : > { %15032 = vst [vmem:[#allocation38_spill] sm:$0xff] %v10677_v6  ;;  %15033 = vst [vmem:[#allocation39_spill] sm:$0xff] %v10679_v7  ;;  %v10689_v16 = vadd.f32 %v1750_v54, %v1603_v15  ;;  %v10695_v11 = vmul.f32 %v10402_v49, %v10677_v6  ;;  %v10699_v13 = vmul.f32 %v10404_v50, %v10677_v6 }
  0xb7   : > { %v10703_v44 = vmul.f32 %v10402_v49, %v10679_v7  ;;  %v10714_v15 = vmul.f32 %v10404_v50, %v10679_v7  ;;  %v10720_v34 = vmul.f32 %v10708_v38, %v10564_v31  ;;  %v10728_v12 = vmul.f32 %v10410_v57, %v10637_v39 }
  0xb8   : > { %15036 = vst [vmem:[#allocation40_spill] sm:$0xff] %v10695_v11  ;;  %15037 = vst [vmem:[#allocation41_spill] sm:$0xff] %v10699_v13  ;;  %v1266_v29 = vrot.slane %v1180_v32, 2  ;;  %v10751_v6 = vadd.f32 %v1040_v1, %v10601_v20  ;;  %v10765_v1 = vmul.f32 %v10414_v59, %v10484_v23  ;;  %v10769_v20 = vmul.f32 %v10414_v59, %v10639_v61 }
  0xb9   : > { %15038 = vst [vmem:[#allocation42_spill] sm:$0xff] %v10703_v44  ;;  %15039 = vst [vmem:[#allocation43_spill] sm:$0xff] %v10714_v15  ;;  %v10722_v25 = vpop.permute.xlu1 %512  ;;  %v10724_v28 = vpop.permute.xlu0 %507 }
  0xba   : > { %15040 = vst [vmem:[#allocation44_spill] sm:$0xff] %v10722_v25  ;;  %15041 = vst [vmem:[#allocation45_spill] sm:$0xff] %v10724_v28  ;;  %v10733_v18 = vmul.f32 %v10402_v49, %v10722_v25  ;;  %v10737_v54 = vmul.f32 %v10404_v50, %v10722_v25  ;;  %v10741_v31 = vmul.f32 %v10402_v49, %v10724_v28 }
  0xbb   : > { %15042 = vst [vmem:[#allocation46_spill] sm:$0xff] %v10728_v12  ;;  %v10745_v19 = vmul.f32 %v10404_v50, %v10724_v28  ;;  %v1267_v27 = vsel %vm1007_vm1, %v15047_v37, %v1266_v29 }
  0xbc   : > { %15043 = vst [vmem:[#allocation47_spill] sm:$0xff] %v10733_v18  ;;  %15044 = vst [vmem:[#allocation48_spill] sm:$0xff] %v10737_v54  ;;  %v15054_v54 = vrot.slane %v10728_v12, 2  ;;  %v10796_v18 = vadd.f32 %v1267_v27, %v1129_v48 }
  0xbd   : > { %15045 = vst [vmem:[#allocation49_spill] sm:$0xff] %v10741_v31  ;;  %15046 = vst [vmem:[#allocation50_spill] sm:$0xff] %v10745_v19  ;;  %v1154_v32 = vpop.permute.xlu1 %1153  ;;  %v10761_v13 = vpop.permute.xlu0 %632  ;;  %v10809_v19 = vmul.f32 %v10414_v59, %v10637_v39 }
  0xbe   : > { %15048 = vst [vmem:[#allocation51_spill] sm:$0xff] %v10761_v13  ;;  %v10774_v14 = vmul.f32 %v10410_v57, %v1154_v32  ;;  %v10777_v26 = vmul.f32 %v10430_v0, %v1154_v32  ;;  %v10780_v10 = vmul.f32 %v10414_v59, %v1154_v32  ;;  %v10783_v7 = vmul.f32 %v10436_v2, %v1154_v32 }
  0xbf   : > { %v1878_v28 = vmul.f32 %v10430_v0, %v10761_v13  ;;  %v2101_v37 = vmul.f32 %v10436_v2, %v10761_v13  ;;  %v10790_v25 = vmul.f32 %v10428_v63, %v1154_v32  ;;  %v1269_v31 = vsel %vm1007_vm1, %v1266_v29, %v15054_v54  ;;  %15058 = vst [vmem:[#allocation60_spill] sm:$0xff] %v10809_v19 }
  0xc0   : > { %15049 = vst [vmem:[#allocation52_spill] sm:$0xff] %v10774_v14  ;;  %15050 = vst [vmem:[#allocation53_spill] sm:$0xff] %v10777_v26  ;;  %v2325_v24 = vmul.f32 %v10708_v38, %v10761_v13  ;;  %v10805_v57 = vmul.f32 %v10708_v38, %v1154_v32  ;;  %v15060_v32 = vrot.slane %v10669_v40, 4  ;;  %v15061_v59 = vrot.slane %v10777_v26, 4 }
  0xc1   : > { %15051 = vst [vmem:[#allocation54_spill] sm:$0xff] %v10780_v10  ;;  %15052 = vst [vmem:[#allocation55_spill] sm:$0xff] %v10783_v7  ;;  %v10798_v15 = vpop.permute.xlu1 %557  ;;  %v10800_v44 = vpop.permute.xlu0 %552  ;;  %v1982_v11 = vrot.slane %v1878_v28, 4  ;;  %v2206_v48 = vrot.slane %v2101_v37, 5  ;;  %v15068_v10 = vrot.slane %v10673_v56, 5  ;;  %v15069_v8 = vrot.slane %v10783_v7, 5 }
  0xc2   : > { %15053 = vst [vmem:[#allocation56_spill] sm:$0xff] %v10790_v25  ;;  %15055 = vst [vmem:[#allocation57_spill] sm:$0xff] %v10798_v15  ;;  %v10813_v29 = vmul.f32 %v10402_v49, %v10798_v15  ;;  %v10828_v37 = vmul.f32 %v10404_v50, %v10798_v15  ;;  %v10832_v54 = vmul.f32 %v10402_v49, %v10800_v44  ;;  %v2430_v43 = vrot.slane %v2325_v24, 6 }
  0xc3   : > { %15056 = vst [vmem:[#allocation58_spill] sm:$0xff] %v10800_v44  ;;  %15057 = vst [vmem:[#allocation59_spill] sm:$0xff] %v10805_v57  ;;  %v1983_v13 = vsel %vm1687_vm3, %v15060_v32, %v1982_v11  ;;  %v1985_v33 = vsel %vm1687_vm3, %v1982_v11, %v15061_v59  ;;  %v10836_v12 = vmul.f32 %v10404_v50, %v10800_v44  ;;  %v14795_v27 = vrot.slane %v10805_v57, 6 }
  0xc4   : > { %15059 = vst [vmem:[#allocation61_spill] sm:$0xff] %v10813_v29  ;;  %15062 = vst [vmem:[#allocation62_spill] sm:$0xff] %v10828_v37  ;;  %v2060_v59 = vadd.f32 %v1983_v13, %v10689_v16  ;;  %v2061_v11 = vadd.f32 %v1985_v33, %v10691_v22  ;;  %v2207_v14 = vsel %vm2144_vm4, %v15068_v10, %v2206_v48  ;;  %v15073_v10 = vrot.slane %v10720_v34, 6 }
  0xc5   : > { %15063 = vst [vmem:[#allocation63_spill] sm:$0xff] %v10832_v54  ;;  %15064 = vst [vmem:[#allocation64_spill] sm:$0xff] %v10836_v12  ;;  %v10838_v28 = vpop.permute.xlu1 %582  ;;  %v10840_v32 = vpop.permute.xlu0 %577  ;;  %v2209_v36 = vsel %vm2144_vm4, %v2206_v48, %v15069_v8  ;;  %v2433_v48 = vsel %vm2368_vm5, %v2430_v43, %v14795_v27  ;;  %v10894_v27 = vld [vmem:[%s14693_s2] ss:$0 sm:$0xff] }
  0xc6   : > { %15065 = vst [vmem:[#allocation65_spill] sm:$0xff] %v10838_v28  ;;  %15066 = vst [vmem:[#allocation66_spill] sm:$0xff] %v10840_v32  ;;  %v10848_v25 = vmul.f32 %v10402_v49, %v10838_v28  ;;  %v10858_v16 = vmul.f32 %v10404_v50, %v10838_v28  ;;  %v10862_v22 = vmul.f32 %v10402_v49, %v10840_v32 }
  0xc7   : > { %v2284_v33 = vadd.f32 %v2207_v14, %v2060_v59  ;;  %v2285_v24 = vadd.f32 %v2209_v36, %v2061_v11  ;;  %v10867_v26 = vmul.f32 %v10404_v50, %v10840_v32  ;;  %v2431_v8 = vsel %vm2368_vm5, %v15073_v10, %v2430_v43 }
  0xc8   : > { %15067 = vst [vmem:[#allocation67_spill] sm:$0xff] %v10848_v25  ;;  %15070 = vst [vmem:[#allocation68_spill] sm:$0xff] %v10858_v16  ;;  %v1493_v11 = vrot.slane %v10769_v20, 3 }
  0xc9   : > { %15071 = vst [vmem:[#allocation69_spill] sm:$0xff] %v10862_v22  ;;  %15072 = vst [vmem:[#allocation70_spill] sm:$0xff] %v10867_v26  ;;  %v10876_v29 = vpop.permute.xlu1 %502  ;;  %v10878_v14 = vpop.permute.xlu0 %497  ;;  %v2508_v36 = vadd.f32 %v2431_v8, %v2284_v33  ;;  %v2509_v59 = vadd.f32 %v2433_v48, %v2285_v24  ;;  %v15082_v48 = vrot.slane %v10765_v1, 3  ;;  %v15097_v26 = vrot.slane %v10418_v60, 1 }
  0xca   : > { %15074 = vst [vmem:[#allocation71_spill] sm:$0xff] %v10876_v29  ;;  %15075 = vst [vmem:[#allocation72_spill] sm:$0xff] %v10878_v14  ;;  %v10885_v10 = vmul.f32 %v10402_v49, %v10876_v29  ;;  %v10889_v43 = vmul.f32 %v10404_v50, %v10876_v29  ;;  %v10903_v13 = vmul.f32 %v10402_v49, %v10878_v14  ;;  %v15101_v60 = vrot.slane %v10426_v62, 2 }
  0xcb   : > { %v2551_v24 = vadd.f32 %v10894_v27, %v2508_v36  ;;  %v2552_v8 = vadd.f32 %v10894_v27, %v2509_v59  ;;  %v10907_v7 = vmul.f32 %v10404_v50, %v10878_v14  ;;  %v1359_v59 = vadd.f32 %v1269_v31, %v10751_v6 }
  0xcc   : > { %15076 = vst [vmem:[#allocation73_spill] sm:$0xff] %v10885_v10  ;;  %15077 = vst [vmem:[#allocation74_spill] sm:$0xff] %v10889_v43  ;;  %v1494_v12 = vsel %vm1463_vm2, %v15082_v48, %v1493_v11  ;;  %v10934_v31 = vmul.f32 %v10428_v63, %v10484_v23  ;;  %v10952_v10 = vmul.f32 %v10428_v63, %v10637_v39 }
  0xcd   : > { %15078 = vst [vmem:[#allocation75_spill] sm:$0xff] %v10903_v13  ;;  %15079 = vst [vmem:[#allocation76_spill] sm:$0xff] %v10907_v7  ;;  %v10910_v57 = vpop.permute.xlu1 %572  ;;  %v10912_v33 = vpop.permute.xlu0 %567  ;;  %v2587_v20 = vmax.f32 %v2551_v24, 0.0  ;;  %v2588_v36 = vmax.f32 %v2552_v8, 0.0  ;;  %v1628_v8 = vmul.f32 %v10428_v63, %v10639_v61  ;;  %v10956_v29 = vmul.f32 %v10430_v0, %v10637_v39 }
  0xce   : > { %15080 = vst [vmem:[#allocation77_spill] sm:$0xff] %v10910_v57  ;;  %15081 = vst [vmem:[#allocation78_spill] sm:$0xff] %v10912_v33  ;;  %v10922_v14 = vmul.f32 %v10402_v49, %v10910_v57  ;;  %v10926_v37 = vmul.f32 %v10404_v50, %v10910_v57  ;;  %v10930_v24 = vmul.f32 %v10402_v49, %v10912_v33  ;;  %v15087_v57 = vrot.slane %v10809_v19, 3 }
  0xcf   : > { %v2644_v6 = vpack.c.bf16 %v2588_v36, %v2587_v20  ;;  %v10942_v54 = vmul.f32 %v10404_v50, %v10912_v33  ;;  %v1587_v36 = vadd.f32 %v1494_v12, %v10796_v18  ;;  %15089 = vst [vmem:[#allocation84_spill] sm:$0xff] %v10952_v10  ;;  %v1717_v48 = vrot.slane %v1628_v8, 4 }
  0xd0   : > { %15083 = vst [vmem:[#allocation79_spill] sm:$0xff] %v10922_v14  ;;  %15084 = vst [vmem:[#allocation80_spill] sm:$0xff] %v10926_v37  ;;  %v1496_v43 = vsel %vm1463_vm2, %v1493_v11, %v15087_v57  ;;  %v14826_v57 = vrot.slane %v10934_v31, 4  ;;  %v14827_v12 = vrot.slane %v10952_v10, 4  ;;  %v1862_v18 = vmul.f32 %v10430_v0, %v10800_v44 }
  0xd1   : > { %15085 = vst [vmem:[#allocation81_spill] sm:$0xff] %v10930_v24  ;;  %15086 = vst [vmem:[#allocation82_spill] sm:$0xff] %v10942_v54  ;;  %8985 = vmatprep.subr.bf16.mxu0 %v2644_v6  ;;  %v10947_v20 = vpop.permute.xlu1 %492  ;;  %v1588_v7 = vadd.f32 %v1496_v43, %v1359_v59  ;;  %v10967_v6 = vmul.f32 %v10430_v0, %v10798_v15  ;;  %v14828_v37 = vrot.slane %v10956_v29, 4 }
  0xd2   : > { %15088 = vst [vmem:[#allocation83_spill] sm:$0xff] %v10947_v20  ;;  %v10972_v33 = vmul.f32 %v10402_v49, %v10947_v20  ;;  %v10976_v43 = vmul.f32 %v10404_v50, %v10947_v20  ;;  %v1718_v59 = vsel %vm1687_vm3, %v14826_v57, %v1717_v48  ;;  %v1720_v19 = vsel %vm1687_vm3, %v1717_v48, %v14827_v12 }
  0xd3   : > { %15090 = vst [vmem:[#allocation85_spill] sm:$0xff] %v10967_v6  ;;  %v1811_v11 = vadd.f32 %v1718_v59, %v1587_v36  ;;  %v1950_v8 = vrot.slane %v1862_v18, 4  ;;  %v1812_v54 = vadd.f32 %v1720_v19, %v1588_v7  ;;  %v14836_v24 = vrot.slane %v10967_v6, 4 }
  0xd4   : > { %15091 = vst [vmem:[#allocation86_spill] sm:$0xff] %v10972_v33  ;;  %15092 = vst [vmem:[#allocation87_spill] sm:$0xff] %v10976_v43  ;;  %v10988_v14 = vmul.f32 %v10436_v2, %v10637_v39  ;;  %v2085_v20 = vmul.f32 %v10436_v2, %v10800_v44  ;;  %v10997_v48 = vmul.f32 %v10436_v2, %v10798_v15 }
  0xd5   : > { %v1951_v57 = vsel %vm1687_vm3, %v14828_v37, %v1950_v8  ;;  %v11001_v7 = vmul.f32 %v10708_v38, %v10637_v39  ;;  %v2309_v19 = vmul.f32 %v10708_v38, %v10800_v44  ;;  %v1953_v36 = vsel %vm1687_vm3, %v1950_v8, %v14836_v24 }
  0xd6   : > { %15093 = vst [vmem:[#allocation88_spill] sm:$0xff] %v10997_v48  ;;  %v2044_v18 = vadd.f32 %v1951_v57, %v1811_v11  ;;  %v14837_v59 = vrot.slane %v10988_v14, 5  ;;  %v2174_v12 = vrot.slane %v2085_v20, 5  ;;  %v2045_v37 = vadd.f32 %v1953_v36, %v1812_v54 }
  0xd7   : > { %v14843_v10 = vrot.slane %v10997_v48, 5  ;;  %v11012_v13 = vmul.f32 %v10708_v38, %v10798_v15  ;;  %v14852_v39 = vrot.slane %v11001_v7, 6  ;;  %v2398_v6 = vrot.slane %v2309_v19, 6 }
  0xd8   : > { %v2175_v44 = vsel %vm2144_vm4, %v14837_v59, %v2174_v12  ;;  %v667_v57 = vmul.f32 %v10412_v58, %v10512_v41  ;;  %v668_v20 = vmul.f32 %v10412_v58, %v10514_v42  ;;  %v15095_v36 = vrot.slane %v10543_v52, 1 }
  0xd9   : > { %15094 = vst [vmem:[#allocation89_spill] sm:$0xff] %v11012_v13  ;;  %v2177_v54 = vsel %vm2144_vm4, %v2174_v12, %v14843_v10  ;;  %v2268_v11 = vadd.f32 %v2175_v44, %v2044_v18  ;;  %v14846_v8 = vrot.slane %v11012_v13, 6  ;;  %v15096_v24 = vrot.slane %v10528_v46, 1 }
  0xda   : > { %v2269_v19 = vadd.f32 %v2177_v54, %v2045_v37  ;;  %v2399_v15 = vsel %vm2368_vm5, %v14852_v39, %v2398_v6  ;;  %v15098_v48 = vmov %v15095_v36  ;;  %v15100_v37 = vrot.slane %v10532_v47, 2 }
  0xdb   : > { %v846_v59 = vsel %vm787_vm0, %v15096_v24, %v15095_v36  ;;  %v848_v12 = vsel %vm787_vm0, %v15098_v48, %v15097_v26  ;;  %v2401_v18 = vsel %vm2368_vm5, %v2398_v6, %v14846_v8  ;;  %v2492_v10 = vadd.f32 %v2399_v15, %v2268_v11 }
  0xdc   : > { %v923_v44 = vadd.f32 %v846_v59, %v667_v57  ;;  %v924_v16 = vadd.f32 %v848_v12, %v668_v20  ;;  %v15099_v24 = vrot.slane %v10547_v53, 2  ;;  %v2493_v36 = vadd.f32 %v2401_v18, %v2269_v19 }
  0xdd   : > { %v15103_v59 = vrot.slane %v10480_v21, 2  ;;  %v15104_v6 = vrot.slane %v10474_v17, 2  ;;  %v2535_v57 = vadd.f32 %v10894_v27, %v2492_v10  ;;  %v15105_v11 = vrot.slane %v10440_v3, 2 }
  0xde   : > { %v1066_v54 = vsel %vm1007_vm1, %v15100_v37, %v15099_v24  ;;  %v15102_v52 = vmov %v15099_v24  ;;  %v14851_v53 = vrot.slane %v10508_v35, 3  ;;  %v2536_v12 = vadd.f32 %v10894_v27, %v2493_v36 }
  0xdf   : > { %v1068_v26 = vsel %vm1007_vm1, %v15102_v52, %v15101_v60  ;;  %v1143_v48 = vadd.f32 %v1066_v54, %v923_v44  ;;  %v1295_v15 = vsel %vm1007_vm1, %v15104_v6, %v15103_v59  ;;  %v15106_v19 = vmov %v15103_v59  ;;  %v11079_v52 = vpop.permute.xlu0 %487 }
  0xe0   : > { %v1144_v20 = vadd.f32 %v1068_v26, %v924_v16  ;;  %v1297_v62 = vsel %vm1007_vm1, %v15106_v19, %v15105_v11  ;;  %v1521_v18 = vrot.slane %v10524_v45, 3  ;;  %v1642_v24 = vmul.f32 %v10428_v63, %v10446_v5  ;;  %15108 = vst [vmem:[#allocation90_spill] sm:$0xff] %v11079_v52 }
  0xe1   : > { %v1372_v44 = vadd.f32 %v1295_v15, %v1143_v48  ;;  %v2571_v37 = vmax.f32 %v2535_v57, 0.0  ;;  %v14850_v16 = vrot.slane %v10539_v51, 4  ;;  %v11071_v3 = vmul.f32 %v10430_v0, %v10406_v55 }
  0xe2   : > { %v1373_v54 = vadd.f32 %v1297_v62, %v1144_v20  ;;  %v2572_v21 = vmax.f32 %v2536_v12, 0.0  ;;  %v1522_v10 = vsel %vm1463_vm2, %v14851_v53, %v1521_v18  ;;  %v15107_v36 = vrot.slane %v10444_v4, 3  ;;  %v15128_v53 = vld [vmem:[#allocation13_spill] sm:$0xff] }
  0xe3   : > { %v1745_v60 = vrot.slane %v1642_v24, 4  ;;  %v1601_v26 = vadd.f32 %v1522_v10, %v1372_v44  ;;  %v1876_v59 = vmul.f32 %v10430_v0, %v10562_v30  ;;  %v14849_v6 = vrot.slane %v11071_v3, 4 }
  0xe4   : > { %v1524_v45 = vsel %vm1463_vm2, %v1521_v18, %v15107_v36  ;;  %v2636_v15 = vpack.c.bf16 %v2572_v21, %v2571_v37  ;;  %v15109_v20 = vrot.slane %v10455_v9, 4  ;;  %v11092_v11 = vmul.f32 %v10436_v2, %v10406_v55 }
  0xe5   : > { %v1602_v48 = vadd.f32 %v1524_v45, %v1373_v54  ;;  %v1746_v57 = vsel %vm1687_vm3, %v14850_v16, %v1745_v60  ;;  %v1978_v12 = vrot.slane %v1876_v59, 4  ;;  %v2099_v44 = vmul.f32 %v10436_v2, %v10562_v30 }
  0xe6   : > { %v1748_v4 = vsel %vm1687_vm3, %v1745_v60, %v15109_v20  ;;  %v1825_v19 = vadd.f32 %v1746_v57, %v1601_v26  ;;  %v11098_v18 = vmul.f32 %v10402_v49, %v11079_v52  ;;  %v11102_v24 = vmul.f32 %v10404_v50, %v11079_v52  ;;  %8986 = vmatpush3.bf16.msra.mxu0 %v2636_v15  ;;  %v15117_v57 = vld [vmem:[#allocation28_spill] sm:$0xff]  ;;  %v15119_v15 = vld [vmem:[#allocation30_spill] sm:$0xff] }
  0xe7   : > { %v1826_v62 = vadd.f32 %v1748_v4, %v1602_v48  ;;  %v11106_v9 = vmul.f32 %v10708_v38, %v10406_v55  ;;  %v2323_v37 = vmul.f32 %v10708_v38, %v10562_v30  ;;  %v1979_v54 = vsel %vm1687_vm3, %v14849_v6, %v1978_v12  ;;  %v15131_v55 = vld [vmem:[#allocation11_spill] sm:$0xff] }
  0xe8   : > { %15110 = vst [vmem:[#allocation91_spill] sm:$0xff] %v11098_v18  ;;  %15111 = vst [vmem:[#allocation92_spill] sm:$0xff] %v11102_v24  ;;  %v15112_v21 = vrot.slane %v10669_v40, 4  ;;  %v14848_v36 = vrot.slane %v11092_v11, 5  ;;  %v2202_v45 = vrot.slane %v2099_v44, 5  ;;  %v2058_v60 = vadd.f32 %v1979_v54, %v1825_v19 }
  0xe9   : > { %v14847_v48 = vrot.slane %v11106_v9, 6  ;;  %v2426_v59 = vrot.slane %v2323_v37, 6  ;;  %v15113_v40 = vrot.slane %v10673_v56, 5  ;;  %v15115_v37 = vld [vmem:[#allocation26_spill] sm:$0xff]  ;;  %v15118_v56 = vrot.slane %v15117_v57, 1  ;;  %v15132_v57 = vld [vmem:[#allocation7_spill] sm:$0xff] }
  0xea   : > { %v1981_v10 = vsel %vm1687_vm3, %v1978_v12, %v15112_v21  ;;  %v2203_v20 = vsel %vm2144_vm4, %v14848_v36, %v2202_v45  ;;  %v651_v54 = vmul.f32 %v10412_v58, %v15115_v37  ;;  %v15126_v36 = vld [vmem:[#allocation31_spill] sm:$0xff]  ;;  %v15129_v39 = vrot.slane %v15128_v53, 2 }
  0xeb   : > { %v2059_v26 = vadd.f32 %v1981_v10, %v1826_v62  ;;  %v2205_v4 = vsel %vm2144_vm4, %v2202_v45, %v15113_v40  ;;  %v2282_v12 = vadd.f32 %v2203_v20, %v2058_v60  ;;  %v2427_v19 = vsel %vm2368_vm5, %v14847_v48, %v2426_v59  ;;  %v15116_v10 = vld [vmem:[#allocation25_spill] sm:$0xff] }
  0xec   : > { %v15114_v62 = vrot.slane %v10720_v34, 6  ;;  %v652_v8 = vmul.f32 %v10412_v58, %v15116_v10  ;;  %v15120_v45 = vrot.slane %v15119_v15, 1  ;;  %v15123_v40 = vmov %v15118_v56 }
  0xed   : > { %v2283_v21 = vadd.f32 %v2205_v4, %v2059_v26  ;;  %v15121_v26 = vld [vmem:[#allocation12_spill] sm:$0xff]  ;;  %v2506_v4 = vadd.f32 %v2427_v19, %v2282_v12  ;;  %v15127_v6 = vrot.slane %v15126_v36, 2  ;;  %v11158_v13 = vmul.f32 %v15132_v57, %v15131_v55  ;;  %v15133_v12 = vld [vmem:[#allocation14_spill] sm:$0xff] }
  0xee   : > { %v2429_v44 = vsel %vm2368_vm5, %v2426_v59, %v15114_v62  ;;  %v814_v60 = vsel %vm787_vm0, %v15120_v45, %v15118_v56  ;;  %v15122_v20 = vrot.slane %v15121_v26, 1  ;;  %v15124_v62 = vld [vmem:[#allocation29_spill] sm:$0xff] }
  0xef   : > { %v2507_v59 = vadd.f32 %v2429_v44, %v2283_v21  ;;  %v15125_v48 = vrot.slane %v15124_v62, 2  ;;  %v907_v45 = vadd.f32 %v814_v60, %v651_v54  ;;  %v1178_v21 = vmul.f32 %v15132_v57, %v15133_v12 }
  0xf0   : > { %v816_v34 = vsel %vm787_vm0, %v15123_v40, %v15122_v20  ;;  %v2549_v19 = vadd.f32 %v10894_v27, %v2506_v4 }
  0xf1   : > { %v1034_v16 = vsel %vm1007_vm1, %v15127_v6, %v15125_v48  ;;  %v15130_v30 = vmov %v15125_v48  ;;  %v908_v26 = vadd.f32 %v816_v34, %v652_v8  ;;  %v2550_v44 = vadd.f32 %v10894_v27, %v2507_v59  ;;  %v15134_v6 = vld [vmem:[#allocation8_spill] sm:$0xff]  ;;  %v15135_v59 = vld [vmem:[#allocation18_spill] sm:$0xff] }
  0xf2   : > { %v1036_v56 = vsel %vm1007_vm1, %v15130_v30, %v15129_v39  ;;  %v11166_v53 = vmul.f32 %v15134_v6, %v15131_v55  ;;  %v1402_v39 = vmul.f32 %v15134_v6, %v15133_v12  ;;  %v1127_v30 = vadd.f32 %v1034_v16, %v907_v45 }
  0xf3   : > { %v1128_v8 = vadd.f32 %v1036_v56, %v908_v26  ;;  %v14858_v48 = vrot.slane %v11158_v13, 2  ;;  %v1262_v54 = vrot.slane %v1178_v21, 2  ;;  %v2585_v60 = vmax.f32 %v2549_v19, 0.0 }
  0xf4   : > { %v2586_v20 = vmax.f32 %v2550_v44, 0.0  ;;  %v14860_v40 = vrot.slane %v11166_v53, 3  ;;  %v1489_v34 = vrot.slane %v1402_v39, 3  ;;  %v15136_v62 = vrot.slane %v15135_v59, 2 }
  0xf5   : > { %v1263_v4 = vsel %vm1007_vm1, %v14858_v48, %v1262_v54  ;;  %v11180_v16 = vmul.f32 %v10428_v63, %v15131_v55  ;;  %v1626_v56 = vmul.f32 %v10428_v63, %v15133_v12  ;;  %v15137_v44 = vrot.slane %v10765_v1, 3 }
  0xf6   : > { %v1265_v43 = vsel %vm1007_vm1, %v1262_v54, %v15136_v62  ;;  %v2643_v45 = vpack.c.bf16 %v2586_v20, %v2585_v60  ;;  %v1356_v26 = vadd.f32 %v1263_v4, %v1127_v30  ;;  %v1490_v19 = vsel %vm1463_vm2, %v14860_v40, %v1489_v34 }
  0xf7   : > { %v1357_v21 = vadd.f32 %v1265_v43, %v1128_v8  ;;  %v1492_v39 = vsel %vm1463_vm2, %v1489_v34, %v15137_v44  ;;  %v14859_v54 = vrot.slane %v11180_v16, 4  ;;  %v1713_v59 = vrot.slane %v1626_v56, 4 }
  0xf8   : > { %v11193_v62 = vmul.f32 %v10430_v0, %v10484_v23  ;;  %8987 = vmatprep.subr.bf16.mxu0 %v2643_v45  ;;  %v1585_v48 = vadd.f32 %v1490_v19, %v1356_v26  ;;  %v1860_v43 = vmul.f32 %v10430_v0, %v10639_v61  ;;  %v11199_v30 = vmul.f32 %v10436_v2, %v10484_v23 }
  0xf9   : > { %v1586_v60 = vadd.f32 %v1492_v39, %v1357_v21  ;;  %v1714_v1 = vsel %vm1687_vm3, %v14859_v54, %v1713_v59  ;;  %v15138_v8 = vrot.slane %v10934_v31, 4  ;;  %v2083_v4 = vmul.f32 %v10436_v2, %v10639_v61  ;;  %v15139_v39 = vld [vmem:[#allocation39_spill] sm:$0xff]  ;;  %v15144_v54 = vld [vmem:[#allocation42_spill] sm:$0xff] }
  0xfa   : > { %v14865_v34 = vrot.slane %v11193_v62, 4  ;;  %v1809_v56 = vadd.f32 %v1714_v1, %v1585_v48  ;;  %v1946_v26 = vrot.slane %v1860_v43, 4  ;;  %v11213_v44 = vmul.f32 %v10708_v38, %v10484_v23  ;;  %v15141_v43 = vld [vmem:[#allocation38_spill] sm:$0xff] }
  0xfb   : > { %v1716_v20 = vsel %vm1687_vm3, %v1713_v59, %v15138_v8  ;;  %v2170_v19 = vrot.slane %v2083_v4, 5  ;;  %v2307_v31 = vmul.f32 %v10708_v38, %v10639_v61  ;;  %v665_v59 = vmul.f32 %v10412_v58, %v15139_v39 }
  0xfc   : > { %v1810_v45 = vadd.f32 %v1716_v20, %v1586_v60  ;;  %v1947_v8 = vsel %vm1687_vm3, %v14865_v34, %v1946_v26  ;;  %v15140_v48 = vrot.slane %v10956_v29, 4  ;;  %v666_v1 = vmul.f32 %v10412_v58, %v15141_v43  ;;  %v15142_v20 = vld [vmem:[#allocation40_spill] sm:$0xff] }
  0xfd   : > { %v15143_v4 = vrot.slane %v15142_v20, 1  ;;  %v15145_v40 = vrot.slane %v15144_v54, 1  ;;  %v2042_v61 = vadd.f32 %v1947_v8, %v1809_v56  ;;  %v15146_v33 = vrot.slane %v11199_v30, 5 }
  0xfe   : > { %v1949_v60 = vsel %vm1687_vm3, %v1946_v26, %v15140_v48  ;;  %v15147_v34 = vrot.slane %v10988_v14, 5  ;;  %v14870_v26 = vrot.slane %v11213_v44, 6  ;;  %v2394_v48 = vrot.slane %v2307_v31, 6 }
  0xff   : > { %v842_v21 = vsel %vm787_vm0, %v15145_v40, %v15143_v4  ;;  %v2043_v23 = vadd.f32 %v1949_v60, %v1810_v45  ;;  %v2171_v39 = vsel %vm2144_vm4, %v15146_v33, %v2170_v19  ;;  %v15148_v43 = vrot.slane %v10528_v46, 1  ;;  %v15150_v60 = vld [vmem:[#allocation41_spill] sm:$0xff]  ;;  %v15152_v33 = vld [vmem:[#allocation43_spill] sm:$0xff] }
 0x100   : > { %v2173_v29 = vsel %vm2144_vm4, %v2170_v19, %v15147_v34  ;;  %v15149_v22 = vmov %v15143_v4  ;;  %v921_v40 = vadd.f32 %v842_v21, %v665_v59  ;;  %v2266_v56 = vadd.f32 %v2171_v39, %v2042_v61  ;;  %v11264_v59 = vpop.permute.xlu0 %562 }
 0x101   : > { %v844_v54 = vsel %vm787_vm0, %v15149_v22, %v15148_v43  ;;  %v2267_v45 = vadd.f32 %v2173_v29, %v2043_v23  ;;  %v15151_v4 = vrot.slane %v15150_v60, 2  ;;  %v15153_v25 = vrot.slane %v15152_v33, 2  ;;  %15157 = vst [vmem:[#allocation26_spill] sm:$0xff] %v11264_v59 }
 0x102   : > { %v922_v8 = vadd.f32 %v844_v54, %v666_v1  ;;  %v2395_v34 = vsel %vm2368_vm5, %v14870_v26, %v2394_v48  ;;  %v15154_v46 = vrot.slane %v11001_v7, 6  ;;  %v15155_v22 = vrot.slane %v10532_v47, 2 }
 0x103   : > { %v1062_v14 = vsel %vm1007_vm1, %v15153_v25, %v15151_v4  ;;  %v15156_v61 = vmov %v15151_v4  ;;  %v2490_v21 = vadd.f32 %v2395_v34, %v2266_v56  ;;  %v11262_v25 = vmul.f32 %v15132_v57, %v10512_v41 }
 0x104   : > { %v2397_v19 = vsel %vm2368_vm5, %v2394_v48, %v15154_v46  ;;  %v1064_v23 = vsel %vm1007_vm1, %v15156_v61, %v15155_v22  ;;  %v1141_v54 = vadd.f32 %v1062_v14, %v921_v40  ;;  %v1192_v7 = vmul.f32 %v15132_v57, %v10514_v42 }
 0x105   : > { %v2491_v31 = vadd.f32 %v2397_v19, %v2267_v45  ;;  %v1142_v39 = vadd.f32 %v1064_v23, %v922_v8  ;;  %v11270_v47 = vmul.f32 %v15134_v6, %v10512_v41  ;;  %v1416_v43 = vmul.f32 %v15134_v6, %v10514_v42 }
 0x106   : > { %v11276_v1 = vmul.f32 %v10428_v63, %v10512_v41  ;;  %v2533_v20 = vadd.f32 %v10894_v27, %v2490_v21  ;;  %v14871_v48 = vrot.slane %v11262_v25, 2  ;;  %v1640_v40 = vmul.f32 %v10428_v63, %v10514_v42  ;;  %v15161_v21 = vld [vmem:[#allocation6_spill] sm:$0xff] }
 0x107   : > { %v2534_v29 = vadd.f32 %v10894_v27, %v2491_v31  ;;  %v1290_v56 = vrot.slane %v1192_v7, 2  ;;  %v14876_v45 = vrot.slane %v11270_v47, 3  ;;  %v1517_v8 = vrot.slane %v1416_v43, 3  ;;  %v11303_v7 = vpop.permute.xlu1 %477 }
 0x108   : > { %v14875_v60 = vrot.slane %v11276_v1, 4  ;;  %v11287_v4 = vmul.f32 %v10402_v49, %v11264_v59  ;;  %v2569_v14 = vmax.f32 %v2533_v20, 0.0  ;;  %v1741_v46 = vrot.slane %v1640_v40, 4  ;;  %15162 = vst [vmem:[#allocation12_spill] sm:$0xff] %v11303_v7 }
 0x109   : > { %v2570_v34 = vmax.f32 %v2534_v29, 0.0  ;;  %v11291_v19 = vmul.f32 %v10404_v50, %v11264_v59  ;;  %v1291_v22 = vsel %vm1007_vm1, %v14871_v48, %v1290_v56  ;;  %v15160_v61 = vrot.slane %v10474_v17, 2 }
 0x10a   : > { %15158 = vst [vmem:[#allocation28_spill] sm:$0xff] %v11287_v4  ;;  %v11301_v31 = vmul.f32 %v10430_v0, %v15161_v21  ;;  %v1370_v20 = vadd.f32 %v1291_v22, %v1141_v54  ;;  %v1518_v40 = vsel %vm1463_vm2, %v14876_v45, %v1517_v8  ;;  %v15163_v26 = vrot.slane %v10508_v35, 3  ;;  %v15181_v4 = vld [vmem:[#allocation50_spill] sm:$0xff] }
 0x10b   : > { %15159 = vst [vmem:[#allocation30_spill] sm:$0xff] %v11291_v19  ;;  %v1293_v23 = vsel %vm1007_vm1, %v1290_v56, %v15160_v61  ;;  %v2635_v43 = vpack.c.bf16 %v2570_v34, %v2569_v14  ;;  %v1742_v17 = vsel %vm1687_vm3, %v14875_v60, %v1741_v46  ;;  %v1874_v56 = vmul.f32 %v10430_v0, %v10446_v5 }
 0x10c   : > { %v1371_v29 = vadd.f32 %v1293_v23, %v1142_v39  ;;  %v1520_v48 = vsel %vm1463_vm2, %v1517_v8, %v15163_v26  ;;  %v11318_v14 = vmul.f32 %v10436_v2, %v15161_v21  ;;  %v1599_v54 = vadd.f32 %v1518_v40, %v1370_v20  ;;  %v11325_v8 = vpop.permute.xlu0 %482 }
 0x10d   : > { %8988 = vmatpush3.bf16.msra.mxu0 %v2635_v43  ;;  %v15164_v34 = vrot.slane %v10539_v51, 4  ;;  %v2097_v26 = vmul.f32 %v10436_v2, %v10446_v5  ;;  %15165 = vst [vmem:[#allocation29_spill] sm:$0xff] %v11325_v8  ;;  %v14874_v22 = vrot.slane %v11301_v31, 4  ;;  %v1974_v61 = vrot.slane %v1874_v56, 4 }
 0x10e   : > { %v1600_v39 = vadd.f32 %v1520_v48, %v1371_v29  ;;  %v11330_v23 = vmul.f32 %v10708_v38, %v15161_v21  ;;  %v2321_v43 = vmul.f32 %v10708_v38, %v10446_v5  ;;  %v1823_v48 = vadd.f32 %v1742_v17, %v1599_v54 }
 0x10f   : > { %v1744_v35 = vsel %vm1687_vm3, %v1741_v46, %v15164_v34  ;;  %v14872_v51 = vrot.slane %v11318_v14, 5  ;;  %v2198_v46 = vrot.slane %v2097_v26, 5  ;;  %v1975_v29 = vsel %vm1687_vm3, %v14874_v22, %v1974_v61 }
 0x110   : > { %v1824_v20 = vadd.f32 %v1744_v35, %v1600_v39  ;;  %v15166_v40 = vrot.slane %v11071_v3, 4  ;;  %v2422_v34 = vrot.slane %v2321_v43, 6  ;;  %v11343_v21 = vmul.f32 %v10402_v49, %v11325_v8  ;;  %v11347_v35 = vpop.permute.xlu1 %467 }
 0x111   : > { %v2056_v54 = vadd.f32 %v1975_v29, %v1823_v48  ;;  %v2199_v26 = vsel %vm2144_vm4, %v14872_v51, %v2198_v46  ;;  %v15168_v3 = vrot.slane %v11092_v11, 5  ;;  %v14873_v43 = vrot.slane %v11330_v23, 6 }
 0x112   : > { %v1977_v56 = vsel %vm1687_vm3, %v1974_v61, %v15166_v40  ;;  %15167 = vst [vmem:[#allocation31_spill] sm:$0xff] %v11343_v21  ;;  %v11358_v40 = vmul.f32 %v10404_v50, %v11325_v8  ;;  %v15170_v11 = vrot.slane %v11106_v9, 6  ;;  %v11371_v5 = vmul.f32 %v10412_v58, %v11347_v35  ;;  %v15179_v21 = vld [vmem:[#allocation48_spill] sm:$0xff] }
 0x113   : > { %v2057_v39 = vadd.f32 %v1977_v56, %v1824_v20  ;;  %v2201_v61 = vsel %vm2144_vm4, %v2198_v46, %v15168_v3  ;;  %v2280_v20 = vadd.f32 %v2199_v26, %v2056_v54  ;;  %v2423_v56 = vsel %vm2368_vm5, %v14873_v43, %v2422_v34  ;;  %v15173_v3 = vld [vmem:[#allocation47_spill] sm:$0xff] }
 0x114   : > { %15169 = vst [vmem:[#allocation13_spill] sm:$0xff] %v11358_v40  ;;  %v2425_v46 = vsel %vm2368_vm5, %v2422_v34, %v15170_v11  ;;  %v11375_v54 = vmul.f32 %v10404_v50, %v11347_v35  ;;  %v11382_v9 = vmul.f32 %v15132_v57, %v11347_v35  ;;  %v15172_v34 = vld [vmem:[#allocation44_spill] sm:$0xff]  ;;  %v15174_v48 = vrot.slane %v15173_v3, 1 }
 0x115   : > { %v2281_v29 = vadd.f32 %v2201_v61, %v2057_v39  ;;  %v2504_v51 = vadd.f32 %v2423_v56, %v2280_v20  ;;  %v15171_v39 = vld [vmem:[#allocation45_spill] sm:$0xff]  ;;  %v650_v11 = vmul.f32 %v10412_v58, %v15172_v34  ;;  %v15177_v22 = vrot.slane %v15119_v15, 1 }
 0x116   : > { %v649_v26 = vmul.f32 %v10412_v58, %v15171_v39  ;;  %v15175_v20 = vld [vmem:[#allocation49_spill] sm:$0xff]  ;;  %v15178_v61 = vmov %v15174_v48  ;;  %v15180_v19 = vrot.slane %v15179_v21, 2  ;;  %v15182_v59 = vrot.slane %v15181_v4, 2 }
 0x117   : > { %v2505_v17 = vadd.f32 %v2425_v46, %v2281_v29  ;;  %v15176_v29 = vrot.slane %v15175_v20, 1  ;;  %v2547_v46 = vadd.f32 %v10894_v27, %v2504_v51  ;;  %v812_v60 = vsel %vm787_vm0, %v15178_v61, %v15177_v22 }
 0x118   : > { %v906_v40 = vadd.f32 %v812_v60, %v650_v11  ;;  %v1030_v24 = vsel %vm1007_vm1, %v15182_v59, %v15180_v19  ;;  %v15184_v51 = vmov %v15180_v19  ;;  %v11410_v15 = vmul.f32 %v15132_v57, %v15115_v37 }
 0x119   : > { %v810_v56 = vsel %vm787_vm0, %v15176_v29, %v15174_v48  ;;  %v2548_v43 = vadd.f32 %v10894_v27, %v2505_v17  ;;  %v15183_v48 = vrot.slane %v15126_v36, 2  ;;  %v2583_v3 = vmax.f32 %v2547_v46, 0.0 }
 0x11a   : > { %v905_v45 = vadd.f32 %v810_v56, %v649_v26  ;;  %15185 = vst [vmem:[#allocation11_spill] sm:$0xff] %v11410_v15  ;;  %v1176_v60 = vmul.f32 %v15132_v57, %v15116_v10  ;;  %v14889_v11 = vrot.slane %v11410_v15, 2  ;;  %v11417_v36 = vmul.f32 %v15134_v6, %v15115_v37 }
 0x11b   : > { %v1032_v17 = vsel %vm1007_vm1, %v15184_v51, %v15183_v48  ;;  %v2584_v22 = vmax.f32 %v2548_v43, 0.0  ;;  %v1400_v59 = vmul.f32 %v15134_v6, %v15116_v10  ;;  %v11423_v29 = vmul.f32 %v10428_v63, %v15115_v37 }
 0x11c   : > { %v1125_v26 = vadd.f32 %v1030_v24, %v905_v45  ;;  %v1126_v61 = vadd.f32 %v1032_v17, %v906_v40  ;;  %v1258_v21 = vrot.slane %v1176_v60, 2  ;;  %v1624_v24 = vmul.f32 %v10428_v63, %v15116_v10 }
 0x11d   : > { %v2642_v19 = vpack.c.bf16 %v2584_v22, %v2583_v3  ;;  %v14898_v45 = vrot.slane %v11417_v36, 3  ;;  %v1485_v43 = vrot.slane %v1400_v59, 3  ;;  %v11430_v40 = vmul.f32 %v10430_v0, %v15131_v55 }
 0x11e   : > { %v1858_v56 = vmul.f32 %v10430_v0, %v15133_v12  ;;  %v1259_v46 = vsel %vm1007_vm1, %v14889_v11, %v1258_v21  ;;  %v15186_v48 = vrot.slane %v11158_v13, 2  ;;  %v14894_v17 = vrot.slane %v11423_v29, 4 }
 0x11f   : > { %8989 = vmatprep.subr.bf16.mxu0 %v2642_v19  ;;  %v1709_v3 = vrot.slane %v1624_v24, 4  ;;  %v11443_v22 = vmul.f32 %v15134_v6, %v11347_v35  ;;  %v11447_v60 = vmul.f32 %v10428_v63, %v11347_v35  ;;  %v1354_v59 = vadd.f32 %v1259_v46, %v1125_v26 }
 0x120   : > { %v1261_v51 = vsel %vm1007_vm1, %v1258_v21, %v15186_v48  ;;  %v1486_v11 = vsel %vm1463_vm2, %v14898_v45, %v1485_v43  ;;  %v15188_v13 = vrot.slane %v11166_v53, 3  ;;  %v1942_v48 = vrot.slane %v1858_v56, 4 }
 0x121   : > { %15187 = vst [vmem:[#allocation7_spill] sm:$0xff] %v11447_v60  ;;  %v1355_v19 = vadd.f32 %v1261_v51, %v1126_v61  ;;  %v1710_v24 = vsel %vm1687_vm3, %v14894_v17, %v1709_v3  ;;  %v1583_v18 = vadd.f32 %v1486_v11, %v1354_v59  ;;  %v11460_v10 = vmul.f32 %v10436_v2, %v15131_v55  ;;  %v15202_v60 = vld [vmem:[#allocation69_spill] sm:$0xff] }
 0x122   : > { %v1488_v21 = vsel %vm1463_vm2, %v1485_v43, %v15188_v13  ;;  %v2081_v26 = vmul.f32 %v10436_v2, %v15133_v12  ;;  %v15190_v61 = vrot.slane %v11180_v16, 4  ;;  %v14897_v43 = vrot.slane %v11430_v40, 4 }
 0x123   : > { %v1584_v15 = vadd.f32 %v1488_v21, %v1355_v19  ;;  %15189 = vst [vmem:[#allocation14_spill] sm:$0xff] %v11460_v10  ;;  %v11470_v46 = vmul.f32 %v10708_v38, %v15131_v55  ;;  %v2305_v11 = vmul.f32 %v10708_v38, %v15133_v12  ;;  %v14905_v56 = vrot.slane %v11375_v54, 2 }
 0x124   : > { %v1712_v53 = vsel %vm1687_vm3, %v1709_v3, %v15190_v61  ;;  %v1807_v51 = vadd.f32 %v1710_v24, %v1583_v18  ;;  %v2166_v19 = vrot.slane %v2081_v26, 5  ;;  %v1943_v16 = vsel %vm1687_vm3, %v14897_v43, %v1942_v48  ;;  %v473_v18 = vpop.permute.xlu0 %472 }
 0x125   : > { %15191 = vst [vmem:[#allocation8_spill] sm:$0xff] %v11470_v46  ;;  %v1808_v59 = vadd.f32 %v1712_v53, %v1584_v15  ;;  %v15192_v3 = vrot.slane %v11193_v62, 4  ;;  %v14896_v21 = vrot.slane %v11460_v10, 5  ;;  %v2390_v55 = vrot.slane %v2305_v11, 6 }
 0x126   : > { %v2040_v17 = vadd.f32 %v1943_v16, %v1807_v51  ;;  %v14895_v12 = vrot.slane %v11470_v46, 6  ;;  %v15193_v24 = vrot.slane %v11199_v30, 5  ;;  %v11496_v26 = vmul.f32 %v10404_v50, %v11303_v7 }
 0x127   : > { %v1945_v13 = vsel %vm1687_vm3, %v1942_v48, %v15192_v3  ;;  %v2167_v15 = vsel %vm2144_vm4, %v14896_v21, %v2166_v19  ;;  %v11492_v48 = vmul.f32 %v10402_v49, %v11303_v7  ;;  %v15197_v30 = vrot.slane %v11213_v44, 6 }
 0x128   : > { %v2041_v38 = vadd.f32 %v1945_v13, %v1808_v59  ;;  %v2169_v62 = vsel %vm2144_vm4, %v2166_v19, %v15193_v24  ;;  %15195 = vst [vmem:[#allocation40_spill] sm:$0xff] %v11496_v26  ;;  %v2264_v53 = vadd.f32 %v2167_v15, %v2040_v17  ;;  %v2391_v51 = vsel %vm2368_vm5, %v14895_v12, %v2390_v55 }
 0x129   : > { %15194 = vst [vmem:[#allocation18_spill] sm:$0xff] %v11492_v48  ;;  %v11503_v59 = vmul.f32 %v15132_v57, %v11325_v8  ;;  %v2393_v19 = vsel %vm2368_vm5, %v2390_v55, %v15197_v30  ;;  %v11510_v16 = vmul.f32 %v15132_v57, %v11079_v52  ;;  %v11513_v3 = vmul.f32 %v10402_v49, %v473_v18  ;;  %v15207_v52 = vld [vmem:[#allocation68_spill] sm:$0xff] }
 0x12a   : > { %v2265_v11 = vadd.f32 %v2169_v62, %v2041_v38  ;;  %v938_v17 = vmul.f32 %v10404_v50, %v473_v18  ;;  %v2488_v38 = vadd.f32 %v2391_v51, %v2264_v53  ;;  %v11518_v24 = vmul.f32 %v15132_v57, %v473_v18 }
 0x12b   : > { %15196 = vst [vmem:[#allocation41_spill] sm:$0xff] %v11503_v59  ;;  %15198 = vst [vmem:[#allocation43_spill] sm:$0xff] %v11510_v16  ;;  %v14900_v55 = vrot.slane %v11503_v59, 2  ;;  %v14902_v62 = vrot.slane %v11513_v3, 1  ;;  %v14899_v43 = vrot.slane %v11492_v48, 1  ;;  %v11527_v45 = vmul.f32 %v15134_v6, %v473_v18 }
 0x12c   : > { %v2489_v15 = vadd.f32 %v2393_v19, %v2265_v11  ;;  %v1013_v30 = vrot.slane %v938_v17, 2  ;;  %v2531_v12 = vadd.f32 %v10894_v27, %v2488_v38  ;;  %v14908_v53 = vrot.slane %v11496_v26, 2 }
 0x12d   : > { %v14901_v11 = vrot.slane %v11510_v16, 2  ;;  %v642_v51 = vmul.f32 %v10412_v58, %v473_v18  ;;  %v11533_v19 = vmul.f32 %v10428_v63, %v473_v18  ;;  %v796_v38 = vsel %vm787_vm0, %v14902_v62, %v14899_v43  ;;  %v458_v18 = vpop.permute.xlu1 %457 }
 0x12e   : > { %v2532_v21 = vadd.f32 %v10894_v27, %v2489_v15  ;;  %v2567_v44 = vmax.f32 %v2531_v12, 0.0  ;;  %v11551_v12 = vsel %vm1007_vm1, %v14905_v56, %v1013_v30  ;;  %v663_v43 = vmul.f32 %v10412_v58, %v10840_v32  ;;  %v15209_v32 = vld [vmem:[#allocation70_spill] sm:$0xff] }
 0x12f   : > { %15199 = vst [vmem:[#allocation6_spill] sm:$0xff] %v11533_v19  ;;  %v11546_v13 = vsel %vm1007_vm1, %v14900_v55, %v14901_v11  ;;  %v664_v55 = vmul.f32 %v10412_v58, %v10838_v28  ;;  %v15200_v11 = vld [vmem:[#allocation67_spill] sm:$0xff]  ;;  %v15203_v59 = vrot.slane %v15202_v60, 1  ;;  %v898_v16 = vadd.f32 %v796_v38, %v642_v51 }
 0x130   : > { %v2568_v17 = vmax.f32 %v2532_v21, 0.0  ;;  %v1016_v21 = vsel %vm1007_vm1, %v1013_v30, %v14908_v53  ;;  %v15201_v62 = vrot.slane %v15200_v11, 1  ;;  %v15204_v30 = vld [vmem:[#allocation42_spill] sm:$0xff]  ;;  %v11573_v15 = vmul.f32 %v10412_v58, %v458_v18 }
 0x131   : > { %v15205_v53 = vrot.slane %v15204_v30, 1  ;;  %v15208_v28 = vrot.slane %v15207_v52, 2  ;;  %v15210_v60 = vrot.slane %v15209_v32, 2  ;;  %v15216_v26 = vrot.slane %v11262_v25, 2 }
 0x132   : > { %v2634_v61 = vpack.c.bf16 %v2568_v17, %v2567_v44  ;;  %v838_v56 = vsel %vm787_vm0, %v15203_v59, %v15201_v62  ;;  %v15206_v48 = vmov %v15201_v62  ;;  %v15211_v62 = vrot.slane %v15152_v33, 2 }
 0x133   : > { %v840_v44 = vsel %vm787_vm0, %v15206_v48, %v15205_v53  ;;  %v919_v17 = vadd.f32 %v838_v56, %v663_v43  ;;  %v1058_v59 = vsel %vm1007_vm1, %v15210_v60, %v15208_v28  ;;  %v15212_v51 = vmov %v15208_v28  ;;  %v15213_v48 = vld [vmem:[#allocation39_spill] sm:$0xff]  ;;  %v15215_v56 = vld [vmem:[#allocation38_spill] sm:$0xff] }
 0x134   : > { %8990 = vmatpush3.bf16.msra.mxu0 %v2634_v61  ;;  %v920_v8 = vadd.f32 %v840_v44, %v664_v55  ;;  %v1060_v11 = vsel %vm1007_vm1, %v15212_v51, %v15211_v62  ;;  %v11587_v43 = vmul.f32 %v15132_v57, %v15213_v48  ;;  %v1190_v61 = vmul.f32 %v15132_v57, %v15215_v56 }
 0x135   : > { %v1139_v38 = vadd.f32 %v1058_v59, %v919_v17  ;;  %v11593_v55 = vmul.f32 %v15134_v6, %v15213_v48  ;;  %v1414_v28 = vmul.f32 %v15134_v6, %v15215_v56  ;;  %v11599_v52 = vmul.f32 %v10428_v63, %v15213_v48 }
 0x136   : > { %15214 = vst [vmem:[#allocation45_spill] sm:$0xff] %v11587_v43  ;;  %v1140_v53 = vadd.f32 %v1060_v11, %v920_v8  ;;  %v1638_v33 = vmul.f32 %v10428_v63, %v15215_v56  ;;  %v14921_v60 = vrot.slane %v11587_v43, 2  ;;  %v1286_v30 = vrot.slane %v1190_v61, 2 }
 0x137   : > { %v11607_v17 = vmul.f32 %v10430_v0, %v10512_v41  ;;  %v1513_v8 = vrot.slane %v1414_v28, 3  ;;  %v1872_v51 = vmul.f32 %v10430_v0, %v10514_v42  ;;  %v11613_v11 = vmul.f32 %v10402_v49, %v458_v18 }
 0x138   : > { %v1737_v62 = vrot.slane %v1638_v33, 4  ;;  %v1287_v61 = vsel %vm1007_vm1, %v14921_v60, %v1286_v30  ;;  %v1289_v44 = vsel %vm1007_vm1, %v1286_v30, %v15216_v26  ;;  %v11623_v28 = vmul.f32 %v10436_v2, %v10512_v41 }
 0x139   : > { %v11626_v33 = vmul.f32 %v10404_v50, %v458_v18  ;;  %v1368_v59 = vadd.f32 %v1287_v61, %v1139_v38  ;;  %v1369_v56 = vadd.f32 %v1289_v44, %v1140_v53  ;;  %v14929_v48 = vrot.slane %v11607_v17, 4  ;;  %v11643_v53 = vld [vmem:[%s14994_s1 + $0x8] ss:$0 sm:$0xff] }
 0x13a   : > { %v15217_v32 = vrot.slane %v11593_v55, 3  ;;  %v15218_v60 = vrot.slane %v11270_v47, 3  ;;  %v1970_v26 = vrot.slane %v1872_v51, 4  ;;  %v2095_v30 = vmul.f32 %v10436_v2, %v10514_v42 }
 0x13b   : > { %v15219_v18 = vrot.slane %v11599_v52, 4  ;;  %v15220_v47 = vrot.slane %v11276_v1, 4  ;;  %v2319_v44 = vmul.f32 %v11643_v53, %v10514_v42  ;;  %v717_v61 = vmul.f32 %v10402_v49, %v11347_v35 }
 0x13c   : > { %v1514_v43 = vsel %vm1463_vm2, %v15217_v32, %v1513_v8  ;;  %v1516_v25 = vsel %vm1463_vm2, %v1513_v8, %v15218_v60  ;;  %v11647_v32 = vmul.f32 %v11643_v53, %v10512_v41  ;;  %v1118_v8 = vadd.f32 %v1016_v21, %v898_v16 }
 0x13d   : > { %v1597_v46 = vadd.f32 %v1514_v43, %v1368_v59  ;;  %v1598_v10 = vadd.f32 %v1516_v25, %v1369_v56  ;;  %v1738_v38 = vsel %vm1687_vm3, %v15219_v18, %v1737_v62  ;;  %v1740_v60 = vsel %vm1687_vm3, %v1737_v62, %v15220_v47 }
 0x13e   : > { %v14928_v43 = vrot.slane %v11623_v28, 5  ;;  %v2194_v56 = vrot.slane %v2095_v30, 5  ;;  %v1971_v41 = vsel %vm1687_vm3, %v14929_v48, %v1970_v26  ;;  %v15221_v1 = vrot.slane %v11301_v31, 4 }
 0x13f   : > { %v1821_v59 = vadd.f32 %v1738_v38, %v1597_v46  ;;  %v1822_v51 = vadd.f32 %v1740_v60, %v1598_v10  ;;  %v14927_v25 = vrot.slane %v11647_v32, 6  ;;  %v2418_v30 = vrot.slane %v2319_v44, 6 }
 0x140   : > { %v1973_v62 = vsel %vm1687_vm3, %v1970_v26, %v15221_v1  ;;  %v791_v42 = vrot.slane %v717_v61, 1  ;;  %v11666_v10 = vmul.f32 %v15132_v57, %v11303_v7  ;;  %v788_v35 = vrot.slane %v11613_v11, 1  ;;  %v463_v26 = vpop.permute.xlu0 %462 }
 0x141   : > { %v2054_v18 = vadd.f32 %v1971_v41, %v1821_v59  ;;  %v2055_v47 = vadd.f32 %v1973_v62, %v1822_v51  ;;  %v1008_v46 = vrot.slane %v11626_v33, 2  ;;  %v2195_v31 = vsel %vm2144_vm4, %v14928_v43, %v2194_v56 }
 0x142   : > { %15222 = vst [vmem:[#allocation44_spill] sm:$0xff] %v11666_v10  ;;  %v15223_v16 = vrot.slane %v11318_v14, 5  ;;  %v11677_v38 = vadd.f32 %v11546_v13, %v1118_v8  ;;  %v15225_v59 = vrot.slane %v11513_v3, 1  ;;  %v2419_v33 = vsel %vm2368_vm5, %v14927_v25, %v2418_v30 }
 0x143   : > { %v2278_v60 = vadd.f32 %v2195_v31, %v2054_v18  ;;  %v15226_v51 = vrot.slane %v11330_v23, 6  ;;  %v15228_v61 = vrot.slane %v11382_v9, 2  ;;  %v11695_v8 = vmul.f32 %v15134_v6, %v11303_v7  ;;  %v11699_v18 = vpop.permute.xlu1 %1158 }
 0x144   : > { %v2197_v21 = vsel %vm2144_vm4, %v2194_v56, %v15223_v16  ;;  %15224 = vst [vmem:[#allocation47_spill] sm:$0xff] %v11677_v38  ;;  %v794_v11 = vsel %vm787_vm0, %v791_v42, %v15225_v59  ;;  %v15227_v56 = vrot.slane %v11518_v24, 2  ;;  %v14926_v1 = vrot.slane %v11666_v10, 2  ;;  %15230 = vst [vmem:[#allocation48_spill] sm:$0xff] %v11699_v18 }
 0x145   : > { %v2279_v44 = vadd.f32 %v2197_v21, %v2055_v47  ;;  %v2421_v14 = vsel %vm2368_vm5, %v2418_v30, %v15226_v51  ;;  %15229 = vst [vmem:[#allocation49_spill] sm:$0xff] %v11695_v8  ;;  %v2502_v3 = vadd.f32 %v2419_v33, %v2278_v60  ;;  %v716_v62 = vmul.f32 %v10402_v49, %v463_v26 }
 0x146   : > { %v1239_v13 = vsel %vm1007_vm1, %v15228_v61, %v15227_v56  ;;  %v897_v23 = vadd.f32 %v794_v11, %v11371_v5  ;;  %v15231_v30 = vrot.slane %v11527_v45, 3  ;;  %v15232_v9 = vrot.slane %v11443_v22, 3 }
 0x147   : > { %v2503_v41 = vadd.f32 %v2421_v14, %v2279_v44  ;;  %v11709_v31 = vmul.f32 %v10428_v63, %v11303_v7  ;;  %v936_v16 = vmul.f32 %v10404_v50, %v463_v26  ;;  %v2545_v21 = vadd.f32 %v10894_v27, %v2502_v3 }
 0x148   : > { %v1466_v47 = vsel %vm1463_vm2, %v15232_v9, %v15231_v30  ;;  %v15234_v5 = vmov %v15227_v56  ;;  %v789_v59 = vrot.slane %v716_v62, 1  ;;  %v14925_v22 = vrot.slane %v11695_v8, 3 }
 0x149   : > { %15233 = vst [vmem:[#allocation50_spill] sm:$0xff] %v11709_v31  ;;  %v2546_v60 = vadd.f32 %v10894_v27, %v2503_v41  ;;  %v1241_v44 = vsel %vm1007_vm1, %v15234_v5, %v14926_v1  ;;  %v640_v11 = vmul.f32 %v10412_v58, %v463_v26  ;;  %v1009_v33 = vrot.slane %v936_v16, 2  ;;  %v15249_v1 = vld [vmem:[#allocation76_spill] sm:$0xff] }
 0x14a   : > { %v11723_v51 = vmul.f32 %v15132_v57, %v11699_v18  ;;  %v2581_v14 = vmax.f32 %v2545_v21, 0.0  ;;  %v790_v27 = vsel %vm787_vm0, %v788_v35, %v789_v59  ;;  %v792_v61 = vsel %vm787_vm0, %v789_v59, %v791_v42 }
 0x14b   : > { %v2582_v56 = vmax.f32 %v2546_v60, 0.0  ;;  %v14924_v24 = vrot.slane %v11709_v31, 4  ;;  %v895_v3 = vadd.f32 %v790_v27, %v11573_v15  ;;  %v896_v41 = vadd.f32 %v792_v61, %v640_v11  ;;  %v15239_v11 = vld [vmem:[#allocation72_spill] sm:$0xff]  ;;  %v15284_v31 = vld [vmem:[#allocation81_spill] sm:$0xff] }
 0x14c   : > { %v11731_v62 = vmul.f32 %v15134_v6, %v11699_v18  ;;  %v1010_v30 = vsel %vm1007_vm1, %v1008_v46, %v1009_v33  ;;  %v15235_v9 = vrot.slane %v11375_v54, 2  ;;  %v11739_v35 = vmul.f32 %v10428_v63, %v11699_v18 }
 0x14d   : > { %v2641_v26 = vpack.c.bf16 %v2582_v56, %v2581_v14  ;;  %v11742_v42 = vadd.f32 %v11551_v12, %v897_v23  ;;  %v15237_v15 = vrot.slane %v11527_v45, 3  ;;  %v1115_v60 = vadd.f32 %v1010_v30, %v895_v3  ;;  %v15240_v23 = vld [vmem:[#allocation73_spill] sm:$0xff]  ;;  %v15242_v14 = vld [vmem:[#allocation75_spill] sm:$0xff] }
 0x14e   : > { %v1012_v16 = vsel %vm1007_vm1, %v1009_v33, %v15235_v9  ;;  %v15238_v54 = vrot.slane %v11533_v19, 4  ;;  %v14938_v59 = vrot.slane %v11723_v51, 2  ;;  %v647_v12 = vmul.f32 %v10412_v58, %v15239_v11 }
 0x14f   : > { %15236 = vst [vmem:[#allocation67_spill] sm:$0xff] %v11742_v42  ;;  %v1468_v21 = vsel %vm1463_vm2, %v15237_v15, %v14925_v22  ;;  %v1116_v5 = vadd.f32 %v1012_v16, %v896_v41  ;;  %8991 = vmatprep.subr.bf16.mxu0 %v2641_v26  ;;  %v15241_v33 = vrot.slane %v15240_v23, 1  ;;  %v15243_v45 = vrot.slane %v15242_v14, 1  ;;  %v15244_v41 = vld [vmem:[#allocation71_spill] sm:$0xff]  ;;  %v15286_v42 = vld [vmem:[#allocation69_spill] sm:$0xff] }
 0x150   : > { %v1692_v46 = vsel %vm1687_vm3, %v15238_v54, %v14924_v24  ;;  %v1344_v27 = vadd.f32 %v1239_v13, %v1115_v60  ;;  %v14943_v3 = vrot.slane %v11731_v62, 3  ;;  %v648_v26 = vmul.f32 %v10412_v58, %v15244_v41  ;;  %v15247_v24 = vld [vmem:[#allocation74_spill] sm:$0xff] }
 0x151   : > { %v806_v56 = vsel %vm787_vm0, %v15243_v45, %v15241_v33  ;;  %v1345_v61 = vadd.f32 %v1241_v44, %v1116_v5  ;;  %v15245_v9 = vrot.slane %v15175_v20, 1  ;;  %v15246_v16 = vmov %v15241_v33 }
 0x152   : > { %v903_v54 = vadd.f32 %v806_v56, %v647_v12  ;;  %v15248_v22 = vrot.slane %v15247_v24, 2  ;;  %v15250_v33 = vrot.slane %v15249_v1, 2  ;;  %v11776_v44 = vadd.f32 %v1466_v47, %v1344_v27 }
 0x153   : > { %v808_v15 = vsel %vm787_vm0, %v15246_v16, %v15245_v9  ;;  %v1574_v60 = vadd.f32 %v1468_v21, %v1345_v61  ;;  %v15252_v45 = vrot.slane %v15181_v4, 2  ;;  %v11785_v12 = vmul.f32 %v15132_v57, %v15171_v39 }
 0x154   : > { %v1026_v13 = vsel %vm1007_vm1, %v15250_v33, %v15248_v22  ;;  %15251 = vst [vmem:[#allocation42_spill] sm:$0xff] %v11776_v44  ;;  %v904_v5 = vadd.f32 %v808_v15, %v648_v26  ;;  %v15253_v25 = vmov %v15248_v22  ;;  %v1174_v56 = vmul.f32 %v15132_v57, %v15172_v34  ;;  %v15255_v15 = vld [vmem:[#allocation25_spill] sm:$0xff] }
 0x155   : > { %v1028_v20 = vsel %vm1007_vm1, %v15253_v25, %v15252_v45  ;;  %v1123_v23 = vadd.f32 %v1026_v13, %v903_v54  ;;  %v11791_v47 = vmul.f32 %v15134_v6, %v15171_v39  ;;  %v11793_v22 = vadd.f32 %v1692_v46, %v1574_v60  ;;  %v15256_v13 = vld [vmem:[#allocation11_spill] sm:$0xff] }
 0x156   : > { %v1124_v21 = vadd.f32 %v1028_v20, %v904_v5  ;;  %v1398_v4 = vmul.f32 %v15134_v6, %v15172_v34  ;;  %v11799_v25 = vmul.f32 %v10428_v63, %v15171_v39  ;;  %v14933_v24 = vrot.slane %v11785_v12, 2 }
 0x157   : > { %15254 = vst [vmem:[#allocation68_spill] sm:$0xff] %v11793_v22  ;;  %v1254_v27 = vrot.slane %v1174_v56, 2  ;;  %v14930_v61 = vrot.slane %v11791_v47, 3  ;;  %v1622_v26 = vmul.f32 %v10428_v63, %v15172_v34  ;;  %v11808_v16 = vmul.f32 %v10430_v0, %v15115_v37  ;;  %v15277_v22 = vld [vmem:[#allocation56_spill] sm:$0xff] }
 0x158   : > { %v1481_v9 = vrot.slane %v1398_v4, 3  ;;  %v14932_v46 = vrot.slane %v11799_v25, 4  ;;  %v1856_v54 = vmul.f32 %v10430_v0, %v15255_v15  ;;  %v15257_v60 = vrot.slane %v15256_v13, 2 }
 0x159   : > { %v1255_v33 = vsel %vm1007_vm1, %v14933_v24, %v1254_v27  ;;  %v1705_v45 = vrot.slane %v1622_v26, 4  ;;  %v11820_v20 = vmul.f32 %v10436_v2, %v15115_v37  ;;  %v15258_v48 = vrot.slane %v11417_v36, 3 }
 0x15a   : > { %v1257_v5 = vsel %vm1007_vm1, %v1254_v27, %v15257_v60  ;;  %v1352_v56 = vadd.f32 %v1255_v33, %v1123_v23  ;;  %v1482_v43 = vsel %vm1463_vm2, %v14930_v61, %v1481_v9  ;;  %v15259_v27 = vrot.slane %v11423_v29, 4 }
 0x15b   : > { %v1353_v4 = vadd.f32 %v1257_v5, %v1124_v21  ;;  %v1484_v30 = vsel %vm1463_vm2, %v1481_v9, %v15258_v48  ;;  %v1706_v13 = vsel %vm1687_vm3, %v14932_v46, %v1705_v45  ;;  %v14931_v60 = vrot.slane %v11808_v16, 4  ;;  %v1383_v21 = vpop.permute.xlu0 %1382 }
 0x15c   : > { %v1708_v26 = vsel %vm1687_vm3, %v1705_v45, %v15259_v27  ;;  %v1938_v23 = vrot.slane %v1856_v54, 4  ;;  %v1581_v33 = vadd.f32 %v1482_v43, %v1352_v56  ;;  %v2079_v61 = vmul.f32 %v10436_v2, %v15255_v15 }
 0x15d   : > { %v1582_v5 = vadd.f32 %v1484_v30, %v1353_v4  ;;  %v14935_v36 = vrot.slane %v11820_v20, 5  ;;  %v15260_v9 = vrot.slane %v11430_v40, 4  ;;  %v11846_v45 = vmul.f32 %v11643_v53, %v15115_v37 }
 0x15e   : > { %v1939_v48 = vsel %vm1687_vm3, %v14931_v60, %v1938_v23  ;;  %v2303_v43 = vmul.f32 %v11643_v53, %v15255_v15  ;;  %v1805_v30 = vadd.f32 %v1706_v13, %v1581_v33  ;;  %v2162_v56 = vrot.slane %v2079_v61, 5  ;;  %v15262_v13 = vld [vmem:[#allocation14_spill] sm:$0xff] }
 0x15f   : > { %v1941_v29 = vsel %vm1687_vm3, %v1938_v23, %v15260_v9  ;;  %v1806_v54 = vadd.f32 %v1708_v26, %v1582_v5  ;;  %v11851_v4 = vmul.f32 %v15134_v6, %v1383_v21  ;;  %v14934_v27 = vrot.slane %v11846_v45, 6  ;;  %v15264_v5 = vld [vmem:[#allocation8_spill] sm:$0xff] }
 0x160   : > { %v2386_v60 = vrot.slane %v2303_v43, 6  ;;  %v11855_v40 = vmul.f32 %v10428_v63, %v1383_v21  ;;  %v11858_v23 = vmul.f32 %v10430_v0, %v1383_v21  ;;  %v2038_v37 = vadd.f32 %v1939_v48, %v1805_v30 }
 0x161   : > { %v2039_v9 = vadd.f32 %v1941_v29, %v1806_v54  ;;  %v2163_v15 = vsel %vm2144_vm4, %v14935_v36, %v2162_v56  ;;  %v15263_v61 = vrot.slane %v15262_v13, 5  ;;  %v15265_v43 = vrot.slane %v15264_v5, 6  ;;  %v15270_v5 = vld [vmem:[#allocation51_spill] sm:$0xff] }
 0x162   : > { %15261 = vst [vmem:[#allocation72_spill] sm:$0xff] %v11858_v23  ;;  %v2387_v33 = vsel %vm2368_vm5, %v14934_v27, %v2386_v60  ;;  %v2262_v29 = vadd.f32 %v2163_v15, %v2038_v37  ;;  %v11876_v13 = vmul.f32 %v10436_v2, %v1383_v21  ;;  %v11901_v24 = vmul.f32 %v10404_v50, %v15270_v5 }
 0x163   : > { %v2165_v26 = vsel %vm2144_vm4, %v2162_v56, %v15263_v61  ;;  %v2389_v46 = vsel %vm2368_vm5, %v2386_v60, %v15265_v43  ;;  %v11879_v56 = vmul.f32 %v11643_v53, %v1383_v21  ;;  %v15268_v61 = vld [vmem:[#allocation20_spill] sm:$0xff]  ;;  %v11889_v43 = vmul.f32 %v10402_v49, %v15270_v5 }
 0x164   : > { %v2263_v30 = vadd.f32 %v2165_v26, %v2039_v9  ;;  %15266 = vst [vmem:[#allocation73_spill] sm:$0xff] %v11876_v13  ;;  %v673_v27 = vmul.f32 %v10412_v58, %v15268_v61  ;;  %v11885_v60 = vmul.f32 %v10402_v49, %v15268_v61  ;;  %v2486_v37 = vadd.f32 %v2387_v33, %v2262_v29  ;;  %v1836_v49 = vpop.permute.xlu1 %1835 }
 0x165   : > { %15267 = vst [vmem:[#allocation75_spill] sm:$0xff] %v11879_v56  ;;  %v11894_v26 = vmul.f32 %v10404_v50, %v15268_v61  ;;  %v14942_v48 = vrot.slane %v11889_v43, 1  ;;  %v15272_v61 = vld [vmem:[#allocation52_spill] sm:$0xff]  ;;  %v14944_v54 = vrot.slane %v11901_v24, 2  ;;  %v15276_v18 = vrot.slane %v11739_v35, 4 }
 0x166   : > { %15269 = vst [vmem:[#allocation71_spill] sm:$0xff] %v11885_v60  ;;  %v2487_v9 = vadd.f32 %v2389_v46, %v2263_v30  ;;  %v14941_v36 = vrot.slane %v11885_v60, 1  ;;  %v11906_v46 = vld [vmem:[%s14693_s2] ss:$0 sm:$0xff]  ;;  %v15273_v21 = vrot.slane %v15272_v61, 2  ;;  %v15278_v61 = vrot.slane %v15277_v22, 4 }
 0x167   : > { %15271 = vst [vmem:[#allocation74_spill] sm:$0xff] %v11894_v26  ;;  %v2529_v33 = vadd.f32 %v11906_v46, %v2486_v37  ;;  %v15274_v37 = vld [vmem:[#allocation54_spill] sm:$0xff]  ;;  %v11933_v60 = vmul.f32 %v10430_v0, %v1836_v49  ;;  %v15285_v38 = vrot.slane %v15284_v31, 1  ;;  %v15287_v10 = vrot.slane %v15286_v42, 1 }
 0x168   : > { %v2530_v29 = vadd.f32 %v11906_v46, %v2487_v9  ;;  %v1307_v15 = vsel %vm1007_vm1, %v15273_v21, %v14938_v59  ;;  %v858_v50 = vsel %vm787_vm0, %v14941_v36, %v14942_v48  ;;  %v15275_v9 = vrot.slane %v15274_v37, 3  ;;  %v15280_v22 = vld [vmem:[#allocation78_spill] sm:$0xff] }
 0x169   : > { %v1758_v21 = vsel %vm1687_vm3, %v15278_v61, %v15276_v18  ;;  %v2565_v59 = vmax.f32 %v2529_v33, 0.0  ;;  %v929_v19 = vadd.f32 %v858_v50, %v673_v27  ;;  %v15279_v36 = vrot.slane %v11894_v26, 2  ;;  %v10055_v27 = vld [vmem:[%s14698_s7 + $0x4] ss:$12 sps:$4 sm:$0xff]  }
 0x16a   : > { %v1534_v30 = vsel %vm1463_vm2, %v15275_v9, %v14943_v3  ;;  %v2566_v44 = vmax.f32 %v2530_v29, 0.0  ;;  %v11941_v9 = vmul.f32 %v10436_v2, %v1836_v49  ;;  %v11944_v3 = vmul.f32 %v11643_v53, %v1836_v49  ;;  %v15281_v50 = vld [vmem:[#allocation77_spill] sm:$0xff]  ;;  %v15282_v49 = vld [vmem:[#allocation79_spill] sm:$0xff]  ;;  %2845 = vmatprep.mubr.bf16.mxu0 %v10055_v27  ;;  %v15295_v27 = vld [vmem:[#allocation80_spill] sm:$0xff] }
 0x16b   : > { %v1078_v48 = vsel %vm1007_vm1, %v15279_v36, %v14944_v54  ;;  %v661_v18 = vmul.f32 %v10412_v58, %v15280_v22  ;;  %v14951_v61 = vrot.slane %v11933_v60, 4  ;;  %v662_v36 = vmul.f32 %v10412_v58, %v15281_v50 }
 0x16c   : > { %v2633_v33 = vpack.c.bf16 %v2566_v44, %v2565_v59  ;;  %v1149_v29 = vadd.f32 %v1078_v48, %v929_v19  ;;  %v15283_v26 = vrot.slane %v15282_v49, 1  ;;  %v15289_v48 = vrot.slane %v11858_v23, 4 }
 0x16d   : > { %v15290_v50 = vrot.slane %v11941_v9, 5 }
 0x16e   : > { %v834_v8 = vsel %vm787_vm0, %v15285_v38, %v15283_v26  ;;  %v15288_v59 = vmov %v15283_v26  ;;  %8992 = vmatpush3.bf16.msra.mxu0 %v2633_v33  ;;  %v1378_v44 = vadd.f32 %v1307_v15, %v1149_v29  ;;  %v1991_v37 = vsel %vm1687_vm3, %v15289_v48, %v14951_v61  ;;  %v15297_v29 = vld [vmem:[#allocation82_spill] sm:$0xff] }
 0x16f   : > { %v836_v19 = vsel %vm787_vm0, %v15288_v59, %v15287_v10  ;;  %v917_v54 = vadd.f32 %v834_v8, %v661_v18  ;;  %v15291_v38 = vrot.slane %v11876_v13, 5  ;;  %v15292_v26 = vrot.slane %v11944_v3, 6  ;;  %v15299_v18 = vld [vmem:[#allocation70_spill] sm:$0xff] }
 0x170   : > { %v918_v7 = vadd.f32 %v836_v19, %v662_v36  ;;  %v15293_v10 = vrot.slane %v11879_v56, 6  ;;  %v15296_v33 = vrot.slane %v15295_v27, 2  ;;  %v15298_v49 = vrot.slane %v15297_v29, 2  ;;  %v15302_v61 = vld [vmem:[#allocation66_spill] sm:$0xff] }
 0x171   : > { %v2215_v42 = vsel %vm2144_vm4, %v15291_v38, %v15290_v50  ;;  %v15300_v36 = vrot.slane %v15299_v18, 2  ;;  %v1607_v50 = vadd.f32 %v1534_v30, %v1378_v44  ;;  %v11995_v56 = vmul.f32 %v15132_v57, %v15302_v61  ;;  %v15305_v44 = vld [vmem:[#allocation39_spill] sm:$0xff] }
 0x172   : > { %v11981_v15 = vsel %vm2368_vm5, %v15293_v10, %v15292_v26  ;;  %v1054_v8 = vsel %vm1007_vm1, %v15298_v49, %v15296_v33  ;;  %v15301_v59 = vmov %v15296_v33  ;;  %v15304_v26 = vld [vmem:[#allocation65_spill] sm:$0xff]  ;;  %v12001_v13 = vmul.f32 %v15134_v6, %v15302_v61 }
 0x173   : > { %15294 = vst [vmem:[#allocation76_spill] sm:$0xff] %v11981_v15  ;;  %v1056_v19 = vsel %vm1007_vm1, %v15301_v59, %v15300_v36  ;;  %v1137_v48 = vadd.f32 %v1054_v8, %v917_v54  ;;  %15303 = vst [vmem:[#allocation25_spill] sm:$0xff] %v11995_v56  ;;  %v1188_v10 = vmul.f32 %v15132_v57, %v15304_v26  ;;  %v15306_v15 = vld [vmem:[#allocation38_spill] sm:$0xff] }
 0x174   : > { %v1138_v38 = vadd.f32 %v1056_v19, %v918_v7  ;;  %v1412_v33 = vmul.f32 %v15134_v6, %v15304_v26  ;;  %v12007_v27 = vmul.f32 %v10428_v63, %v15302_v61  ;;  %v1831_v54 = vadd.f32 %v1758_v21, %v1607_v50  ;;  %v15307_v61 = vld [vmem:[#allocation45_spill] sm:$0xff] }
 0x175   : > { %v14958_v7 = vrot.slane %v11995_v56, 2  ;;  %v1636_v30 = vmul.f32 %v10428_v63, %v15304_v26  ;;  %v12014_v49 = vmul.f32 %v10430_v0, %v15305_v44  ;;  %v1282_v8 = vrot.slane %v1188_v10, 2 }
 0x176   : > { %v14959_v18 = vrot.slane %v12001_v13, 3  ;;  %v1509_v36 = vrot.slane %v1412_v33, 3  ;;  %v2064_v19 = vadd.f32 %v1991_v37, %v1831_v54  ;;  %v1870_v21 = vmul.f32 %v10430_v0, %v15306_v15 }
 0x177   : > { %v1733_v23 = vrot.slane %v1636_v30, 4  ;;  %v1283_v26 = vsel %vm1007_vm1, %v14958_v7, %v1282_v8  ;;  %v15308_v22 = vrot.slane %v15307_v61, 2  ;;  %v15309_v37 = vrot.slane %v11593_v55, 3 }
 0x178   : > { %v1510_v33 = vsel %vm1463_vm2, %v14959_v18, %v1509_v36  ;;  %v12033_v30 = vadd.f32 %v2215_v42, %v2064_v19  ;;  %v1366_v59 = vadd.f32 %v1283_v26, %v1137_v48  ;;  %v15310_v56 = vrot.slane %v12007_v27, 4 }
 0x179   : > { %v1285_v10 = vsel %vm1007_vm1, %v1282_v8, %v15308_v22  ;;  %v1512_v54 = vsel %vm1463_vm2, %v1509_v36, %v15309_v37  ;;  %v15311_v61 = vrot.slane %v11599_v52, 4  ;;  %v1966_v8 = vrot.slane %v1870_v21, 4 }
 0x17a   : > { %v1367_v50 = vadd.f32 %v1285_v10, %v1138_v38  ;;  %v1734_v7 = vsel %vm1687_vm3, %v15310_v56, %v1733_v23  ;;  %v12043_v18 = vmul.f32 %v10436_v2, %v15305_v44  ;;  %v2093_v55 = vmul.f32 %v10436_v2, %v15306_v15 }
 0x17b   : > { %v1736_v22 = vsel %vm1687_vm3, %v1733_v23, %v15311_v61  ;;  %v1595_v42 = vadd.f32 %v1510_v33, %v1366_v59  ;;  %v12049_v48 = vmul.f32 %v11643_v53, %v15305_v44  ;;  %v2317_v56 = vmul.f32 %v11643_v53, %v15306_v15  ;;  %v1841_v33 = vpop.permute.xlu0 %1840 }
 0x17c   : > { %v1596_v36 = vadd.f32 %v1512_v54, %v1367_v50  ;;  %v15312_v52 = vrot.slane %v12014_v49, 4  ;;  %v15313_v38 = vrot.slane %v11607_v17, 4  ;;  %v2188_v19 = vrot.slane %v12043_v18, 5 }
 0x17d   : > { %v2190_v21 = vrot.slane %v2093_v55, 5  ;;  %v1819_v59 = vadd.f32 %v1734_v7, %v1595_v42  ;;  %v14969_v10 = vrot.slane %v12049_v48, 6  ;;  %v2414_v44 = vrot.slane %v2317_v56, 6 }
 0x17e   : > { %v1967_v23 = vsel %vm1687_vm3, %v15312_v52, %v1966_v8  ;;  %v1969_v26 = vsel %vm1687_vm3, %v1966_v8, %v15313_v38  ;;  %v1820_v50 = vadd.f32 %v1736_v22, %v1596_v36  ;;  %v15314_v37 = vrot.slane %v11623_v28, 5 }
 0x17f   : > { %v2191_v15 = vsel %vm2144_vm4, %v2188_v19, %v2190_v21  ;;  %v674_v17 = vmul.f32 %v10412_v58, %v15270_v5  ;;  %v15315_v61 = vrot.slane %v11851_v4, 3  ;;  %v15316_v7 = vrot.slane %v11731_v62, 3 }
 0x180   : > { %v2193_v54 = vsel %vm2144_vm4, %v2190_v21, %v15314_v37  ;;  %v2052_v8 = vadd.f32 %v1967_v23, %v1819_v59  ;;  %v2053_v55 = vadd.f32 %v1969_v26, %v1820_v50  ;;  %v2415_v42 = vsel %vm2368_vm5, %v14969_v10, %v2414_v44 }
 0x181   : > { %v1536_v22 = vsel %vm1463_vm2, %v15316_v7, %v15315_v61  ;;  %v15317_v36 = vrot.slane %v11647_v32, 6  ;;  %v15318_v56 = vrot.slane %v11889_v43, 1  ;;  %v15319_v38 = vrot.slane %v11855_v40, 4  ;;  %v15321_v32 = vld [vmem:[#allocation90_spill] sm:$0xff]  ;;  %v15323_v61 = vld [vmem:[#allocation83_spill] sm:$0xff] }
 0x182   : > { %v15320_v4 = vrot.slane %v11739_v35, 4  ;;  %v1883_v23 = vmul.f32 %v10430_v0, %v1841_v33  ;;  %v2106_v26 = vmul.f32 %v10436_v2, %v1841_v33  ;;  %v2276_v21 = vadd.f32 %v2191_v15, %v2052_v8  ;;  %v15326_v15 = vld [vmem:[#allocation91_spill] sm:$0xff] }
 0x183   : > { %v2417_v28 = vsel %vm2368_vm5, %v2414_v44, %v15317_v36  ;;  %v930_v52 = vadd.f32 %v15318_v56, %v674_v17  ;;  %v2277_v59 = vadd.f32 %v2193_v54, %v2053_v55  ;;  %v2330_v50 = vmul.f32 %v11643_v53, %v1841_v33 }
 0x184   : > { %v1760_v62 = vsel %vm1687_vm3, %v15320_v4, %v15319_v38  ;;  %v645_v44 = vmul.f32 %v10412_v58, %v15321_v32  ;;  %v15322_v43 = vrot.slane %v11901_v24, 2  ;;  %v1992_v17 = vrot.slane %v1883_v23, 4  ;;  %v15324_v38 = vld [vmem:[#allocation86_spill] sm:$0xff] }
 0x185   : > { %v2216_v40 = vrot.slane %v2106_v26, 5  ;;  %v646_v35 = vmul.f32 %v10412_v58, %v15323_v61  ;;  %v2500_v7 = vadd.f32 %v2415_v42, %v2276_v21  ;;  %v2501_v36 = vadd.f32 %v2417_v28, %v2277_v59 }
 0x186   : > { %v1150_v37 = vadd.f32 %v15322_v43, %v930_v52  ;;  %v2440_v56 = vrot.slane %v2330_v50, 6  ;;  %v15325_v4 = vrot.slane %v15324_v38, 1  ;;  %v15327_v54 = vrot.slane %v15326_v15, 1 }
 0x187   : > { %v15328_v8 = vrot.slane %v11723_v51, 2  ;;  %v15329_v24 = vrot.slane %v11933_v60, 4  ;;  %v15330_v23 = vrot.slane %v11941_v9, 5  ;;  %v15331_v42 = vrot.slane %v15242_v14, 1 }
 0x188   : > { %v802_v33 = vsel %vm787_vm0, %v15327_v54, %v15325_v4  ;;  %v15332_v28 = vmov %v15325_v4  ;;  %v2543_v59 = vadd.f32 %v11906_v46, %v2500_v7  ;;  %v2544_v50 = vadd.f32 %v11906_v46, %v2501_v36  ;;  %v15336_v4 = vld [vmem:[#allocation92_spill] sm:$0xff] }
 0x189   : > { %v1379_v55 = vadd.f32 %v15328_v8, %v1150_v37  ;;  %v1993_v52 = vsel %vm1687_vm3, %v15329_v24, %v1992_v17  ;;  %v2217_v26 = vsel %vm2144_vm4, %v15330_v23, %v2216_v40  ;;  %v804_v21 = vsel %vm787_vm0, %v15332_v28, %v15331_v42  ;;  %v15334_v17 = vld [vmem:[#allocation87_spill] sm:$0xff] }
 0x18a   : > { %v15333_v51 = vrot.slane %v11944_v3, 6  ;;  %v901_v43 = vadd.f32 %v802_v33, %v645_v44  ;;  %v902_v9 = vadd.f32 %v804_v21, %v646_v35  ;;  %v15335_v40 = vrot.slane %v15334_v17, 2 }
 0x18b   : > { %v1608_v37 = vadd.f32 %v1536_v22, %v1379_v55  ;;  %v15337_v14 = vrot.slane %v15336_v4, 2  ;;  %v15338_v54 = vrot.slane %v15249_v1, 2  ;;  %v2579_v8 = vmax.f32 %v2543_v59, 0.0 }
 0x18c   : > { %v12119_v60 = vsel %vm2368_vm5, %v15333_v51, %v2440_v56  ;;  %v15339_v7 = vmov %v15335_v40  ;;  %v2580_v3 = vmax.f32 %v2544_v50, 0.0  ;;  %v12133_v44 = vmul.f32 %v15132_v57, %v15239_v11 }
 0x18d   : > { %v1022_v38 = vsel %vm1007_vm1, %v15337_v14, %v15335_v40  ;;  %v1024_v36 = vsel %vm1007_vm1, %v15339_v7, %v15338_v54  ;;  %v1832_v22 = vadd.f32 %v1760_v62, %v1608_v37  ;;  %v1172_v56 = vmul.f32 %v15132_v57, %v15244_v41 }
 0x18e   : > { %v1121_v24 = vadd.f32 %v1022_v38, %v901_v43  ;;  %v1122_v35 = vadd.f32 %v1024_v36, %v902_v9  ;;  %v12139_v33 = vmul.f32 %v15134_v6, %v15239_v11  ;;  %v2640_v1 = vpack.c.bf16 %v2580_v3, %v2579_v8 }
 0x18f   : > { %v14968_v55 = vrot.slane %v12133_v44, 2  ;;  %v1396_v23 = vmul.f32 %v15134_v6, %v15244_v41  ;;  %v12146_v42 = vmul.f32 %v10428_v63, %v15239_v11  ;;  %v2065_v28 = vadd.f32 %v1993_v52, %v1832_v22 }
 0x190   : > { %v1250_v62 = vrot.slane %v1172_v56, 2  ;;  %v14965_v21 = vrot.slane %v12139_v33, 3  ;;  %v1620_v59 = vmul.f32 %v10428_v63, %v15244_v41  ;;  %8993 = vmatprep.subr.bf16.mxu0 %v2640_v1  ;;  %v12154_v43 = vmul.f32 %v10430_v0, %v15171_v39 }
 0x191   : > { %v1477_v50 = vrot.slane %v1396_v23, 3  ;;  %v14964_v51 = vrot.slane %v12146_v42, 4  ;;  %v1854_v37 = vmul.f32 %v10430_v0, %v15172_v34  ;;  %v12158_v9 = vadd.f32 %v2217_v26, %v2065_v28 }
 0x192   : > { %v1251_v52 = vsel %vm1007_vm1, %v14968_v55, %v1250_v62  ;;  %v15340_v17 = vrot.slane %v11785_v12, 2  ;;  %v1701_v14 = vrot.slane %v1620_v59, 4  ;;  %v15341_v36 = vrot.slane %v11791_v47, 3 }
 0x193   : > { %v1350_v38 = vadd.f32 %v1251_v52, %v1121_v24  ;;  %v1478_v7 = vsel %vm1463_vm2, %v14965_v21, %v1477_v50  ;;  %v15342_v3 = vrot.slane %v11799_v25, 4  ;;  %v14962_v22 = vrot.slane %v12154_v43, 4  ;;  %v15365_v21 = vld [vmem:[#allocation66_spill] sm:$0xff] }
 0x194   : > { %v1253_v40 = vsel %vm1007_vm1, %v1250_v62, %v15340_v17  ;;  %v1480_v26 = vsel %vm1463_vm2, %v1477_v50, %v15341_v36  ;;  %v1702_v8 = vsel %vm1687_vm3, %v14964_v51, %v1701_v14  ;;  %v1934_v24 = vrot.slane %v1854_v37, 4 }
 0x195   : > { %v1351_v54 = vadd.f32 %v1253_v40, %v1122_v35  ;;  %v1704_v12 = vsel %vm1687_vm3, %v1701_v14, %v15342_v3  ;;  %v1579_v35 = vadd.f32 %v1478_v7, %v1350_v38  ;;  %v12181_v1 = vmul.f32 %v10436_v2, %v15171_v39  ;;  %v15344_v38 = vld [vmem:[#allocation57_spill] sm:$0xff] }
 0x196   : > { %v2077_v47 = vmul.f32 %v10436_v2, %v15172_v34  ;;  %v1935_v23 = vsel %vm1687_vm3, %v14962_v22, %v1934_v24  ;;  %v15343_v25 = vrot.slane %v11808_v16, 4  ;;  %v12193_v62 = vmul.f32 %v11643_v53, %v15171_v39 }
 0x197   : > { %v1580_v56 = vadd.f32 %v1480_v26, %v1351_v54  ;;  %v2301_v59 = vmul.f32 %v11643_v53, %v15172_v34  ;;  %v1803_v50 = vadd.f32 %v1702_v8, %v1579_v35  ;;  %v14961_v52 = vrot.slane %v12181_v1, 5  ;;  %v15345_v54 = vld [vmem:[#allocation26_spill] sm:$0xff]  ;;  %v15348_v35 = vld [vmem:[#allocation28_spill] sm:$0xff] }
 0x198   : > { %v1937_v28 = vsel %vm1687_vm3, %v1934_v24, %v15343_v25  ;;  %v2158_v17 = vrot.slane %v2077_v47, 5  ;;  %v14960_v40 = vrot.slane %v12193_v62, 6  ;;  %v659_v16 = vmul.f32 %v10412_v58, %v15344_v38  ;;  %v15350_v47 = vld [vmem:[#allocation61_spill] sm:$0xff] }
 0x199   : > { %v1804_v37 = vadd.f32 %v1704_v12, %v1580_v56  ;;  %v2382_v14 = vrot.slane %v2301_v59, 6  ;;  %v660_v7 = vmul.f32 %v10412_v58, %v15345_v54  ;;  %v2036_v36 = vadd.f32 %v1935_v23, %v1803_v50 }
 0x19a   : > { %v2159_v34 = vsel %vm2144_vm4, %v14961_v52, %v2158_v17  ;;  %v15346_v26 = vrot.slane %v11820_v20, 5  ;;  %v15347_v12 = vrot.slane %v11846_v45, 6  ;;  %v15349_v56 = vrot.slane %v15348_v35, 1  ;;  %v15356_v52 = vld [vmem:[#allocation62_spill] sm:$0xff] }
 0x19b   : > { %v2037_v39 = vadd.f32 %v1937_v28, %v1804_v37  ;;  %v2383_v3 = vsel %vm2368_vm5, %v14960_v40, %v2382_v14  ;;  %v15351_v23 = vrot.slane %v15350_v47, 1  ;;  %v15352_v28 = vrot.slane %v15284_v31, 1  ;;  %v15354_v40 = vld [vmem:[#allocation30_spill] sm:$0xff] }
 0x19c   : > { %v2161_v8 = vsel %vm2144_vm4, %v2158_v17, %v15346_v26  ;;  %v2385_v24 = vsel %vm2368_vm5, %v2382_v14, %v15347_v12  ;;  %v15353_v20 = vmov %v15349_v56  ;;  %v2260_v50 = vadd.f32 %v2159_v34, %v2036_v36  ;;  %v15361_v36 = vld [vmem:[#allocation77_spill] sm:$0xff] }
 0x19d   : > { %v830_v25 = vsel %vm787_vm0, %v15351_v23, %v15349_v56  ;;  %v832_v59 = vsel %vm787_vm0, %v15353_v20, %v15352_v28  ;;  %v2261_v37 = vadd.f32 %v2161_v8, %v2037_v39  ;;  %v15355_v45 = vrot.slane %v15354_v40, 2  ;;  %v15360_v23 = vld [vmem:[#allocation78_spill] sm:$0xff] }
 0x19e   : > { %v915_v17 = vadd.f32 %v830_v25, %v659_v16  ;;  %v916_v26 = vadd.f32 %v832_v59, %v660_v7  ;;  %v15357_v14 = vrot.slane %v15356_v52, 2  ;;  %v15358_v22 = vrot.slane %v15297_v29, 2 }
 0x19f   : > { %v15359_v56 = vmov %v15355_v45  ;;  %v12237_v35 = vmul.f32 %v15132_v57, %v15360_v23  ;;  %v1186_v16 = vmul.f32 %v15132_v57, %v15361_v36  ;;  %v2484_v7 = vadd.f32 %v2383_v3, %v2260_v50  ;;  %v15362_v50 = vld [vmem:[#allocation25_spill] sm:$0xff] }
 0x1a0   : > { %v1050_v12 = vsel %vm1007_vm1, %v15357_v14, %v15355_v45  ;;  %v1052_v31 = vsel %vm1007_vm1, %v15359_v56, %v15358_v22  ;;  %v2485_v39 = vadd.f32 %v2385_v24, %v2261_v37  ;;  %v12244_v29 = vmul.f32 %v15134_v6, %v15360_v23 }
 0x1a1   : > { %v1135_v34 = vadd.f32 %v1050_v12, %v915_v17  ;;  %v1136_v8 = vadd.f32 %v1052_v31, %v916_v26  ;;  %v14963_v25 = vrot.slane %v12237_v35, 2  ;;  %v1278_v28 = vrot.slane %v1186_v16, 2 }
 0x1a2   : > { %v1410_v22 = vmul.f32 %v15134_v6, %v15361_v36  ;;  %v2527_v40 = vadd.f32 %v11906_v46, %v2484_v7  ;;  %v2528_v20 = vadd.f32 %v11906_v46, %v2485_v39  ;;  %v12252_v3 = vmul.f32 %v10428_v63, %v15360_v23 }
 0x1a3   : > { %v1634_v24 = vmul.f32 %v10428_v63, %v15361_v36  ;;  %v1279_v59 = vsel %vm1007_vm1, %v14963_v25, %v1278_v28  ;;  %v15363_v37 = vrot.slane %v15362_v50, 2  ;;  %v14967_v26 = vrot.slane %v12244_v29, 3 }
 0x1a4   : > { %v1505_v45 = vrot.slane %v1410_v22, 3  ;;  %v2563_v14 = vmax.f32 %v2527_v40, 0.0  ;;  %v2564_v12 = vmax.f32 %v2528_v20, 0.0  ;;  %v1364_v56 = vadd.f32 %v1279_v59, %v1135_v34  ;;  %v15367_v40 = vld [vmem:[#allocation65_spill] sm:$0xff] }
 0x1a5   : > { %v1281_v17 = vsel %vm1007_vm1, %v1278_v28, %v15363_v37  ;;  %v15364_v7 = vrot.slane %v12001_v13, 3  ;;  %v14966_v25 = vrot.slane %v12252_v3, 4  ;;  %v1729_v50 = vrot.slane %v1634_v24, 4 }
 0x1a6   : > { %v1365_v31 = vadd.f32 %v1281_v17, %v1136_v8  ;;  %v1506_v16 = vsel %vm1463_vm2, %v14967_v26, %v1505_v45  ;;  %v2632_v51 = vpack.c.bf16 %v2564_v12, %v2563_v14  ;;  %v12272_v22 = vmul.f32 %v10430_v0, %v15365_v21 }
 0x1a7   : > { %v1508_v39 = vsel %vm1463_vm2, %v1505_v45, %v15364_v7  ;;  %v1593_v28 = vadd.f32 %v1506_v16, %v1364_v56  ;;  %v1730_v34 = vsel %vm1687_vm3, %v14966_v25, %v1729_v50  ;;  %v15366_v8 = vrot.slane %v12007_v27, 4  ;;  %v15368_v7 = vld [vmem:[#allocation12_spill] sm:$0xff] }
 0x1a8   : > { %v1594_v37 = vadd.f32 %v1508_v39, %v1365_v31  ;;  %v1868_v20 = vmul.f32 %v10430_v0, %v15367_v40  ;;  %v12284_v24 = vmul.f32 %v10436_v2, %v15365_v21  ;;  %8994 = vmatpush3.bf16.msra.mxu0 %v2632_v51  ;;  %v1960_v45 = vrot.slane %v12272_v22, 4  ;;  %v15369_v39 = vld [vmem:[#allocation29_spill] sm:$0xff] }
 0x1a9   : > { %v1732_v13 = vsel %vm1687_vm3, %v1729_v50, %v15366_v8  ;;  %v1817_v59 = vadd.f32 %v1730_v34, %v1593_v28  ;;  %v2091_v14 = vmul.f32 %v10436_v2, %v15367_v40  ;;  %v12292_v56 = vmul.f32 %v11643_v53, %v15365_v21  ;;  %v15370_v28 = vld [vmem:[#allocation31_spill] sm:$0xff]  ;;  %v15372_v34 = vld [vmem:[#allocation18_spill] sm:$0xff] }
 0x1aa   : > { %v1818_v17 = vadd.f32 %v1732_v13, %v1594_v37  ;;  %v1962_v12 = vrot.slane %v1868_v20, 4  ;;  %v14970_v27 = vrot.slane %v12284_v24, 5  ;;  %v2315_v31 = vmul.f32 %v11643_v53, %v15367_v40 }
 0x1ab   : > { %v2186_v16 = vrot.slane %v2091_v14, 5  ;;  %v643_v51 = vmul.f32 %v10412_v58, %v15368_v7  ;;  %v644_v50 = vmul.f32 %v10412_v58, %v15369_v39  ;;  %v15371_v37 = vrot.slane %v15370_v28, 1 }
 0x1ac   : > { %v15373_v8 = vrot.slane %v15372_v34, 1  ;;  %v1963_v21 = vsel %vm1687_vm3, %v1960_v45, %v1962_v12  ;;  %v15374_v20 = vrot.slane %v12014_v49, 4  ;;  %v14971_v14 = vrot.slane %v12292_v56, 6 }
 0x1ad   : > { %v2410_v25 = vrot.slane %v2315_v31, 6  ;;  %v2050_v26 = vadd.f32 %v1963_v21, %v1817_v59  ;;  %v2187_v10 = vsel %vm2144_vm4, %v14970_v27, %v2186_v16  ;;  %v15375_v49 = vrot.slane %v12049_v48, 6 }
 0x1ae   : > { %v798_v13 = vsel %vm787_vm0, %v15373_v8, %v15371_v37  ;;  %v1965_v40 = vsel %vm1687_vm3, %v1962_v12, %v15374_v20  ;;  %v2189_v37 = vsel %vm2144_vm4, %v2186_v16, %v2188_v19  ;;  %v15376_v31 = vrot.slane %v15326_v15, 1  ;;  %v15380_v16 = vld [vmem:[#allocation40_spill] sm:$0xff] }
 0x1af   : > { %v2051_v55 = vadd.f32 %v1965_v40, %v1818_v17  ;;  %v2411_v34 = vsel %vm2368_vm5, %v14971_v14, %v2410_v25  ;;  %v2413_v12 = vsel %vm2368_vm5, %v2410_v25, %v15375_v49  ;;  %v15377_v59 = vrot.slane %v15370_v28, 1  ;;  %v15378_v40 = vld [vmem:[#allocation13_spill] sm:$0xff] }
 0x1b0   : > { %v899_v8 = vadd.f32 %v798_v13, %v643_v51  ;;  %v2274_v21 = vadd.f32 %v2187_v10, %v2050_v26  ;;  %v15379_v19 = vrot.slane %v15378_v40, 2  ;;  %v15381_v27 = vrot.slane %v15380_v16, 2 }
 0x1b1   : > { %v800_v17 = vsel %vm787_vm0, %v15377_v59, %v15376_v31  ;;  %v2275_v20 = vadd.f32 %v2189_v37, %v2051_v55  ;;  %v15382_v48 = vrot.slane %v15336_v4, 2  ;;  %v1170_v28 = vmul.f32 %v15132_v57, %v15323_v61  ;;  %v15384_v59 = vld [vmem:[#allocation43_spill] sm:$0xff] }
 0x1b2   : > { %v900_v18 = vadd.f32 %v800_v17, %v644_v50  ;;  %v1018_v14 = vsel %vm1007_vm1, %v15381_v27, %v15379_v19  ;;  %v15383_v25 = vmov %v15379_v19  ;;  %v12343_v10 = vmul.f32 %v15134_v6, %v15321_v32 }
 0x1b3   : > { %v1020_v15 = vsel %vm1007_vm1, %v15383_v25, %v15382_v48  ;;  %v1119_v49 = vadd.f32 %v1018_v14, %v899_v8  ;;  %v2498_v55 = vadd.f32 %v2411_v34, %v2274_v21  ;;  %v2499_v26 = vadd.f32 %v2413_v12, %v2275_v20 }
 0x1b4   : > { %v1120_v51 = vadd.f32 %v1020_v15, %v900_v18  ;;  %v1394_v27 = vmul.f32 %v15134_v6, %v15323_v61  ;;  %v1246_v50 = vrot.slane %v1170_v28, 2  ;;  %v1471_v4 = vrot.slane %v12343_v10, 3 }
 0x1b5   : > { %v12350_v13 = vmul.f32 %v10428_v63, %v15321_v32  ;;  %v1618_v14 = vmul.f32 %v10428_v63, %v15323_v61  ;;  %v2541_v37 = vadd.f32 %v11906_v46, %v2498_v55  ;;  %v2542_v31 = vadd.f32 %v11906_v46, %v2499_v26 }
 0x1b6   : > { %v1473_v34 = vrot.slane %v1394_v27, 3  ;;  %v12358_v12 = vmul.f32 %v10430_v0, %v15239_v11  ;;  %v15385_v17 = vrot.slane %v15384_v59, 2  ;;  %v15386_v21 = vrot.slane %v12133_v44, 2 }
 0x1b7   : > { %v1695_v18 = vrot.slane %v12350_v13, 4  ;;  %v1697_v40 = vrot.slane %v1618_v14, 4  ;;  %v2577_v19 = vmax.f32 %v2541_v37, 0.0  ;;  %v2578_v16 = vmax.f32 %v2542_v31, 0.0 }
 0x1b8   : > { %v1247_v8 = vsel %vm1007_vm1, %v15385_v17, %v1246_v50  ;;  %v1249_v20 = vsel %vm1007_vm1, %v1246_v50, %v15386_v21  ;;  %v1474_v15 = vsel %vm1463_vm2, %v1471_v4, %v1473_v34  ;;  %v15387_v28 = vrot.slane %v12139_v33, 3 }
 0x1b9   : > { %v1348_v48 = vadd.f32 %v1247_v8, %v1119_v49  ;;  %v1349_v25 = vadd.f32 %v1249_v20, %v1120_v51  ;;  %v1698_v44 = vsel %vm1687_vm3, %v1695_v18, %v1697_v40  ;;  %v15388_v26 = vrot.slane %v12146_v42, 4 }
 0x1ba   : > { %v1476_v55 = vsel %vm1463_vm2, %v1473_v34, %v15387_v28  ;;  %v2639_v50 = vpack.c.bf16 %v2578_v16, %v2577_v19  ;;  %v1852_v51 = vmul.f32 %v10430_v0, %v15244_v41  ;;  %v1928_v37 = vrot.slane %v12358_v12, 4  ;;  %v15389_v19 = vld [vmem:[#allocation32_spill] sm:$0xff]  ;;  %v15391_v28 = vld [vmem:[#allocation58_spill] sm:$0xff] }
 0x1bb   : > { %v1700_v27 = vsel %vm1687_vm3, %v1697_v40, %v15388_v26  ;;  %v1577_v14 = vadd.f32 %v1474_v15, %v1348_v48  ;;  %v1578_v49 = vadd.f32 %v1476_v55, %v1349_v25  ;;  %v12384_v33 = vmul.f32 %v10436_v2, %v15239_v11 }
 0x1bc   : > { %v2075_v31 = vmul.f32 %v10436_v2, %v15244_v41  ;;  %v12390_v42 = vmul.f32 %v11643_v53, %v15239_v11  ;;  %8995 = vmatprep.subr.bf16.mxu0 %v2639_v50  ;;  %v1930_v17 = vrot.slane %v1852_v51, 4  ;;  %v2299_v8 = vmul.f32 %v11643_v53, %v15244_v41  ;;  %v15394_v51 = vld [vmem:[#allocation63_spill] sm:$0xff] }
 0x1bd   : > { %v1801_v34 = vadd.f32 %v1698_v44, %v1577_v14  ;;  %v1802_v59 = vadd.f32 %v1700_v27, %v1578_v49  ;;  %v14973_v21 = vrot.slane %v12384_v33, 5  ;;  %v657_v16 = vmul.f32 %v10412_v58, %v15389_v19 }
 0x1be   : > { %v2154_v20 = vrot.slane %v2075_v31, 5  ;;  %v14972_v40 = vrot.slane %v12390_v42, 6  ;;  %v1931_v11 = vsel %vm1687_vm3, %v1928_v37, %v1930_v17  ;;  %v15390_v48 = vrot.slane %v12154_v43, 4 }
 0x1bf   : > { %v2378_v15 = vrot.slane %v2299_v8, 6  ;;  %v658_v41 = vmul.f32 %v10412_v58, %v15391_v28  ;;  %v2034_v55 = vadd.f32 %v1931_v11, %v1801_v34  ;;  %v15392_v27 = vrot.slane %v12181_v1, 5  ;;  %v15396_v34 = vld [vmem:[#allocation34_spill] sm:$0xff] }
 0x1c0   : > { %v1933_v25 = vsel %vm1687_vm3, %v1930_v17, %v15390_v48  ;;  %v2155_v26 = vsel %vm2144_vm4, %v14973_v21, %v2154_v20  ;;  %v15393_v14 = vrot.slane %v12193_v62, 6  ;;  %v15395_v31 = vrot.slane %v15394_v51, 1 }
 0x1c1   : > { %v2035_v44 = vadd.f32 %v1933_v25, %v1802_v59  ;;  %v2157_v50 = vsel %vm2144_vm4, %v2154_v20, %v15392_v27  ;;  %v2379_v43 = vsel %vm2368_vm5, %v14972_v40, %v2378_v15  ;;  %v15397_v59 = vrot.slane %v15396_v34, 1  ;;  %v15400_v27 = vld [vmem:[#allocation64_spill] sm:$0xff]  ;;  %v15402_v40 = vld [vmem:[#allocation35_spill] sm:$0xff] }
 0x1c2   : > { %v2381_v49 = vsel %vm2368_vm5, %v2378_v15, %v15393_v14  ;;  %v15398_v8 = vrot.slane %v15350_v47, 1  ;;  %v15399_v1 = vmov %v15395_v31  ;;  %v2258_v19 = vadd.f32 %v2155_v26, %v2034_v55 }
 0x1c3   : > { %v826_v17 = vsel %vm787_vm0, %v15397_v59, %v15395_v31  ;;  %v2259_v11 = vadd.f32 %v2157_v50, %v2035_v44  ;;  %v15401_v62 = vrot.slane %v15400_v27, 2  ;;  %v15403_v15 = vrot.slane %v15402_v40, 2 }
 0x1c4   : > { %v828_v20 = vsel %vm787_vm0, %v15399_v1, %v15398_v8  ;;  %v913_v48 = vadd.f32 %v826_v17, %v657_v16  ;;  %v15404_v21 = vrot.slane %v15356_v52, 2  ;;  %v12440_v51 = vmul.f32 %v15132_v57, %v15344_v38 }
 0x1c5   : > { %v914_v25 = vadd.f32 %v828_v20, %v658_v41  ;;  %v1046_v14 = vsel %vm1007_vm1, %v15403_v15, %v15401_v62  ;;  %v15405_v31 = vmov %v15401_v62  ;;  %v1184_v16 = vmul.f32 %v15132_v57, %v15345_v54 }
 0x1c6   : > { %v1048_v47 = vsel %vm1007_vm1, %v15405_v31, %v15404_v21  ;;  %v2482_v41 = vadd.f32 %v2379_v43, %v2258_v19  ;;  %v2483_v55 = vadd.f32 %v2381_v49, %v2259_v11  ;;  %v1133_v44 = vadd.f32 %v1046_v14, %v913_v48 }
 0x1c7   : > { %v1134_v26 = vadd.f32 %v1048_v47, %v914_v25  ;;  %v1272_v50 = vrot.slane %v12440_v51, 2  ;;  %v1274_v59 = vrot.slane %v1184_v16, 2  ;;  %v12447_v52 = vmul.f32 %v15134_v6, %v15344_v38 }
 0x1c8   : > { %v1408_v21 = vmul.f32 %v15134_v6, %v15345_v54  ;;  %v2525_v17 = vadd.f32 %v11906_v46, %v2482_v41  ;;  %v2526_v8 = vadd.f32 %v11906_v46, %v2483_v55  ;;  %v12455_v43 = vmul.f32 %v10428_v63, %v15344_v38 }
 0x1c9   : > { %v1632_v49 = vmul.f32 %v10428_v63, %v15345_v54  ;;  %v1275_v1 = vsel %vm1007_vm1, %v1272_v50, %v1274_v59  ;;  %v15406_v20 = vrot.slane %v12237_v35, 2  ;;  %v1499_v11 = vrot.slane %v12447_v52, 3 }
 0x1ca   : > { %v1501_v48 = vrot.slane %v1408_v21, 3  ;;  %v2561_v25 = vmax.f32 %v2525_v17, 0.0  ;;  %v2562_v27 = vmax.f32 %v2526_v8, 0.0  ;;  %v1362_v62 = vadd.f32 %v1275_v1, %v1133_v44 }
 0x1cb   : > { %v1277_v19 = vsel %vm1007_vm1, %v1274_v59, %v15406_v20  ;;  %v15407_v14 = vrot.slane %v12244_v29, 3  ;;  %v1723_v47 = vrot.slane %v12455_v43, 4  ;;  %v1725_v35 = vrot.slane %v1632_v49, 4 }
 0x1cc   : > { %v1363_v15 = vadd.f32 %v1277_v19, %v1134_v26  ;;  %v1502_v38 = vsel %vm1463_vm2, %v1499_v11, %v1501_v48  ;;  %v2631_v16 = vpack.c.bf16 %v2562_v27, %v2561_v25  ;;  %v12475_v59 = vmul.f32 %v10430_v0, %v15360_v23 }
 0x1cd   : > { %v1504_v31 = vsel %vm1463_vm2, %v1501_v48, %v15407_v14  ;;  %v1591_v41 = vadd.f32 %v1502_v38, %v1362_v62  ;;  %v1726_v44 = vsel %vm1687_vm3, %v1723_v47, %v1725_v35  ;;  %v15408_v26 = vrot.slane %v12252_v3, 4  ;;  %v15409_v62 = vld [vmem:[#allocation41_spill] sm:$0xff]  ;;  %v15411_v38 = vld [vmem:[#allocation44_spill] sm:$0xff] }
 0x1ce   : > { %v1592_v55 = vadd.f32 %v1504_v31, %v1363_v15  ;;  %v1866_v21 = vmul.f32 %v10430_v0, %v15361_v36  ;;  %v12487_v17 = vmul.f32 %v10436_v2, %v15360_v23  ;;  %8996 = vmatpush3.bf16.msra.mxu0 %v2631_v16  ;;  %v1956_v1 = vrot.slane %v12475_v59, 4 }
 0x1cf   : > { %v1728_v29 = vsel %vm1687_vm3, %v1725_v35, %v15408_v26  ;;  %v1815_v8 = vadd.f32 %v1726_v44, %v1591_v41  ;;  %v2089_v20 = vmul.f32 %v10436_v2, %v15361_v36  ;;  %v12495_v48 = vmul.f32 %v11643_v53, %v15360_v23 }
 0x1d0   : > { %v1816_v49 = vadd.f32 %v1728_v29, %v1592_v55  ;;  %v1958_v19 = vrot.slane %v1866_v21, 4  ;;  %v2180_v3 = vrot.slane %v12487_v17, 5  ;;  %v2313_v25 = vmul.f32 %v11643_v53, %v15361_v36  ;;  %v15450_v17 = vld [vmem:[#allocation6_spill] sm:$0xff] }
 0x1d1   : > { %v2182_v27 = vrot.slane %v2089_v20, 5  ;;  %v15410_v15 = vrot.slane %v15409_v62, 2  ;;  %v15412_v14 = vrot.slane %v15411_v38, 2  ;;  %v1392_v35 = vmul.f32 %v15134_v6, %v15369_v39 }
 0x1d2   : > { %v1616_v16 = vmul.f32 %v10428_v63, %v15369_v39  ;;  %v1959_v23 = vsel %vm1687_vm3, %v1956_v1, %v1958_v19  ;;  %v1961_v53 = vsel %vm1687_vm3, %v1958_v19, %v1960_v45  ;;  %v2404_v36 = vrot.slane %v12495_v48, 6  ;;  %v15415_v19 = vld [vmem:[#allocation67_spill] sm:$0xff] }
 0x1d3   : > { %v1243_v31 = vsel %vm1007_vm1, %v15412_v14, %v15410_v15  ;;  %v2406_v41 = vrot.slane %v2313_v25, 6  ;;  %v2048_v55 = vadd.f32 %v1959_v23, %v1815_v8  ;;  %v2049_v44 = vadd.f32 %v1961_v53, %v1816_v49 }
 0x1d4   : > { %v2183_v26 = vsel %vm2144_vm4, %v2180_v3, %v2182_v27  ;;  %v15413_v29 = vrot.slane %v12284_v24, 5  ;;  %v15414_v22 = vrot.slane %v12292_v56, 6  ;;  %v1346_v25 = vadd.f32 %v1243_v31, %v15415_v19  ;;  %v15416_v24 = vld [vmem:[#allocation49_spill] sm:$0xff] }
 0x1d5   : > { %v2407_v20 = vsel %vm2368_vm5, %v2404_v36, %v2406_v41  ;;  %v1469_v8 = vrot.slane %v1392_v35, 3  ;;  %v2272_v49 = vadd.f32 %v2183_v26, %v2048_v55  ;;  %v1693_v15 = vrot.slane %v1616_v16, 4 }
 0x1d6   : > { %v2185_v21 = vsel %vm2144_vm4, %v2182_v27, %v15413_v29  ;;  %v2409_v45 = vsel %vm2368_vm5, %v2406_v41, %v15414_v22  ;;  %v12530_v38 = vmul.f32 %v10430_v0, %v15321_v32  ;;  %v15417_v27 = vrot.slane %v15416_v24, 3  ;;  %v15418_v41 = vld [vmem:[#allocation47_spill] sm:$0xff] }
 0x1d7   : > { %v2273_v62 = vadd.f32 %v2185_v21, %v2049_v44  ;;  %v1472_v56 = vsel %vm1463_vm2, %v1469_v8, %v1471_v4  ;;  %v1850_v23 = vmul.f32 %v10430_v0, %v15323_v61  ;;  %v12542_v31 = vmul.f32 %v10436_v2, %v15321_v32  ;;  %v15419_v44 = vld [vmem:[#allocation50_spill] sm:$0xff] }
 0x1d8   : > { %v1470_v14 = vsel %vm1463_vm2, %v15417_v27, %v1469_v8  ;;  %v2496_v35 = vadd.f32 %v2407_v20, %v2272_v49  ;;  %v1576_v55 = vadd.f32 %v1472_v56, %v15418_v41  ;;  %v15420_v26 = vrot.slane %v15419_v44, 4  ;;  %v15421_v56 = vld [vmem:[#allocation15_spill] sm:$0xff]  ;;  %v15423_v41 = vld [vmem:[#allocation36_spill] sm:$0xff] }
 0x1d9   : > { %v2497_v16 = vadd.f32 %v2409_v45, %v2273_v62  ;;  %v1575_v53 = vadd.f32 %v1470_v14, %v1346_v25  ;;  %v1696_v10 = vsel %vm1687_vm3, %v1693_v15, %v1695_v18  ;;  %v1924_v4 = vrot.slane %v12530_v38, 4  ;;  %v12566_v14 = vld [vmem:[%s14994_s1 + $0x8] ss:$0 sm:$0xff]  ;;  %v15425_v44 = vld [vmem:[#allocation16_spill] sm:$0xff]  ;;  %s10172_s1 = scalar_lea.vmem %s8597_s26, 16 }
 0x1da   : > { %v1694_v29 = vsel %vm1687_vm3, %v15420_v26, %v1693_v15  ;;  %v1926_v21 = vrot.slane %v1850_v23, 4  ;;  %v2539_v22 = vadd.f32 %v11906_v46, %v2496_v35  ;;  %v1800_v45 = vadd.f32 %v1696_v10, %v1576_v55  ;;  %p10173_p11 = scmp.ne.s32.totalorder %s8597_s26, %s10172_s1  ;;  %p10180_p1 = scmp.lt.s32.totalorder %s10178_s18, %s10172_s1 }
 0x1db   : > { %v2540_v19 = vadd.f32 %v11906_v46, %v2497_v16  ;;  %v1799_v20 = vadd.f32 %v1694_v29, %v1575_v53  ;;  %v2073_v13 = vmul.f32 %v10436_v2, %v15323_v61  ;;  %v2148_v18 = vrot.slane %v12542_v31, 5  ;;  %v15422_v16 = vld [vmem:[#allocation33_spill] sm:$0xff]  ;;  %v15457_v31 = vld [vmem:[#allocation19_spill] sm:$0xff] }
 0x1dc   : > { %v1927_v25 = vsel %vm1687_vm3, %v1924_v4, %v1926_v21  ;;  %v1929_v8 = vsel %vm1687_vm3, %v1926_v21, %v1928_v37  ;;  %v2575_v49 = vmax.f32 %v2539_v22, 0.0  ;;  %v12570_v12 = vmul.f32 %v12566_v14, %v15321_v32  ;;  %p10174_p12 = pnand %p10173_p11, %p10341_p5  ;;  %p10181_p2 = por %p10180_p1, %p10179_p0 }
 0x1dd   : > { %v2576_v62 = vmax.f32 %v2540_v19, 0.0  ;;  %v2032_v15 = vadd.f32 %v1927_v25, %v1799_v20  ;;  %v2033_v24 = vadd.f32 %v1929_v8, %v1800_v45  ;;  %v2150_v27 = vrot.slane %v2073_v13, 5 }
 0x1de   : > { %v2297_v37 = vmul.f32 %v12566_v14, %v15323_v61  ;;  %v655_v23 = vmul.f32 %v10412_v58, %v15421_v56  ;;  %v656_v53 = vmul.f32 %v10412_v58, %v15422_v16  ;;  %v15424_v55 = vrot.slane %v15423_v41, 1  ;;  %v15431_v16 = vld [vmem:[#allocation37_spill] sm:$0xff]  ;;  %p10175_p13 = pneg %p10174_p12 }
 0x1df   : > { %v2638_v35 = vpack.c.bf16 %v2576_v62, %v2575_v49  ;;  %v15426_v26 = vrot.slane %v15425_v44, 1  ;;  %v15427_v10 = vrot.slane %v15396_v34, 1  ;;  %v2151_v61 = vsel %vm2144_vm4, %v2148_v18, %v2150_v27  ;;  %v15433_v41 = vld [vmem:[#allocation17_spill] sm:$0xff] }
 0x1e0   : > { %v15428_v32 = vmov %v15424_v55  ;;  %v15429_v22 = vrot.slane %v12384_v33, 5  ;;  %v2372_v20 = vrot.slane %v12570_v12, 6  ;;  %v2374_v45 = vrot.slane %v2297_v37, 6  ;;  %v10171_v12 = vld [vmem:[%s14693_s2] ss:$0 sm:$0xff]  ;;  %p10182_p3 = pnand %p10181_p2, %p10175_p13 }
 0x1e1   : > { %v822_v29 = vsel %vm787_vm0, %v15426_v26, %v15424_v55  ;;  %v824_v21 = vsel %vm787_vm0, %v15428_v32, %v15427_v10  ;;  %8997 = vmatprep.subr.bf16.mxu0 %v2638_v35  ;;  %v2256_v25 = vadd.f32 %v2151_v61, %v2032_v15  ;;  %v15430_v62 = vrot.slane %v12390_v42, 6 }
 0x1e2   : > { %v2153_v19 = vsel %vm2144_vm4, %v2150_v27, %v15429_v22  ;;  %v911_v13 = vadd.f32 %v822_v29, %v655_v23  ;;  %v912_v34 = vadd.f32 %v824_v21, %v656_v53  ;;  %v2375_v49 = vsel %vm2368_vm5, %v2372_v20, %v2374_v45 }
 0x1e3   : > { %v2257_v8 = vadd.f32 %v2153_v19, %v2033_v24  ;;  %v2377_v56 = vsel %vm2368_vm5, %v2374_v45, %v15430_v62  ;;  %v15432_v33 = vrot.slane %v15431_v16, 2  ;;  %v15434_v27 = vrot.slane %v15433_v41, 2 }
 0x1e4   : > { %v15435_v37 = vrot.slane %v15402_v40, 2  ;;  %v2480_v23 = vadd.f32 %v2375_v49, %v2256_v25  ;;  %v1182_v42 = vmul.f32 %v15132_v57, %v15391_v28  ;;  %v1406_v26 = vmul.f32 %v15134_v6, %v15391_v28  ;;  %v15437_v49 = vld [vmem:[#allocation46_spill] sm:$0xff] }
 0x1e5   : > { %v1042_v55 = vsel %vm1007_vm1, %v15434_v27, %v15432_v33  ;;  %v15436_v15 = vmov %v15432_v33  ;;  %v2481_v35 = vadd.f32 %v2377_v56, %v2257_v8  ;;  %v1630_v29 = vmul.f32 %v10428_v63, %v15391_v28  ;;  %v15439_v33 = vld [vmem:[#allocation60_spill] sm:$0xff] }
 0x1e6   : > { %v1044_v24 = vsel %vm1007_vm1, %v15436_v15, %v15435_v37  ;;  %v1131_v53 = vadd.f32 %v1042_v55, %v911_v13  ;;  %v1864_v40 = vmul.f32 %v10430_v0, %v15345_v54  ;;  %v2523_v10 = vadd.f32 %v11906_v46, %v2480_v23 }
 0x1e7   : > { %v1132_v44 = vadd.f32 %v1044_v24, %v912_v34  ;;  %v2524_v32 = vadd.f32 %v11906_v46, %v2481_v35  ;;  %v2087_v21 = vmul.f32 %v10436_v2, %v15345_v54  ;;  %v2311_v61 = vmul.f32 %v12566_v14, %v15345_v54  ;;  %v15441_v24 = vld [vmem:[#allocation84_spill] sm:$0xff] }
 0x1e8   : > { %v1270_v22 = vrot.slane %v1182_v42, 2  ;;  %v1497_v19 = vrot.slane %v1406_v26, 3  ;;  %v1721_v45 = vrot.slane %v1630_v29, 4  ;;  %v1954_v25 = vrot.slane %v1864_v40, 4 }
 0x1e9   : > { %v2559_v8 = vmax.f32 %v2523_v10, 0.0  ;;  %v2560_v13 = vmax.f32 %v2524_v32, 0.0  ;;  %v2178_v28 = vrot.slane %v2087_v21, 5  ;;  %v2402_v34 = vrot.slane %v2311_v61, 6 }
 0x1ea   : > { %v15438_v62 = vrot.slane %v15437_v49, 2  ;;  %v1273_v16 = vsel %vm1007_vm1, %v1270_v22, %v1272_v50  ;;  %v15440_v41 = vrot.slane %v15439_v33, 3  ;;  %v1500_v27 = vsel %vm1463_vm2, %v1497_v19, %v1499_v11  ;;  %v15443_v50 = vld [vmem:[#allocation85_spill] sm:$0xff]  ;;  %v15445_v11 = vld [vmem:[#allocation88_spill] sm:$0xff] }
 0x1eb   : > { %v2630_v55 = vpack.c.bf16 %v2560_v13, %v2559_v8  ;;  %v1361_v15 = vadd.f32 %v1273_v16, %v1132_v44  ;;  %v15442_v23 = vrot.slane %v15441_v24, 4  ;;  %v1724_v51 = vsel %vm1687_vm3, %v1721_v45, %v1723_v47  ;;  %v15447_v47 = vld [vmem:[#allocation89_spill] sm:$0xff] }
 0x1ec   : > { %v1271_v56 = vsel %vm1007_vm1, %v15438_v62, %v1270_v22  ;;  %v1498_v54 = vsel %vm1463_vm2, %v15440_v41, %v1497_v19  ;;  %v15444_v42 = vrot.slane %v15443_v50, 4  ;;  %v1957_v52 = vsel %vm1687_vm3, %v1954_v25, %v1956_v1  ;;  %v15449_v1 = vld [vmem:[#allocation76_spill] sm:$0xff] }
 0x1ed   : > { %v1360_v37 = vadd.f32 %v1271_v56, %v1131_v53  ;;  %v1722_v35 = vsel %vm1687_vm3, %v15442_v23, %v1721_v45  ;;  %v15446_v29 = vrot.slane %v15445_v11, 5  ;;  %8998 = vmatpush3.bf16.msra.mxu0 %v2630_v55  ;;  %v1590_v40 = vadd.f32 %v1500_v27, %v1361_v15 }
 0x1ee   : > { %v1955_v26 = vsel %vm1687_vm3, %v15444_v42, %v1954_v25  ;;  %v2181_v43 = vsel %vm2144_vm4, %v2178_v28, %v2180_v3  ;;  %v15448_v10 = vrot.slane %v15447_v47, 6  ;;  %v2405_v59 = vsel %vm2368_vm5, %v2402_v34, %v2404_v36  ;;  %v15452_v25 = vld [vmem:[#allocation7_spill] sm:$0xff] }
 0x1ef   : > { %v2179_v53 = vsel %vm2144_vm4, %v15446_v29, %v2178_v28  ;;  %v1589_v44 = vadd.f32 %v1498_v54, %v1360_v37  ;;  %v2512_v21 = vadd.f32 %v15449_v1, %v12033_v30  ;;  %v2513_v61 = vadd.f32 %v12119_v60, %v12158_v9  ;;  %v15454_v28 = vld [vmem:[#allocation42_spill] sm:$0xff] }
 0x1f0   : > { %v2403_v32 = vsel %vm2368_vm5, %v15448_v10, %v2402_v34  ;;  %v1814_v19 = vadd.f32 %v1724_v51, %v1590_v40  ;;  %v14974_v45 = vmov 0.0   ;;  %v15451_v3 = vrot.slane %v15450_v17, 4  ;;  %v15462_v17 = vld [vmem:[#allocation71_spill] sm:$0xff] }
 0x1f1   : > { %v1813_v22 = vadd.f32 %v1722_v35, %v1589_v44  ;;  %9365 = vmatprep.subr.bf16.mxu1 %v14974_v45  ;;  %v15453_v8 = vrot.slane %v15452_v25, 4  ;;  %v1847_v48 = vmul.f32 %v10430_v0, %v15368_v7  ;;  %v2555_v36 = vadd.f32 %v11906_v46, %v2512_v21  ;;  %9369 = vmatprep.mubr.msk.bf16.mxu1 %vm10236_vm6, %v14974_v45 }
 0x1f2   : > { %v2556_v30 = vadd.f32 %v11906_v46, %v2513_v61  ;;  %v1848_v9 = vmul.f32 %v10430_v0, %v15369_v39  ;;  %v2047_v49 = vadd.f32 %v1957_v52, %v1814_v19  ;;  %v2070_v56 = vmul.f32 %v10436_v2, %v15368_v7  ;;  %v15455_v52 = vld [vmem:[#allocation68_spill] sm:$0xff] }
 0x1f3   : > { %v1690_v13 = vsel %vm1687_vm3, %v15453_v8, %v15451_v3  ;;  %v2046_v34 = vadd.f32 %v1955_v26, %v1813_v22  ;;  %v1921_v62 = vrot.slane %v1847_v48, 4  ;;  %v2591_v16 = vmax.f32 %v2555_v36, 0.0  ;;  %v15460_v22 = vld [vmem:[#allocation9_spill] sm:$0xff] }
 0x1f4   : > { %v1797_v60 = vadd.f32 %v1690_v13, %v15454_v28  ;;  %v2592_v33 = vmax.f32 %v2556_v30, 0.0  ;;  %v1922_v41 = vrot.slane %v1848_v9, 4  ;;  %v2071_v54 = vmul.f32 %v10436_v2, %v15369_v39  ;;  %v15465_v13 = vld [vmem:[#allocation27_spill] sm:$0xff] }
 0x1f5   : > { %v2270_v27 = vadd.f32 %v2179_v53, %v2046_v34  ;;  %v2271_v55 = vadd.f32 %v2181_v43, %v2047_v49  ;;  %v2145_v37 = vrot.slane %v2070_v56, 5  ;;  %v2294_v15 = vmul.f32 %v12566_v14, %v15368_v7  ;;  %v15466_v49 = vld [vmem:[#allocation48_spill] sm:$0xff] }
 0x1f6   : > { %v2646_v24 = vpack.c.bf16 %v2592_v33, %v2591_v16  ;;  %v1923_v23 = vsel %vm1687_vm3, %v1921_v62, %v1922_v41  ;;  %v1925_v35 = vsel %vm1687_vm3, %v1922_v41, %v1924_v4  ;;  %v2146_v51 = vrot.slane %v2071_v54, 5 }
 0x1f7   : > { %v2494_v50 = vadd.f32 %v2403_v32, %v2270_v27  ;;  %v2495_v42 = vadd.f32 %v2405_v59, %v2271_v55  ;;  %v2030_v26 = vadd.f32 %v1923_v23, %v1797_v60  ;;  %v2031_v11 = vadd.f32 %v1925_v35, %v15455_v52  ;;  %v15456_v32 = vld [vmem:[#allocation5_spill] sm:$0xff]  ;;  %v15469_v55 = vld [vmem:[#allocation74_spill] sm:$0xff] }
 0x1f8   : > { %v2811_v29 = vsel %vm787_vm0, %v2646_v24, 0  ;;  %v2147_v53 = vsel %vm2144_vm4, %v2145_v37, %v2146_v51  ;;  %v2149_v7 = vsel %vm2144_vm4, %v2146_v51, %v2148_v18  ;;  %v2295_v44 = vmul.f32 %v12566_v14, %v15369_v39  ;;  %v15458_v39 = vld [vmem:[#allocation21_spill] sm:$0xff] }
 0x1f9   : > { %v2537_v38 = vadd.f32 %v11906_v46, %v2494_v50  ;;  %v2538_v4 = vadd.f32 %v11906_v46, %v2495_v42  ;;  %9366 = vmatpush3.bf16.msra.mxu1 %v2811_v29  ;;  %v2254_v40 = vadd.f32 %v2147_v53, %v2030_v26  ;;  %v2255_v43 = vadd.f32 %v2149_v7, %v2031_v11  ;;  %v15471_v42 = vld [vmem:[#allocation22_spill] sm:$0xff] }
 0x1fa   : > { %v2369_v47 = vrot.slane %v2294_v15, 6  ;;  %v2370_v10 = vrot.slane %v2295_v44, 6  ;;  %9367 = vmatprep.subr.bf16.mxu1 %v14974_v45  ;;  %v671_v59 = vmul.f32 %v10412_v58, %v15456_v32  ;;  %v672_v18 = vmul.f32 %v10412_v58, %v15457_v31 }
 0x1fb   : > { %v2573_v1 = vmax.f32 %v2537_v38, 0.0  ;;  %v2574_v21 = vmax.f32 %v2538_v4, 0.0  ;;  %v15459_v61 = vrot.slane %v15458_v39, 1  ;;  %v15461_v19 = vrot.slane %v15460_v22, 1  ;;  %v10053_v4 = vld [vmem:[%s14698_s7] ss:$12 sps:$4 sm:$0xff]  }
 0x1fc   : > { %v15463_v3 = vrot.slane %v15462_v17, 1  ;;  %v1073_v48 = vrot.slane %v15465_v13, 2  ;;  %v2371_v36 = vsel %vm2368_vm5, %v2369_v47, %v2370_v10  ;;  %v2373_v58 = vsel %vm2368_vm5, %v2370_v10, %v2372_v20  ;;  %v15477_v10 = vld [vmem:[#allocation54_spill] sm:$0xff]  ;;  %v15481_v22 = vld [vmem:[#allocation56_spill] sm:$0xff]  ;;  %v15483_v17 = vld [vmem:[#allocation53_spill] sm:$0xff] }
 0x1fd   : > { %v854_v46 = vsel %vm787_vm0, %v15461_v19, %v15459_v61  ;;  %v15464_v25 = vmov %v15459_v61  ;;  %v2637_v28 = vpack.c.bf16 %v2574_v21, %v2573_v1  ;;  %v2478_v60 = vadd.f32 %v2371_v36, %v2254_v40  ;;  %v15475_v40 = vld [vmem:[#allocation23_spill] sm:$0xff]  ;;  %v15479_v21 = vld [vmem:[#allocation24_spill] sm:$0xff] }
 0x1fe   : > { %v856_v8 = vsel %vm787_vm0, %v15464_v25, %v15463_v3  ;;  %v927_v30 = vadd.f32 %v854_v46, %v671_v59  ;;  %v2479_v9 = vadd.f32 %v2373_v58, %v2255_v43  ;;  %v1880_v62 = vmul.f32 %v10430_v0, %v15466_v49  ;;  %v15467_v0 = vld [vmem:[#allocation10_spill] sm:$0xff] }
 0x1ff   : > { %v928_v34 = vadd.f32 %v856_v8, %v672_v18  ;;  %v1198_v56 = vmul.f32 %v15132_v57, %v15270_v5  ;;  %v1422_v16 = vmul.f32 %v15134_v6, %v15270_v5  ;;  %v2103_v33 = vmul.f32 %v10436_v2, %v15466_v49  ;;  %8999 = vmatprep.subr.bf16.mxu0 %v2637_v28  ;;  %v15485_v8 = vld [vmem:[#allocation72_spill] sm:$0xff] }
 0x200   : > { %v2521_v20 = vadd.f32 %v10171_v12, %v2478_v60  ;;  %v2522_v41 = vadd.f32 %v10171_v12, %v2479_v9  ;;  %v1646_v54 = vmul.f32 %v10428_v63, %v15270_v5  ;;  %v15468_v27 = vrot.slane %v15467_v0, 2  ;;  %v15473_v63 = vld [vmem:[#allocation52_spill] sm:$0xff]  ;;  %v15487_v9 = vld [vmem:[#allocation55_spill] sm:$0xff] }
 0x201   : > { %v15470_v37 = vrot.slane %v15469_v55, 2  ;;  %v1302_v15 = vrot.slane %v1198_v56, 2  ;;  %v1529_v2 = vrot.slane %v1422_v16, 3  ;;  %v1986_v50 = vrot.slane %v1880_v62, 4  ;;  %v15489_v62 = vld [vmem:[#allocation73_spill] sm:$0xff] }
 0x202   : > { %v1074_v57 = vsel %vm1007_vm1, %v15468_v27, %v1073_v48  ;;  %v2557_v24 = vmax.f32 %v2521_v20, 0.0  ;;  %v2558_v23 = vmax.f32 %v2522_v41, 0.0  ;;  %v15472_v26 = vrot.slane %v15471_v42, 2  ;;  %v15491_v41 = vld [vmem:[#allocation59_spill] sm:$0xff] }
 0x203   : > { %v1076_v6 = vsel %vm1007_vm1, %v1073_v48, %v15470_v37  ;;  %v1147_v35 = vadd.f32 %v1074_v57, %v927_v30  ;;  %v15474_v5 = vrot.slane %v15473_v63, 2  ;;  %v1753_v29 = vrot.slane %v1646_v54, 4  ;;  %v15493_v27 = vld [vmem:[#allocation75_spill] sm:$0xff]  ;;  %v10060_v63 = vld [vmem:[%s14698_s7 + $0x20] ss:$12 sps:$4 sm:$0xff]  }
 0x204   : > { %v1148_v51 = vadd.f32 %v1076_v6, %v928_v34  ;;  %v1303_v52 = vsel %vm1007_vm1, %v15472_v26, %v1302_v15  ;;  %v2629_v53 = vpack.c.bf16 %v2558_v23, %v2557_v24  ;;  %v2327_v38 = vmul.f32 %v12566_v14, %v15466_v49  ;;  %v10057_v14 = vld [vmem:[%s14698_s7 + $0x1c] ss:$12 sps:$4 sm:$0xff]   ;;  %v10059_v37 = vld [vmem:[%s14698_s7 + $0x18] ss:$12 sps:$4 sm:$0xff]  }
 0x205   : > { %v1305_v11 = vsel %vm1007_vm1, %v1302_v15, %v15474_v5  ;;  %v1376_v7 = vadd.f32 %v1303_v52, %v1147_v35  ;;  %v15476_v43 = vrot.slane %v15475_v40, 3  ;;  %v15478_v32 = vrot.slane %v15477_v10, 3  ;;  %v10056_v26 = vld [vmem:[%s14698_s7 + $0x8] ss:$12 sps:$4 sm:$0xff]   ;;  %v10063_v52 = vld [vmem:[%s14698_s7 + $0x30] ss:$12 sps:$4 sm:$0xff]  }
 0x206   : > { %v1377_v44 = vadd.f32 %v1305_v11, %v1148_v51  ;;  %v2210_v31 = vrot.slane %v2103_v33, 5  ;;  %9000 = vmatpush3.bf16.msra.mxu0 %v2629_v53  ;;  %v15480_v39 = vrot.slane %v15479_v21, 4  ;;  %v15482_v19 = vrot.slane %v15481_v22, 4  ;;  %v10067_v5 = vld [vmem:[%s14698_s7 + $0x48] ss:$12 sps:$4 sm:$0xff]   ;;  %v12886_v21 = vld [vmem:[%s14694_s3] sm:$0xff]  }
 0x207   : > { %v1530_v47 = vsel %vm1463_vm2, %v15476_v43, %v1529_v2  ;;  %v1532_v59 = vsel %vm1463_vm2, %v1529_v2, %v15478_v32  ;;  %v15484_v3 = vrot.slane %v15483_v17, 4  ;;  %v15486_v13 = vrot.slane %v15485_v8, 4  ;;  %v10061_v2 = vld [vmem:[%s14698_s7 + $0x34] ss:$12 sps:$4 sm:$0xff]   ;;  %v10069_v11 = vld [vmem:[%s14698_s7 + $0x64] ss:$12 sps:$4 sm:$0xff]   ;;  %9419 = vmatprep.subr.bf16.mxu0 %v12886_v21 }
 0x208   : > { %v1605_v18 = vadd.f32 %v1530_v47, %v1376_v7  ;;  %v1606_v1 = vadd.f32 %v1532_v59, %v1377_v44  ;;  %v1754_v61 = vsel %vm1687_vm3, %v15480_v39, %v1753_v29  ;;  %v1756_v46 = vsel %vm1687_vm3, %v1753_v29, %v15482_v19  ;;  %v10064_v29 = vld [vmem:[%s14698_s7 + $0x38] ss:$12 sps:$4 sm:$0xff]   ;;  %v10071_v53 = vld [vmem:[%s14698_s7 + $0x60] ss:$12 sps:$4 sm:$0xff]   ;;  %v10073_v7 = vld [vmem:[%s14698_s7 + $0x7c] ss:$12 sps:$4 sm:$0xff]  }
 0x209   : > { %v1987_v25 = vsel %vm1687_vm3, %v15484_v3, %v1986_v50  ;;  %v1989_v48 = vsel %vm1687_vm3, %v1986_v50, %v15486_v13  ;;  %v2434_v30 = vrot.slane %v2327_v38, 6  ;;  %2846 = vmatmul.mubr.bf16.vlgmr.msra.gmra.mxu0 %v10053_v4  ;;  %v15488_v34 = vrot.slane %v15487_v9, 5  ;;  %v10085_v50 = vld [vmem:[%s14694_s3 + $0x8] sm:$0xff]   ;;  %v10068_v44 = vld [vmem:[%s14698_s7 + $0x50] ss:$12 sps:$4 sm:$0xff]  }
 0x20a   : > { %v1829_v36 = vadd.f32 %v1754_v61, %v1605_v18  ;;  %v1830_v58 = vadd.f32 %v1756_v46, %v1606_v1  ;;  %2853 = vmatprep.mubr.bf16.mxu0 %v10057_v14  ;;  %v15490_v56 = vrot.slane %v15489_v62, 5  ;;  %v15492_v54 = vrot.slane %v15491_v41, 6  ;;  %v10075_v38 = vld [vmem:[%s14698_s7 + $0x78] ss:$12 sps:$4 sm:$0xff]   ;;  %v10077_v4 = vld [vmem:[%s14698_s7 + $0x94] ss:$12 sps:$4 sm:$0xff]   ;;  %9420 = vmatpush3.bf16.msra.mxu0 %v12886_v21 }
 0x20b   : > { %v2211_v49 = vsel %vm2144_vm4, %v15488_v34, %v2210_v31  ;;  %v15494_v57 = vrot.slane %v15493_v27, 6  ;;  %v10072_v40 = vld [vmem:[%s14698_s7 + $0x68] ss:$12 sps:$4 sm:$0xff]   ;;  %v10079_v43 = vld [vmem:[%s14698_s7 + $0x90] ss:$12 sps:$4 sm:$0xff]  }
 0x20c   : > { %v2062_v28 = vadd.f32 %v1987_v25, %v1829_v36  ;;  %v2063_v60 = vadd.f32 %v1989_v48, %v1830_v58  ;;  %v2213_v16 = vsel %vm2144_vm4, %v2210_v31, %v15490_v56  ;;  %v2435_v0 = vsel %vm2368_vm5, %v15492_v54, %v2434_v30  ;;  %v10081_v47 = vld [vmem:[%s14698_s7 + $0xac] ss:$12 sps:$4 sm:$0xff]   ;;  %v10083_v32 = vld [vmem:[%s14698_s7 + $0xa8] ss:$12 sps:$4 sm:$0xff]   ;;  %v10086_v59 = vld [vmem:[%s14698_s7 + $0xc4] ss:$12 sps:$4 sm:$0xff]  }
 0x20d   : > { %v2437_v55 = vsel %vm2368_vm5, %v2434_v30, %v15494_v57  ;;  %v10076_v10 = vld [vmem:[%s14698_s7 + $0x80] ss:$12 sps:$4 sm:$0xff]   ;;  %v10080_v31 = vld [vmem:[%s14698_s7 + $0x98] ss:$12 sps:$4 sm:$0xff]   ;;  %v10084_v1 = vld [vmem:[%s14698_s7 + $0xb0] ss:$12 sps:$4 sm:$0xff]  }
 0x20e   : > { %v2286_v33 = vadd.f32 %v2211_v49, %v2062_v28  ;;  %v2287_v20 = vadd.f32 %v2213_v16, %v2063_v60  ;;  %v10088_v18 = vld [vmem:[%s14698_s7 + $0xc0] ss:$12 sps:$4 sm:$0xff]   ;;  %v10089_v14 = vld [vmem:[%s14698_s7 + $0xc8] ss:$12 sps:$4 sm:$0xff]   ;;  %v10091_v39 = vld [vmem:[%s14694_s3 + $0x18] sm:$0xff]  }
 0x20f   : > { %9447 = vmatprep.subr.bf16.mxu0 %v10091_v39 }
 0x210   : > { %v2510_v6 = vadd.f32 %v2435_v0, %v2286_v33  ;;  %v2511_v15 = vadd.f32 %v2437_v55, %v2287_v20 }
 0x211   : > { %2854 = vmatmul.mubr.bf16.gmra.mxu0 %v10059_v37 }
 0x212   : > { %v2553_v24 = vadd.f32 %v10171_v12, %v2510_v6  ;;  %v2554_v23 = vadd.f32 %v10171_v12, %v2511_v15  ;;  %2861 = vmatprep.mubr.bf16.mxu0 %v10061_v2  ;;  %v10065_v12 = vld [vmem:[%s14698_s7 + $0x4c] ss:$12 sps:$4 sm:$0xff]  }
 0x214   : > { %v2589_v35 = vmax.f32 %v2553_v24, 0.0  ;;  %v2590_v51 = vmax.f32 %v2554_v23, 0.0 }
 0x216   : > { %v2645_v42 = vpack.c.bf16 %v2590_v51, %v2589_v35  ;;  %v12913_v51 = vld [vmem:[%s14694_s3 + $0x28] sm:$0xff]  }
 0x218   : > { %9368 = vmatpush3.bf16.msra.mxu1 %v2645_v42 }
 0x219   : > { %9405 = vmatprep.subr.bf16.mxu1 %v10085_v50  ;;  %2862 = vmatmul.mubr.bf16.gmra.mxu0 %v10063_v52 }
 0x21a   : > { %2869 = vmatprep.mubr.bf16.mxu0 %v10065_v12 }
 0x21b   : > { %9370 = vmatmul.mubr.msk.bf16.vlgmr.msra.gmra.mxu1 %vm2782_vm7, %v10056_v26 }
 0x21c   : > { %9373 = vmatprep.mubr.msk.bf16.mxu1 %vm10236_vm6, %v14974_v45  ;;  %9406 = vmatpush3.bf16.msra.mxu1 %v10085_v50 }
 0x21d   : > { %10005 = vmatprep.subr.bf16.mxu1 %v12886_v21 }
 0x221   : > { %2870 = vmatmul.mubr.bf16.gmra.mxu0 %v10067_v5 }
 0x222   : > { %2877 = vmatprep.mubr.bf16.mxu0 %v10069_v11 }
 0x223   : > { %9374 = vmatmul.mubr.msk.bf16.gmra.mxu1 %vm2782_vm7, %v10060_v63 }
 0x224   : > { %9377 = vmatprep.mubr.msk.bf16.mxu1 %vm10236_vm6, %v14974_v45 }
 0x229   : > { %2878 = vmatmul.mubr.bf16.gmra.mxu0 %v10071_v53 }
 0x22a   : > { %2885 = vmatprep.mubr.bf16.mxu0 %v10073_v7 }
 0x22b   : > { %9378 = vmatmul.mubr.msk.bf16.gmra.mxu1 %vm2782_vm7, %v10064_v29 }
 0x22c   : > { %9381 = vmatprep.mubr.msk.bf16.mxu1 %vm10236_vm6, %v14974_v45 }
 0x231   : > { %2886 = vmatmul.mubr.bf16.gmra.mxu0 %v10075_v38 }
 0x232   : > { %2893 = vmatprep.mubr.bf16.mxu0 %v10077_v4 }
 0x233   : > { %9382 = vmatmul.mubr.msk.bf16.gmra.mxu1 %vm2782_vm7, %v10068_v44 }
 0x234   : > { %9385 = vmatprep.mubr.msk.bf16.mxu1 %vm10236_vm6, %v14974_v45 }
 0x239   : > { %2894 = vmatmul.mubr.bf16.gmra.mxu0 %v10079_v43 }
 0x23a   : > { %2901 = vmatprep.mubr.bf16.mxu0 %v10081_v47 }
 0x23b   : > { %9386 = vmatmul.mubr.msk.bf16.gmra.mxu1 %vm2782_vm7, %v10072_v40 }
 0x23c   : > { %9389 = vmatprep.mubr.msk.bf16.mxu1 %vm10236_vm6, %v14974_v45 }
 0x241   : > { %2902 = vmatmul.mubr.bf16.gmra.mxu0 %v10083_v32 }
 0x242   : > { %2909 = vmatprep.mubr.bf16.mxu0 %v10086_v59 }
 0x243   : > { %9390 = vmatmul.mubr.msk.bf16.gmra.mxu1 %vm2782_vm7, %v10076_v10 }
 0x244   : > { %9393 = vmatprep.mubr.msk.bf16.mxu1 %vm10236_vm6, %v14974_v45 }
 0x249   : > { %2910 = vmatmul.mubr.bf16.gmra.mxu0 %v10088_v18 }
 0x24b   : > { %9394 = vmatmul.mubr.msk.bf16.gmra.mxu1 %vm2782_vm7, %v10080_v31 }
 0x24c   : > { %9397 = vmatprep.mubr.msk.bf16.mxu1 %vm10236_vm6, %v14974_v45 }
 0x253   : > { %9398 = vmatmul.mubr.msk.bf16.gmra.mxu1 %vm2782_vm7, %v10084_v1 }
 0x254   : > { %9401 = vmatprep.mubr.msk.bf16.mxu1 %vm10236_vm6, %v14974_v45 }
 0x25b   : > { %9402 = vmatmul.mubr.msk.bf16.gmra.mxu1 %vm2782_vm7, %v10089_v14 }
 0x2c9   : > { %v9001_v61 = vpop.f32.mrf.mxu0 }
 0x2cb   : > { %v9002_v22 = vpop.f32.mrf.mxu0 }
 0x2cc   : > { %v9003_v36 = vadd.f32 %v9002_v22, %v9001_v61 }
 0x2cd   : > { %v9004_v19 = vpop.f32.mrf.mxu0 }
 0x2cf   : > { %v9005_v46 = vpop.f32.mrf.mxu0 }
 0x2d0   : > { %v9006_v58 = vadd.f32 %v9005_v46, %v9004_v19 }
 0x2d1   : > { %v9007_v17 = vpop.f32.mrf.mxu0 }
 0x2d3   : > { %v9008_v3 = vpop.f32.mrf.mxu0 }
 0x2d4   : > { %v9009_v41 = vadd.f32 %v9008_v3, %v9007_v17 }
 0x2d5   : > { %v9010_v25 = vpop.f32.mrf.mxu0 }
 0x2d7   : > { %v9011_v8 = vpop.f32.mrf.mxu0 }
 0x2d8   : > { %v9012_v54 = vadd.f32 %v9011_v8, %v9010_v25 }
 0x2d9   : > { %v9013_v48 = vpop.f32.mrf.mxu0 }
 0x2db   : > { %v2952_v13 = vpop.f32.mrf.mxu1  ;;  %v9014_v28 = vpop.f32.mrf.mxu0 }
 0x2dc   : > { %v2953_v34 = vadd.f32 %v9003_v36, %v2952_v13  ;;  %v9015_v26 = vadd.f32 %v9014_v28, %v9013_v48  ;;  %v12943_v36 = vld [vmem:[%s14694_s3 + $0x10] sm:$0xff]  }
 0x2dd   : > { %v9371_v30 = vpop.f32.mrf.mxu1  ;;  %v9016_v9 = vpop.f32.mrf.mxu0 }
 0x2df   : > { %v2955_v60 = vpop.f32.mrf.mxu1  ;;  %v9017_v56 = vpop.f32.mrf.mxu0 }
 0x2e0   : > { %v12894_v49 = vadd.f32 %v9006_v58, %v2955_v60  ;;  %v9018_v52 = vadd.f32 %v9017_v56, %v9016_v9 }
 0x2e1   : > { %v9372_v62 = vpop.f32.mrf.mxu1  ;;  %v9019_v20 = vpop.f32.mrf.mxu0 }
 0x2e2   : > { %v12897_v16 = vpack.c.bf16 %v12894_v49, %v2953_v34 }
 0x2e3   : > { %v2960_v33 = vpop.f32.mrf.mxu1  ;;  %v9020_v27 = vpop.f32.mrf.mxu0 }
 0x2e4   : > { %9421 = vmatprep.mubr.msk.bf16.mxu0 %vm3133_vm8, %v12897_v16  ;;  %v3083_v57 = vshll.u32 %v12897_v16, 16  ;;  %v12902_v6 = vadd.f32 %v9009_v41, %v2960_v33  ;;  %v3081_v12 = vshrl.u32 %v12897_v16, 16  ;;  %v9021_v59 = vadd.f32 %v9020_v27, %v9019_v20 }
 0x2e5   : > { %v9375_v0 = vpop.f32.mrf.mxu1  ;;  %v9022_v37 = vpop.f32.mrf.mxu0 }
 0x2e6   : > { %v3085_v35 = vrot.slane %v3083_v57, 1  ;;  %v3468_v3 = vrot.slane %v3081_v12, 1  ;;  %v3469_v25 = vrot.slane %v3083_v57, 2 }
 0x2e7   : > { %v2963_v55 = vpop.f32.mrf.mxu1  ;;  %v9023_v24 = vpop.f32.mrf.mxu0 }
 0x2e8   : > { %v12904_v15 = vadd.f32 %v9012_v54, %v2963_v55  ;;  %v3086_v29 = vor.u32 %v3085_v35, %v3081_v12  ;;  %v9024_v1 = vadd.f32 %v9023_v24, %v9022_v37  ;;  %v3470_v56 = vor.u32 %v3469_v25, %v3468_v3 }
 0x2e9   : > { %v9376_v2 = vpop.f32.mrf.mxu1  ;;  %v9025_v42 = vpop.f32.mrf.mxu0 }
 0x2ea   : > { %v12908_v23 = vpack.c.bf16 %v12904_v15, %v12902_v6 }
 0x2eb   : > { %v2968_v50 = vpop.f32.mrf.mxu1  ;;  %v9026_v11 = vpop.f32.mrf.mxu0 }
 0x2ec   : > { %9422 = vmatmul.mubr.msk.bf16.vlgmr.msra.gmra.mxu0 %vm3133_vm8, %v12908_v23  ;;  %v3088_v63 = vshll.u32 %v12908_v23, 16  ;;  %v12920_v38 = vadd.f32 %v9015_v26, %v2968_v50  ;;  %v3092_v43 = vshrl.u32 %v12908_v23, 16  ;;  %v9027_v33 = vadd.f32 %v9026_v11, %v9025_v42 }
 0x2ed   : > { %v9379_v5 = vpop.f32.mrf.mxu1  ;;  %9448 = vmatpush3.bf16.msra.mxu0 %v10091_v39  ;;  %v9028_v44 = vpop.f32.mrf.mxu0 }
 0x2ee   : > { %v3090_v53 = vrot.slane %v3088_v63, 1  ;;  %9475 = vmatprep.subr.bf16.mxu0 %v12913_v51  ;;  %v3471_v39 = vrot.slane %v3092_v43, 1  ;;  %v3472_v61 = vrot.slane %v3088_v63, 2 }
 0x2ef   : > { %v2971_v7 = vpop.f32.mrf.mxu1  ;;  %v9029_v10 = vpop.f32.mrf.mxu0 }
 0x2f0   : > { %v12922_v4 = vadd.f32 %v9018_v52, %v2971_v7  ;;  %v3091_v40 = vsel %vm3079_vm9, %v3086_v29, %v3090_v53  ;;  %v3094_v46 = vor.u32 %v3092_v43, %v3090_v53  ;;  %v3473_v60 = vor.u32 %v3472_v61, %v3471_v39 }
 0x2f1   : > { %v9380_v47 = vpop.f32.mrf.mxu1  ;;  %9407 = vmatprep.mubr.msk.bf16.mxu1 %vm3133_vm8, %v3091_v40  ;;  %v9031_v18 = vpop.f32.mrf.mxu0  ;;  %v9030_v27 = vadd.f32 %v9029_v10, %v9028_v44  ;;  %v12992_v44 = vld [vmem:[%s14694_s3 + $0x38] sm:$0xff]  }
 0x2f2   : > { %v12929_v32 = vpack.c.bf16 %v12922_v4, %v12920_v38  ;;  %v3474_v57 = vsel %vm3467_vm10, %v3470_v56, %v3473_v60 }
 0x2f3   : > { %v2976_v31 = vpop.f32.mrf.mxu1  ;;  %v9032_v19 = vpop.f32.mrf.mxu0 }
 0x2f4   : > { %9425 = vmatprep.mubr.msk.bf16.mxu0 %vm3133_vm8, %v12929_v32  ;;  %v12934_v14 = vshll.u32 %v12929_v32, 16  ;;  %v12938_v13 = vshrl.u32 %v12929_v32, 16  ;;  %v12945_v58 = vadd.f32 %v9021_v59, %v2976_v31  ;;  %v9033_v40 = vadd.f32 %v9032_v19, %v9031_v18 }
 0x2f5   : > { %v9383_v22 = vpop.f32.mrf.mxu1  ;;  %v9034_v48 = vpop.f32.mrf.mxu0 }
 0x2f6   : > { %v3098_v17 = vrot.slane %v12934_v14, 1  ;;  %v3475_v41 = vrot.slane %v12938_v13, 1  ;;  %v3476_v54 = vrot.slane %v12934_v14, 2 }
 0x2f7   : > { %v2979_v8 = vpop.f32.mrf.mxu1  ;;  %v9035_v34 = vpop.f32.mrf.mxu0 }
 0x2f8   : > { %v12947_v30 = vadd.f32 %v9024_v1, %v2979_v8  ;;  %v3099_v28 = vsel %vm3079_vm9, %v3094_v46, %v3098_v17  ;;  %v3102_v24 = vor.u32 %v12938_v13, %v3098_v17  ;;  %v3477_v52 = vor.u32 %v3476_v54, %v3475_v41 }
 0x2f9   : > { %v9384_v9 = vpop.f32.mrf.mxu1  ;;  %9408 = vmatmul.mubr.msk.bf16.vlgmr.msra.gmra.mxu1 %vm3133_vm8, %v3099_v28  ;;  %v12958_v0 = vpop.f32.mrf.mxu0  ;;  %v9036_v59 = vadd.f32 %v9035_v34, %v9034_v48  ;;  %v13027_v34 = vpack.c.bf16 %v12920_v38, %v12904_v15  ;;  %v13039_v54 = vpack.c.bf16 %v12902_v6, %v12894_v49 }
 0x2fa   : > { %v12953_v62 = vpack.c.bf16 %v12947_v30, %v12945_v58  ;;  %10006 = vmatpush3.bf16.msra.mxu1 %v12886_v21  ;;  %v3478_v47 = vsel %vm3467_vm10, %v3473_v60, %v3477_v52 }
 0x2fb   : > { %v2984_v20 = vpop.f32.mrf.mxu1  ;;  %9433 = vmatprep.subr.bf16.mxu1 %v12943_v36  ;;  %v12971_v2 = vpop.f32.mrf.mxu0 }
 0x2fc   : > { %9426 = vmatmul.mubr.msk.bf16.gmra.mxu0 %vm3133_vm8, %v12953_v62  ;;  %v12965_v55 = vshll.u32 %v12953_v62, 16  ;;  %v12968_v21 = vshrl.u32 %v12953_v62, 16  ;;  %v12979_v63 = vadd.f32 %v9027_v33, %v2984_v20 }
 0x2fd   : > { %v9387_v37 = vpop.f32.mrf.mxu1  ;;  %9449 = vmatprep.mubr.msk.bf16.mxu0 %vm3133_vm8, %v3474_v57  ;;  %v12977_v12 = vpop.f32.mrf.mxu0 }
 0x2fe   : > { %v3106_v35 = vrot.slane %v12965_v55, 1  ;;  %v3479_v50 = vrot.slane %v12968_v21, 1  ;;  %v3480_v42 = vrot.slane %v12965_v55, 2 }
 0x2ff   : > { %v2987_v26 = vpop.f32.mrf.mxu1  ;;  %v12995_v10 = vpop.f32.mrf.mxu0 }
 0x300   : > { %v12981_v5 = vadd.f32 %v9030_v27, %v2987_v26  ;;  %v3107_v11 = vsel %vm3079_vm9, %v3102_v24, %v3106_v35  ;;  %v3481_v29 = vor.u32 %v3480_v42, %v3479_v50  ;;  %v3110_v18 = vor.u32 %v12968_v21, %v3106_v35 }
 0x301   : > { %v9388_v53 = vpop.f32.mrf.mxu1  ;;  %9411 = vmatprep.mubr.msk.bf16.mxu1 %vm3133_vm8, %v3107_v11  ;;  %v9043_v3 = vpop.f32.mrf.mxu0  ;;  %v3750_v50 = vrot.slane %v13027_v34, 2 }
 0x302   : > { %v12987_v7 = vpack.c.bf16 %v12981_v5, %v12979_v63  ;;  %v3482_v31 = vsel %vm3467_vm10, %v3477_v52, %v3481_v29  ;;  %v3749_v52 = vrot.slane %v13039_v54, 2  ;;  %v13067_v53 = vpack.c.bf16 %v12945_v58, %v12922_v4 }
 0x303   : > { %v2992_v43 = vpop.f32.mrf.mxu1  ;;  %v9044_v33 = vpop.f32.mrf.mxu0 }
 0x304   : > { %9450 = vmatmul.mubr.msk.bf16.vlgmr.msra.gmra.mxu0 %vm3133_vm8, %v3478_v47  ;;  %v13000_v1 = vshll.u32 %v12987_v7, 16  ;;  %v13003_v39 = vshrl.u32 %v12987_v7, 16  ;;  %v2993_v25 = vadd.f32 %v9033_v40, %v2992_v43  ;;  %v3751_v43 = vsel %vm1007_vm1, %v3749_v52, %v3750_v50  ;;  %v13138_v52 = vld [vmem:[%s14694_s3 + $0x30] sm:$0xff]  }
 0x305   : > { %v9391_v61 = vpop.f32.mrf.mxu1  ;;  %9453 = vmatprep.mubr.msk.bf16.mxu0 %vm3133_vm8, %v3482_v31  ;;  %9476 = vmatpush3.bf16.msra.mxu0 %v12913_v51  ;;  %v9046_v57 = vpop.f32.mrf.mxu0  ;;  %v13076_v47 = vpack.c.bf16 %v12979_v63, %v12947_v30  ;;  %v9045_v31 = vadd.f32 %v9044_v33, %v9043_v3 }
 0x306   : > { %v3114_v22 = vrot.slane %v13000_v1, 1  ;;  %v3483_v19 = vrot.slane %v13003_v39, 1  ;;  %v3484_v46 = vrot.slane %v13000_v1, 2  ;;  %9503 = vmatprep.subr.bf16.mxu0 %v12992_v44 }
 0x307   : > { %v2995_v17 = vpop.f32.mrf.mxu1  ;;  %v9047_v11 = vpop.f32.mrf.mxu0 }
 0x308   : > { %v13012_v8 = vadd.f32 %v9036_v59, %v2995_v17  ;;  %v13015_v48 = vsel %vm3079_vm9, %v3110_v18, %v3114_v22  ;;  %v3485_v28 = vor.u32 %v3484_v46, %v3483_v19  ;;  %v3118_v15 = vor.u32 %v13003_v39, %v3114_v22 }
 0x309   : > { %v9392_v51 = vpop.f32.mrf.mxu1  ;;  %9412 = vmatmul.mubr.msk.bf16.gmra.mxu1 %vm3133_vm8, %v13015_v48  ;;  %v9039_v59 = vadd.f32 %v12971_v2, %v12958_v0  ;;  %v9048_v4 = vadd.f32 %v9047_v11, %v9046_v57  ;;  %v9049_v61 = vpop.f32.mrf.mxu0  ;;  %v3340_v18 = vrot.slane %v12908_v23, 1  ;;  %v3339_v22 = vrot.slane %v12897_v16, 1  ;;  %v10094_v2 = vld [vmem:[%s14694_s3 + $0x20] sm:$0xff]  }
 0x30a   : > { %v13020_v60 = vpack.c.bf16 %v13012_v8, %v2993_v25  ;;  %v13023_v9 = vsel %vm3467_vm10, %v3481_v29, %v3485_v28  ;;  %v3752_v19 = vrot.slane %v13067_v53, 2  ;;  %v3754_v0 = vrot.slane %v13076_v47, 2 }
 0x30b   : > { %15495 = vst [vmem:[#allocation11_spill] sm:$0xff] %v13023_v9  ;;  %v3000_v56 = vpop.f32.mrf.mxu1  ;;  %v9050_v3 = vpop.f32.mrf.mxu0  ;;  %v3341_v51 = vsel %vm787_vm0, %v3339_v22, %v3340_v18 }
 0x30c   : > { %9454 = vmatmul.mubr.msk.bf16.gmra.mxu0 %vm3133_vm8, %v13023_v9  ;;  %v13032_v20 = vshll.u32 %v13020_v60, 16  ;;  %v13035_v41 = vshrl.u32 %v13020_v60, 16  ;;  %v13086_v63 = vadd.f32 %v9039_v59, %v3000_v56  ;;  %v13102_v56 = vld [vmem:[%s14694_s3 + $0x48] sm:$0xff]   ;;  %v13114_v57 = vsel %vm1007_vm1, %v3750_v50, %v3752_v19 }
 0x30d   : > { %v9395_v27 = vpop.f32.mrf.mxu1 }
 0x30e   : > { %v3122_v38 = vrot.slane %v13032_v20, 1  ;;  %v3487_v37 = vrot.slane %v13035_v41, 1  ;;  %v3488_v24 = vrot.slane %v13032_v20, 2  ;;  %v13109_v27 = vpack.c.bf16 %v2993_v25, %v12981_v5  ;;  %v9052_v5 = vpop.f32.mrf.mxu0 }
 0x30f   : > { %v13045_v35 = vpop.f32.mrf.mxu1 }
 0x310   : > { %v13049_v42 = vsel %vm3079_vm9, %v3118_v15, %v3122_v38  ;;  %v13052_v49 = vor.u32 %v13035_v41, %v3122_v38  ;;  %v13054_v6 = vor.u32 %v3488_v24, %v3487_v37  ;;  %v13118_v38 = vpack.c.bf16 %v13086_v63, %v13012_v8 }
 0x311   : > { %v9396_v26 = vpop.f32.mrf.mxu1  ;;  %9415 = vmatprep.mubr.msk.bf16.mxu1 %vm3133_vm8, %v13049_v42  ;;  %v13123_v37 = vsel %vm1007_vm1, %v3752_v19, %v3754_v0  ;;  %v3344_v24 = vrot.slane %v12953_v62, 1  ;;  %v3756_v8 = vrot.slane %v13109_v27, 2  ;;  %v13162_v19 = vrot.slane %v13020_v60, 1 }
 0x312   : > { %15496 = vst [vmem:[#allocation14_spill] sm:$0xff] %v13054_v6  ;;  %9416 = vmatmul.mubr.msk.bf16.gmra.mxu1 %vm3133_vm8, %v13052_v49  ;;  %v13063_v29 = vsel %vm3467_vm10, %v3485_v28, %v13054_v6  ;;  %v13133_v26 = vrot.slane %v13118_v38, 2 }
 0x313   : > { %15497 = vst [vmem:[#allocation8_spill] sm:$0xff] %v13063_v29  ;;  %v3008_v40 = vpop.f32.mrf.mxu1  ;;  %9429 = vmatprep.mubr.msk.bf16.mxu1 %vm3133_vm8, %v12987_v7  ;;  %9457 = vmatprep.mubr.msk.bf16.mxu0 %vm3133_vm8, %v13063_v29  ;;  %15498 = vst [vmem:[#allocation20_spill] sm:$0xff] %v13162_v19 }
 0x314   : > { %9458 = vmatmul.mubr.msk.bf16.gmra.mxu0 %vm3133_vm8, %v13054_v6  ;;  %v13088_v46 = vadd.f32 %v9045_v31, %v3008_v40  ;;  %v9053_v40 = vpop.f32.mrf.mxu0  ;;  %v13145_v31 = vsel %vm1007_vm1, %v3754_v0, %v3756_v8  ;;  %v4057_v0 = vrot.slane %v13027_v34, 3 }
 0x315   : > { %9477 = vmatprep.mubr.msk.bf16.mxu0 %vm3133_vm8, %v3751_v43  ;;  %v9399_v58 = vpop.f32.mrf.mxu1 }
 0x316   : > { %v13153_v58 = vsel %vm1007_vm1, %v3756_v8, %v13133_v26  ;;  %v5182_v8 = vrot.slane %v12968_v21, 2 }
 0x317   : > { %v3011_v30 = vpop.f32.mrf.mxu1 }
 0x318   : > { %v13094_v17 = vadd.f32 %v9048_v4, %v3011_v30 }
 0x319   : > { %v9400_v28 = vpop.f32.mrf.mxu1 }
 0x31a   : > { %9430 = vmatmul.mubr.msk.bf16.vlgmr.msra.gmra.mxu1 %vm3133_vm8, %v13020_v60  ;;  %v13106_v33 = vpack.c.bf16 %v13094_v17, %v13088_v46 }
 0x31b   : > { %9434 = vmatpush3.bf16.msra.mxu1 %v12943_v36  ;;  %9435 = vmatprep.mubr.msk.bf16.mxu1 %vm3133_vm8, %v3341_v51  ;;  %v3016_v15 = vpop.f32.mrf.mxu1  ;;  %v3342_v36 = vrot.slane %v12929_v32, 1  ;;  %v4056_v51 = vrot.slane %v13039_v54, 3 }
 0x31c   : > { %9478 = vmatmul.mubr.msk.bf16.vlgmr.msra.gmra.mxu0 %vm3133_vm8, %v13114_v57  ;;  %9461 = vmatprep.subr.bf16.mxu1 %v10094_v2 }
 0x31d   : > { %9481 = vmatprep.mubr.msk.bf16.mxu0 %vm3133_vm8, %v13123_v37  ;;  %9504 = vmatpush3.bf16.msra.mxu0 %v12992_v44  ;;  %v9403_v25 = vpop.f32.mrf.mxu1  ;;  %v3343_v11 = vsel %vm787_vm0, %v3340_v18, %v3342_v36  ;;  %v9051_v44 = vadd.f32 %v9050_v3, %v9049_v61  ;;  %v3345_v59 = vsel %vm787_vm0, %v3342_v36, %v3344_v24  ;;  %v3346_v18 = vrot.slane %v12987_v7, 1 }
 0x31e   : > { %9531 = vmatprep.subr.bf16.mxu0 %v13102_v56  ;;  %v9054_v61 = vadd.f32 %v9053_v40, %v9052_v5  ;;  %v5179_v36 = vrot.slane %v12938_v13, 2  ;;  %v5180_v5 = vrot.slane %v12934_v14, 3  ;;  %v3610_v25 = vrot.slane %v12908_v23, 2 }
 0x31f   : > { %v3019_v50 = vpop.f32.mrf.mxu1  ;;  %v13147_v4 = vadd.f32 %v9051_v44, %v3016_v15  ;;  %v13169_v3 = vsel %vm787_vm0, %v3344_v24, %v3346_v18  ;;  %v13175_v28 = vsel %vm787_vm0, %v3346_v18, %v13162_v19  ;;  %v4058_v15 = vsel %vm1463_vm2, %v4056_v51, %v4057_v0 }
 0x320   : > { %v3020_v30 = vadd.f32 %v9054_v61, %v3019_v50  ;;  %15500 = vst [vmem:[#allocation79_spill] sm:$0xff] %v13169_v3  ;;  %15501 = vst [vmem:[#allocation81_spill] sm:$0xff] %v13175_v28  ;;  %v4059_v24 = vrot.slane %v13067_v53, 3  ;;  %v5183_v50 = vrot.slane %v12965_v55, 3  ;;  %v5186_v44 = vrot.slane %v13003_v39, 2 }
 0x321   : > { %v9404_v43 = vpop.f32.mrf.mxu1  ;;  %v5187_v40 = vrot.slane %v13000_v1, 3  ;;  %v4061_v61 = vrot.slane %v13076_v47, 3 }
 0x322   : > { %9436 = vmatmul.mubr.msk.bf16.vlgmr.msra.gmra.mxu1 %vm3133_vm8, %v3343_v11  ;;  %v5181_v11 = vor.u32 %v5180_v5, %v5179_v36  ;;  %v5190_v43 = vrot.slane %v13035_v41, 2  ;;  %v5184_v18 = vor.u32 %v5183_v50, %v5182_v8  ;;  %v13203_v5 = vld [vmem:[%s14694_s3 + $0x58] sm:$0xff]   ;;  %v9042_v50 = vadd.f32 %v12995_v10, %v12977_v12 }
 0x323   : > { %9439 = vmatprep.mubr.msk.bf16.mxu1 %vm3133_vm8, %v3345_v59  ;;  %9462 = vmatpush3.bf16.msra.mxu1 %v10094_v2  ;;  %v13166_v2 = vpack.c.bf16 %v3020_v30, %v13147_v4  ;;  %v3609_v59 = vrot.slane %v12897_v16, 2  ;;  %v5191_v30 = vrot.slane %v13032_v20, 3  ;;  %v5188_v51 = vor.u32 %v5187_v40, %v5186_v44 }
 0x324   : > { %9482 = vmatmul.mubr.msk.bf16.gmra.mxu0 %vm3133_vm8, %v13145_v31  ;;  %9489 = vmatprep.subr.bf16.mxu1 %v13138_v52  ;;  %v13206_v16 = vsel %vm3878_vm11, %v5181_v11, %v5184_v18  ;;  %v5465_v40 = vrot.slane %v12934_v14, 4  ;;  %v5468_v12 = vrot.slane %v12965_v55, 4  ;;  %v3612_v10 = vrot.slane %v12929_v32, 2 }
 0x325   : > { %9485 = vmatprep.mubr.msk.bf16.mxu0 %vm3133_vm8, %v13153_v58  ;;  %15499 = vst [vmem:[#allocation51_spill] sm:$0xff] %v13166_v2  ;;  %v3611_v36 = vsel %vm1007_vm1, %v3609_v59, %v3610_v25  ;;  %v13208_v8 = vor.u32 %v5191_v30, %v5190_v43  ;;  %v13215_v44 = vsel %vm3878_vm11, %v5184_v18, %v5188_v51  ;;  %v5467_v43 = vrot.slane %v12968_v21, 3 }
 0x326   : > { %v4062_v59 = vsel %vm1463_vm2, %v4059_v24, %v4061_v61  ;;  %v5471_v14 = vrot.slane %v13003_v39, 3  ;;  %v3614_v18 = vrot.slane %v12953_v62, 2  ;;  %v5472_v30 = vrot.slane %v13000_v1, 4  ;;  %v13243_v39 = vld [vmem:[%s14694_s3 + $0x40] sm:$0xff]  }
 0x327   : > { %v13222_v11 = vsel %vm3878_vm11, %v5188_v51, %v13208_v8  ;;  %v5475_v21 = vrot.slane %v13035_v41, 3  ;;  %v13235_v55 = vadd.f32 %v9042_v50, %v13045_v35  ;;  %v4063_v51 = vrot.slane %v13109_v27, 3 }
 0x328   : > { %v5473_v1 = vor.u32 %v5472_v30, %v5471_v14  ;;  %v3613_v41 = vsel %vm1007_vm1, %v3610_v25, %v3612_v10  ;;  %v13253_v50 = vsel %vm1007_vm1, %v3612_v10, %v3614_v18  ;;  %v14976_v14 = vshll.u32 %v13039_v54, 16 }
 0x329   : > { %v4064_v25 = vsel %vm1463_vm2, %v4061_v61, %v4063_v51  ;;  %v13282_v61 = vshll.u32 %v13027_v34, 16  ;;  %v13377_v29 = vpack.c.bf16 %v13235_v55, %v13086_v63  ;;  %v15506_v63 = vshll.u32 %v13039_v54, 16 }
 0x32a   : > { %9440 = vmatmul.mubr.msk.bf16.gmra.mxu1 %vm3133_vm8, %v13169_v3 }
 0x32b   : > { %9443 = vmatprep.mubr.msk.bf16.mxu1 %vm3133_vm8, %v13175_v28  ;;  %v4188_v6 = vrot.slane %v15506_v63, 4 }
 0x32c   : > { %9486 = vmatmul.mubr.msk.bf16.gmra.mxu0 %vm3133_vm8, %v13133_v26 }
 0x32d   : > { %9505 = vmatprep.mubr.msk.bf16.mxu0 %vm3133_vm8, %v4058_v15  ;;  %v5464_v15 = vrot.slane %v12938_v13, 3  ;;  %v4060_v13 = vsel %vm1463_vm2, %v4057_v0, %v4059_v24  ;;  %v5469_v24 = vor.u32 %v5468_v12, %v5467_v43  ;;  %v3616_v43 = vrot.slane %v12987_v7, 2 }
 0x32e   : > { %v13276_v12 = vrot.slane %v13020_v60, 2 }
 0x32f   : > { %v5466_v0 = vor.u32 %v5465_v40, %v5464_v15  ;;  %v4065_v15 = vrot.slane %v13118_v38, 3 }
 0x330   : > { %v13294_v30 = vsel %vm1007_vm1, %v3616_v43, %v13276_v12 }
 0x332   : > { %9444 = vmatmul.mubr.msk.bf16.gmra.mxu1 %vm3133_vm8, %v13162_v19 }
 0x333   : > { %9463 = vmatprep.mubr.msk.bf16.mxu1 %vm3133_vm8, %v3611_v36  ;;  %v13246_v36 = vsel %vm4186_vm12, %v5466_v0, %v5469_v24  ;;  %v14977_v0 = vshrl.u32 %v13039_v54, 16 }
 0x334   : > { %9506 = vmatmul.mubr.msk.bf16.vlgmr.msra.gmra.mxu0 %vm3133_vm8, %v4060_v13  ;;  %v13260_v13 = vpack.c.bf16 %v13235_v55, %v13235_v55 }
 0x335   : > { %9509 = vmatprep.mubr.msk.bf16.mxu0 %vm3133_vm8, %v4062_v59  ;;  %9532 = vmatpush3.bf16.msra.mxu0 %v13102_v56  ;;  %v5476_v56 = vrot.slane %v13032_v20, 4  ;;  %v13256_v20 = vsel %vm4186_vm12, %v5469_v24, %v5473_v1  ;;  %v4066_v59 = vsel %vm1463_vm2, %v4063_v51, %v4065_v15  ;;  %v13288_v24 = vsel %vm1007_vm1, %v3614_v18, %v3616_v43 }
 0x336   : > { %9559 = vmatprep.subr.bf16.mxu0 %v13203_v5  ;;  %15503 = vst [vmem:[#allocation80_spill] sm:$0xff] %v13256_v20  ;;  %v4067_v10 = vrot.slane %v13260_v13, 3  ;;  %v3893_v51 = vrot.slane %v13282_v61, 3  ;;  %v3882_v18 = vrot.slane %v14977_v0, 2  ;;  %v13318_v43 = vshll.u32 %v13076_v47, 16 }
 0x337   : > { %v13249_v35 = vor.u32 %v5476_v56, %v5475_v21  ;;  %v13345_v0 = vshrl.u32 %v13118_v38, 16 }
 0x338   : > { %v4068_v56 = vsel %vm1463_vm2, %v4065_v15, %v4067_v10  ;;  %v13315_v15 = vshrl.u32 %v13076_v47, 16 }
 0x339   : > { %15502 = vst [vmem:[#allocation69_spill] sm:$0xff] %v13249_v35  ;;  %v13268_v40 = vsel %vm4186_vm12, %v5473_v1, %v13249_v35  ;;  %v3885_v1 = vrot.slane %v14976_v14, 3  ;;  %v4554_v35 = vrot.slane %v13318_v43, 1 }
 0x33a   : > { %9464 = vmatmul.mubr.msk.bf16.vlgmr.msra.gmra.mxu1 %vm3133_vm8, %v3613_v41  ;;  %15504 = vst [vmem:[#allocation82_spill] sm:$0xff] %v13268_v40  ;;  %v13309_v41 = vshrl.u32 %v13067_v53, 16  ;;  %v3908_v22 = vrot.slane %v13315_v15, 2 }
 0x33b   : > { %9467 = vmatprep.mubr.msk.bf16.mxu1 %vm3133_vm8, %v13253_v50  ;;  %9490 = vmatpush3.bf16.msra.mxu1 %v13138_v52  ;;  %v13279_v52 = vshrl.u32 %v13027_v34, 16  ;;  %v3886_v10 = vor.u32 %v3885_v1, %v3882_v18  ;;  %v13338_v1 = vshrl.u32 %v13109_v27, 16 }
 0x33c   : > { %9510 = vmatmul.mubr.msk.bf16.gmra.mxu0 %vm3133_vm8, %v4064_v25  ;;  %9517 = vmatprep.subr.bf16.mxu1 %v13243_v39  ;;  %v13312_v25 = vshll.u32 %v13067_v53, 16  ;;  %v4194_v63 = vrot.slane %v13309_v41, 3 }
 0x33d   : > { %9513 = vmatprep.mubr.msk.bf16.mxu0 %vm3133_vm8, %v4066_v59  ;;  %v3890_v21 = vrot.slane %v13279_v52, 2  ;;  %v3917_v19 = vrot.slane %v13338_v1, 2 }
 0x33e   : > { %v3902_v45 = vrot.slane %v13312_v25, 3  ;;  %v4551_v3 = vrot.slane %v13312_v25, 1 }
 0x33f   : > { %v3894_v59 = vor.u32 %v3893_v51, %v3890_v21  ;;  %v3911_v21 = vrot.slane %v13318_v43, 3  ;;  %v13330_v51 = vld [vmem:[%s14694_s3 + $0x68] sm:$0xff]  }
 0x341   : > { %v3912_v14 = vor.u32 %v3911_v21, %v3908_v22  ;;  %v3926_v21 = vrot.slane %v13345_v0, 2 }
 0x342   : > { %9468 = vmatmul.mubr.msk.bf16.gmra.mxu1 %vm3133_vm8, %v13288_v24 }
 0x343   : > { %9471 = vmatprep.mubr.msk.bf16.mxu1 %vm3133_vm8, %v13294_v30 }
 0x344   : > { %9514 = vmatmul.mubr.msk.bf16.gmra.mxu0 %vm3133_vm8, %v4068_v56  ;;  %v3899_v56 = vrot.slane %v13309_v41, 2 }
 0x345   : > { %9533 = vmatprep.mubr.msk.bf16.mxu0 %vm3133_vm8, %v12908_v23  ;;  %v3895_v23 = vsel %vm3878_vm11, %v3886_v10, %v3894_v59  ;;  %v13341_v10 = vshll.u32 %v13109_v27, 16 }
 0x346   : > { %v3903_v18 = vor.u32 %v3902_v45, %v3899_v56  ;;  %v13354_v45 = vld [vmem:[%s14694_s3 + $0x50] sm:$0xff]  }
 0x348   : > { %v3904_v56 = vsel %vm3878_vm11, %v3894_v59, %v3903_v18  ;;  %v3913_v22 = vsel %vm3878_vm11, %v3903_v18, %v3912_v14  ;;  %v4549_v18 = vrot.slane %v13282_v61, 1 }
 0x34a   : > { %9472 = vmatmul.mubr.msk.bf16.gmra.mxu1 %vm3133_vm8, %v13276_v12 }
 0x34b   : > { %9491 = vmatprep.mubr.msk.bf16.mxu1 %vm3133_vm8, %v3895_v23  ;;  %v13348_v23 = vshll.u32 %v13118_v38, 16 }
 0x34c   : > { %9534 = vmatmul.mubr.msk.bf16.vlgmr.msra.gmra.mxu0 %vm3133_vm8, %v12929_v32 }
 0x34d   : > { %9537 = vmatprep.mubr.msk.bf16.mxu0 %vm3133_vm8, %v12953_v62  ;;  %9560 = vmatpush3.bf16.msra.mxu0 %v13203_v5  ;;  %v3920_v5 = vrot.slane %v13341_v10, 3  ;;  %v3929_v28 = vrot.slane %v13348_v23, 3 }
 0x34e   : > { %9587 = vmatprep.subr.bf16.mxu0 %v13330_v51 }
 0x34f   : > { %v3921_v59 = vor.u32 %v3920_v5, %v3917_v19  ;;  %v4550_v19 = vor.u32 %v4549_v18, %v13279_v52  ;;  %v15505_v5 = vshrl.u32 %v13039_v54, 16 }
 0x352   : > { %9492 = vmatmul.mubr.msk.bf16.vlgmr.msra.gmra.mxu1 %vm3133_vm8, %v3904_v56  ;;  %v3930_v56 = vor.u32 %v3929_v28, %v3926_v21  ;;  %v4191_v28 = vrot.slane %v13282_v61, 4  ;;  %v4187_v21 = vrot.slane %v15505_v5, 3  ;;  %v4553_v5 = vor.u32 %v4551_v3, %v13309_v41 }
 0x353   : > { %9495 = vmatprep.mubr.msk.bf16.mxu1 %vm3133_vm8, %v3913_v22  ;;  %9518 = vmatpush3.bf16.msra.mxu1 %v13243_v39  ;;  %v3922_v22 = vsel %vm3878_vm11, %v3912_v14, %v3921_v59  ;;  %v4190_v39 = vrot.slane %v13279_v52, 3  ;;  %v4552_v14 = vsel %vm3079_vm9, %v4550_v19, %v4551_v3  ;;  %v4557_v19 = vrot.slane %v13341_v10, 1  ;;  %v13412_v3 = vld [vmem:[%s14694_s3 + $0x78] sm:$0xff]  }
 0x354   : > { %9538 = vmatmul.mubr.msk.bf16.gmra.mxu0 %vm3133_vm8, %v12987_v7  ;;  %9545 = vmatprep.subr.bf16.mxu1 %v13354_v45  ;;  %v3931_v9 = vsel %vm3878_vm11, %v3921_v59, %v3930_v56  ;;  %v15507_v59 = vshll.u32 %v13260_v13, 16  ;;  %v4189_v40 = vor.u32 %v4188_v6, %v4187_v21  ;;  %v4199_v6 = vrot.slane %v13318_v43, 4 }
 0x355   : > { %9541 = vmatprep.mubr.msk.bf16.mxu0 %vm3133_vm8, %v13020_v60 }
 0x356   : > { %v3935_v18 = vrot.slane %v15507_v59, 3 }
 0x358   : > { %v3936_v54 = vsel %vm3878_vm11, %v3930_v56, %v3935_v18  ;;  %v4560_v18 = vrot.slane %v13348_v23, 1 }
 0x35a   : > { %9496 = vmatmul.mubr.msk.bf16.gmra.mxu1 %vm3133_vm8, %v3922_v22  ;;  %v4192_v22 = vor.u32 %v4191_v28, %v4190_v39  ;;  %v4556_v28 = vor.u32 %v4554_v35, %v13315_v15 }
 0x35b   : > { %9499 = vmatprep.mubr.msk.bf16.mxu1 %vm3133_vm8, %v3931_v9  ;;  %v13397_v9 = vpack.c.bf16 %v13088_v46, %v13235_v55  ;;  %v4198_v46 = vrot.slane %v13315_v15, 3  ;;  %v4555_v55 = vsel %vm3079_vm9, %v4553_v5, %v4554_v35  ;;  %v13426_v35 = vld [vmem:[%s14694_s3 + $0x60] sm:$0xff]  }
 0x35c   : > { %9542 = vmatmul.mubr.msk.bf16.gmra.mxu0 %vm3133_vm8, %v13377_v29  ;;  %v4193_v39 = vsel %vm4186_vm12, %v4189_v40, %v4192_v22  ;;  %v4558_v56 = vsel %vm3079_vm9, %v4556_v28, %v4557_v19  ;;  %v4202_v28 = vrot.slane %v13338_v1, 3 }
 0x35d   : > { %9561 = vmatprep.mubr.msk.bf16.mxu0 %vm3133_vm8, %v4552_v14  ;;  %v4195_v14 = vrot.slane %v13312_v25, 4  ;;  %v4563_v40 = vshll.u32 %v13397_v9, 16  ;;  %v4200_v59 = vor.u32 %v4199_v6, %v4198_v46  ;;  %v4206_v46 = vrot.slane %v13345_v0, 3 }
 0x35e   : > { %v4207_v6 = vrot.slane %v13348_v23, 4 }
 0x35f   : > { %v4196_v21 = vor.u32 %v4195_v14, %v4194_v63  ;;  %v4203_v63 = vrot.slane %v13341_v10, 4  ;;  %v4562_v14 = vor.u32 %v4560_v18, %v13345_v0 }
 0x361   : > { %v4197_v5 = vsel %vm4186_vm12, %v4192_v22, %v4196_v21 }
 0x362   : > { %9500 = vmatmul.mubr.msk.bf16.gmra.mxu1 %vm3133_vm8, %v3936_v54  ;;  %v4565_v54 = vrot.slane %v4563_v40, 1 }
 0x363   : > { %9519 = vmatprep.mubr.msk.bf16.mxu1 %vm3133_vm8, %v4193_v39  ;;  %v4559_v39 = vor.u32 %v4557_v19, %v13338_v1 }
 0x364   : > { %9562 = vmatmul.mubr.msk.bf16.vlgmr.msra.gmra.mxu0 %vm3133_vm8, %v4555_v55  ;;  %v4566_v19 = vsel %vm3079_vm9, %v4562_v14, %v4565_v54  ;;  %v4819_v55 = vrot.slane %v13309_v41, 1 }
 0x365   : > { %9565 = vmatprep.mubr.msk.bf16.mxu0 %vm3133_vm8, %v4558_v56  ;;  %9588 = vmatpush3.bf16.msra.mxu0 %v13330_v51  ;;  %v4201_v51 = vsel %vm4186_vm12, %v4196_v21, %v4200_v59  ;;  %v4561_v22 = vsel %vm3079_vm9, %v4559_v39, %v4560_v18  ;;  %v4820_v56 = vrot.slane %v13312_v25, 2  ;;  %v4210_v21 = vshrl.u32 %v13260_v13, 16 }
 0x366   : > { %9615 = vmatprep.subr.bf16.mxu0 %v13412_v3  ;;  %v4817_v18 = vrot.slane %v13282_v61, 2  ;;  %v4567_v39 = vshrl.u32 %v13397_v9, 16  ;;  %v15508_v25 = vshll.u32 %v13260_v13, 16  ;;  %v4824_v61 = vrot.slane %v13318_v43, 2 }
 0x367   : > { %v4212_v41 = vrot.slane %v4210_v21, 3  ;;  %v4828_v13 = vrot.slane %v13341_v10, 2  ;;  %v4831_v43 = vrot.slane %v13345_v0, 1 }
 0x368   : > { %v4213_v20 = vrot.slane %v15508_v25, 4  ;;  %v4835_v10 = vrot.slane %v4567_v39, 1 }
 0x36a   : > { %9520 = vmatmul.mubr.msk.bf16.vlgmr.msra.gmra.mxu1 %vm3133_vm8, %v4197_v5  ;;  %v4204_v5 = vor.u32 %v4203_v63, %v4202_v28  ;;  %v4827_v63 = vrot.slane %v13338_v1, 1  ;;  %v4832_v1 = vrot.slane %v13348_v23, 2 }
 0x36b   : > { %9523 = vmatprep.mubr.msk.bf16.mxu1 %vm3133_vm8, %v4201_v51  ;;  %9546 = vmatpush3.bf16.msra.mxu1 %v13354_v45  ;;  %v4208_v51 = vor.u32 %v4207_v6, %v4206_v46  ;;  %v4816_v45 = vrot.slane %v13279_v52, 1  ;;  %v4823_v52 = vrot.slane %v13315_v15, 1  ;;  %v4214_v46 = vor.u32 %v4213_v20, %v4212_v41 }
 0x36c   : > { %9566 = vmatmul.mubr.msk.bf16.gmra.mxu0 %vm3133_vm8, %v4561_v22  ;;  %9573 = vmatprep.subr.bf16.mxu1 %v13426_v35  ;;  %v4821_v22 = vor.u32 %v4820_v56, %v4819_v55  ;;  %v4205_v14 = vsel %vm4186_vm12, %v4200_v59, %v4204_v5  ;;  %v4836_v56 = vrot.slane %v4563_v40, 2  ;;  %v4833_v21 = vor.u32 %v4832_v1, %v4831_v43  ;;  %v10108_v1 = vld [vmem:[%s14694_s3 + $0x90] sm:$0xff]  }
 0x36d   : > { %9569 = vmatprep.mubr.msk.bf16.mxu0 %vm3133_vm8, %v4566_v19  ;;  %v4209_v2 = vsel %vm4186_vm12, %v4204_v5, %v4208_v51  ;;  %v4569_v19 = vor.u32 %v4567_v39, %v4565_v54  ;;  %v4818_v28 = vor.u32 %v4817_v18, %v4816_v45  ;;  %v4825_v6 = vor.u32 %v4824_v61, %v4823_v52  ;;  %v10107_v45 = vld [vmem:[%s14694_s3 + $0x98] sm:$0xff]  }
 0x36e   : > { %v4829_v54 = vor.u32 %v4828_v13, %v4827_v63  ;;  %v4215_v55 = vsel %vm4186_vm12, %v4208_v51, %v4214_v46  ;;  %v4837_v5 = vor.u32 %v4836_v56, %v4835_v10  ;;  %v10104_v51 = vld [vmem:[%s14694_s3 + $0x70] sm:$0xff]   ;;  %v4688_v40 = vrot.slane %v13027_v34, 1 }
 0x36f   : > { %v4822_v59 = vsel %vm3467_vm10, %v4818_v28, %v4821_v22  ;;  %v4826_v15 = vsel %vm3467_vm10, %v4821_v22, %v4825_v6  ;;  %v5066_v18 = vrot.slane %v13377_v29, 2  ;;  %v13513_v39 = vrot.slane %v13106_v33, 2  ;;  %v10106_v22 = vld [vmem:[%s14694_s3 + $0x80] sm:$0xff]  }
 0x370   : > { %v4830_v20 = vsel %vm3467_vm10, %v4825_v6, %v4829_v54  ;;  %v4834_v0 = vsel %vm3467_vm10, %v4829_v54, %v4833_v21  ;;  %v4838_v23 = vsel %vm3467_vm10, %v4833_v21, %v4837_v5  ;;  %v4695_v28 = vrot.slane %v13118_v38, 1  ;;  %v10109_v54 = vld [vmem:[%s14694_s3 + $0xa8] sm:$0xff]  }
 0x371   : > { %15509 = vst [vmem:[#allocation70_spill] sm:$0xff] %v13513_v39  ;;  %v13524_v25 = vsel %vm1007_vm1, %v13276_v12, %v5066_v18  ;;  %v4697_v52 = vrot.slane %v13397_v9, 1  ;;  %v5335_v61 = vrot.slane %v12953_v62, 3  ;;  %v5334_v63 = vrot.slane %v12929_v32, 3 }
 0x372   : > { %9524 = vmatmul.mubr.msk.bf16.gmra.mxu1 %vm3133_vm8, %v4205_v14  ;;  %v5337_v46 = vrot.slane %v12987_v7, 3  ;;  %v5339_v6 = vrot.slane %v13020_v60, 3  ;;  %v5343_v43 = vrot.slane %v13106_v33, 3 }
 0x373   : > { %9527 = vmatprep.mubr.msk.bf16.mxu1 %vm3133_vm8, %v4209_v2  ;;  %v10105_v2 = vld [vmem:[%s14694_s3 + $0x88] sm:$0xff]   ;;  %v5336_v13 = vsel %vm1463_vm2, %v5334_v63, %v5335_v61 }
 0x374   : > { %9570 = vmatmul.mubr.msk.bf16.gmra.mxu0 %vm3133_vm8, %v4569_v19  ;;  %v13530_v19 = vsel %vm1007_vm1, %v5066_v18, %v13513_v39  ;;  %v5338_v32 = vsel %vm1463_vm2, %v5335_v61, %v5337_v46 }
 0x375   : > { %9589 = vmatprep.mubr.msk.bf16.mxu0 %vm3133_vm8, %v4822_v59  ;;  %v4698_v59 = vsel %vm787_vm0, %v4695_v28, %v4697_v52 }
 0x37a   : > { %9528 = vmatmul.mubr.msk.bf16.gmra.mxu1 %vm3133_vm8, %v4215_v55  ;;  %v5340_v55 = vsel %vm1463_vm2, %v5337_v46, %v5339_v6 }
 0x37b   : > { %9547 = vmatprep.mubr.msk.bf16.mxu1 %vm3133_vm8, %v13027_v34  ;;  %v4693_v34 = vrot.slane %v13109_v27, 1 }
 0x37c   : > { %9590 = vmatmul.mubr.msk.bf16.vlgmr.msra.gmra.mxu0 %vm3133_vm8, %v4826_v15  ;;  %v5341_v15 = vrot.slane %v13377_v29, 3 }
 0x37d   : > { %9593 = vmatprep.mubr.msk.bf16.mxu0 %vm3133_vm8, %v4830_v20  ;;  %9616 = vmatpush3.bf16.msra.mxu0 %v13412_v3  ;;  %v4689_v3 = vrot.slane %v13067_v53, 1  ;;  %v4696_v12 = vsel %vm787_vm0, %v4693_v34, %v4695_v28  ;;  %v13567_v20 = vpack.c.bf16 %v13147_v4, %v13147_v4 }
 0x37e   : > { %9643 = vmatprep.subr.bf16.mxu0 %v10105_v2  ;;  %v5342_v10 = vsel %vm1463_vm2, %v5339_v6, %v5341_v15  ;;  %v5344_v56 = vsel %vm1463_vm2, %v5341_v15, %v5343_v43 }
 0x382   : > { %9548 = vmatmul.mubr.msk.bf16.vlgmr.msra.gmra.mxu1 %vm3133_vm8, %v13067_v53 }
 0x383   : > { %9551 = vmatprep.mubr.msk.bf16.mxu1 %vm3133_vm8, %v13076_v47  ;;  %9574 = vmatpush3.bf16.msra.mxu1 %v13426_v35  ;;  %v4690_v35 = vsel %vm787_vm0, %v4688_v40, %v4689_v3 }
 0x384   : > { %9594 = vmatmul.mubr.msk.bf16.gmra.mxu0 %vm3133_vm8, %v4834_v0  ;;  %9601 = vmatprep.subr.bf16.mxu1 %v10104_v51 }
 0x385   : > { %9597 = vmatprep.mubr.msk.bf16.mxu0 %vm3133_vm8, %v4838_v23 }
 0x38a   : > { %9552 = vmatmul.mubr.msk.bf16.gmra.mxu1 %vm3133_vm8, %v13109_v27 }
 0x38b   : > { %9555 = vmatprep.mubr.msk.bf16.mxu1 %vm3133_vm8, %v13118_v38 }
 0x38c   : > { %9598 = vmatmul.mubr.msk.bf16.gmra.mxu0 %vm3133_vm8, %v4837_v5  ;;  %v5345_v5 = vrot.slane %v13567_v20, 3 }
 0x38d   : > { %9617 = vmatprep.mubr.msk.bf16.mxu0 %vm3133_vm8, %v13253_v50  ;;  %v4691_v50 = vrot.slane %v13076_v47, 1 }
 0x38e   : > { %v5346_v40 = vsel %vm1463_vm2, %v5343_v43, %v5345_v5 }
 0x38f   : > { %v4692_v14 = vsel %vm787_vm0, %v4689_v3, %v4691_v50  ;;  %v4694_v41 = vsel %vm787_vm0, %v4691_v50, %v4693_v34 }
 0x392   : > { %9556 = vmatmul.mubr.msk.bf16.gmra.mxu1 %vm3133_vm8, %v13397_v9 }
 0x393   : > { %9575 = vmatprep.mubr.msk.bf16.mxu1 %vm3133_vm8, %v4690_v35 }
 0x394   : > { %9618 = vmatmul.mubr.msk.bf16.vlgmr.msra.gmra.mxu0 %vm3133_vm8, %v13288_v24 }
 0x395   : > { %9621 = vmatprep.mubr.msk.bf16.mxu0 %vm3133_vm8, %v13294_v30  ;;  %9644 = vmatpush3.bf16.msra.mxu0 %v10105_v2 }
 0x396   : > { %9671 = vmatprep.subr.bf16.mxu0 %v10107_v45 }
 0x39a   : > { %9576 = vmatmul.mubr.msk.bf16.vlgmr.msra.gmra.mxu1 %vm3133_vm8, %v4692_v14 }
 0x39b   : > { %9579 = vmatprep.mubr.msk.bf16.mxu1 %vm3133_vm8, %v4694_v41  ;;  %9602 = vmatpush3.bf16.msra.mxu1 %v10104_v51  ;;  %v13598_v41 = vld [vmem:[%s14694_s3 + $0xb8] sm:$0xff]  }
 0x39c   : > { %9622 = vmatmul.mubr.msk.bf16.gmra.mxu0 %vm3133_vm8, %v13524_v25  ;;  %9629 = vmatprep.subr.bf16.mxu1 %v10106_v22 }
 0x39d   : > { %9625 = vmatprep.mubr.msk.bf16.mxu0 %vm3133_vm8, %v13530_v19 }
 0x3a2   : > { %9580 = vmatmul.mubr.msk.bf16.gmra.mxu1 %vm3133_vm8, %v4696_v12  ;;  %v13617_v12 = vshrl.u32 %v13106_v33, 16 }
 0x3a3   : > { %9583 = vmatprep.mubr.msk.bf16.mxu1 %vm3133_vm8, %v4698_v59 }
 0x3a4   : > { %9626 = vmatmul.mubr.msk.bf16.gmra.mxu0 %vm3133_vm8, %v13513_v39 }
 0x3a5   : > { %9645 = vmatprep.mubr.msk.bf16.mxu0 %vm3133_vm8, %v5336_v13 }
 0x3aa   : > { %9584 = vmatmul.mubr.msk.bf16.gmra.mxu1 %vm3133_vm8, %v4697_v52  ;;  %v13612_v52 = vshll.u32 %v13377_v29, 16 }
 0x3ab   : > { %9603 = vmatprep.mubr.msk.bf16.mxu1 %vm3133_vm8, %v13114_v57 }
 0x3ac   : > { %9646 = vmatmul.mubr.msk.bf16.vlgmr.msra.gmra.mxu0 %vm3133_vm8, %v5338_v32  ;;  %v9423_v2 = vpop.f32.mrf.mxu0  ;;  %v5199_v13 = vrot.slane %v13612_v52, 3 }
 0x3ad   : > { %9649 = vmatprep.mubr.msk.bf16.mxu0 %vm3133_vm8, %v5340_v55  ;;  %9672 = vmatpush3.bf16.msra.mxu0 %v10107_v45 }
 0x3ae   : > { %9699 = vmatprep.subr.bf16.mxu0 %v10109_v54  ;;  %v3285_v57 = vpop.f32.mrf.mxu0 }
 0x3b0   : > { %v9424_v21 = vpop.f32.mrf.mxu0 }
 0x3b2   : > { %9604 = vmatmul.mubr.msk.bf16.vlgmr.msra.gmra.mxu1 %vm3133_vm8, %v13123_v37  ;;  %v4956_v37 = vrot.slane %v13397_v9, 2  ;;  %v3288_v0 = vpop.f32.mrf.mxu0 }
 0x3b3   : > { %9607 = vmatprep.mubr.msk.bf16.mxu1 %vm3133_vm8, %v13145_v31  ;;  %9630 = vmatpush3.bf16.msra.mxu1 %v10106_v22 }
 0x3b4   : > { %9650 = vmatmul.mubr.msk.bf16.gmra.mxu0 %vm3133_vm8, %v5342_v10  ;;  %9657 = vmatprep.subr.bf16.mxu1 %v10108_v1  ;;  %v4957_v31 = vsel %vm1007_vm1, %v13133_v26, %v4956_v37 }
 0x3b5   : > { %9653 = vmatprep.mubr.msk.bf16.mxu0 %vm3133_vm8, %v5344_v56 }
 0x3b9   : > { %v9409_v51 = vpop.f32.mrf.mxu1 }
 0x3ba   : > { %v13577_v23 = vadd.f32 %v9423_v2, %v9409_v51  ;;  %9608 = vmatmul.mubr.msk.bf16.gmra.mxu1 %vm3133_vm8, %v13153_v58  ;;  %v14987_v51 = vshll.u32 %v13567_v20, 16 }
 0x3bb   : > { %v3186_v3 = vpop.f32.mrf.mxu1  ;;  %9611 = vmatprep.mubr.msk.bf16.mxu1 %vm3133_vm8, %v4957_v31 }
 0x3bc   : > { %v13585_v35 = vadd.f32 %v3285_v57, %v3186_v3  ;;  %v9427_v45 = vpop.f32.mrf.mxu0  ;;  %9654 = vmatmul.mubr.msk.bf16.gmra.mxu0 %vm3133_vm8, %v5346_v40  ;;  %v15510_v3 = vpack.c.bf16 %v13147_v4, %v13094_v17 }
 0x3bd   : > { %v9410_v50 = vpop.f32.mrf.mxu1  ;;  %9673 = vmatprep.mubr.msk.bf16.mxu0 %vm3133_vm8, %v13067_v53  ;;  %v13609_v53 = vshrl.u32 %v13377_v29, 16 }
 0x3be   : > { %v13590_v34 = vadd.f32 %v9424_v21, %v9410_v50  ;;  %v3301_v58 = vpop.f32.mrf.mxu0 }
 0x3bf   : > { %v3189_v18 = vpop.f32.mrf.mxu1  ;;  %v5196_v63 = vrot.slane %v13609_v53, 2 }
 0x3c0   : > { %v13592_v22 = vadd.f32 %v3288_v0, %v3189_v18  ;;  %v9428_v26 = vpop.f32.mrf.mxu0  ;;  %v5818_v18 = vrot.slane %v13612_v52, 1 }
 0x3c2   : > { %v3304_v14 = vpop.f32.mrf.mxu0  ;;  %9612 = vmatmul.mubr.msk.bf16.gmra.mxu1 %vm3133_vm8, %v4956_v37 }
 0x3c3   : > { %9631 = vmatprep.mubr.msk.bf16.mxu1 %vm3133_vm8, %v13206_v16  ;;  %v13620_v16 = vshll.u32 %v13106_v33, 16 }
 0x3c4   : > { %v13602_v28 = vpop.f32.mrf.mxu0  ;;  %9674 = vmatmul.mubr.msk.bf16.vlgmr.msra.gmra.mxu0 %vm3133_vm8, %v13076_v47 }
 0x3c5   : > { %9677 = vmatprep.mubr.msk.bf16.mxu0 %vm3133_vm8, %v13109_v27  ;;  %9700 = vmatpush3.bf16.msra.mxu0 %v10109_v54  ;;  %v13628_v27 = vld [vmem:[%s14694_s3 + $0xa0] sm:$0xff]   ;;  %v5205_v54 = vrot.slane %v13617_v12, 2  ;;  %v5208_v32 = vrot.slane %v13620_v16, 3 }
 0x3c6   : > { %v13614_v61 = vpop.f32.mrf.mxu0  ;;  %9727 = vmatprep.subr.bf16.mxu0 %v13598_v41 }
 0x3c8   : > { %v13623_v47 = vpop.f32.mrf.mxu0 }
 0x3c9   : > { %v9413_v59 = vpop.f32.mrf.mxu1 }
 0x3ca   : > { %v13632_v46 = vadd.f32 %v9427_v45, %v9413_v59  ;;  %v13634_v6 = vpop.f32.mrf.mxu0  ;;  %9632 = vmatmul.mubr.msk.bf16.vlgmr.msra.gmra.mxu1 %vm3133_vm8, %v13215_v44  ;;  %v5200_v44 = vor.u32 %v5199_v13, %v5196_v63  ;;  %v5819_v63 = vsel %vm3079_vm9, %v13052_v49, %v5818_v18  ;;  %v15511_v13 = vld [vmem:[#allocation51_spill] sm:$0xff] }
 0x3cb   : > { %v3202_v55 = vpop.f32.mrf.mxu1  ;;  %9635 = vmatprep.mubr.msk.bf16.mxu1 %vm3133_vm8, %v13222_v11  ;;  %9658 = vmatpush3.bf16.msra.mxu1 %v10108_v1  ;;  %v5209_v11 = vor.u32 %v5208_v32, %v5205_v54  ;;  %v14986_v54 = vshll.u32 %v15511_v13, 16 }
 0x3cc   : > { %v13642_v2 = vadd.f32 %v3301_v58, %v3202_v55  ;;  %v13644_v15 = vpop.f32.mrf.mxu0  ;;  %9678 = vmatmul.mubr.msk.bf16.gmra.mxu0 %vm3133_vm8, %v13118_v38  ;;  %9685 = vmatprep.subr.bf16.mxu1 %v13628_v27  ;;  %v5201_v38 = vsel %vm3878_vm11, %v13208_v8, %v5200_v44  ;;  %v5214_v8 = vrot.slane %v14987_v51, 3  ;;  %v5828_v51 = vshrl.u32 %v15511_v13, 16 }
 0x3cd   : > { %v9414_v43 = vpop.f32.mrf.mxu1  ;;  %9681 = vmatprep.mubr.msk.bf16.mxu0 %vm3133_vm8, %v13397_v9  ;;  %v5210_v9 = vsel %vm3878_vm11, %v5200_v44, %v5209_v11  ;;  %v5820_v44 = vor.u32 %v5818_v18, %v13609_v53  ;;  %v5483_v18 = vrot.slane %v13617_v12, 3 }
 0x3ce   : > { %v13651_v57 = vadd.f32 %v9428_v26, %v9414_v43  ;;  %v13653_v10 = vpop.f32.mrf.mxu0  ;;  %v5215_v26 = vsel %vm3878_vm11, %v5209_v11, %v5214_v8 }
 0x3cf   : > { %v3205_v1 = vpop.f32.mrf.mxu1 }
 0x3d0   : > { %v13655_v56 = vadd.f32 %v3304_v14, %v3205_v1  ;;  %v13657_v21 = vpop.f32.mrf.mxu0 }
 0x3d2   : > { %v9417_v37 = vpop.f32.mrf.mxu1  ;;  %v13661_v5 = vpop.f32.mrf.mxu0  ;;  %9636 = vmatmul.mubr.msk.bf16.gmra.mxu1 %vm3133_vm8, %v5201_v38  ;;  %v5826_v38 = vrot.slane %v14986_v54, 1 }
 0x3d3   : > { %9639 = vmatprep.mubr.msk.bf16.mxu1 %vm3133_vm8, %v5210_v9  ;;  %v5479_v9 = vrot.slane %v13609_v53, 3 }
 0x3d4   : > { %v3218_v0 = vpop.f32.mrf.mxu1  ;;  %v13667_v31 = vpop.f32.mrf.mxu0  ;;  %9682 = vmatmul.mubr.msk.bf16.gmra.mxu0 %vm3133_vm8, %v15510_v3 }
 0x3d5   : > { %9701 = vmatprep.mubr.msk.bf16.mxu0 %vm3133_vm8, %v13015_v48 }
 0x3d6   : > { %v9418_v40 = vpop.f32.mrf.mxu1  ;;  %v13677_v45 = vpop.f32.mrf.mxu0 }
 0x3d8   : > { %v3221_v50 = vpop.f32.mrf.mxu1  ;;  %v13679_v58 = vpop.f32.mrf.mxu0 }
 0x3da   : > { %v9431_v14 = vpop.f32.mrf.mxu1  ;;  %v13683_v17 = vpop.f32.mrf.mxu0  ;;  %9640 = vmatmul.mubr.msk.bf16.gmra.mxu1 %vm3133_vm8, %v5215_v26  ;;  %v5484_v26 = vrot.slane %v13620_v16, 4 }
 0x3db   : > { %v13686_v4 = vadd.f32 %v9431_v14, %v9417_v37  ;;  %9659 = vmatprep.mubr.msk.bf16.mxu1 %vm3133_vm8, %v13246_v36  ;;  %v5821_v36 = vrot.slane %v13620_v16, 1 }
 0x3dc   : > { %v3317_v48 = vpop.f32.mrf.mxu1  ;;  %v13690_v59 = vpop.f32.mrf.mxu0  ;;  %9702 = vmatmul.mubr.msk.bf16.vlgmr.msra.gmra.mxu0 %vm3133_vm8, %v13049_v42 }
 0x3dd   : > { %v13697_v32 = vadd.f32 %v3317_v48, %v3218_v0  ;;  %9705 = vmatprep.mubr.msk.bf16.mxu0 %vm3133_vm8, %v5819_v63  ;;  %9728 = vmatpush3.bf16.msra.mxu0 %v13598_v41  ;;  %v5823_v49 = vor.u32 %v5821_v36, %v13617_v12  ;;  %v13715_v41 = vld [vmem:[%s14694_s3 + $0xb0] sm:$0xff]   ;;  %v5480_v0 = vrot.slane %v13612_v52, 4  ;;  %v5487_v63 = vshrl.u32 %v13567_v20, 16 }
 0x3de   : > { %v9432_v55 = vpop.f32.mrf.mxu1  ;;  %v13701_v43 = vpop.f32.mrf.mxu0  ;;  %v15513_v48 = vld [vmem:[#allocation82_spill] sm:$0xff] }
 0x3df   : > { %v13705_v11 = vadd.f32 %v9432_v55, %v9418_v40  ;;  %v15512_v40 = vld [vmem:[#allocation80_spill] sm:$0xff] }
 0x3e0   : > { %v3320_v42 = vpop.f32.mrf.mxu1  ;;  %v13707_v1 = vpop.f32.mrf.mxu0 }
 0x3e1   : > { %v13717_v37 = vadd.f32 %v3320_v42, %v3221_v50  ;;  %v5822_v50 = vsel %vm3079_vm9, %v5820_v44, %v5821_v36 }
 0x3e2   : > { %v9437_v3 = vpop.f32.mrf.mxu1  ;;  %v13721_v8 = vpop.f32.mrf.mxu0  ;;  %9660 = vmatmul.mubr.msk.bf16.vlgmr.msra.gmra.mxu1 %vm3133_vm8, %v15512_v40  ;;  %v5827_v40 = vsel %vm3079_vm9, %v5823_v49, %v5826_v38  ;;  %v5489_v49 = vrot.slane %v5487_v63, 3 }
 0x3e3   : > { %v3457_v14 = vadd.f32 %v9437_v3, %v13577_v23  ;;  %9663 = vmatprep.mubr.msk.bf16.mxu1 %vm3133_vm8, %v15513_v48  ;;  %9686 = vmatpush3.bf16.msra.mxu1 %v13628_v27  ;;  %v5481_v3 = vor.u32 %v5480_v0, %v5479_v9  ;;  %v5485_v48 = vor.u32 %v5484_v26, %v5483_v18  ;;  %v15514_v9 = vshll.u32 %v13567_v20, 16 }
 0x3e4   : > { %v3408_v55 = vpop.f32.mrf.mxu1  ;;  %v13733_v42 = vpop.f32.mrf.mxu0  ;;  %9706 = vmatmul.mubr.msk.bf16.gmra.mxu0 %vm3133_vm8, %v5822_v50  ;;  %9713 = vmatprep.subr.bf16.mxu1 %v13715_v41 }
 0x3e5   : > { %v3455_v23 = vadd.f32 %v3408_v55, %v13585_v35  ;;  %9709 = vmatprep.mubr.msk.bf16.mxu0 %vm3133_vm8, %v5827_v40  ;;  %v13741_v27 = vadd.f32 %v13602_v28, %v3457_v14  ;;  %v5490_v0 = vrot.slane %v15514_v9, 4  ;;  %v15515_v14 = vld [vmem:[#allocation69_spill] sm:$0xff]  ;;  %v5486_v63 = vsel %vm4186_vm12, %v5481_v3, %v5485_v48 }
 0x3e6   : > { %v9438_v36 = vpop.f32.mrf.mxu1  ;;  %v13743_v44 = vpop.f32.mrf.mxu0  ;;  %v5482_v55 = vsel %vm4186_vm12, %v15515_v14, %v5481_v3 }
 0x3e7   : > { %v3458_v54 = vadd.f32 %v9438_v36, %v13590_v34  ;;  %v13747_v50 = vadd.f32 %v13614_v61, %v3455_v23  ;;  %v5830_v34 = vor.u32 %v5828_v51, %v5826_v38  ;;  %v15516_v23 = vld [vmem:[#allocation11_spill] sm:$0xff] }
 0x3e8   : > { %v3411_v39 = vpop.f32.mrf.mxu1  ;;  %v13750_v35 = vpop.f32.mrf.mxu0 }
 0x3e9   : > { %v3456_v28 = vadd.f32 %v3411_v39, %v13592_v22  ;;  %v13758_v18 = vadd.f32 %v13623_v47, %v3458_v54  ;;  %v6060_v47 = vrot.slane %v13609_v53, 1  ;;  %v6061_v54 = vrot.slane %v13612_v52, 2 }
 0x3ea   : > { %v9441_v61 = vpop.f32.mrf.mxu1  ;;  %v13760_v26 = vpop.f32.mrf.mxu0  ;;  %9664 = vmatmul.mubr.msk.bf16.gmra.mxu1 %vm3133_vm8, %v5482_v55 }
 0x3eb   : > { %v3461_v40 = vadd.f32 %v9441_v61, %v13632_v46  ;;  %9667 = vmatprep.mubr.msk.bf16.mxu1 %vm3133_vm8, %v5486_v63  ;;  %v13767_v39 = vadd.f32 %v13634_v6, %v3456_v28  ;;  %v5491_v46 = vor.u32 %v5490_v0, %v5489_v49  ;;  %v6062_v52 = vor.u32 %v6061_v54, %v6060_v47  ;;  %v15518_v63 = vld [vmem:[#allocation14_spill] sm:$0xff] }
 0x3ec   : > { %v3424_v20 = vpop.f32.mrf.mxu1  ;;  %v13769_v22 = vpop.f32.mrf.mxu0  ;;  %9710 = vmatmul.mubr.msk.bf16.gmra.mxu0 %vm3133_vm8, %v5830_v34  ;;  %v6065_v34 = vrot.slane %v13620_v16, 2 }
 0x3ed   : > { %v3459_v38 = vadd.f32 %v3424_v20, %v13642_v2  ;;  %9729 = vmatprep.mubr.msk.bf16.mxu0 %vm3133_vm8, %v15516_v23  ;;  %v13778_v3 = vadd.f32 %v13644_v15, %v3461_v40  ;;  %v5492_v55 = vsel %vm4186_vm12, %v5485_v48, %v5491_v46  ;;  %v6063_v40 = vsel %vm3467_vm10, %v15518_v63, %v6062_v52 }
 0x3ee   : > { %v9442_v6 = vpop.f32.mrf.mxu1  ;;  %v13780_v36 = vpop.f32.mrf.mxu0  ;;  %v6068_v20 = vrot.slane %v5828_v51, 1 }
 0x3ef   : > { %v3462_v9 = vadd.f32 %v9442_v6, %v13651_v57  ;;  %v13784_v28 = vadd.f32 %v13653_v10, %v3459_v38  ;;  %v6064_v10 = vrot.slane %v13617_v12, 1 }
 0x3f0   : > { %v3427_v53 = vpop.f32.mrf.mxu1  ;;  %v13786_v14 = vpop.f32.mrf.mxu0 }
 0x3f1   : > { %v3460_v2 = vadd.f32 %v3427_v53, %v13655_v56  ;;  %v13791_v49 = vadd.f32 %v13657_v21, %v3462_v9  ;;  %v15517_v21 = vld [vmem:[#allocation8_spill] sm:$0xff]  ;;  %v6066_v38 = vor.u32 %v6065_v34, %v6064_v10 }
 0x3f2   : > { %v9445_v15 = vpop.f32.mrf.mxu1  ;;  %v13793_v0 = vpop.f32.mrf.mxu0  ;;  %9668 = vmatmul.mubr.msk.bf16.gmra.mxu1 %vm3133_vm8, %v5492_v55 }
 0x3f3   : > { %v3465_v57 = vadd.f32 %v9445_v15, %v13686_v4  ;;  %9687 = vmatprep.mubr.msk.bf16.mxu1 %vm3133_vm8, %v12953_v62  ;;  %v3601_v56 = vadd.f32 %v13661_v5, %v3460_v2  ;;  %v15519_v4 = vshll.u32 %v15511_v13, 16 }
 0x3f4   : > { %v3440_v48 = vpop.f32.mrf.mxu1  ;;  %v13802_v61 = vpop.f32.mrf.mxu0  ;;  %9730 = vmatmul.mubr.msk.bf16.vlgmr.msra.gmra.mxu0 %vm3133_vm8, %v15517_v21 }
 0x3f5   : > { %v6069_v47 = vrot.slane %v15519_v4, 2  ;;  %v3463_v62 = vadd.f32 %v3440_v48, %v13697_v32  ;;  %9733 = vmatprep.mubr.msk.bf16.mxu0 %vm3133_vm8, %v6063_v40  ;;  %v3606_v12 = vadd.f32 %v13667_v31, %v3465_v57  ;;  %v13822_v32 = vld [vmem:[%s14694_s3 + $0xc0] sm:$0xff]  }
 0x3f6   : > { %v9446_v16 = vpop.f32.mrf.mxu1  ;;  %v13813_v5 = vpop.f32.mrf.mxu0 }
 0x3f7   : > { %v3466_v54 = vadd.f32 %v9446_v16, %v13705_v11  ;;  %v3604_v23 = vadd.f32 %v13677_v45, %v3463_v62  ;;  %v6070_v51 = vor.u32 %v6069_v47, %v6068_v20  ;;  %v6067_v11 = vsel %vm3467_vm10, %v6062_v52, %v6066_v38 }
 0x3f8   : > { %v3443_v46 = vpop.f32.mrf.mxu1  ;;  %v13817_v6 = vpop.f32.mrf.mxu0 }
 0x3f9   : > { %v3464_v9 = vadd.f32 %v3443_v46, %v13717_v37  ;;  %v3607_v31 = vadd.f32 %v13679_v58, %v3466_v54  ;;  %v6071_v58 = vsel %vm3467_vm10, %v6066_v38, %v6070_v51 }
 0x3fa   : > { %v9465_v53 = vpop.f32.mrf.mxu1  ;;  %v13826_v2 = vpop.f32.mrf.mxu0  ;;  %9688 = vmatmul.mubr.msk.bf16.vlgmr.msra.gmra.mxu1 %vm3133_vm8, %v12987_v7 }
 0x3fb   : > { %v3727_v45 = vadd.f32 %v9465_v53, %v13741_v27  ;;  %9691 = vmatprep.mubr.msk.bf16.mxu1 %vm3133_vm8, %v13020_v60  ;;  %9714 = vmatpush3.bf16.msra.mxu1 %v13715_v41  ;;  %v3605_v55 = vadd.f32 %v13683_v17, %v3464_v9  ;;  %v5943_v53 = vrot.slane %v13377_v29, 1 }
 0x3fc   : > { %v3678_v37 = vpop.f32.mrf.mxu1  ;;  %v13836_v15 = vpop.f32.mrf.mxu0  ;;  %9734 = vmatmul.mubr.msk.bf16.gmra.mxu0 %vm3133_vm8, %v6067_v11  ;;  %9741 = vmatprep.subr.bf16.mxu1 %v13822_v32 }
 0x3fd   : > { %v3725_v7 = vadd.f32 %v3678_v37, %v13747_v50  ;;  %9737 = vmatprep.mubr.msk.bf16.mxu0 %vm3133_vm8, %v6071_v58  ;;  %v3867_v60 = vadd.f32 %v13690_v59, %v3727_v45 }
 0x3fe   : > { %v9466_v41 = vpop.f32.mrf.mxu1  ;;  %v13844_v27 = vpop.f32.mrf.mxu0 }
 0x3ff   : > { %v3728_v17 = vadd.f32 %v9466_v41, %v13758_v18  ;;  %v3865_v52 = vadd.f32 %v13701_v43, %v3725_v7 }
 0x400   : > { %v3681_v57 = vpop.f32.mrf.mxu1  ;;  %v13848_v10 = vpop.f32.mrf.mxu0 }
 0x401   : > { %v3726_v34 = vadd.f32 %v3681_v57, %v13767_v39  ;;  %v3868_v48 = vadd.f32 %v13707_v1, %v3728_v17 }
 0x402   : > { %v9469_v21 = vpop.f32.mrf.mxu1  ;;  %v13852_v50 = vpop.f32.mrf.mxu0  ;;  %9692 = vmatmul.mubr.msk.bf16.gmra.mxu1 %vm3133_vm8, %v13377_v29 }
 0x403   : > { %v3731_v59 = vadd.f32 %v9469_v21, %v13778_v3  ;;  %9695 = vmatprep.mubr.msk.bf16.mxu1 %vm3133_vm8, %v13106_v33  ;;  %v3866_v43 = vadd.f32 %v13721_v8, %v3726_v34 }
 0x404   : > { %v3694_v18 = vpop.f32.mrf.mxu1  ;;  %v13860_v63 = vpop.f32.mrf.mxu0  ;;  %9738 = vmatmul.mubr.msk.bf16.gmra.mxu0 %vm3133_vm8, %v6070_v51 }
 0x405   : > { %v3729_v1 = vadd.f32 %v3694_v18, %v13784_v28  ;;  %v3871_v39 = vadd.f32 %v13733_v42, %v3731_v59  ;;  %v15520_v28 = vld [vmem:[#allocation79_spill] sm:$0xff]  ;;  %v5947_v59 = vrot.slane %v15511_v13, 1 }
 0x406   : > { %v9470_v40 = vpop.f32.mrf.mxu1  ;;  %v13865_v20 = vpop.f32.mrf.mxu0 }
 0x407   : > { %v3732_v4 = vadd.f32 %v9470_v40, %v13791_v49  ;;  %v3869_v3 = vadd.f32 %v13743_v44, %v3729_v1 }
 0x408   : > { %v3697_v47 = vpop.f32.mrf.mxu1  ;;  %v13869_v62 = vpop.f32.mrf.mxu0 }
 0x409   : > { %v3730_v8 = vadd.f32 %v3697_v47, %v3601_v56  ;;  %v3872_v16 = vadd.f32 %v13750_v35, %v3732_v4 }
 0x40a   : > { %v9473_v54 = vpop.f32.mrf.mxu1  ;;  %v13872_v38 = vpop.f32.mrf.mxu0  ;;  %9696 = vmatmul.mubr.msk.bf16.gmra.mxu1 %vm3133_vm8, %v15511_v13 }
 0x40b   : > { %v3735_v42 = vadd.f32 %v9473_v54, %v3606_v12  ;;  %9715 = vmatprep.mubr.msk.bf16.mxu1 %vm3133_vm8, %v15520_v28  ;;  %v3870_v49 = vadd.f32 %v13760_v26, %v3730_v8 }
 0x40c   : > { %v3710_v46 = vpop.f32.mrf.mxu1  ;;  %v13879_v44 = vpop.f32.mrf.mxu0 }
 0x40d   : > { %v3733_v51 = vadd.f32 %v3710_v46, %v3604_v23  ;;  %v3875_v56 = vadd.f32 %v13769_v22, %v3735_v42  ;;  %v15521_v23 = vld [vmem:[#allocation81_spill] sm:$0xff]  ;;  %v15522_v22 = vld [vmem:[#allocation20_spill] sm:$0xff] }
 0x40e   : > { %v9474_v9 = vpop.f32.mrf.mxu1  ;;  %v13882_v35 = vpop.f32.mrf.mxu0  ;;  %v5944_v17 = vsel %vm787_vm0, %v15522_v22, %v5943_v53 }
 0x40f   : > { %v3736_v45 = vadd.f32 %v9474_v9, %v3607_v31  ;;  %v3873_v11 = vadd.f32 %v13780_v36, %v3733_v51 }
 0x410   : > { %v3713_v12 = vpop.f32.mrf.mxu1  ;;  %v13886_v37 = vpop.f32.mrf.mxu0 }
 0x411   : > { %v13888_v58 = vadd.f32 %v3713_v12, %v3605_v55  ;;  %v3876_v26 = vadd.f32 %v13786_v14, %v3736_v45  ;;  %v5945_v14 = vrot.slane %v13106_v33, 1 }
 0x412   : > { %v9493_v7 = vpop.f32.mrf.mxu1  ;;  %v13891_v41 = vpop.f32.mrf.mxu0  ;;  %9716 = vmatmul.mubr.msk.bf16.vlgmr.msra.gmra.mxu1 %vm3133_vm8, %v15521_v23 }
 0x413   : > { %v4044_v29 = vadd.f32 %v9493_v7, %v3867_v60  ;;  %9719 = vmatprep.mubr.msk.bf16.mxu1 %vm3133_vm8, %v5944_v17  ;;  %9742 = vmatpush3.bf16.msra.mxu1 %v13822_v32  ;;  %v5946_v4 = vsel %vm787_vm0, %v5943_v53, %v5945_v14 }
 0x414   : > { %v3995_v36 = vpop.f32.mrf.mxu1  ;;  %v13899_v31 = vpop.f32.mrf.mxu0 }
 0x415   : > { %v4042_v55 = vadd.f32 %v3995_v36, %v3865_v52  ;;  %v4176_v57 = vadd.f32 %v13802_v61, %v4044_v29  ;;  %v5948_v61 = vsel %vm787_vm0, %v5945_v14, %v5947_v59 }
 0x416   : > { %v9494_v34 = vpop.f32.mrf.mxu1  ;;  %v13903_v21 = vpop.f32.mrf.mxu0 }
 0x417   : > { %v4045_v18 = vadd.f32 %v9494_v34, %v3868_v48  ;;  %v4174_v60 = vadd.f32 %v13813_v5, %v4042_v55 }
 0x418   : > { %v3998_v1 = vpop.f32.mrf.mxu1  ;;  %v13907_v40 = vpop.f32.mrf.mxu0 }
 0x419   : > { %v13909_v32 = vadd.f32 %v3998_v1, %v3866_v43  ;;  %v4177_v52 = vadd.f32 %v13817_v6, %v4045_v18 }
 0x41a   : > { %v9497_v33 = vpop.f32.mrf.mxu1  ;;  %v13913_v47 = vpop.f32.mrf.mxu0  ;;  %9720 = vmatmul.mubr.msk.bf16.gmra.mxu1 %vm3133_vm8, %v5946_v4 }
 0x41b   : > { %v4048_v8 = vadd.f32 %v9497_v33, %v3871_v39  ;;  %9723 = vmatprep.mubr.msk.bf16.mxu1 %vm3133_vm8, %v5948_v61 }
 0x41c   : > { %v4011_v5 = vpop.f32.mrf.mxu1  ;;  %v13918_v48 = vpop.f32.mrf.mxu0 }
 0x41d   : > { %v4046_v54 = vadd.f32 %v4011_v5, %v3869_v3  ;;  %v4180_v43 = vadd.f32 %v13836_v15, %v4048_v8 }
 0x41e   : > { %v9498_v42 = vpop.f32.mrf.mxu1  ;;  %v13921_v28 = vpop.f32.mrf.mxu0 }
 0x41f   : > { %v4049_v6 = vadd.f32 %v9498_v42, %v3872_v16  ;;  %v4178_v46 = vadd.f32 %v13844_v27, %v4046_v54 }
 0x420   : > { %v4014_v51 = vpop.f32.mrf.mxu1  ;;  %v13924_v9 = vpop.f32.mrf.mxu0 }
 0x421   : > { %v13926_v53 = vadd.f32 %v4014_v51, %v3870_v49  ;;  %v4181_v39 = vadd.f32 %v13848_v10, %v4049_v6 }
 0x422   : > { %v9501_v45 = vpop.f32.mrf.mxu1  ;;  %v13929_v12 = vpop.f32.mrf.mxu0  ;;  %9724 = vmatmul.mubr.msk.bf16.gmra.mxu1 %vm3133_vm8, %v5947_v59 }
 0x423   : > { %v4052_v3 = vadd.f32 %v9501_v45, %v3875_v56  ;;  %9743 = vmatprep.mubr.msk.bf16.mxu1 %vm3133_vm8, %v13288_v24 }
 0x424   : > { %v4027_v15 = vpop.f32.mrf.mxu1  ;;  %v13934_v16 = vpop.f32.mrf.mxu0 }
 0x425   : > { %v4050_v27 = vadd.f32 %v4027_v15, %v3873_v11  ;;  %v4184_v7 = vadd.f32 %v13860_v63, %v4052_v3 }
 0x426   : > { %v9502_v23 = vpop.f32.mrf.mxu1  ;;  %v13937_v49 = vpop.f32.mrf.mxu0 }
 0x427   : > { %v4053_v22 = vadd.f32 %v9502_v23, %v3876_v26  ;;  %v4182_v10 = vadd.f32 %v13865_v20, %v4050_v27 }
 0x428   : > { %v13940_v17 = vpop.f32.mrf.mxu1  ;;  %v13942_v29 = vpop.f32.mrf.mxu0 }
 0x429   : > { %v4185_v56 = vadd.f32 %v13869_v62, %v4053_v22  ;;  %v6183_v62 = vrot.slane %v15511_v13, 2 }
 0x42a   : > { %v9521_v36 = vpop.f32.mrf.mxu1  ;;  %v13945_v24 = vpop.f32.mrf.mxu0  ;;  %9744 = vmatmul.mubr.msk.bf16.vlgmr.msra.gmra.mxu1 %vm3133_vm8, %v13294_v30 }
 0x42b   : > { %v4323_v11 = vadd.f32 %v9521_v36, %v4176_v57  ;;  %9747 = vmatprep.mubr.msk.bf16.mxu1 %vm3133_vm8, %v13524_v25 }
 0x42c   : > { %v4274_v63 = vpop.f32.mrf.mxu1  ;;  %v13951_v26 = vpop.f32.mrf.mxu0 }
 0x42d   : > { %v4321_v20 = vadd.f32 %v4274_v63, %v4174_v60  ;;  %v4426_v55 = vadd.f32 %v13879_v44, %v4323_v11  ;;  %v15523_v44 = vld [vmem:[#allocation70_spill] sm:$0xff] }
 0x42e   : > { %v9522_v14 = vpop.f32.mrf.mxu1  ;;  %v13954_v34 = vpop.f32.mrf.mxu0  ;;  %v6184_v60 = vsel %vm1007_vm1, %v15523_v44, %v6183_v62 }
 0x42f   : > { %v4324_v59 = vadd.f32 %v9522_v14, %v4177_v52  ;;  %v4424_v18 = vadd.f32 %v13882_v35, %v4321_v20 }
 0x430   : > { %v13958_v1 = vpop.f32.mrf.mxu1  ;;  %v9568_v30 = vpop.f32.mrf.mxu0 }
 0x431   : > { %v4427_v57 = vadd.f32 %v13886_v37, %v4324_v59 }
 0x432   : > { %v9525_v25 = vpop.f32.mrf.mxu1  ;;  %v13961_v4 = vpop.f32.mrf.mxu0  ;;  %9748 = vmatmul.mubr.msk.bf16.gmra.mxu1 %vm3133_vm8, %v13530_v19 }
 0x433   : > { %v4327_v33 = vadd.f32 %v9525_v25, %v4180_v43  ;;  %9751 = vmatprep.mubr.msk.bf16.mxu1 %vm3133_vm8, %v6184_v60 }
 0x434   : > { %v4290_v13 = vpop.f32.mrf.mxu1  ;;  %v9571_v52 = vpop.f32.mrf.mxu0 }
 0x435   : > { %v4325_v35 = vadd.f32 %v4290_v13, %v4178_v46  ;;  %v4430_v61 = vadd.f32 %v13899_v31, %v4327_v33 }
 0x436   : > { %v9526_v8 = vpop.f32.mrf.mxu1  ;;  %v4660_v5 = vpop.f32.mrf.mxu0 }
 0x437   : > { %v4328_v37 = vadd.f32 %v9526_v8, %v4181_v39  ;;  %v4428_v54 = vadd.f32 %v13903_v21, %v4325_v35 }
 0x438   : > { %v13970_v42 = vpop.f32.mrf.mxu1  ;;  %v9572_v6 = vpop.f32.mrf.mxu0 }
 0x439   : > { %v4431_v19 = vadd.f32 %v13907_v40, %v4328_v37 }
 0x43a   : > { %v9529_v51 = vpop.f32.mrf.mxu1  ;;  %v13973_v45 = vpop.f32.mrf.mxu0  ;;  %9752 = vmatmul.mubr.msk.bf16.gmra.mxu1 %vm3133_vm8, %v6183_v62 }
 0x43b   : > { %v4331_v43 = vadd.f32 %v9529_v51, %v4184_v7 }
 0x43c   : > { %v4306_v3 = vpop.f32.mrf.mxu1  ;;  %v9591_v46 = vpop.f32.mrf.mxu0 }
 0x43d   : > { %v4329_v15 = vadd.f32 %v4306_v3, %v4182_v10  ;;  %v4434_v31 = vadd.f32 %v13918_v48, %v4331_v43 }
 0x43e   : > { %v9530_v27 = vpop.f32.mrf.mxu1  ;;  %v4897_v39 = vpop.f32.mrf.mxu0 }
 0x43f   : > { %v4332_v23 = vadd.f32 %v9530_v27, %v4185_v56  ;;  %v4432_v21 = vadd.f32 %v13921_v28, %v4329_v15 }
 0x440   : > { %v13978_v22 = vpop.f32.mrf.mxu1  ;;  %v9592_v36 = vpop.f32.mrf.mxu0 }
 0x441   : > { %v4435_v40 = vadd.f32 %v13924_v9, %v4332_v23 }
 0x442   : > { %v9549_v11 = vpop.f32.mrf.mxu1  ;;  %v13981_v63 = vpop.f32.mrf.mxu0 }
 0x443   : > { %v4539_v20 = vadd.f32 %v9549_v11, %v4426_v55 }
 0x444   : > { %v4490_v7 = vpop.f32.mrf.mxu1  ;;  %v9595_v14 = vpop.f32.mrf.mxu0 }
 0x445   : > { %v4537_v62 = vadd.f32 %v4490_v7, %v4424_v18  ;;  %v4677_v10 = vadd.f32 %v13934_v16, %v4539_v20 }
 0x446   : > { %v9550_v48 = vpop.f32.mrf.mxu1  ;;  %v4913_v59 = vpop.f32.mrf.mxu0 }
 0x447   : > { %v4540_v25 = vadd.f32 %v9550_v48, %v4427_v57  ;;  %v4675_v56 = vadd.f32 %v13937_v49, %v4537_v62 }
 0x448   : > { %v13985_v28 = vpop.f32.mrf.mxu1  ;;  %v9596_v44 = vpop.f32.mrf.mxu0 }
 0x449   : > { %v4678_v60 = vadd.f32 %v13942_v29, %v4540_v25 }
 0x44a   : > { %v9553_v9 = vpop.f32.mrf.mxu1  ;;  %v13988_v33 = vpop.f32.mrf.mxu0 }
 0x44b   : > { %v4543_v13 = vadd.f32 %v9553_v9, %v4430_v61 }
 0x44c   : > { %v4506_v55 = vpop.f32.mrf.mxu1  ;;  %v9599_v35 = vpop.f32.mrf.mxu0 }
 0x44d   : > { %v4541_v8 = vadd.f32 %v4506_v55, %v4428_v54  ;;  %v4681_v18 = vadd.f32 %v13951_v26, %v4543_v13 }
 0x44e   : > { %v9554_v16 = vpop.f32.mrf.mxu1  ;;  %v4929_v37 = vpop.f32.mrf.mxu0 }
 0x44f   : > { %v4544_v51 = vadd.f32 %v9554_v16, %v4431_v19  ;;  %v4679_v57 = vadd.f32 %v13954_v34, %v4541_v8 }
 0x450   : > { %v13992_v49 = vpop.f32.mrf.mxu1  ;;  %v9600_v43 = vpop.f32.mrf.mxu0 }
 0x451   : > { %v4682_v3 = vadd.f32 %v9568_v30, %v4544_v51 }
 0x452   : > { %v9557_v15 = vpop.f32.mrf.mxu1  ;;  %v13994_v29 = vpop.f32.mrf.mxu0 }
 0x453   : > { %v4547_v27 = vadd.f32 %v9557_v15, %v4434_v31 }
 0x454   : > { %v4522_v23 = vpop.f32.mrf.mxu1  ;;  %v13996_v61 = vpop.f32.mrf.mxu0 }
 0x455   : > { %v4545_v11 = vadd.f32 %v4522_v23, %v4432_v21  ;;  %v4685_v54 = vadd.f32 %v9571_v52, %v4547_v27 }
 0x456   : > { %v9558_v20 = vpop.f32.mrf.mxu1  ;;  %v13998_v26 = vpop.f32.mrf.mxu0 }
 0x457   : > { %v4548_v7 = vadd.f32 %v9558_v20, %v4435_v40  ;;  %v4683_v19 = vadd.f32 %v4660_v5, %v4545_v11 }
 0x458   : > { %v14000_v62 = vpop.f32.mrf.mxu1  ;;  %v14002_v34 = vpop.f32.mrf.mxu0 }
 0x459   : > { %v4686_v48 = vadd.f32 %v9572_v6, %v4548_v7 }
 0x45a   : > { %v9577_v30 = vpop.f32.mrf.mxu1  ;;  %v14004_v25 = vpop.f32.mrf.mxu0 }
 0x45b   : > { %v4806_v9 = vadd.f32 %v9577_v30, %v4677_v10 }
 0x45c   : > { %v4757_v31 = vpop.f32.mrf.mxu1  ;;  %v14006_v13 = vpop.f32.mrf.mxu0 }
 0x45d   : > { %v4804_v55 = vadd.f32 %v4757_v31, %v4675_v56  ;;  %v4946_v21 = vadd.f32 %v9591_v46, %v4806_v9 }
 0x45e   : > { %v9578_v52 = vpop.f32.mrf.mxu1  ;;  %v14008_v8 = vpop.f32.mrf.mxu0 }
 0x45f   : > { %15524 = vst [vmem:[#allocation39_spill] sm:$0xff] %v14008_v8  ;;  %v4807_v16 = vadd.f32 %v9578_v52, %v4678_v60  ;;  %v4944_v40 = vadd.f32 %v4897_v39, %v4804_v55 }
 0x460   : > { %v14010_v5 = vpop.f32.mrf.mxu1  ;;  %v14012_v51 = vpop.f32.mrf.mxu0 }
 0x461   : > { %v4947_v15 = vadd.f32 %v9592_v36, %v4807_v16 }
 0x462   : > { %v9581_v6 = vpop.f32.mrf.mxu1  ;;  %v14014_v27 = vpop.f32.mrf.mxu0 }
 0x463   : > { %v4810_v23 = vadd.f32 %v9581_v6, %v4681_v18 }
 0x464   : > { %v4773_v10 = vpop.f32.mrf.mxu1  ;;  %v14016_v11 = vpop.f32.mrf.mxu0 }
 0x465   : > { %v4808_v20 = vadd.f32 %v4773_v10, %v4679_v57  ;;  %v4950_v56 = vadd.f32 %v9595_v14, %v4810_v23  ;;  %v4179_v57 = vadd.f32 %v13852_v50, %v13926_v53 }
 0x466   : > { %v9582_v46 = vpop.f32.mrf.mxu1  ;;  %v14018_v7 = vpop.f32.mrf.mxu0 }
 0x467   : > { %v4811_v30 = vadd.f32 %v9582_v46, %v4682_v3  ;;  %v4948_v60 = vadd.f32 %v4913_v59, %v4808_v20  ;;  %v3874_v59 = vadd.f32 %v13793_v0, %v13888_v58 }
 0x468   : > { %v4776_v39 = vpop.f32.mrf.mxu1  ;;  %v14020_v9 = vpop.f32.mrf.mxu0 }
 0x469   : > { %v4951_v31 = vadd.f32 %v9596_v44, %v4811_v30  ;;  %v4326_v44 = vadd.f32 %v13970_v42, %v4179_v57  ;;  %v4051_v30 = vadd.f32 %v13940_v17, %v3874_v59  ;;  %v4175_v17 = vadd.f32 %v13826_v2, %v13909_v32 }
 0x46a   : > { %v9585_v55 = vpop.f32.mrf.mxu1  ;;  %v14022_v36 = vpop.f32.mrf.mxu0 }
 0x46b   : > { %v4814_v52 = vadd.f32 %v9585_v55, %v4685_v54  ;;  %v4429_v53 = vadd.f32 %v13913_v47, %v4326_v44  ;;  %v4183_v0 = vadd.f32 %v13872_v38, %v4051_v30  ;;  %v4322_v38 = vadd.f32 %v13958_v1, %v4175_v17 }
 0x46c   : > { %v4789_v16 = vpop.f32.mrf.mxu1  ;;  %v14024_v18 = vpop.f32.mrf.mxu0 }
 0x46d   : > { %v4812_v14 = vadd.f32 %v4789_v16, %v4683_v19  ;;  %v4954_v6 = vadd.f32 %v9599_v35, %v4814_v52  ;;  %v4542_v58 = vadd.f32 %v13992_v49, %v4429_v53 }
 0x46e   : > { %v9586_v23 = vpop.f32.mrf.mxu1  ;;  %v14028_v10 = vpop.f32.mrf.mxu0 }
 0x46f   : > { %v4815_v3 = vadd.f32 %v9586_v23, %v4686_v48  ;;  %v4952_v20 = vadd.f32 %v4929_v37, %v4812_v14  ;;  %v4680_v49 = vadd.f32 %v13961_v4, %v4542_v58 }
 0x470   : > { %v4792_v46 = vpop.f32.mrf.mxu1  ;;  %v14033_v54 = vpop.f32.mrf.mxu0 }
 0x471   : > { %v4955_v55 = vadd.f32 %v9600_v43, %v4815_v3  ;;  %v4330_v43 = vadd.f32 %v13978_v22, %v4183_v0  ;;  %v4809_v2 = vadd.f32 %v4776_v39, %v4680_v49 }
 0x472   : > { %v9605_v8 = vpop.f32.mrf.mxu1  ;;  %v14036_v50 = vpop.f32.mrf.mxu0 }
 0x473   : > { %v5053_v35 = vadd.f32 %v9605_v8, %v4946_v21  ;;  %v4433_v23 = vadd.f32 %v13929_v12, %v4330_v43  ;;  %v4949_v12 = vadd.f32 %v13988_v33, %v4809_v2 }
 0x474   : > { %v5004_v19 = vpop.f32.mrf.mxu1  ;;  %v14039_v52 = vpop.f32.mrf.mxu0 }
 0x475   : > { %v5051_v42 = vadd.f32 %v5004_v19, %v4944_v40  ;;  %v5168_v37 = vadd.f32 %v13996_v61, %v5053_v35 }
 0x476   : > { %v9606_v48 = vpop.f32.mrf.mxu1  ;;  %v14044_v16 = vpop.f32.mrf.mxu0 }
 0x477   : > { %v5166_v47 = vadd.f32 %v13998_v26, %v5051_v42  ;;  %v5054_v21 = vadd.f32 %v9606_v48, %v4947_v15  ;;  %v4425_v26 = vadd.f32 %v13891_v41, %v4322_v38  ;;  %v4546_v15 = vadd.f32 %v14000_v62, %v4433_v23 }
 0x478   : > { %v5007_v8 = vpop.f32.mrf.mxu1  ;;  %v14050_v57 = vpop.f32.mrf.mxu0 }
 0x479   : > { %v5169_v61 = vadd.f32 %v14002_v34, %v5054_v21  ;;  %v4538_v34 = vadd.f32 %v13985_v28, %v4425_v26  ;;  %v4684_v53 = vadd.f32 %v13973_v45, %v4546_v15 }
 0x47a   : > { %v9609_v40 = vpop.f32.mrf.mxu1  ;;  %v14055_v14 = vpop.f32.mrf.mxu0 }
 0x47b   : > { %v5057_v32 = vadd.f32 %v9609_v40, %v4950_v56  ;;  %v4813_v19 = vadd.f32 %v4792_v46, %v4684_v53 }
 0x47c   : > { %v5020_v22 = vpop.f32.mrf.mxu1  ;;  %v14058_v59 = vpop.f32.mrf.mxu0 }
 0x47d   : > { %v5055_v44 = vadd.f32 %v5020_v22, %v4948_v60  ;;  %v5172_v1 = vadd.f32 %v14006_v13, %v5057_v32  ;;  %v4676_v13 = vadd.f32 %v13945_v24, %v4538_v34  ;;  %v4953_v43 = vadd.f32 %v13994_v29, %v4813_v19  ;;  %v15525_v34 = vld [vmem:[#allocation39_spill] sm:$0xff] }
 0x47e   : > { %v9610_v4 = vpop.f32.mrf.mxu1  ;;  %v14063_v3 = vpop.f32.mrf.mxu0 }
 0x47f   : > { %v5058_v30 = vadd.f32 %v9610_v4, %v4951_v31  ;;  %v4805_v33 = vadd.f32 %v14010_v5, %v4676_v13 }
 0x480   : > { %v5023_v39 = vpop.f32.mrf.mxu1  ;;  %v14067_v56 = vpop.f32.mrf.mxu0 }
 0x481   : > { %v5056_v35 = vadd.f32 %v5023_v39, %v4949_v12  ;;  %v5173_v41 = vadd.f32 %v14012_v51, %v5058_v30 }
 0x482   : > { %v9613_v62 = vpop.f32.mrf.mxu1  ;;  %v14071_v60 = vpop.f32.mrf.mxu0 }
 0x483   : > { %v5061_v0 = vadd.f32 %v9613_v62, %v4954_v6  ;;  %v5171_v28 = vadd.f32 %v14014_v27, %v5056_v35  ;;  %v4945_v27 = vadd.f32 %v13981_v63, %v4805_v33 }
 0x484   : > { %v5036_v31 = vpop.f32.mrf.mxu1  ;;  %v14075_v58 = vpop.f32.mrf.mxu0 }
 0x485   : > { %v5059_v42 = vadd.f32 %v5036_v31, %v4952_v20  ;;  %v5176_v45 = vadd.f32 %v14016_v11, %v5061_v0  ;;  %v5052_v11 = vadd.f32 %v5007_v8, %v4945_v27 }
 0x486   : > { %v9614_v48 = vpop.f32.mrf.mxu1  ;;  %v14079_v17 = vpop.f32.mrf.mxu0 }
 0x487   : > { %v5062_v51 = vadd.f32 %v9614_v48, %v4955_v55  ;;  %v5174_v24 = vadd.f32 %v14018_v7, %v5059_v42  ;;  %v5167_v22 = vadd.f32 %v14004_v25, %v5052_v11 }
 0x488   : > { %v5039_v46 = vpop.f32.mrf.mxu1  ;;  %v14083_v6 = vpop.f32.mrf.mxu0 }
 0x489   : > { %v5060_v21 = vadd.f32 %v5039_v46, %v4953_v43  ;;  %v5177_v38 = vadd.f32 %v14020_v9, %v5062_v51 }
 0x48a   : > { %v9633_v5 = vpop.f32.mrf.mxu1  ;;  %v14087_v20 = vpop.f32.mrf.mxu0 }
 0x48b   : > { %v5323_v49 = vadd.f32 %v9633_v5, %v5168_v37  ;;  %v5175_v40 = vadd.f32 %v14022_v36, %v5060_v21 }
 0x48c   : > { %v5274_v55 = vpop.f32.mrf.mxu1  ;;  %v14090_v23 = vpop.f32.mrf.mxu0 }
 0x48d   : > { %v5321_v29 = vadd.f32 %v5274_v55, %v5166_v47  ;;  %v5454_v7 = vadd.f32 %v14024_v18, %v5323_v49  ;;  %v5170_v18 = vadd.f32 %v15525_v34, %v5055_v44 }
 0x48e   : > { %v9634_v2 = vpop.f32.mrf.mxu1  ;;  %v14093_v32 = vpop.f32.mrf.mxu0 }
 0x48f   : > { %v5324_v63 = vadd.f32 %v9634_v2, %v5169_v61  ;;  %v5452_v9 = vadd.f32 %v14028_v10, %v5321_v29 }
 0x490   : > { %v5277_v26 = vpop.f32.mrf.mxu1  ;;  %v14097_v15 = vpop.f32.mrf.mxu0 }
 0x491   : > { %v5322_v37 = vadd.f32 %v5277_v26, %v5167_v22  ;;  %v5455_v36 = vadd.f32 %v14033_v54, %v5324_v63 }
 0x492   : > { %v9637_v8 = vpop.f32.mrf.mxu1  ;;  %v14100_v4 = vpop.f32.mrf.mxu0 }
 0x493   : > { %v5327_v47 = vadd.f32 %v9637_v8, %v5172_v1  ;;  %v5453_v30 = vadd.f32 %v14036_v50, %v5322_v37 }
 0x494   : > { %v5290_v12 = vpop.f32.mrf.mxu1  ;;  %v14104_v61 = vpop.f32.mrf.mxu0 }
 0x495   : > { %v5325_v25 = vadd.f32 %v5290_v12, %v5170_v18  ;;  %v5458_v10 = vadd.f32 %v14039_v52, %v5327_v47  ;;  %v10114_v52 = vld [vmem:[%s14699_s8] sm:$0xff]  }
 0x496   : > { %v9638_v39 = vpop.f32.mrf.mxu1  ;;  %v14107_v53 = vpop.f32.mrf.mxu0  ;;  %9767 = vmatprep.mubr.msk.bf16.mxu0 %vm6355_vm13, %v10114_v52 }
 0x497   : > { %v5328_v35 = vadd.f32 %v9638_v39, %v5173_v41  ;;  %v5456_v54 = vadd.f32 %v14044_v16, %v5325_v25 }
 0x498   : > { %v5293_v62 = vpop.f32.mrf.mxu1  ;;  %v14111_v19 = vpop.f32.mrf.mxu0 }
 0x499   : > { %v5326_v13 = vadd.f32 %v5293_v62, %v5171_v28  ;;  %v5459_v1 = vadd.f32 %v14050_v57, %v5328_v35 }
 0x49a   : > { %v9641_v44 = vpop.f32.mrf.mxu1  ;;  %v14118_v16 = vpop.f32.mrf.mxu0 }
 0x49b   : > { %v5331_v50 = vadd.f32 %v9641_v44, %v5176_v45  ;;  %v5457_v0 = vadd.f32 %v14055_v14, %v5326_v13 }
 0x49c   : > { %v5306_v31 = vpop.f32.mrf.mxu1  ;;  %v14126_v48 = vpop.f32.mrf.mxu0 }
 0x49d   : > { %v5329_v33 = vadd.f32 %v5306_v31, %v5174_v24  ;;  %v5462_v41 = vadd.f32 %v14058_v59, %v5331_v50 }
 0x49e   : > { %v9642_v28 = vpop.f32.mrf.mxu1  ;;  %v14129_v27 = vpop.f32.mrf.mxu0 }
 0x49f   : > { %v14121_v57 = vadd.f32 %v9642_v28, %v5177_v38  ;;  %v5460_v42 = vadd.f32 %v14063_v3, %v5329_v33  ;;  %v10118_v3 = vld [vmem:[%s14696_s5 + $0x18] sm:$0xff]  }
 0x4a0   : > { %v5309_v45 = vpop.f32.mrf.mxu1  ;;  %9775 = vmatprep.subr.bf16.mxu1 %v10118_v3  ;;  %v14136_v55 = vpop.f32.mrf.mxu0 }
 0x4a1   : > { %v14124_v14 = vadd.f32 %v5309_v45, %v5175_v40  ;;  %9776 = vmatpush3.bf16.msra.mxu1 %v10118_v3 }
 0x4a2   : > { %v9661_v51 = vpop.f32.mrf.mxu1  ;;  %v14139_v22 = vpop.f32.mrf.mxu0 }
 0x4a3   : > { %v5600_v43 = vadd.f32 %v9661_v51, %v5454_v7 }
 0x4a4   : > { %v5551_v46 = vpop.f32.mrf.mxu1 }
 0x4a5   : > { %v5598_v24 = vadd.f32 %v5551_v46, %v5452_v9  ;;  %v5703_v59 = vadd.f32 %v14075_v58, %v5600_v43 }
 0x4a6   : > { %v9662_v21 = vpop.f32.mrf.mxu1 }
 0x4a7   : > { %v5601_v5 = vadd.f32 %v9662_v21, %v5455_v36  ;;  %v5701_v38 = vadd.f32 %v14079_v17, %v5598_v24  ;;  %v14143_v36 = vpop.f32.mrf.mxu0 }
 0x4a8   : > { %v5554_v11 = vpop.f32.mrf.mxu1 }
 0x4a9   : > { %v5599_v49 = vadd.f32 %v5554_v11, %v5453_v30  ;;  %v5704_v40 = vadd.f32 %v14083_v6, %v5601_v5  ;;  %v14149_v18 = vpop.f32.mrf.mxu0 }
 0x4aa   : > { %v9665_v29 = vpop.f32.mrf.mxu1 }
 0x4ab   : > { %v5604_v58 = vadd.f32 %v9665_v29, %v5458_v10  ;;  %v5702_v7 = vadd.f32 %v14087_v20, %v5599_v49  ;;  %v14153_v12 = vpop.f32.mrf.mxu0 }
 0x4ac   : > { %v5567_v2 = vpop.f32.mrf.mxu1 }
 0x4ad   : > { %v5602_v63 = vadd.f32 %v5567_v2, %v5456_v54  ;;  %v14155_v54 = vpop.f32.mrf.mxu0 }
 0x4ae   : > { %v9666_v17 = vpop.f32.mrf.mxu1 }
 0x4af   : > { %v5605_v9 = vadd.f32 %v9666_v17, %v5459_v1  ;;  %v14157_v50 = vpop.f32.mrf.mxu0 }
 0x4b0   : > { %v5570_v26 = vpop.f32.mrf.mxu1  ;;  %15526 = vst [vmem:[#allocation38_spill] sm:$0xff] %v14157_v50 }
 0x4b1   : > { %v14141_v37 = vadd.f32 %v5570_v26, %v5457_v0  ;;  %v14159_v52 = vpop.f32.mrf.mxu0 }
 0x4b2   : > { %v9669_v6 = vpop.f32.mrf.mxu1  ;;  %15527 = vst [vmem:[#allocation45_spill] sm:$0xff] %v14159_v52 }
 0x4b3   : > { %v14145_v8 = vadd.f32 %v9669_v6, %v5462_v41  ;;  %v14161_v28 = vpop.f32.mrf.mxu0 }
 0x4b4   : > { %v5583_v47 = vpop.f32.mrf.mxu1  ;;  %15528 = vst [vmem:[#allocation90_spill] sm:$0xff] %v14161_v28 }
 0x4b5   : > { %v14147_v34 = vadd.f32 %v5583_v47, %v5460_v42  ;;  %v14165_v51 = vpop.f32.mrf.mxu0 }
 0x4b6   : > { %v9670_v20 = vpop.f32.mrf.mxu1  ;;  %15529 = vst [vmem:[#allocation83_spill] sm:$0xff] %v14165_v51  ;;  %v5705_v51 = vadd.f32 %v14093_v32, %v5602_v63  ;;  %v5461_v32 = vadd.f32 %v14071_v60, %v14124_v14  ;;  %v14200_v60 = vld [vmem:[%s14695_s4] ss:$0 sm:$0xff] }
 0x4b7   : > { %v9731_v24 = vpop.f32.mrf.mxu0 }
 0x4b8   : > { %v14151_v30 = vpop.f32.mrf.mxu1 }
 0x4b9   : > { %v6124_v5 = vpop.f32.mrf.mxu0 }
 0x4ba   : > { %v9689_v25 = vpop.f32.mrf.mxu1 }
 0x4bb   : > { %v5808_v10 = vadd.f32 %v9689_v25, %v5703_v59  ;;  %v9732_v11 = vpop.f32.mrf.mxu0  ;;  %v5707_v25 = vadd.f32 %v14090_v23, %v5604_v58 }
 0x4bc   : > { %v5759_v39 = vpop.f32.mrf.mxu1 }
 0x4bd   : > { %v5806_v35 = vadd.f32 %v5759_v39, %v5701_v38  ;;  %v6127_v29 = vpop.f32.mrf.mxu0  ;;  %v5932_v6 = vadd.f32 %v14126_v48, %v5808_v10  ;;  %v5708_v10 = vadd.f32 %v14097_v15, %v5605_v9 }
 0x4be   : > { %v9690_v62 = vpop.f32.mrf.mxu1 }
 0x4bf   : > { %v5809_v13 = vadd.f32 %v9690_v62, %v5704_v40  ;;  %v9735_v17 = vpop.f32.mrf.mxu0  ;;  %v5930_v62 = vadd.f32 %v14129_v27, %v5806_v35 }
 0x4c0   : > { %v5762_v1 = vpop.f32.mrf.mxu1 }
 0x4c1   : > { %v5807_v44 = vadd.f32 %v5762_v1, %v5702_v7  ;;  %v6140_v1 = vpop.f32.mrf.mxu0  ;;  %v5933_v50 = vadd.f32 %v14136_v55, %v5809_v13  ;;  %v5706_v55 = vadd.f32 %v14100_v4, %v14141_v37 }
 0x4c2   : > { %v9693_v0 = vpop.f32.mrf.mxu1 }
 0x4c3   : > { %v5812_v52 = vadd.f32 %v9693_v0, %v5707_v25  ;;  %v5931_v27 = vadd.f32 %v14139_v22, %v5807_v44  ;;  %v9736_v63 = vpop.f32.mrf.mxu0  ;;  %v5711_v22 = vadd.f32 %v14104_v61, %v14145_v8 }
 0x4c4   : > { %v5775_v31 = vpop.f32.mrf.mxu1 }
 0x4c5   : > { %v5810_v48 = vadd.f32 %v5775_v31, %v5705_v51 }
 0x4c6   : > { %v9694_v33 = vpop.f32.mrf.mxu1 }
 0x4c7   : > { %v5813_v0 = vadd.f32 %v9694_v33, %v5708_v10 }
 0x4c8   : > { %v5778_v41 = vpop.f32.mrf.mxu1 }
 0x4c9   : > { %v5811_v31 = vadd.f32 %v5778_v41, %v5706_v55  ;;  %v5937_v41 = vadd.f32 %v14153_v12, %v5813_v0  ;;  %v15538_v0 = vld [vmem:[#allocation90_spill] sm:$0xff] }
 0x4ca   : > { %v9697_v42 = vpop.f32.mrf.mxu1 }
 0x4cc   : > { %v14163_v45 = vpop.f32.mrf.mxu1 }
 0x4ce   : > { %v14167_v43 = vpop.f32.mrf.mxu1 }
 0x4d0   : > { %v14169_v46 = vpop.f32.mrf.mxu1 }
 0x4d1   : > { %15530 = vst [vmem:[#allocation86_spill] sm:$0xff] %v14169_v46 }
 0x4d2   : > { %v9717_v59 = vpop.f32.mrf.mxu1 }
 0x4d3   : > { %v6050_v39 = vadd.f32 %v9717_v59, %v5932_v6 }
 0x4d4   : > { %v6001_v21 = vpop.f32.mrf.mxu1 }
 0x4d5   : > { %v6048_v46 = vadd.f32 %v6001_v21, %v5930_v62  ;;  %v6173_v58 = vadd.f32 %v9731_v24, %v6050_v39 }
 0x4d6   : > { %v9718_v38 = vpop.f32.mrf.mxu1 }
 0x4d7   : > { %v6051_v23 = vadd.f32 %v9718_v38, %v5933_v50  ;;  %v6171_v9 = vadd.f32 %v6124_v5, %v6048_v46  ;;  %v5607_v50 = vadd.f32 %v14151_v30, %v5461_v32  ;;  %v5709_v30 = vadd.f32 %v14107_v53, %v14147_v34 }
 0x4d8   : > { %v6004_v3 = vpop.f32.mrf.mxu1  ;;  %v15534_v6 = vld [vmem:[#allocation86_spill] sm:$0xff] }
 0x4d9   : > { %v6174_v44 = vadd.f32 %v9732_v11, %v6051_v23  ;;  %v5814_v24 = vadd.f32 %v14163_v45, %v5709_v30  ;;  %v5710_v59 = vadd.f32 %v14118_v16, %v5607_v50 }
 0x4da   : > { %v9721_v49 = vpop.f32.mrf.mxu1 }
 0x4db   : > { %v5815_v25 = vadd.f32 %v15534_v6, %v5710_v59  ;;  %v10117_v6 = vld [vmem:[%s14699_s8 + $0x18] sm:$0xff]  }
 0x4dc   : > { %v6017_v40 = vpop.f32.mrf.mxu1 }
 0x4de   : > { %v9722_v7 = vpop.f32.mrf.mxu1 }
 0x4df   : > { %v6055_v21 = vadd.f32 %v9722_v7, %v5937_v41 }
 0x4e0   : > { %v6020_v2 = vpop.f32.mrf.mxu1 }
 0x4e1   : > { %v6178_v23 = vadd.f32 %v9736_v63, %v6055_v21 }
 0x4e2   : > { %v14171_v26 = vpop.f32.mrf.mxu1 }
 0x4e3   : > { %15531 = vst [vmem:[#allocation91_spill] sm:$0xff] %v14171_v26  ;;  %v5463_v26 = vadd.f32 %v14067_v56, %v14121_v57  ;;  %v6049_v56 = vadd.f32 %v6004_v3, %v5931_v27  ;;  %v5936_v57 = vadd.f32 %v14143_v36, %v5812_v52  ;;  %v6143_v36 = vpop.f32.mrf.mxu0  ;;  %v5816_v52 = vadd.f32 %v9697_v42, %v5711_v22 }
 0x4e4   : > { %v14174_v47 = vpop.f32.mrf.mxu1  ;;  %v5935_v42 = vadd.f32 %v14155_v54, %v5811_v31  ;;  %v15539_v31 = vld [vmem:[#allocation83_spill] sm:$0xff] }
 0x4e5   : > { %15532 = vst [vmem:[#allocation87_spill] sm:$0xff] %v14174_v47  ;;  %v5609_v35 = vadd.f32 %v9670_v20, %v5463_v26  ;;  %v5934_v20 = vadd.f32 %v14149_v18, %v5810_v48  ;;  %v6054_v14 = vadd.f32 %v9721_v49, %v5936_v57  ;;  %v6172_v46 = vadd.f32 %v6127_v29, %v6049_v56  ;;  %v9739_v3 = vpop.f32.mrf.mxu0  ;;  %v15533_v49 = vld [vmem:[#allocation38_spill] sm:$0xff]  ;;  %v15536_v48 = vld [vmem:[#allocation45_spill] sm:$0xff] }
 0x4e6   : > { %v14179_v28 = vpop.f32.mrf.mxu1  ;;  %v6053_v11 = vadd.f32 %v6020_v2, %v5935_v42  ;;  %v5938_v10 = vadd.f32 %v15536_v48, %v5814_v24  ;;  %v5939_v22 = vadd.f32 %v15539_v31, %v5815_v25  ;;  %v10119_v25 = vld [vmem:[%s14696_s5 + $0x10] sm:$0xff]   ;;  %v10122_v48 = vld [vmem:[%s14696_s5 + $0x48] sm:$0xff]  }
 0x4e7   : > { %v6052_v33 = vadd.f32 %v6017_v40, %v5934_v20  ;;  %v5712_v8 = vadd.f32 %v14111_v19, %v5609_v35  ;;  %v6177_v38 = vadd.f32 %v9735_v17, %v6054_v14  ;;  %v5940_v40 = vadd.f32 %v15533_v49, %v5816_v52  ;;  %v6156_v35 = vpop.f32.mrf.mxu0  ;;  %9777 = vmatprep.subr.bf16.mxu1 %v10119_v25 }
 0x4e8   : > { %v14185_v47 = vpop.f32.mrf.mxu1  ;;  %9778 = vmatpush3.bf16.msra.mxu1 %v10119_v25  ;;  %v10134_v25 = vld [vmem:[%s14696_s5 + $0xa8] sm:$0xff]  }
 0x4e9   : > { %v5817_v19 = vadd.f32 %v14167_v43, %v5712_v8  ;;  %v6175_v45 = vadd.f32 %v6140_v1, %v6052_v33  ;;  %v6057_v52 = vadd.f32 %v14185_v47, %v5939_v22 }
 0x4ea   : > { %v9745_v13 = vpop.f32.mrf.mxu1  ;;  %v15535_v39 = vld [vmem:[#allocation91_spill] sm:$0xff] }
 0x4eb   : > { %v6280_v15 = vadd.f32 %v9745_v13, %v6173_v58  ;;  %v6058_v62 = vadd.f32 %v15535_v39, %v5940_v40  ;;  %v5941_v55 = vadd.f32 %v15538_v0, %v5817_v19  ;;  %v10120_v39 = vld [vmem:[%s14696_s5 + $0x28] sm:$0xff]  }
 0x4ec   : > { %v6231_v4 = vpop.f32.mrf.mxu1  ;;  %v15537_v32 = vld [vmem:[#allocation87_spill] sm:$0xff] }
 0x4ed   : > { %v6278_v37 = vadd.f32 %v6231_v4, %v6171_v9  ;;  %v6299_v18 = vadd.f32 %v14200_v60, %v6280_v15  ;;  %v6056_v1 = vadd.f32 %v15537_v32, %v5938_v10  ;;  %v6176_v15 = vadd.f32 %v6143_v36, %v6053_v11  ;;  %v10123_v10 = vld [vmem:[%s14696_s5 + $0x8] sm:$0xff]  }
 0x4ee   : > { %v9746_v61 = vpop.f32.mrf.mxu1  ;;  %v6059_v50 = vadd.f32 %v14179_v28, %v5941_v55  ;;  %9783 = vmatprep.subr.bf16.mxu1 %v10123_v10 }
 0x4ef   : > { %v6281_v51 = vadd.f32 %v9746_v61, %v6174_v44  ;;  %v6297_v53 = vadd.f32 %v14200_v60, %v6278_v37  ;;  %v6311_v26 = vmax.f32 %v6299_v18, 0.0  ;;  %v6181_v37 = vadd.f32 %v9739_v3, %v6058_v62  ;;  %v9740_v44 = vpop.f32.mrf.mxu0  ;;  %v10121_v62 = vld [vmem:[%s14696_s5 + $0x20] sm:$0xff]  }
 0x4f0   : > { %v6234_v5 = vpop.f32.mrf.mxu1  ;;  %v6179_v33 = vadd.f32 %v6156_v35, %v6056_v1  ;;  %v6182_v18 = vadd.f32 %v9740_v44, %v6059_v50 }
 0x4f1   : > { %v6300_v34 = vadd.f32 %v14200_v60, %v6281_v51  ;;  %v6279_v12 = vadd.f32 %v6234_v5, %v6172_v46  ;;  %v6309_v27 = vmax.f32 %v6297_v53, 0.0  ;;  %v6159_v21 = vpop.f32.mrf.mxu0 }
 0x4f2   : > { %v9749_v29 = vpop.f32.mrf.mxu1 }
 0x4f3   : > { %v6312_v16 = vmax.f32 %v6300_v34, 0.0  ;;  %v6298_v7 = vadd.f32 %v14200_v60, %v6279_v12  ;;  %v6284_v54 = vadd.f32 %v9749_v29, %v6177_v38  ;;  %v6180_v34 = vadd.f32 %v6159_v21, %v6057_v52 }
 0x4f4   : > { %v6247_v17 = vpop.f32.mrf.mxu1 }
 0x4f5   : > { %v6310_v43 = vmax.f32 %v6298_v7, 0.0  ;;  %v6282_v2 = vadd.f32 %v6247_v17, %v6175_v45  ;;  %v6330_v58 = vpack.c.bf16 %v6312_v16, %v6311_v26  ;;  %v6303_v56 = vadd.f32 %v14200_v60, %v6284_v54  ;;  %v10116_v54 = vld [vmem:[%s14699_s8 + $0x10] sm:$0xff]  }
 0x4f6   : > { %v9750_v13 = vpop.f32.mrf.mxu1 }
 0x4f7   : > { %v6285_v57 = vadd.f32 %v9750_v13, %v6178_v23  ;;  %v6329_v9 = vpack.c.bf16 %v6310_v43, %v6309_v27  ;;  %v6301_v20 = vadd.f32 %v14200_v60, %v6282_v2  ;;  %v6315_v41 = vmax.f32 %v6303_v56, 0.0 }
 0x4f8   : > { %v6250_v63 = vpop.f32.mrf.mxu1 }
 0x4f9   : > { %v6304_v4 = vadd.f32 %v14200_v60, %v6285_v57  ;;  %v6283_v14 = vadd.f32 %v6250_v63, %v6176_v15  ;;  %v6313_v51 = vmax.f32 %v6301_v20, 0.0  ;;  %v10124_v20 = vld [vmem:[%s14696_s5 + $0x40] sm:$0xff]  }
 0x4fa   : > { %v9753_v30 = vpop.f32.mrf.mxu1 }
 0x4fb   : > { %v6316_v61 = vmax.f32 %v6304_v4, 0.0  ;;  %v6302_v36 = vadd.f32 %v14200_v60, %v6283_v14  ;;  %v6288_v8 = vadd.f32 %v9753_v30, %v6181_v37 }
 0x4fc   : > { %v6263_v28 = vpop.f32.mrf.mxu1 }
 0x4fd   : > { %v6314_v46 = vmax.f32 %v6302_v36, 0.0  ;;  %v6286_v24 = vadd.f32 %v6263_v28, %v6179_v33  ;;  %v6332_v59 = vpack.c.bf16 %v6316_v61, %v6315_v41  ;;  %v6307_v5 = vadd.f32 %v14200_v60, %v6288_v8  ;;  %v10125_v41 = vld [vmem:[%s14696_s5] sm:$0xff]   ;;  %v10126_v61 = vld [vmem:[%s14696_s5 + $0x68] sm:$0xff]  }
 0x4fe   : > { %v9754_v42 = vpop.f32.mrf.mxu1 }
 0x4ff   : > { %v6289_v53 = vadd.f32 %v9754_v42, %v6182_v18  ;;  %v6331_v47 = vpack.c.bf16 %v6314_v46, %v6313_v51  ;;  %v6305_v38 = vadd.f32 %v14200_v60, %v6286_v24  ;;  %v6319_v11 = vmax.f32 %v6307_v5, 0.0  ;;  %v10127_v42 = vld [vmem:[%s14696_s5 + $0x38] sm:$0xff]   ;;  %v10128_v5 = vld [vmem:[%s14696_s5 + $0x60] sm:$0xff]  }
 0x500   : > { %v6266_v12 = vpop.f32.mrf.mxu1 }
 0x501   : > { %v6308_v3 = vadd.f32 %v14200_v60, %v6289_v53  ;;  %v6287_v19 = vadd.f32 %v6266_v12, %v6180_v34  ;;  %v6317_v29 = vmax.f32 %v6305_v38, 0.0 }
 0x503   : > { %v6320_v49 = vmax.f32 %v6308_v3, 0.0  ;;  %v6306_v40 = vadd.f32 %v14200_v60, %v6287_v19  ;;  %v10115_v60 = vld [vmem:[%s14699_s8 + $0x8] sm:$0xff]   ;;  %v10129_v3 = vld [vmem:[%s14696_s5 + $0x30] sm:$0xff]  }
 0x504   : > { %v10130_v19 = vld [vmem:[%s14696_s5 + $0x88] sm:$0xff]  }
 0x505   : > { %v6334_v45 = vpack.c.bf16 %v6320_v49, %v6319_v11  ;;  %v6318_v26 = vmax.f32 %v6306_v40, 0.0 }
 0x507   : > { %10007 = vmatprep.subr.msk.bf16.mxu0 %vm1007_vm1, %v6334_v45  ;;  %v6369_v16 = vsel %vm1007_vm1, %v6334_v45, 0  ;;  %v6333_v7 = vpack.c.bf16 %v6318_v26, %v6317_v29 }
 0x508   : > { %9756 = vmatpush3.bf16.msra.mxu0 %v6369_v16  ;;  %v10131_v16 = vld [vmem:[%s14696_s5 + $0x58] sm:$0xff]  }
 0x509   : > { %9757 = vmatprep.subr.bf16.mxu0 %v6333_v7 }
 0x50c   : > { %9758 = vmatpush3.bf16.msra.mxu0 %v6333_v7  ;;  %v10132_v7 = vld [vmem:[%s14696_s5 + $0x80] sm:$0xff]  }
 0x50d   : > { %9759 = vmatprep.subr.bf16.mxu0 %v6332_v59 }
 0x510   : > { %9760 = vmatpush3.bf16.msra.mxu0 %v6332_v59 }
 0x511   : > { %9761 = vmatprep.subr.bf16.mxu0 %v6331_v47 }
 0x514   : > { %9762 = vmatpush3.bf16.msra.mxu0 %v6331_v47 }
 0x515   : > { %9763 = vmatprep.subr.bf16.mxu0 %v6330_v58 }
 0x518   : > { %9764 = vmatpush3.bf16.msra.mxu0 %v6330_v58 }
 0x519   : > { %9765 = vmatprep.subr.bf16.mxu0 %v6329_v9 }
 0x51c   : > { %9766 = vmatpush3.bf16.msra.mxu0 %v6329_v9 }
 0x51d   : > { %9791 = vmatprep.subr.bf16.mxu0 %v10120_v39 }
 0x51f   : > { %9768 = vmatmul.mubr.msk.bf16.vlgmr.msra.gmra.mxu0 %vm6355_vm13, %v10115_v60 }
 0x520   : > { %9771 = vmatprep.mubr.msk.bf16.mxu0 %vm6355_vm13, %v10116_v54  ;;  %9792 = vmatpush3.bf16.msra.mxu0 %v10120_v39 }
 0x521   : > { %9793 = vmatprep.subr.bf16.mxu0 %v10121_v62 }
 0x524   : > { %9794 = vmatpush3.bf16.msra.mxu0 %v10121_v62  ;;  %v10135_v62 = vld [vmem:[%s14696_s5 + $0x78] sm:$0xff]  }
 0x525   : > { %9807 = vmatprep.subr.bf16.mxu0 %v10122_v48 }
 0x527   : > { %9772 = vmatmul.mubr.msk.bf16.gmra.mxu0 %vm6355_vm13, %v10117_v6  ;;  %v10133_v6 = vld [vmem:[%s14696_s5 + $0x50] sm:$0xff]  }
 0x5df   : > { %v9769_v17 = vpop.f32.mrf.mxu0 }
 0x5e1   : > { %v6405_v23 = vpop.f32.mrf.mxu0 }
 0x5e3   : > { %v9770_v27 = vpop.f32.mrf.mxu0 }
 0x5e4   : > { %v14260_v43 = vpack.c.bf16 %v9770_v27, %v9769_v17 }
 0x5e5   : > { %v6408_v2 = vpop.f32.mrf.mxu0 }
 0x5e6   : > { %v6536_v58 = vpack.c.bf16 %v6408_v2, %v6405_v23  ;;  %v14262_v35 = vpack.c.bf16 %v9769_v17, %v6408_v2  ;;  %v6546_v1 = vshll.u32 %v14260_v43, 16  ;;  %v14268_v55 = vrot.slane %v14260_v43, 1  ;;  %v10138_v2 = vld [vmem:[%s14696_s5 + $0xc8] sm:$0xff]  }
 0x5e7   : > { %v14264_v32 = vpop.f32.mrf.mxu0  ;;  %v14273_v15 = vrot.slane %v14260_v43, 2  ;;  %v6550_v44 = vshrl.u32 %v14260_v43, 16 }
 0x5e8   : > { %v6688_v0 = vrot.slane %v6536_v58, 1  ;;  %v6840_v13 = vrot.slane %v6536_v58, 2  ;;  %v6541_v56 = vshll.u32 %v6536_v58, 16  ;;  %v6539_v9 = vshrl.u32 %v6536_v58, 16 }
 0x5e9   : > { %v14270_v57 = vpop.f32.mrf.mxu0  ;;  %v6548_v63 = vrot.slane %v6546_v1, 1  ;;  %v6989_v4 = vshll.u32 %v14262_v35, 16  ;;  %v6987_v18 = vshrl.u32 %v14262_v35, 16  ;;  %v6765_v24 = vrot.slane %v6550_v44, 1 }
 0x5ea   : > { %v14276_v50 = vpack.c.bf16 %v14270_v57, %v9770_v27  ;;  %v6690_v31 = vsel %vm787_vm0, %v6688_v0, %v14268_v55  ;;  %v6543_v22 = vrot.slane %v6541_v56, 1  ;;  %v6842_v14 = vsel %vm1007_vm1, %v6840_v13, %v14273_v15  ;;  %v10137_v27 = vld [vmem:[%s14696_s5 + $0x70] sm:$0xff]   ;;  %v10140_v0 = vld [vmem:[%s14696_s5 + $0xc0] sm:$0xff]  }
 0x5eb   : > { %9795 = vmatprep.mubr.msk.bf16.mxu0 %vm6565_vm14, %v6690_v31  ;;  %v14293_v33 = vor.u32 %v6550_v44, %v6548_v63  ;;  %v6991_v36 = vrot.slane %v6989_v4, 1  ;;  %v6762_v8 = vrot.slane %v6539_v9, 1  ;;  %v6763_v28 = vrot.slane %v6541_v56, 2  ;;  %v14344_v54 = vpop.f32.mrf.mxu0  ;;  %v10142_v31 = vld [vmem:[%s14696_s5 + $0xe8] sm:$0xff]  }
 0x5ec   : > { %9796 = vmatmul.mubr.msk.bf16.vlgmr.msra.gmra.mxu0 %vm6565_vm14, %v14268_v55  ;;  %v6544_v37 = vor.u32 %v6543_v22, %v6539_v9  ;;  %v6993_v52 = vshll.u32 %v14276_v50, 16  ;;  %v6997_v46 = vshrl.u32 %v14276_v50, 16  ;;  %v6766_v59 = vrot.slane %v6546_v1, 2  ;;  %v10139_v1 = vld [vmem:[%s14696_s5 + $0x98] sm:$0xff]   ;;  %v10141_v9 = vld [vmem:[%s14696_s5 + $0x90] sm:$0xff]  }
 0x5ed   : > { %9808 = vmatpush3.bf16.msra.mxu0 %v10122_v48  ;;  %9811 = vmatprep.mubr.msk.bf16.mxu0 %vm6565_vm14, %v6842_v14  ;;  %v6992_v21 = vor.u32 %v6991_v36, %v6987_v18  ;;  %v6764_v53 = vor.u32 %v6763_v28, %v6762_v8  ;;  %v7147_v11 = vrot.slane %v6987_v18, 1  ;;  %v7148_v49 = vrot.slane %v6989_v4, 2  ;;  %v6424_v39 = vpop.f32.mrf.mxu0  ;;  %v10136_v48 = vld [vmem:[%s14696_s5 + $0xa0] sm:$0xff]   ;;  %v10147_v18 = vld [vmem:[%s14696_s5 + $0xd8] sm:$0xff]  }
 0x5ee   : > { %v6549_v30 = vsel %vm3079_vm9, %v6544_v37, %v6548_v63  ;;  %9809 = vmatprep.subr.bf16.mxu0 %v10124_v20  ;;  %v6995_v51 = vrot.slane %v6993_v52, 1  ;;  %v7150_v47 = vrot.slane %v6997_v46, 1  ;;  %v7151_v12 = vrot.slane %v6993_v52, 2  ;;  %v10144_v4 = vld [vmem:[%s14696_s5 + $0xe0] sm:$0xff]  }
 0x5ef   : > { %9779 = vmatprep.mubr.msk.bf16.mxu1 %vm6565_vm14, %v6549_v30  ;;  %v14317_v38 = vor.u32 %v6766_v59, %v6765_v24  ;;  %v7149_v26 = vor.u32 %v7148_v49, %v7147_v11  ;;  %v14367_v17 = vpack.c.bf16 %v6424_v39, %v14270_v57  ;;  %v7073_v23 = vrot.slane %v14262_v35, 1  ;;  %v10145_v30 = vld [vmem:[%s14696_s5 + $0xb0] sm:$0xff]   ;;  %v10154_v11 = vld [vmem:[%s14696_s5 + $0x148] sm:$0xff]   ;;  %v10155_v49 = vld [vmem:[%s14696_s5 + $0x118] sm:$0xff]  }
 0x5f0   : > { %9780 = vmatmul.mubr.msk.bf16.vlgmr.msra.gmra.mxu1 %vm6565_vm14, %v14293_v33  ;;  %v6996_v34 = vsel %vm3079_vm9, %v6992_v21, %v6995_v51  ;;  %v14330_v29 = vor.u32 %v7151_v12, %v7150_v47  ;;  %v14332_v45 = vor.u32 %v6997_v46, %v6995_v51  ;;  %v14395_v13 = vrot.slane %v14276_v50, 2  ;;  %v10148_v51 = vld [vmem:[%s14696_s5 + $0x100] sm:$0xff]   ;;  %v10151_v12 = vld [vmem:[%s14696_s5 + $0xf8] sm:$0xff]  }
 0x5f1   : > { %9784 = vmatpush3.bf16.msra.mxu1 %v10123_v10  ;;  %9787 = vmatprep.mubr.msk.bf16.mxu1 %vm6565_vm14, %v6536_v58  ;;  %v6768_v40 = vsel %vm3467_vm10, %v6764_v53, %v14317_v38  ;;  %v14364_v10 = vrot.slane %v14276_v50, 1  ;;  %v7225_v57 = vrot.slane %v14262_v35, 2  ;;  %v7368_v22 = vshll.u32 %v14367_v17, 16 }
 0x5f2   : > { %9810 = vmatpush3.bf16.msra.mxu0 %v10124_v20  ;;  %9785 = vmatprep.subr.bf16.mxu1 %v10125_v41  ;;  %v7153_v60 = vsel %vm3467_vm10, %v7149_v26, %v14330_v29  ;;  %v14420_v63 = vrot.slane %v14367_v17, 2  ;;  %v10143_v20 = vld [vmem:[%s14696_s5 + $0xb8] sm:$0xff]   ;;  %v7372_v37 = vshrl.u32 %v14367_v17, 16  ;;  %v10158_v26 = vld [vmem:[%s14696_s5 + $0x168] sm:$0xff]  }
 0x5f3   : > { %9823 = vmatprep.subr.bf16.mxu0 %v10126_v61  ;;  %v7075_v58 = vsel %vm787_vm0, %v7073_v23, %v14364_v10  ;;  %v7370_v14 = vrot.slane %v7368_v22, 1  ;;  %v7521_v36 = vrot.slane %v7368_v22, 2  ;;  %v10164_v23 = vld [vmem:[%s14696_s5 + $0x180] sm:$0xff]  }
 0x5f4   : > { %v7596_v44 = vsel %vm1007_vm1, %v14273_v15, %v14420_v63 }
 0x5f5   : > { %9812 = vmatmul.mubr.msk.bf16.vlgmr.msra.gmra.mxu0 %vm6565_vm14, %v14273_v15  ;;  %9786 = vmatpush3.bf16.msra.mxu1 %v10125_v41  ;;  %v10146_v41 = vld [vmem:[%s14696_s5 + $0x108] sm:$0xff]   ;;  %v7371_v15 = vsel %vm3079_vm9, %v14293_v33, %v7370_v14  ;;  %v14460_v21 = vor.u32 %v7372_v37, %v7370_v14  ;;  %v8502_v14 = vld [vmem:[%s14701_s10 + $0x18] sm:$0xff] }
 0x5f6   : > { %9824 = vmatpush3.bf16.msra.mxu0 %v10126_v61  ;;  %9827 = vmatprep.mubr.msk.bf16.mxu0 %vm6565_vm14, %v6996_v34  ;;  %v7520_v61 = vrot.slane %v7372_v37, 1 }
 0x5f7   : > { %9799 = vmatprep.subr.bf16.mxu1 %v10127_v42  ;;  %9825 = vmatprep.subr.bf16.mxu0 %v10128_v5 }
 0x5f8   : > { %9788 = vmatmul.mubr.msk.bf16.vlgmr.msra.gmra.mxu1 %vm6565_vm14, %v14260_v43  ;;  %v14454_v33 = vor.u32 %v7521_v36, %v7520_v61 }
 0x5f9   : > { %9800 = vmatpush3.bf16.msra.mxu1 %v10127_v42  ;;  %9803 = vmatprep.mubr.msk.bf16.mxu1 %vm6565_vm14, %v6768_v40  ;;  %v10149_v42 = vld [vmem:[%s14696_s5 + $0xd0] sm:$0xff]   ;;  %v10156_v40 = vld [vmem:[%s14696_s5 + $0x140] sm:$0xff]  }
 0x5fa   : > { %9826 = vmatpush3.bf16.msra.mxu0 %v10128_v5  ;;  %9801 = vmatprep.subr.bf16.mxu1 %v10129_v3  ;;  %v10150_v5 = vld [vmem:[%s14696_s5 + $0x128] sm:$0xff]   ;;  %v7523_v53 = vsel %vm3467_vm10, %v14317_v38, %v14454_v33 }
 0x5fb   : > { %9839 = vmatprep.subr.bf16.mxu0 %v10130_v19 }
 0x5fd   : > { %9828 = vmatmul.mubr.msk.bf16.vlgmr.msra.gmra.mxu0 %vm6565_vm14, %v14332_v45  ;;  %9802 = vmatpush3.bf16.msra.mxu1 %v10129_v3  ;;  %v10152_v3 = vld [vmem:[%s14696_s5 + $0x120] sm:$0xff]  }
 0x5fe   : > { %9840 = vmatpush3.bf16.msra.mxu0 %v10130_v19  ;;  %9843 = vmatprep.mubr.msk.bf16.mxu0 %vm6565_vm14, %v7153_v60  ;;  %v10153_v19 = vld [vmem:[%s14696_s5 + $0xf0] sm:$0xff]   ;;  %v10160_v60 = vld [vmem:[%s14696_s5 + $0x160] sm:$0xff]  }
 0x5ff   : > { %9815 = vmatprep.subr.bf16.mxu1 %v10131_v16  ;;  %9841 = vmatprep.subr.bf16.mxu0 %v10132_v7 }
 0x600   : > { %9804 = vmatmul.mubr.msk.bf16.vlgmr.msra.gmra.mxu1 %vm6565_vm14, %v14317_v38 }
 0x601   : > { %9816 = vmatpush3.bf16.msra.mxu1 %v10131_v16  ;;  %9819 = vmatprep.mubr.msk.bf16.mxu1 %vm6565_vm14, %v14262_v35  ;;  %v14416_v35 = vpack.c.bf16 %v14264_v32, %v6424_v39  ;;  %v10162_v39 = vld [vmem:[%s14696_s5 + $0x188] sm:$0xff]  }
 0x602   : > { %9842 = vmatpush3.bf16.msra.mxu0 %v10132_v7  ;;  %9817 = vmatprep.subr.bf16.mxu1 %v10133_v6 }
 0x603   : > { %9855 = vmatprep.subr.bf16.mxu0 %v10134_v25  ;;  %v7737_v52 = vshll.u32 %v14416_v35, 16  ;;  %v7741_v28 = vshrl.u32 %v14416_v35, 16 }
 0x605   : > { %9844 = vmatmul.mubr.msk.bf16.vlgmr.msra.gmra.mxu0 %vm6565_vm14, %v14330_v29  ;;  %9818 = vmatpush3.bf16.msra.mxu1 %v10133_v6  ;;  %v7739_v8 = vrot.slane %v7737_v52, 1  ;;  %v7889_v24 = vrot.slane %v7741_v28, 1  ;;  %v7890_v59 = vrot.slane %v7737_v52, 2 }
 0x606   : > { %9856 = vmatpush3.bf16.msra.mxu0 %v10134_v25  ;;  %9859 = vmatprep.mubr.msk.bf16.mxu0 %vm6565_vm14, %v14260_v43  ;;  %v14386_v43 = vrot.slane %v14367_v17, 1  ;;  %v10161_v25 = vld [vmem:[%s14696_s5 + $0x130] sm:$0xff]  }
 0x607   : > { %9831 = vmatprep.subr.bf16.mxu1 %v10135_v62  ;;  %9857 = vmatprep.subr.bf16.mxu0 %v10136_v48  ;;  %v7740_v46 = vsel %vm3079_vm9, %v14332_v45, %v7739_v8  ;;  %v7891_v34 = vor.u32 %v7890_v59, %v7889_v24  ;;  %v7743_v47 = vor.u32 %v7741_v28, %v7739_v8 }
 0x608   : > { %9820 = vmatmul.mubr.msk.bf16.vlgmr.msra.gmra.mxu1 %vm6565_vm14, %v14276_v50  ;;  %v7448_v56 = vsel %vm787_vm0, %v14268_v55, %v14386_v43  ;;  %v7227_v55 = vsel %vm1007_vm1, %v7225_v57, %v14395_v13  ;;  %v8037_v45 = vpack.c.bf16 %v14344_v54, %v14264_v32  ;;  %v10159_v32 = vld [vmem:[%s14696_s5 + $0x138] sm:$0xff]   ;;  %v7964_v54 = vrot.slane %v14416_v35, 2 }
 0x609   : > { %9832 = vmatpush3.bf16.msra.mxu1 %v10135_v62  ;;  %9835 = vmatprep.mubr.msk.bf16.mxu1 %vm6565_vm14, %v7075_v58  ;;  %v7892_v38 = vsel %vm3467_vm10, %v14330_v29, %v7891_v34  ;;  %v7816_v29 = vrot.slane %v14416_v35, 1  ;;  %v15540_v57 = vmov 0.0  }
 0x60a   : > { %9858 = vmatpush3.bf16.msra.mxu0 %v10136_v48  ;;  %9833 = vmatprep.subr.bf16.mxu1 %v10137_v27  ;;  %v8185_v7 = vrot.slane %v8037_v45, 1  ;;  %v7965_v62 = vsel %vm1007_vm1, %v14395_v13, %v7964_v54  ;;  %v8333_v48 = vrot.slane %v8037_v45, 2 }
 0x60b   : > { %9871 = vmatprep.subr.bf16.mxu0 %v10138_v2  ;;  %v7817_v16 = vsel %vm787_vm0, %v14364_v10, %v7816_v29 }
 0x60c   : > { %v8186_v6 = vsel %vm787_vm0, %v14386_v43, %v8185_v7  ;;  %vm8508_vm0 = vcmask 523264  }
 0x60d   : > { %9860 = vmatmul.mubr.msk.bf16.vlgmr.msra.gmra.mxu0 %vm6565_vm14, %v14367_v17  ;;  %9834 = vmatpush3.bf16.msra.mxu1 %v10137_v27  ;;  %v8110_v27 = vshrl.u32 %v8037_v45, 16 }
 0x60e   : > { %9872 = vmatpush3.bf16.msra.mxu0 %v10138_v2  ;;  %9875 = vmatprep.mubr.msk.bf16.mxu0 %vm6565_vm14, %v7448_v56  ;;  %v8334_v2 = vsel %vm1007_vm1, %v14420_v63, %v8333_v48  ;;  %v10166_v56 = vld [vmem:[%s14696_s5 + $0x178] sm:$0xff]  }
 0x60f   : > { %9847 = vmatprep.subr.bf16.mxu1 %v10139_v1  ;;  %9873 = vmatprep.subr.bf16.mxu0 %v10140_v0 }
 0x610   : > { %9836 = vmatmul.mubr.msk.bf16.vlgmr.msra.gmra.mxu1 %vm6565_vm14, %v14364_v10  ;;  %v8106_v10 = vshll.u32 %v8037_v45, 16 }
 0x611   : > { %9848 = vmatpush3.bf16.msra.mxu1 %v10139_v1  ;;  %9851 = vmatprep.mubr.msk.bf16.mxu1 %vm6565_vm14, %v7227_v55  ;;  %v10167_v55 = vld [vmem:[%s14696_s5 + $0x170] sm:$0xff]  }
 0x612   : > { %9874 = vmatpush3.bf16.msra.mxu0 %v10140_v0  ;;  %9849 = vmatprep.subr.bf16.mxu1 %v10141_v9  ;;  %v8108_v58 = vrot.slane %v8106_v10, 1  ;;  %v8258_v0 = vrot.slane %v8110_v27, 1 }
 0x613   : > { %9887 = vmatprep.subr.bf16.mxu0 %v10142_v31 }
 0x614   : > { %v8109_v1 = vsel %vm3079_vm9, %v14460_v21, %v8108_v58 }
 0x615   : > { %9876 = vmatmul.mubr.msk.bf16.vlgmr.msra.gmra.mxu0 %vm6565_vm14, %v14386_v43  ;;  %9850 = vmatpush3.bf16.msra.mxu1 %v10141_v9  ;;  %v10165_v43 = vld [vmem:[%s14696_s5 + $0x150] sm:$0xff]  }
 0x616   : > { %9888 = vmatpush3.bf16.msra.mxu0 %v10142_v31  ;;  %9891 = vmatprep.mubr.msk.bf16.mxu0 %vm6565_vm14, %v7596_v44  ;;  %v8112_v31 = vor.u32 %v8110_v27, %v8108_v58  ;;  %v8501_v44 = vld [vmem:[%s14701_s10 + $0x10] sm:$0xff] }
 0x617   : > { %9863 = vmatprep.subr.bf16.mxu1 %v10143_v20  ;;  %9889 = vmatprep.subr.bf16.mxu0 %v10144_v4 }
 0x618   : > { %9852 = vmatmul.mubr.msk.bf16.vlgmr.msra.gmra.mxu1 %vm6565_vm14, %v14395_v13  ;;  %v8259_v13 = vrot.slane %v8106_v10, 2 }
 0x619   : > { %9864 = vmatpush3.bf16.msra.mxu1 %v10143_v20  ;;  %9867 = vmatprep.mubr.msk.bf16.mxu1 %vm6565_vm14, %v7371_v15  ;;  %v8504_v20 = vld [vmem:[%s14701_s10 + $0x28] sm:$0xff] }
 0x61a   : > { %9890 = vmatpush3.bf16.msra.mxu0 %v10144_v4  ;;  %9865 = vmatprep.subr.bf16.mxu1 %v10145_v30  ;;  %v8260_v9 = vor.u32 %v8259_v13, %v8258_v0  ;;  %v8503_v4 = vld [vmem:[%s14701_s10 + $0x20] sm:$0xff] }
 0x61b   : > { %9903 = vmatprep.subr.bf16.mxu0 %v10146_v41 }
 0x61c   : > { %v8261_v22 = vsel %vm3467_vm10, %v14454_v33, %v8260_v9 }
 0x61d   : > { %9892 = vmatmul.mubr.msk.bf16.vlgmr.msra.gmra.mxu0 %vm6565_vm14, %v14420_v63  ;;  %9866 = vmatpush3.bf16.msra.mxu1 %v10145_v30  ;;  %v8505_v63 = vld [vmem:[%s14701_s10 + $0x30] sm:$0xff]  ;;  %v8500_v30 = vld [vmem:[%s14701_s10 + $0x8] sm:$0xff] }
 0x61e   : > { %9904 = vmatpush3.bf16.msra.mxu0 %v10146_v41  ;;  %9907 = vmatprep.mubr.msk.bf16.mxu0 %vm6565_vm14, %v7740_v46 }
 0x61f   : > { %9879 = vmatprep.subr.bf16.mxu1 %v10147_v18  ;;  %9905 = vmatprep.subr.bf16.mxu0 %v10148_v51 }
 0x620   : > { %9868 = vmatmul.mubr.msk.bf16.vlgmr.msra.gmra.mxu1 %vm6565_vm14, %v14460_v21 }
 0x621   : > { %9880 = vmatpush3.bf16.msra.mxu1 %v10147_v18  ;;  %9883 = vmatprep.mubr.msk.bf16.mxu1 %vm6565_vm14, %v7523_v53 }
 0x622   : > { %9906 = vmatpush3.bf16.msra.mxu0 %v10148_v51  ;;  %9881 = vmatprep.subr.bf16.mxu1 %v10149_v42 }
 0x623   : > { %9919 = vmatprep.subr.bf16.mxu0 %v10150_v5 }
 0x625   : > { %9908 = vmatmul.mubr.msk.bf16.vlgmr.msra.gmra.mxu0 %vm6565_vm14, %v7743_v47  ;;  %9882 = vmatpush3.bf16.msra.mxu1 %v10149_v42 }
 0x626   : > { %9920 = vmatpush3.bf16.msra.mxu0 %v10150_v5  ;;  %9923 = vmatprep.mubr.msk.bf16.mxu0 %vm6565_vm14, %v7892_v38 }
 0x627   : > { %9895 = vmatprep.subr.bf16.mxu1 %v10151_v12  ;;  %9921 = vmatprep.subr.bf16.mxu0 %v10152_v3 }
 0x628   : > { %9884 = vmatmul.mubr.msk.bf16.vlgmr.msra.gmra.mxu1 %vm6565_vm14, %v14454_v33 }
 0x629   : > { %9896 = vmatpush3.bf16.msra.mxu1 %v10151_v12  ;;  %9899 = vmatprep.mubr.msk.bf16.mxu1 %vm6565_vm14, %v14276_v50  ;;  %v10157_v50 = vld [vmem:[%s14696_s5 + $0x110] sm:$0xff]  }
 0x62a   : > { %9922 = vmatpush3.bf16.msra.mxu0 %v10152_v3  ;;  %9897 = vmatprep.subr.bf16.mxu1 %v10153_v19 }
 0x62b   : > { %9935 = vmatprep.subr.bf16.mxu0 %v10154_v11 }
 0x62d   : > { %9924 = vmatmul.mubr.msk.bf16.vlgmr.msra.gmra.mxu0 %vm6565_vm14, %v7891_v34  ;;  %9898 = vmatpush3.bf16.msra.mxu1 %v10153_v19 }
 0x62e   : > { %9936 = vmatpush3.bf16.msra.mxu0 %v10154_v11  ;;  %9939 = vmatprep.mubr.msk.bf16.mxu0 %vm6565_vm14, %v14367_v17  ;;  %v10163_v17 = vld [vmem:[%s14696_s5 + $0x158] sm:$0xff]  }
 0x62f   : > { %9911 = vmatprep.subr.bf16.mxu1 %v10155_v49  ;;  %9937 = vmatprep.subr.bf16.mxu0 %v10156_v40 }
 0x630   : > { %9900 = vmatmul.mubr.msk.bf16.vlgmr.msra.gmra.mxu1 %vm6565_vm14, %v14416_v35  ;;  %v8506_v35 = vld [vmem:[%s14701_s10 + $0x38] sm:$0xff] }
 0x631   : > { %9912 = vmatpush3.bf16.msra.mxu1 %v10155_v49  ;;  %9915 = vmatprep.mubr.msk.bf16.mxu1 %vm6565_vm14, %v7817_v16 }
 0x632   : > { %9938 = vmatpush3.bf16.msra.mxu0 %v10156_v40  ;;  %9913 = vmatprep.subr.bf16.mxu1 %v10157_v50 }
 0x633   : > { %9951 = vmatprep.subr.bf16.mxu0 %v10158_v26 }
 0x635   : > { %9940 = vmatmul.mubr.msk.bf16.vlgmr.msra.gmra.mxu0 %vm6565_vm14, %v8037_v45  ;;  %9914 = vmatpush3.bf16.msra.mxu1 %v10157_v50 }
 0x636   : > { %9952 = vmatpush3.bf16.msra.mxu0 %v10158_v26  ;;  %9955 = vmatprep.mubr.msk.bf16.mxu0 %vm6565_vm14, %v8186_v6 }
 0x637   : > { %9927 = vmatprep.subr.bf16.mxu1 %v10159_v32  ;;  %9953 = vmatprep.subr.bf16.mxu0 %v10160_v60 }
 0x638   : > { %9916 = vmatmul.mubr.msk.bf16.vlgmr.msra.gmra.mxu1 %vm6565_vm14, %v7816_v29 }
 0x639   : > { %9928 = vmatpush3.bf16.msra.mxu1 %v10159_v32  ;;  %9931 = vmatprep.mubr.msk.bf16.mxu1 %vm6565_vm14, %v7965_v62 }
 0x63a   : > { %9954 = vmatpush3.bf16.msra.mxu0 %v10160_v60  ;;  %9929 = vmatprep.subr.bf16.mxu1 %v10161_v25 }
 0x63b   : > { %9967 = vmatprep.subr.bf16.mxu0 %v10162_v39 }
 0x63d   : > { %9956 = vmatmul.mubr.msk.bf16.vlgmr.msra.gmra.mxu0 %vm6565_vm14, %v8185_v7  ;;  %9930 = vmatpush3.bf16.msra.mxu1 %v10161_v25 }
 0x63e   : > { %9968 = vmatpush3.bf16.msra.mxu0 %v10162_v39  ;;  %9971 = vmatprep.mubr.msk.bf16.mxu0 %vm6565_vm14, %v8334_v2 }
 0x63f   : > { %9943 = vmatprep.subr.bf16.mxu1 %v10163_v17  ;;  %9969 = vmatprep.subr.bf16.mxu0 %v10164_v23 }
 0x640   : > { %9932 = vmatmul.mubr.msk.bf16.vlgmr.msra.gmra.mxu1 %vm6565_vm14, %v7964_v54 }
 0x641   : > { %9944 = vmatpush3.bf16.msra.mxu1 %v10163_v17  ;;  %9947 = vmatprep.mubr.msk.bf16.mxu1 %vm6565_vm14, %v8109_v1 }
 0x642   : > { %9970 = vmatpush3.bf16.msra.mxu0 %v10164_v23  ;;  %9945 = vmatprep.subr.bf16.mxu1 %v10165_v43 }
 0x643   : > { %9986 = vmatprep.subr.mxu0 %v15540_v57 }
 0x645   : > { %9972 = vmatmul.mubr.msk.bf16.vlgmr.msra.gmra.mxu0 %vm6565_vm14, %v8333_v48  ;;  %9946 = vmatpush3.bf16.msra.mxu1 %v10165_v43 }
 0x646   : > { %9959 = vmatprep.subr.bf16.mxu1 %v10166_v56  ;;  %10002 = vmatprep.mubr.msk.f32.mxu0 %vm10236_vm6, %v15540_v57 }
 0x647   : > { %9987 = vmatpush3.msra.mxu0 %v8506_v35 }
 0x648   : > { %9948 = vmatmul.mubr.msk.bf16.vlgmr.msra.gmra.mxu1 %vm6565_vm14, %v8112_v31  ;;  %9988 = vmatprep.subr.mxu0 %v15540_v57 }
 0x649   : > { %9960 = vmatpush3.bf16.msra.mxu1 %v10166_v56  ;;  %9963 = vmatprep.mubr.msk.bf16.mxu1 %vm6565_vm14, %v8261_v22 }
 0x64a   : > { %9961 = vmatprep.subr.bf16.mxu1 %v10167_v55  ;;  %9989 = vmatpush3.msra.mxu0 %v8505_v63 }
 0x64b   : > { %9990 = vmatprep.subr.mxu0 %v15540_v57 }
 0x64c   : > { %9991 = vmatpush3.msra.mxu0 %v8504_v20 }
 0x64d   : > { %9962 = vmatpush3.bf16.msra.mxu1 %v10167_v55  ;;  %9992 = vmatprep.subr.mxu0 %v15540_v57 }
 0x64e   : > { %9975 = vmatprep.subr.mxu1 %v15540_v57  ;;  %9993 = vmatpush3.msra.mxu0 %v8503_v4 }
 0x64f   : > { %9994 = vmatprep.subr.mxu0 %v15540_v57 }
 0x650   : > { %9964 = vmatmul.mubr.msk.bf16.vlgmr.msra.gmra.mxu1 %vm6565_vm14, %v8260_v9  ;;  %9995 = vmatpush3.msra.mxu0 %v8502_v14 }
 0x651   : > { %9983 = vmatprep.mubr.msk.f32.mxu1 %vm10236_vm6, %v15540_v57  ;;  %9996 = vmatprep.subr.mxu0 %v15540_v57 }
 0x652   : > { %9997 = vmatpush3.msra.mxu0 %v8501_v44 }
 0x653   : > { %9998 = vmatprep.subr.mxu0 %v15540_v57 }
 0x654   : > { %9999 = vmatpush3.msra.mxu0 %v8500_v30 }
 0x655   : > { %10000 = vmatprep.subr.mxu0 %v15540_v57 }
 0x6ac   : > { %v9797_v37 = vpop.f32.mrf.mxu0 }
 0x6ae   : > { %v6743_v52 = vpop.f32.mrf.mxu0 }
 0x6b0   : > { %v9781_v41 = vpop.f32.mrf.mxu1  ;;  %v9798_v15 = vpop.f32.mrf.mxu0 }
 0x6b2   : > { %v6606_v61 = vpop.f32.mrf.mxu1  ;;  %v6746_v36 = vpop.f32.mrf.mxu0 }
 0x6b4   : > { %v9782_v8 = vpop.f32.mrf.mxu1 }
 0x6b5   : > { %v9813_v28 = vpop.f32.mrf.mxu0 }
 0x6b6   : > { %v6609_v18 = vpop.f32.mrf.mxu1 }
 0x6b7   : > { %v6895_v51 = vpop.f32.mrf.mxu0 }
 0x6b8   : > { %v9789_v33 = vpop.f32.mrf.mxu1 }
 0x6b9   : > { %v9814_v46 = vpop.f32.mrf.mxu0  ;;  %v6680_v32 = vadd.f32 %v9789_v33, %v9781_v41 }
 0x6ba   : > { %v6671_v24 = vpop.f32.mrf.mxu1 }
 0x6bb   : > { %v6898_v59 = vpop.f32.mrf.mxu0  ;;  %v6672_v39 = vadd.f32 %v6671_v24, %v6606_v61  ;;  %v6760_v48 = vadd.f32 %v9797_v37, %v6680_v32 }
 0x6bc   : > { %v9790_v21 = vpop.f32.mrf.mxu1 }
 0x6bd   : > { %v9829_v42 = vpop.f32.mrf.mxu0  ;;  %v6683_v62 = vadd.f32 %v9790_v21, %v9782_v8  ;;  %v6758_v43 = vadd.f32 %v6743_v52, %v6672_v39 }
 0x6be   : > { %v6674_v5 = vpop.f32.mrf.mxu1 }
 0x6bf   : > { %v7052_v53 = vpop.f32.mrf.mxu0  ;;  %v6675_v23 = vadd.f32 %v6674_v5, %v6609_v18  ;;  %v6761_v1 = vadd.f32 %v9798_v15, %v6683_v62 }
 0x6c0   : > { %v9805_v34 = vpop.f32.mrf.mxu1 }
 0x6c1   : > { %v9830_v47 = vpop.f32.mrf.mxu0  ;;  %v6838_v27 = vadd.f32 %v9805_v34, %v6760_v48  ;;  %v6759_v31 = vadd.f32 %v6746_v36, %v6675_v23 }
 0x6c2   : > { %v6821_v12 = vpop.f32.mrf.mxu1 }
 0x6c3   : > { %v7055_v3 = vpop.f32.mrf.mxu0  ;;  %v6836_v56 = vadd.f32 %v6821_v12, %v6758_v43  ;;  %v6912_v55 = vadd.f32 %v9813_v28, %v6838_v27 }
 0x6c4   : > { %v9806_v38 = vpop.f32.mrf.mxu1 }
 0x6c5   : > { %v9845_v19 = vpop.f32.mrf.mxu0  ;;  %v6839_v9 = vadd.f32 %v9806_v38, %v6761_v1  ;;  %v6910_v37 = vadd.f32 %v6895_v51, %v6836_v56 }
 0x6c6   : > { %v6824_v11 = vpop.f32.mrf.mxu1 }
 0x6c7   : > { %v14602_v49 = vpop.f32.mrf.mxu0  ;;  %v6837_v63 = vadd.f32 %v6824_v11, %v6759_v31  ;;  %v6913_v44 = vadd.f32 %v9814_v46, %v6839_v9 }
 0x6c8   : > { %v9821_v40 = vpop.f32.mrf.mxu1 }
 0x6c9   : > { %v14604_v29 = vpop.f32.mrf.mxu0  ;;  %v6985_v20 = vadd.f32 %v9821_v40, %v6912_v55  ;;  %v6911_v61 = vadd.f32 %v6898_v59, %v6837_v63 }
 0x6ca   : > { %v6968_v50 = vpop.f32.mrf.mxu1 }
 0x6cb   : > { %v14606_v45 = vpop.f32.mrf.mxu0  ;;  %v6983_v41 = vadd.f32 %v6968_v50, %v6910_v37  ;;  %v7069_v8 = vadd.f32 %v9829_v42, %v6985_v20 }
 0x6cc   : > { %v9822_v26 = vpop.f32.mrf.mxu1 }
 0x6cd   : > { %v14608_v16 = vpop.f32.mrf.mxu0  ;;  %v6986_v15 = vadd.f32 %v9822_v26, %v6913_v44  ;;  %v7067_v5 = vadd.f32 %v7052_v53, %v6983_v41 }
 0x6ce   : > { %v6971_v7 = vpop.f32.mrf.mxu1 }
 0x6cf   : > { %v14610_v60 = vpop.f32.mrf.mxu0  ;;  %v6984_v36 = vadd.f32 %v6971_v7, %v6911_v61  ;;  %v7070_v34 = vadd.f32 %v9830_v47, %v6986_v15 }
 0x6d0   : > { %v9837_v54 = vpop.f32.mrf.mxu1 }
 0x6d1   : > { %v14612_v6 = vpop.f32.mrf.mxu0  ;;  %v7145_v28 = vadd.f32 %v9837_v54, %v7069_v8  ;;  %v7068_v51 = vadd.f32 %v7055_v3, %v6984_v36 }
 0x6d2   : > { %v7128_v25 = vpop.f32.mrf.mxu1 }
 0x6d3   : > { %v14614_v10 = vpop.f32.mrf.mxu0  ;;  %v7143_v11 = vadd.f32 %v7128_v25, %v7067_v5  ;;  %v7223_v46 = vadd.f32 %v9845_v19, %v7145_v28 }
 0x6d4   : > { %v9838_v17 = vpop.f32.mrf.mxu1 }
 0x6d5   : > { %v14616_v2 = vpop.f32.mrf.mxu0  ;;  %v7146_v40 = vadd.f32 %v9838_v17, %v7070_v34  ;;  %v7221_v62 = vadd.f32 %v14602_v49, %v7143_v11 }
 0x6d6   : > { %v7131_v58 = vpop.f32.mrf.mxu1 }
 0x6d7   : > { %v14618_v0 = vpop.f32.mrf.mxu0  ;;  %v7144_v50 = vadd.f32 %v7131_v58, %v7068_v51  ;;  %v7224_v7 = vadd.f32 %v14604_v29, %v7146_v40 }
 0x6d8   : > { %v9853_v13 = vpop.f32.mrf.mxu1 }
 0x6d9   : > { %v14620_v22 = vpop.f32.mrf.mxu0  ;;  %v7297_v26 = vadd.f32 %v9853_v13, %v7223_v46  ;;  %v7222_v23 = vadd.f32 %v14606_v45, %v7144_v50 }
 0x6da   : > { %v7280_v35 = vpop.f32.mrf.mxu1 }
 0x6db   : > { %v14622_v4 = vpop.f32.mrf.mxu0  ;;  %v7295_v53 = vadd.f32 %v7280_v35, %v7221_v62  ;;  %v7366_v25 = vadd.f32 %v14608_v16, %v7297_v26 }
 0x6dc   : > { %v9854_v14 = vpop.f32.mrf.mxu1 }
 0x6dd   : > { %v9893_v30 = vpop.f32.mrf.mxu0  ;;  %v7298_v47 = vadd.f32 %v9854_v14, %v7224_v7  ;;  %v7364_v1 = vadd.f32 %v14610_v60, %v7295_v53 }
 0x6de   : > { %v7283_v52 = vpop.f32.mrf.mxu1 }
 0x6df   : > { %v7649_v18 = vpop.f32.mrf.mxu0  ;;  %v7296_v17 = vadd.f32 %v7283_v52, %v7222_v23  ;;  %v7367_v49 = vadd.f32 %v14612_v6, %v7298_v47 }
 0x6e0   : > { %v9869_v33 = vpop.f32.mrf.mxu1 }
 0x6e1   : > { %v9894_v24 = vpop.f32.mrf.mxu0  ;;  %v7444_v27 = vadd.f32 %v9869_v33, %v7366_v25  ;;  %v7365_v31 = vadd.f32 %v14614_v10, %v7296_v17 }
 0x6e2   : > { %v7427_v21 = vpop.f32.mrf.mxu1 }
 0x6e3   : > { %v7652_v12 = vpop.f32.mrf.mxu0  ;;  %v7442_v56 = vadd.f32 %v7427_v21, %v7364_v1  ;;  %v7518_v45 = vadd.f32 %v14616_v2, %v7444_v27 }
 0x6e4   : > { %v9870_v38 = vpop.f32.mrf.mxu1 }
 0x6e5   : > { %v9909_v32 = vpop.f32.mrf.mxu0  ;;  %v7445_v9 = vadd.f32 %v9870_v38, %v7367_v49  ;;  %v7516_v37 = vadd.f32 %v14618_v0, %v7442_v56 }
 0x6e6   : > { %v7430_v39 = vpop.f32.mrf.mxu1 }
 0x6e7   : > { %v7796_v59 = vpop.f32.mrf.mxu0  ;;  %v7443_v35 = vadd.f32 %v7430_v39, %v7365_v31  ;;  %v7519_v60 = vadd.f32 %v14620_v22, %v7445_v9 }
 0x6e8   : > { %v9885_v42 = vpop.f32.mrf.mxu1 }
 0x6e9   : > { %v9910_v54 = vpop.f32.mrf.mxu0  ;;  %v7593_v63 = vadd.f32 %v9885_v42, %v7518_v45  ;;  %v7517_v15 = vadd.f32 %v14622_v4, %v7443_v35 }
 0x6ea   : > { %v7576_v48 = vpop.f32.mrf.mxu1 }
 0x6eb   : > { %v7799_v3 = vpop.f32.mrf.mxu0  ;;  %v7591_v52 = vadd.f32 %v7576_v48, %v7516_v37  ;;  %v7666_v61 = vadd.f32 %v9893_v30, %v7593_v63 }
 0x6ec   : > { %v9886_v19 = vpop.f32.mrf.mxu1 }
 0x6ed   : > { %v9925_v58 = vpop.f32.mrf.mxu0  ;;  %v7594_v41 = vadd.f32 %v9886_v19, %v7519_v60  ;;  %v7664_v21 = vadd.f32 %v7649_v18, %v7591_v52 }
 0x6ee   : > { %v7579_v43 = vpop.f32.mrf.mxu1 }
 0x6ef   : > { %v7945_v13 = vpop.f32.mrf.mxu0  ;;  %v7592_v2 = vadd.f32 %v7579_v43, %v7517_v15  ;;  %v7667_v5 = vadd.f32 %v9894_v24, %v7594_v41 }
 0x6f0   : > { %v9901_v29 = vpop.f32.mrf.mxu1 }
 0x6f1   : > { %v9926_v55 = vpop.f32.mrf.mxu0  ;;  %v7735_v33 = vadd.f32 %v9901_v29, %v7666_v61  ;;  %v7665_v22 = vadd.f32 %v7652_v12, %v7592_v2 }
 0x6f2   : > { %v7718_v16 = vpop.f32.mrf.mxu1 }
 0x6f3   : > { %v7948_v20 = vpop.f32.mrf.mxu0  ;;  %v7733_v0 = vadd.f32 %v7718_v16, %v7664_v21  ;;  %v7813_v40 = vadd.f32 %v9909_v32, %v7735_v33 }
 0x6f4   : > { %v9902_v14 = vpop.f32.mrf.mxu1 }
 0x6f5   : > { %v9941_v44 = vpop.f32.mrf.mxu0  ;;  %v7736_v11 = vadd.f32 %v9902_v14, %v7667_v5  ;;  %v7811_v26 = vadd.f32 %v7796_v59, %v7733_v0 }
 0x6f6   : > { %v7721_v6 = vpop.f32.mrf.mxu1 }
 0x6f7   : > { %v8087_v10 = vpop.f32.mrf.mxu0  ;;  %v7734_v39 = vadd.f32 %v7721_v6, %v7665_v22  ;;  %v7814_v42 = vadd.f32 %v9910_v54, %v7736_v11 }
 0x6f8   : > { %v9917_v8 = vpop.f32.mrf.mxu1 }
 0x6f9   : > { %v9942_v36 = vpop.f32.mrf.mxu0  ;;  %v7887_v50 = vadd.f32 %v9917_v8, %v7813_v40  ;;  %v7812_v53 = vadd.f32 %v7799_v3, %v7734_v39 }
 0x6fa   : > { %v7870_v28 = vpop.f32.mrf.mxu1 }
 0x6fb   : > { %v8090_v34 = vpop.f32.mrf.mxu0  ;;  %v7885_v7 = vadd.f32 %v7870_v28, %v7811_v26  ;;  %v7962_v18 = vadd.f32 %v9925_v58, %v7887_v50  ;;  %v8421_v50 = vld [vmem:[%s14700_s9] sm:$0x1] }
 0x6fc   : > { %v9918_v38 = vpop.f32.mrf.mxu1 }
 0x6fd   : > { %v9957_v51 = vpop.f32.mrf.mxu0  ;;  %v7888_v48 = vadd.f32 %v9918_v38, %v7814_v42  ;;  %v7960_v12 = vadd.f32 %v7945_v13, %v7885_v7  ;;  %v8507_v42 = vld [vmem:[%s14702_s11] sm:$0x1] }
 0x6fe   : > { %v7873_v46 = vpop.f32.mrf.mxu1 }
 0x6ff   : > { %v8239_v4 = vpop.f32.mrf.mxu0  ;;  %v7886_v23 = vadd.f32 %v7873_v46, %v7812_v53  ;;  %v7963_v32 = vadd.f32 %v9926_v55, %v7888_v48 }
 0x700   : > { %v9933_v30 = vpop.f32.mrf.mxu1 }
 0x701   : > { %v9958_v24 = vpop.f32.mrf.mxu0  ;;  %v8035_v25 = vadd.f32 %v9933_v30, %v7962_v18  ;;  %v7961_v49 = vadd.f32 %v7948_v20, %v7886_v23 }
 0x702   : > { %v8018_v62 = vpop.f32.mrf.mxu1 }
 0x703   : > { %v8242_v17 = vpop.f32.mrf.mxu0  ;;  %v8033_v43 = vadd.f32 %v8018_v62, %v7960_v12  ;;  %v8104_v29 = vadd.f32 %v9941_v44, %v8035_v25 }
 0x704   : > { %v9934_v47 = vpop.f32.mrf.mxu1 }
 0x705   : > { %v8036_v1 = vadd.f32 %v9934_v47, %v7963_v32  ;;  %v9973_v9 = vpop.f32.mrf.mxu0  ;;  %v8102_v3 = vadd.f32 %v8087_v10, %v8033_v43  ;;  %v8978_v10 = vld [vmem:[%s14697_s6] ss:$0 sm:$0xff] }
 0x706   : > { %v8021_v19 = vpop.f32.mrf.mxu1 }
 0x707   : > { %v8034_v54 = vadd.f32 %v8021_v19, %v7961_v49  ;;  %v8105_v58 = vadd.f32 %v9942_v36, %v8036_v1  ;;  %v8387_v13 = vpop.f32.mrf.mxu0 }
 0x708   : > { %v9949_v27 = vpop.f32.mrf.mxu1 }
 0x709   : > { %v8182_v56 = vadd.f32 %v9949_v27, %v8104_v29  ;;  %v8103_v63 = vadd.f32 %v8090_v34, %v8034_v54  ;;  %v9974_v44 = vpop.f32.mrf.mxu0 }
 0x70a   : > { %v8165_v59 = vpop.f32.mrf.mxu1 }
 0x70b   : > { %v8180_v16 = vadd.f32 %v8165_v59, %v8102_v3  ;;  %v8256_v14 = vadd.f32 %v9957_v51, %v8182_v56  ;;  %v8390_v21 = vpop.f32.mrf.mxu0 }
 0x70c   : > { %v9950_v31 = vpop.f32.mrf.mxu1 }
 0x70d   : > { %v8183_v35 = vadd.f32 %v9950_v31, %v8105_v58  ;;  %v8254_v52 = vadd.f32 %v8239_v4, %v8180_v16  ;;  %v8499_v4 = vld [vmem:[%s14701_s10] sm:$0xff] }
 0x70e   : > { %v8168_v45 = vpop.f32.mrf.mxu1  ;;  %10001 = vmatpush3.msra.mxu0 %v8499_v4 }
 0x70f   : > { %v8181_v37 = vadd.f32 %v8168_v45, %v8103_v63  ;;  %v8257_v20 = vadd.f32 %v9958_v24, %v8183_v35 }
 0x710   : > { %v9965_v55 = vpop.f32.mrf.mxu1 }
 0x711   : > { %v8331_v60 = vadd.f32 %v9965_v55, %v8256_v14  ;;  %v8255_v2 = vadd.f32 %v8242_v17, %v8181_v37 }
 0x712   : > { %v8314_v6 = vpop.f32.mrf.mxu1 }
 0x713   : > { %v8404_v15 = vadd.f32 %v9973_v9, %v8331_v60  ;;  %v8329_v61 = vadd.f32 %v8314_v6, %v8254_v52 }
 0x714   : > { %v9966_v41 = vpop.f32.mrf.mxu1 }
 0x715   : > { %v8332_v8 = vadd.f32 %v9966_v41, %v8257_v20  ;;  %v8415_v5 = vadd.f32 %v8978_v10, %v8404_v15  ;;  %v8402_v34 = vadd.f32 %v8387_v13, %v8329_v61 }
 0x716   : > { %v8317_v33 = vpop.f32.mrf.mxu1 }
 0x717   : > { %v8405_v36 = vadd.f32 %v9974_v44, %v8332_v8  ;;  %v8330_v28 = vadd.f32 %v8317_v33, %v8255_v2  ;;  %v8419_v40 = vmax.f32 %v8415_v5, 0.0  ;;  %v8413_v51 = vadd.f32 %v8978_v10, %v8402_v34 }
 0x719   : > { %v8416_v38 = vadd.f32 %v8978_v10, %v8405_v36  ;;  %v8403_v0 = vadd.f32 %v8390_v21, %v8330_v28  ;;  %v8417_v39 = vmax.f32 %v8413_v51, 0.0 }
 0x71b   : > { %v8420_v11 = vmax.f32 %v8416_v38, 0.0  ;;  %v8414_v22 = vadd.f32 %v8978_v10, %v8403_v0 }
 0x71d   : > { %9976 = vmatpush3.msk.msra.mxu1 %vm1687_vm3, %v8420_v11  ;;  %v8418_v46 = vmax.f32 %v8414_v22, 0.0 }
 0x71e   : > { %9977 = vmatprep.subr.mxu1 %v15540_v57 }
 0x71f   : > { %9978 = vmatpush3.msra.mxu1 %v8419_v40 }
 0x720   : > { %9979 = vmatprep.subr.mxu1 %v15540_v57 }
 0x721   : > { %9980 = vmatpush3.msra.mxu1 %v8418_v46 }
 0x722   : > { %9981 = vmatprep.subr.mxu1 %v15540_v57 }
 0x723   : > { %9982 = vmatpush3.msra.mxu1 %v8417_v39 }
 0x724   : > { %9984 = vmatmul.mubr.msk.f32.vlgmr.msra.gmra.mxu1 %vm8422_vm15, %v8421_v50 }
 0x7e4   : > { %v8495_v30 = vpop.f32.mrf.mxu1 }
 0x7e5   : > { %10003 = vmatmul.mubr.msk.f32.vlgmr.msra.gmra.mxu0 %vm8508_vm0, %v8495_v30 }
 0x7e6   : > { %v9985_v26 = vpop.f32.mrf.mxu1 }
 0x8a5   : > { %v8578_v57 = vpop.f32.mrf.mxu0 }
 0x8a6   : > { %v8579_v62 = vadd.f32 %v8578_v57, %v8507_v42 }
 0x8a7   : > { %v10004_v7 = vpop.f32.mrf.mxu0 }
 0x8a8   : > { %8582 = vst [vmem:[%s405_s20] sm:$0x1] %v8579_v62 }
 0x8a9   : > { %10185 = shalt.err (!%p10182_p3)
}
 0x8aa   : > { %s10186_s0 = scalar_lea.hbm %s14656_s29, 16  ;;  %s10190_s20 = scalar_lea.hbm %s14703_s12, 32 }
 0x8ab   : > { %p10187_p4 = scmp.ne.s32.totalorder %s14656_s29, %s10186_s0  ;;  %p10191_p9 = scmp.lt.s32.totalorder %s14656_s29, %s14703_s12 }
 0x8ac   : > { %p10192_p10 = scmp.lt.s32.totalorder %s10190_s20, %s10186_s0 }
 0x8ad   : > { %p10188_p7 = pnand %p10187_p4, %p10341_p5 }
 0x8ae   : > { %p10193_p11 = por %p10192_p10, %p10191_p9 }
 0x8af   : > { %p10189_p8 = pneg %p10188_p7 }
 0x8b1   : > { %p10194_p12 = pnand %p10193_p11, %p10189_p8 }
 0x8b3   : > { %10197 = shalt.err (!%p10194_p12)
}
 0x8b4   : > { %10009 = dma.vmem_to_hbm [thread:$0]  (%p10341_p5), %s8597_s26, 16, %s14656_s29, %s8584_s15  }
 0x8b5 PF: > { %p10015_p13 = scmp.ge.s32.totalorder %s10232_s24, 2  ;;  %s8608_s1 = sand.u32 1, %s10220_s21  }
 0x8b6   : > { %s8609_s25 = scalar_lea.sflag [#allocation3], %s8608_s1 }
 0x8b7   : > { %p10012_p0 = pnand %p10015_p13, %p10345_p6 }
 0x8b9   : > { %p10013_p1 = pneg %p10012_p0 }
 0x8bb   : > { %10215 = dma.done.wait (%p10013_p1), %s8609_s25, 16  }
 0x8bc   : > { %10217 = vsyncadd (%p10013_p1), %s8609_s25, 4294967280  ;;  %p22_p2 = scmp.ge.s32.totalorder %s10328_s27, 4   ;;  %s15541_s21 = smov %s10224_s22 }
 0x8bd   : > { %s15542_s22 = smov %s10228_s23  ;;  %s15543_s23 = smov %s10339_s30 }
 0x8be   : > { %s15544_s24 = smov %s10328_s27  ;;  %24 = sbr.rel (!%p22_p2) target bundleno = 6 (0x6), region = 103 }
 0x8c3   :  { %8613 = vsyncpa [#allocation3], 1 }
 0x8c4   :  { %8615 = vsyncpa [#allocation3 + $0x1], 1 }

</bundles_post_ra>
